<compile_context>
chip_gen: v7x
topology: tpu7x:2x2x1
jax: 0.10.0
libtpu: 0.0.40
codegen_flags: <defaults>
</compile_context>

<pallas_src>
import math
from functools import partial

import jax
import jax.numpy as jnp
from jax.experimental import pallas as pl
from jax.experimental.pallas import tpu as pltpu

F32 = jnp.float32


# ----------------------------- Pallas kernels ------------------------------

def _linear_kernel(*refs, has_bias, has_residual, activation):
    # refs = (x, w, [b], [res], out)
    x_ref, w_ref = refs[0], refs[1]
    i = 2
    acc = jnp.dot(x_ref[...], w_ref[...], preferred_element_type=F32)
    if has_bias:
        acc = acc + refs[i][...]
        i += 1
    if activation == "relu":
        acc = jnp.maximum(acc, 0.0)
    if has_residual:
        acc = acc + refs[i][...]
        i += 1
    refs[-1][...] = acc


def linear(x, w, b=None, residual=None, activation=None):
    """out = act(x @ w [+ b]) [+ residual]; bias/residual/ReLU fused in-kernel.
    GELU (exact erf) is applied in XLA after the kernel to keep reference
    numerics (erf lowering inside Mosaic is not relied upon)."""
    x = x.astype(F32)
    w = w.astype(F32)
    M, K = x.shape
    N = w.shape[1]
    has_bias = b is not None
    has_res = residual is not None
    fuse_act = activation if activation == "relu" else None

    ops = [x, w]
    specs = [pl.BlockSpec((M, K), lambda i: (0, 0)),
             pl.BlockSpec((K, N), lambda i: (0, 0))]
    if has_bias:
        ops.append(b.reshape(1, N).astype(F32))
        specs.append(pl.BlockSpec((1, N), lambda i: (0, 0)))
    if has_res:
        ops.append(residual.astype(F32))
        specs.append(pl.BlockSpec((M, N), lambda i: (0, 0)))

    out = pl.pallas_call(
        partial(_linear_kernel, has_bias=has_bias, has_residual=has_res,
                activation=fuse_act),
        out_shape=jax.ShapeDtypeStruct((M, N), F32),
        grid=(1,),
        in_specs=specs,
        out_specs=pl.BlockSpec((M, N), lambda i: (0, 0)),
        compiler_params=pltpu.CompilerParams(dimension_semantics=("arbitrary",)),
    )(*ops)
    if activation == "gelu":
        out = jax.nn.gelu(out, approximate=False)
    return out


def _ln_linear_kernel(x_ref, lnw_ref, lnb_ref, w_ref, b_ref, o_ref, *, eps,
                      activation):
    x = x_ref[...]
    mu = jnp.mean(x, axis=-1, keepdims=True)
    var = jnp.mean(jnp.square(x - mu), axis=-1, keepdims=True)
    xn = (x - mu) / jnp.sqrt(var + eps) * lnw_ref[...] + lnb_ref[...]
    y = jnp.dot(xn, w_ref[...], preferred_element_type=F32) + b_ref[...]
    if activation == "relu":
        y = jnp.maximum(y, 0.0)
    o_ref[...] = y


def ln_linear(x, ln_w, ln_b, w, b, eps, activation=None):
    """Fused LayerNorm (over last dim) -> linear (+bias) (+ReLU)."""
    x = x.astype(F32)
    M, C = x.shape
    N = w.shape[1]
    fuse_act = activation if activation == "relu" else None
    out = pl.pallas_call(
        partial(_ln_linear_kernel, eps=eps, activation=fuse_act),
        out_shape=jax.ShapeDtypeStruct((M, N), F32),
        grid=(1,),
        in_specs=[pl.BlockSpec((M, C), lambda i: (0, 0)),
                  pl.BlockSpec((1, C), lambda i: (0, 0)),
                  pl.BlockSpec((1, C), lambda i: (0, 0)),
                  pl.BlockSpec((C, N), lambda i: (0, 0)),
                  pl.BlockSpec((1, N), lambda i: (0, 0))],
        out_specs=pl.BlockSpec((M, N), lambda i: (0, 0)),
        compiler_params=pltpu.CompilerParams(dimension_semantics=("arbitrary",)),
    )(x, ln_w.reshape(1, C).astype(F32), ln_b.reshape(1, C).astype(F32),
      w.astype(F32), b.reshape(1, N).astype(F32))
    if activation == "gelu":
        out = jax.nn.gelu(out, approximate=False)
    return out


def _linear_ln_kernel(x_ref, w_ref, lnw_ref, lnb_ref, o_ref, *, eps):
    y = jnp.dot(x_ref[...], w_ref[...], preferred_element_type=F32)
    mu = jnp.mean(y, axis=-1, keepdims=True)
    var = jnp.mean(jnp.square(y - mu), axis=-1, keepdims=True)
    o_ref[...] = (y - mu) / jnp.sqrt(var + eps) * lnw_ref[...] + lnb_ref[...]


def linear_ln(x, w, ln_w, ln_b, eps):
    """Fused bias-less linear -> LayerNorm (used for the SAM neck convs)."""
    x = x.astype(F32)
    M, K = x.shape
    N = w.shape[1]
    return pl.pallas_call(
        partial(_linear_ln_kernel, eps=eps),
        out_shape=jax.ShapeDtypeStruct((M, N), F32),
        grid=(1,),
        in_specs=[pl.BlockSpec((M, K), lambda i: (0, 0)),
                  pl.BlockSpec((K, N), lambda i: (0, 0)),
                  pl.BlockSpec((1, N), lambda i: (0, 0)),
                  pl.BlockSpec((1, N), lambda i: (0, 0))],
        out_specs=pl.BlockSpec((M, N), lambda i: (0, 0)),
        compiler_params=pltpu.CompilerParams(dimension_semantics=("arbitrary",)),
    )(x, w.astype(F32), ln_w.reshape(1, N).astype(F32),
      ln_b.reshape(1, N).astype(F32))


def _layernorm_kernel(x_ref, w_ref, b_ref, o_ref, *, eps):
    x = x_ref[...]
    mu = jnp.mean(x, axis=-1, keepdims=True)
    var = jnp.mean(jnp.square(x - mu), axis=-1, keepdims=True)
    o_ref[...] = (x - mu) / jnp.sqrt(var + eps) * w_ref[...] + b_ref[...]


def layernorm2d(x, w, b, eps):
    M, C = x.shape
    return pl.pallas_call(
        partial(_layernorm_kernel, eps=eps),
        out_shape=jax.ShapeDtypeStruct((M, C), F32),
        grid=(1,),
        in_specs=[pl.BlockSpec((M, C), lambda i: (0, 0)),
                  pl.BlockSpec((1, C), lambda i: (0, 0)),
                  pl.BlockSpec((1, C), lambda i: (0, 0))],
        out_specs=pl.BlockSpec((M, C), lambda i: (0, 0)),
        compiler_params=pltpu.CompilerParams(dimension_semantics=("arbitrary",)),
    )(x.astype(F32), w.reshape(1, C).astype(F32), b.reshape(1, C).astype(F32))


def _mha_bias_kernel(q_ref, k_ref, v_ref, bias_ref, o_ref, *, scale):
    # all windows x heads processed in one kernel invocation (batched einsum)
    q = q_ref[...] * scale
    s = jnp.einsum("bqd,bkd->bqk", q, k_ref[...], preferred_element_type=F32)
    s = s + bias_ref[...]
    m = jnp.max(s, axis=-1, keepdims=True)
    p = jnp.exp(s - m)
    p = p / jnp.sum(p, axis=-1, keepdims=True)
    o_ref[...] = jnp.einsum("bqk,bkd->bqd", p, v_ref[...],
                            preferred_element_type=F32)


def mha(q, k, v, bias, scale):
    BH, Nq, d = q.shape
    Nk = k.shape[1]
    return pl.pallas_call(
        partial(_mha_bias_kernel, scale=scale),
        out_shape=jax.ShapeDtypeStruct((BH, Nq, d), F32),
        grid=(1,),
        in_specs=[pl.BlockSpec((BH, Nq, d), lambda i: (0, 0, 0)),
                  pl.BlockSpec((BH, Nk, d), lambda i: (0, 0, 0)),
                  pl.BlockSpec((BH, Nk, d), lambda i: (0, 0, 0)),
                  pl.BlockSpec((BH, Nq, Nk), lambda i: (0, 0, 0))],
        out_specs=pl.BlockSpec((BH, Nq, d), lambda i: (0, 0, 0)),
        compiler_params=pltpu.CompilerParams(dimension_semantics=("arbitrary",)),
    )(q.astype(F32), k.astype(F32), v.astype(F32), bias.astype(F32))


def _dec_attn_kernel(q_ref, k_ref, v_ref, qw_ref, qb_ref, kw_ref, kb_ref,
                     vw_ref, vb_ref, ow_ref, ob_ref, lnw_ref, lnb_ref, *rest,
                     num_heads, scale, eps, has_residual):
    o_ref = rest[-1]
    q = q_ref[0]
    k = k_ref[0]
    v = v_ref[0]
    qp = jnp.dot(q, qw_ref[...], preferred_element_type=F32) + qb_ref[...]
    kp = jnp.dot(k, kw_ref[...], preferred_element_type=F32) + kb_ref[...]
    vp = jnp.dot(v, vw_ref[...], preferred_element_type=F32) + vb_ref[...]
    internal = qp.shape[-1]
    hd = internal // num_heads
    acc = None
    for h in range(num_heads):                       # static unroll
        sl = slice(h * hd, (h + 1) * hd)
        qh, kh, vh = qp[:, sl], kp[:, sl], vp[:, sl]
        s = jax.lax.dot_general(qh, kh, (((1,), (1,)), ((), ())),
                                preferred_element_type=F32) * scale
        m = jnp.max(s, axis=-1, keepdims=True)
        p = jnp.exp(s - m)
        p = p / jnp.sum(p, axis=-1, keepdims=True)
        oh = jnp.dot(p, vh, preferred_element_type=F32)            # (Nq, hd)
        contrib = jnp.dot(oh, ow_ref[sl, :], preferred_element_type=F32)
        acc = contrib if acc is None else acc + contrib
    y = acc + ob_ref[...]
    if has_residual:
        y = y + rest[0][0]
    mu = jnp.mean(y, axis=-1, keepdims=True)
    var = jnp.mean(jnp.square(y - mu), axis=-1, keepdims=True)
    o_ref[0] = (y - mu) / jnp.sqrt(var + eps) * lnw_ref[...] + lnb_ref[...]


def decoder_attention(q, k, v, p, num_heads, residual, ln_w, ln_b, eps=1e-5):
    """Fused q/k/v proj + per-head attention + out proj + residual + LayerNorm."""
    B, Nq, C = q.shape
    Nk = k.shape[1]
    internal = p["q_w"].shape[1]
    hd = internal // num_heads
    scale = 1.0 / math.sqrt(hd)
    has_res = residual is not None

    def bmap(i):
        return (i, 0, 0)

    def wmap(i):
        return (0, 0)

    ops = [q, k, v,
           p["q_w"], p["q_b"].reshape(1, internal),
           p["k_w"], p["k_b"].reshape(1, internal),
           p["v_w"], p["v_b"].reshape(1, internal),
           p["out_w"], p["out_b"].reshape(1, C),
           ln_w.reshape(1, C), ln_b.reshape(1, C)]
    specs = [pl.BlockSpec((1, Nq, C), bmap),
             pl.BlockSpec((1, Nk, C), bmap),
             pl.BlockSpec((1, Nk, C), bmap),
             pl.BlockSpec((C, internal), wmap), pl.BlockSpec((1, internal), wmap),
             pl.BlockSpec((C, internal), wmap), pl.BlockSpec((1, internal), wmap),
             pl.BlockSpec((C, internal), wmap), pl.BlockSpec((1, internal), wmap),
             pl.BlockSpec((internal, C), wmap), pl.BlockSpec((1, C), wmap),
             pl.BlockSpec((1, C), wmap), pl.BlockSpec((1, C), wmap)]
    if has_res:
        ops.append(residual)
        specs.append(pl.BlockSpec((1, Nq, C), bmap))

    return pl.pallas_call(
        partial(_dec_attn_kernel, num_heads=num_heads, scale=scale, eps=eps,
                has_residual=has_res),
        out_shape=jax.ShapeDtypeStruct((B, Nq, C), F32),
        grid=(B,),
        in_specs=specs,
        out_specs=pl.BlockSpec((1, Nq, C), bmap),
        compiler_params=pltpu.CompilerParams(dimension_semantics=("parallel",)),
    )(*[o.astype(F32) for o in ops])


def _mlp_block_kernel(x_ref, w1_ref, b1_ref, w2_ref, b2_ref, lnw_ref, lnb_ref,
                      o_ref, *, eps):
    x = x_ref[0]
    h = jnp.maximum(jnp.dot(x, w1_ref[...], preferred_element_type=F32)
                    + b1_ref[...], 0.0)
    y = x + jnp.dot(h, w2_ref[...], preferred_element_type=F32) + b2_ref[...]
    mu = jnp.mean(y, axis=-1, keepdims=True)
    var = jnp.mean(jnp.square(y - mu), axis=-1, keepdims=True)
    o_ref[0] = (y - mu) / jnp.sqrt(var + eps) * lnw_ref[...] + lnb_ref[...]


def mlp_block(x, w1, b1, w2, b2, ln_w, ln_b, eps=1e-5):
    """Fused (lin -> relu -> lin) + residual + LayerNorm for the decoder block."""
    B, Nq, C = x.shape
    Hd = w1.shape[1]

    def bmap(i):
        return (i, 0, 0)

    def wmap(i):
        return (0, 0)

    return pl.pallas_call(
        partial(_mlp_block_kernel, eps=eps),
        out_shape=jax.ShapeDtypeStruct((B, Nq, C), F32),
        grid=(B,),
        in_specs=[pl.BlockSpec((1, Nq, C), bmap),
                  pl.BlockSpec((C, Hd), wmap), pl.BlockSpec((1, Hd), wmap),
                  pl.BlockSpec((Hd, C), wmap), pl.BlockSpec((1, C), wmap),
                  pl.BlockSpec((1, C), wmap), pl.BlockSpec((1, C), wmap)],
        out_specs=pl.BlockSpec((1, Nq, C), bmap),
        compiler_params=pltpu.CompilerParams(dimension_semantics=("parallel",)),
    )(x.astype(F32), w1.astype(F32), b1.reshape(1, Hd).astype(F32),
      w2.astype(F32), b2.reshape(1, C).astype(F32),
      ln_w.reshape(1, C).astype(F32), ln_b.reshape(1, C).astype(F32))


def _mlp3_kernel(x_ref, w1_ref, b1_ref, w2_ref, b2_ref, w3_ref, b3_ref, o_ref):
    x = x_ref[0]
    h = jnp.maximum(jnp.dot(x, w1_ref[0], preferred_element_type=F32)
                    + b1_ref[0], 0.0)
    h = jnp.maximum(jnp.dot(h, w2_ref[0], preferred_element_type=F32)
                    + b2_ref[0], 0.0)
    o_ref[0] = jnp.dot(h, w3_ref[0], preferred_element_type=F32) + b3_ref[0]


def batched_mlp3(x, w1, b1, w2, b2, w3, b3):
    """3-layer ReLU MLP with per-group weights, one gridded kernel (grid=(G,))."""
    G, M, K = x.shape
    H1, H2, O = w1.shape[2], w2.shape[2], w3.shape[2]

    def gmap(g):
        return (g, 0, 0)

    return pl.pallas_call(
        _mlp3_kernel,
        out_shape=jax.ShapeDtypeStruct((G, M, O), F32),
        grid=(G,),
        in_specs=[pl.BlockSpec((1, M, K), gmap),
                  pl.BlockSpec((1, K, H1), gmap), pl.BlockSpec((1, 1, H1), gmap),
                  pl.BlockSpec((1, H1, H2), gmap), pl.BlockSpec((1, 1, H2), gmap),
                  pl.BlockSpec((1, H2, O), gmap), pl.BlockSpec((1, 1, O), gmap)],
        out_specs=pl.BlockSpec((1, M, O), gmap),
        compiler_params=pltpu.CompilerParams(dimension_semantics=("parallel",)),
    )(x.astype(F32), w1.astype(F32), b1.astype(F32), w2.astype(F32),
      b2.astype(F32), w3.astype(F32), b3.astype(F32))


def _bmm_kernel(a_ref, b_ref, o_ref):
    o_ref[0] = jnp.dot(a_ref[0], b_ref[0], preferred_element_type=F32)


def batched_matmul(a, b):
    B, M, K = a.shape
    N = b.shape[2]

    def gmap(i):
        return (i, 0, 0)

    return pl.pallas_call(
        _bmm_kernel,
        out_shape=jax.ShapeDtypeStruct((B, M, N), F32),
        grid=(B,),
        in_specs=[pl.BlockSpec((1, M, K), gmap),
                  pl.BlockSpec((1, K, N), gmap)],
        out_specs=pl.BlockSpec((1, M, N), gmap),
        compiler_params=pltpu.CompilerParams(dimension_semantics=("parallel",)),
    )(a.astype(F32), b.astype(F32))


def _class_conv_kernel(x_ref, w_ref, b_ref, o_ref):
    # Conv2d(1, nc, 1): out[c, m] = w[c] * x[m] + b[c]; lane-dense over m.
    o_ref[...] = x_ref[...] * w_ref[...] + b_ref[...]


def class_conv(x_flat, w, b):
    """x_flat: (1, M) with M=B*H*W on the lane axis; w,b: (nc, 1)."""
    M = x_flat.shape[1]
    nc = w.shape[0]
    return pl.pallas_call(
        _class_conv_kernel,
        out_shape=jax.ShapeDtypeStruct((nc, M), F32),
        grid=(1,),
        in_specs=[pl.BlockSpec((1, M), lambda i: (0, 0)),
                  pl.BlockSpec((nc, 1), lambda i: (0, 0)),
                  pl.BlockSpec((nc, 1), lambda i: (0, 0))],
        out_specs=pl.BlockSpec((nc, M), lambda i: (0, 0)),
        compiler_params=pltpu.CompilerParams(dimension_semantics=("arbitrary",)),
    )(x_flat.astype(F32), w.astype(F32), b.astype(F32))


# --------------------------- Image encoder (ViT) ----------------------------

def patch_embed(image, w, b, patch_size, pos_embed):
    B, Cin, H, W = image.shape
    P = patch_size
    Hp, Wp = H // P, W // P
    x = image.reshape(B, Cin, Hp, P, Wp, P)
    x = x.transpose(0, 2, 4, 1, 3, 5).reshape(B * Hp * Wp, Cin * P * P)
    w2 = w.reshape(w.shape[0], -1).T              # (Cin*P*P, embed_dim)
    C = pos_embed.shape[-1]
    pos = jnp.broadcast_to(pos_embed.reshape(1, Hp * Wp, C),
                           (B, Hp * Wp, C)).reshape(B * Hp * Wp, C)
    y = linear(x, w2, b, residual=pos)            # patch embed + pos embed fused
    return y.reshape(B, Hp, Wp, C)


def window_partition_tokens(t, B, H, W, ws):
    # (B*H*W, F) -> (nW*B, ws*ws, F); requires H % ws == 0 and W % ws == 0.
    Fdim = t.shape[-1]
    t = t.reshape(B, H // ws, ws, W // ws, ws, Fdim)
    return t.transpose(0, 1, 3, 2, 4, 5).reshape(-1, ws * ws, Fdim)


def window_unpartition_tokens(t, B, H, W, ws):
    Fdim = t.shape[-1]
    t = t.reshape(B, H // ws, W // ws, ws, ws, Fdim)
    return t.transpose(0, 1, 3, 2, 4, 5).reshape(B * H * W, Fdim)


def get_rel_pos(q_size, k_size, rel_pos):
    q_coords = jnp.arange(q_size)[:, None] * max(k_size / q_size, 1.0)
    k_coords = jnp.arange(k_size)[None, :] * max(q_size / k_size, 1.0)
    rel = (q_coords - k_coords) + (k_size - 1) * max(q_size / k_size, 1.0)
    return rel_pos[rel.astype(jnp.int32)]


def vit_block(x, p, num_heads, window_size):
    B, H, W, C = x.shape
    N = H * W
    hd = C // num_heads
    scale = hd ** -0.5
    x_flat = x.reshape(B * N, C)
    shortcut = x_flat

    # fused LayerNorm(norm1) + QKV projection
    qkv = ln_linear(x_flat, p["norm1_w"], p["norm1_b"], p["qkv_w"], p["qkv_b"],
                    eps=1e-6)

    if window_size > 0:
        ws = window_size
        # TODO(synk): the fused LN->QKV ordering assumes H, W divisible by the
        # window size (true for this config); the padded-window case of the
        # reference would require LN before the zero padding.
        assert H % ws == 0 and W % ws == 0
        qkv_tok = window_partition_tokens(qkv, B, H, W, ws)   # (nW*B, ws*ws, 3C)
        Bw, Nq = qkv_tok.shape[0], ws * ws
        Hq = Wq = ws
    else:
        qkv_tok = qkv.reshape(B, N, 3 * C)
        Bw, Nq = B, N
        Hq, Wq = H, W

    t = qkv_tok.reshape(Bw, Nq, 3, num_heads, hd).transpose(2, 0, 3, 1, 4)
    t = t.reshape(3, Bw * num_heads, Nq, hd)
    q, k, v = t[0], t[1], t[2]

    # decomposed relative-position bias (tiny gathers/einsums kept in XLA)
    Rh = get_rel_pos(Hq, Hq, p["rel_pos_h"])
    Rw = get_rel_pos(Wq, Wq, p["rel_pos_w"])
    r_q = q.reshape(Bw * num_heads, Hq, Wq, hd)
    rel_h = jnp.einsum("bhwc,hkc->bhwk", r_q, Rh)
    rel_w = jnp.einsum("bhwc,wkc->bhwk", r_q, Rw)
    bias = (rel_h[:, :, :, :, None] + rel_w[:, :, :, None, :]).reshape(
        Bw * num_heads, Nq, Nq)

    # all windows x heads in a single batched attention kernel
    attn = mha(q, k, v, bias, scale)                          # (Bw*nH, Nq, hd)
    attn = attn.reshape(Bw, num_heads, Nq, hd).transpose(0, 2, 1, 3)
    attn = attn.reshape(Bw, Nq, C)
    if window_size > 0:
        attn = window_unpartition_tokens(attn, B, H, W, window_size)
    else:
        attn = attn.reshape(B * N, C)

    # fused output projection + residual add
    x_attn = linear(attn, p["proj_w"], p["proj_b"], residual=shortcut)

    # fused LayerNorm(norm2) + MLP fc1 (GELU applied in XLA); fused fc2 + residual
    h = ln_linear(x_attn, p["norm2_w"], p["norm2_b"], p["mlp_w1"], p["mlp_b1"],
                  eps=1e-6, activation="gelu")
    y = linear(h, p["mlp_w2"], p["mlp_b2"], residual=x_attn)
    return y.reshape(B, H, W, C)


def image_encoder(image, p, cfg):
    x = patch_embed(image, p["patch_w"], p["patch_b"], cfg["patch_size"],
                    p["pos_embed"])
    for i, blk in enumerate(p["blocks"]):
        ws = 0 if i in cfg["global_attn_indexes"] else cfg["window_size"]
        x = vit_block(x, blk, cfg["num_heads"], ws)

    B, H, W, C = x.shape
    # neck: fused 1x1 conv (no bias) + LayerNorm2d
    y = linear_ln(x.reshape(B * H * W, C), p["neck_conv1_w"],
                  p["neck_ln1_w"], p["neck_ln1_b"], eps=1e-6)
    OC = y.shape[-1]
    y = y.reshape(B, H, W, OC)
    # 3x3 conv: im2col glue (tiny) + fused matmul + LayerNorm2d
    # TODO(synk): at real SAM scale this should be an in-kernel shifted-read conv.
    yp = jnp.pad(y, ((0, 0), (1, 1), (1, 1), (0, 0)))
    cols = [yp[:, kh:kh + H, kw:kw + W, :] for kh in range(3) for kw in range(3)]
    col = jnp.concatenate(cols, axis=-1).reshape(B * H * W, 9 * OC)
    w2 = p["neck_conv2_w"].transpose(2, 3, 1, 0).reshape(9 * OC, OC)
    y = linear_ln(col, w2, p["neck_ln2_w"], p["neck_ln2_b"], eps=1e-6)
    return y.reshape(B, H, W, OC).transpose(0, 3, 1, 2)       # NCHW


# ------------------------------ Prompt encoder ------------------------------

def pe_encoding(coords, gauss):
    coords = 2.0 * coords - 1.0
    coords = coords @ gauss
    coords = 2.0 * jnp.pi * coords
    return jnp.concatenate([jnp.sin(coords), jnp.cos(coords)], axis=-1)


def prompt_encoder_forward(B, H_img, W_img, p, cfg):
    embed_dim = cfg["out_chans"]
    he = we = cfg["img_size"] // cfg["patch_size"]
    boxes = jnp.tile(jnp.array([[0.0, 0.0, float(W_img), float(H_img)]], F32),
                     (B, 1))[:, None, :]
    boxes = boxes + 0.5
    coords = boxes.reshape(-1, 2, 2)
    coords = coords / jnp.array([float(W_img), float(H_img)], F32)
    corner = pe_encoding(coords, p["gauss"])                  # (B, 2, embed_dim)
    corner = corner.at[:, 0, :].add(p["point_embed_2"])
    corner = corner.at[:, 1, :].add(p["point_embed_3"])
    sparse = corner
    dense = jnp.broadcast_to(p["no_mask_embed"].reshape(1, embed_dim, 1, 1),
                             (B, embed_dim, he, we))
    return sparse, dense


def get_dense_pe(p, cfg):
    h = w = cfg["img_size"] // cfg["patch_size"]
    ye = (jnp.arange(h, dtype=F32) + 0.5) / h
    xe = (jnp.arange(w, dtype=F32) + 0.5) / w
    coords = jnp.stack([jnp.broadcast_to(xe[None, :], (h, w)),
                        jnp.broadcast_to(ye[:, None], (h, w))], axis=-1)
    pe = pe_encoding(coords, p["gauss"])                      # (h, w, C)
    return pe.transpose(2, 0, 1)[None]                        # (1, C, h, w)


# ------------------------------- Mask decoder -------------------------------

def two_way_block(queries, keys, query_pe, key_pe, p, num_heads, skip_first_pe):
    if skip_first_pe:
        queries = decoder_attention(queries, queries, queries, p["self_attn"],
                                    num_heads, residual=None,
                                    ln_w=p["norm1_w"], ln_b=p["norm1_b"])
    else:
        q = queries + query_pe
        queries = decoder_attention(q, q, queries, p["self_attn"], num_heads,
                                    residual=queries,
                                    ln_w=p["norm1_w"], ln_b=p["norm1_b"])

    q = queries + query_pe
    k = keys + key_pe
    queries = decoder_attention(q, k, keys, p["cross_t2i"], num_heads,
                                residual=queries,
                                ln_w=p["norm2_w"], ln_b=p["norm2_b"])

    queries = mlp_block(queries, p["mlp_w1"], p["mlp_b1"], p["mlp_w2"],
                        p["mlp_b2"], p["norm3_w"], p["norm3_b"])

    q = queries + query_pe
    k = keys + key_pe
    keys = decoder_attention(k, q, queries, p["cross_i2t"], num_heads,
                             residual=keys,
                             ln_w=p["norm4_w"], ln_b=p["norm4_b"])
    return queries, keys


def two_way_transformer(image_embedding, image_pe, point_embedding, p, num_heads):
    bs, c, h, w = image_embedding.shape
    image_embedding = image_embedding.reshape(bs, c, h * w).transpose(0, 2, 1)
    image_pe = image_pe.reshape(bs, c, h * w).transpose(0, 2, 1)
    queries, keys = point_embedding, image_embedding
    for i, layer in enumerate(p["layers"]):
        queries, keys = two_way_block(queries, keys, point_embedding, image_pe,
                                      layer, num_heads, skip_first_pe=(i == 0))
    q = queries + point_embedding
    k = keys + image_pe
    queries = decoder_attention(q, k, keys, p["final_attn"], num_heads,
                                residual=queries,
                                ln_w=p["norm_final_w"], ln_b=p["norm_final_b"])
    return queries, keys


def conv_transpose_2x2(x, w, b, activation=None):
    # x: (B, Cin, H, W); w: (Cin, Cout, 2, 2)  (PyTorch ConvTranspose2d layout)
    B, Cin, H, W = x.shape
    Cout = w.shape[1]
    x2 = x.transpose(0, 2, 3, 1).reshape(B * H * W, Cin)
    w2 = w.reshape(Cin, Cout * 4)
    b2 = jnp.repeat(b, 4)
    y = linear(x2, w2, b2)
    y = y.reshape(B, H, W, Cout, 2, 2).transpose(0, 3, 1, 4, 2, 5)
    y = y.reshape(B, Cout, 2 * H, 2 * W)
    if activation == "gelu":
        y = jax.nn.gelu(y, approximate=False)
    return y


def mask_decoder_forward(image_embeddings, image_pe, sparse, dense, p, cfg,
                         multimask_output=False):
    num_mask_tokens = cfg["num_mask_tokens"]
    output_tokens = jnp.concatenate([p["iou_token"], p["mask_tokens"]], axis=0)
    output_tokens = jnp.broadcast_to(output_tokens[None],
                                     (sparse.shape[0],) + output_tokens.shape)
    tokens = jnp.concatenate([output_tokens, sparse], axis=1)

    src = jnp.repeat(image_embeddings, tokens.shape[0], axis=0)  # repeat_interleave
    src = src + dense
    pos_src = jnp.repeat(image_pe, tokens.shape[0], axis=0)
    b, c, h, w = src.shape

    hs, src = two_way_transformer(src, pos_src, tokens, p["transformer"],
                                  cfg["dec_num_heads"])
    iou_token_out = hs[:, 0, :]
    mask_tokens_out = hs[:, 1:1 + num_mask_tokens, :]

    src = src.transpose(0, 2, 1).reshape(b, c, h, w)
    # output upscaling: ConvT(2,2) -> LayerNorm2d -> GELU -> ConvT(2,2) -> GELU
    x = conv_transpose_2x2(src, p["up1_w"], p["up1_b"])
    bb, cc, hh, ww = x.shape
    xf = layernorm2d(x.transpose(0, 2, 3, 1).reshape(-1, cc),
                     p["up_ln_w"], p["up_ln_b"], 1e-6)
    xf = jax.nn.gelu(xf, approximate=False)
    x = xf.reshape(bb, hh, ww, cc).transpose(0, 3, 1, 2)
    upscaled = conv_transpose_2x2(x, p["up2_w"], p["up2_b"], activation="gelu")

    # hyper-network MLPs for all mask tokens in a single gridded kernel
    hw1 = jnp.stack([p["hyper"][i][0][0] for i in range(num_mask_tokens)])
    hb1 = jnp.stack([p["hyper"][i][0][1] for i in range(num_mask_tokens)])[:, None, :]
    hw2 = jnp.stack([p["hyper"][i][1][0] for i in range(num_mask_tokens)])
    hb2 = jnp.stack([p["hyper"][i][1][1] for i in range(num_mask_tokens)])[:, None, :]
    hw3 = jnp.stack([p["hyper"][i][2][0] for i in range(num_mask_tokens)])
    hb3 = jnp.stack([p["hyper"][i][2][1] for i in range(num_mask_tokens)])[:, None, :]
    tok_in = mask_tokens_out.transpose(1, 0, 2)               # (nmt, B, C)
    hyper_out = batched_mlp3(tok_in, hw1, hb1, hw2, hb2, hw3, hb3)
    hyper_in = hyper_out.transpose(1, 0, 2)                   # (B, nmt, C//8)

    bb, c8, hh, ww = upscaled.shape
    up_flat = upscaled.reshape(bb, c8, hh * ww)
    masks = batched_matmul(hyper_in, up_flat)                 # (B, nmt, hh*ww)
    masks = masks.reshape(bb, num_mask_tokens, hh, ww)

    # IoU head as the same fused 3-layer MLP kernel (G=1)
    iw1 = p["iou_head"][0][0][None]
    ib1 = p["iou_head"][0][1][None, None, :]
    iw2 = p["iou_head"][1][0][None]
    ib2 = p["iou_head"][1][1][None, None, :]
    iw3 = p["iou_head"][2][0][None]
    ib3 = p["iou_head"][2][1][None, None, :]
    iou_pred = batched_mlp3(iou_token_out[None], iw1, ib1, iw2, ib2, iw3, ib3)[0]

    sl = slice(1, None) if multimask_output else slice(0, 1)
    return masks[:, sl, :, :], iou_pred[:, sl]


# ------------------------------ MedSAM forward ------------------------------

def medsam_forward(image, params, cfg):
    image_embedding = image_encoder(image, params["image_encoder"], cfg)
    B, _, H, W = image.shape
    sparse, dense = prompt_encoder_forward(B, H, W, params["prompt_encoder"], cfg)
    image_pe = get_dense_pe(params["prompt_encoder"], cfg)
    low_res_masks, _ = mask_decoder_forward(image_embedding, image_pe, sparse,
                                            dense, params["mask_decoder"], cfg,
                                            multimask_output=False)
    # F.interpolate(..., mode="bilinear", align_corners=False) equivalent.
    ori = jax.image.resize(low_res_masks, (B, 1, H, W), method="bilinear")
    # class_conv: Conv2d(1, num_classes, kernel_size=1) -- lane-dense kernel.
    nc = cfg["num_classes"]
    out = class_conv(ori.reshape(1, B * H * W),
                     params["class_conv_w"].reshape(nc, 1),
                     params["class_conv_b"].reshape(nc, 1))
    return out.reshape(nc, B, H, W).transpose(1, 0, 2, 3)     # (B, nc, H, W)


# ----------------------------- parameter init -------------------------------

def init_params(key, cfg):
    keys = iter(jax.random.split(key, 1024))

    def nrm(shape, s=0.02):
        return (s * jax.random.normal(next(keys), shape)).astype(F32)

    def zeros(shape):
        return jnp.zeros(shape, F32)

    def ones(shape):
        return jnp.ones(shape, F32)

    C = cfg["embed_dim"]
    hd = C // cfg["num_heads"]
    P = cfg["patch_size"]
    hp = cfg["img_size"] // P
    OC = cfg["out_chans"]

    blocks = []
    for i in range(cfg["depth"]):
        S = hp if i in cfg["global_attn_indexes"] else cfg["window_size"]
        blocks.append(dict(
            norm1_w=ones((C,)), norm1_b=zeros((C,)),
            qkv_w=nrm((C, 3 * C)), qkv_b=zeros((3 * C,)),
            proj_w=nrm((C, C)), proj_b=zeros((C,)),
            rel_pos_h=nrm((2 * S - 1, hd)), rel_pos_w=nrm((2 * S - 1, hd)),
            norm2_w=ones((C,)), norm2_b=zeros((C,)),
            mlp_w1=nrm((C, cfg["mlp_ratio"] * C)),
            mlp_b1=zeros((cfg["mlp_ratio"] * C,)),
            mlp_w2=nrm((cfg["mlp_ratio"] * C, C)), mlp_b2=zeros((C,)),
        ))
    image_enc = dict(
        patch_w=nrm((C, cfg["in_chans"], P, P)), patch_b=zeros((C,)),
        pos_embed=nrm((1, hp, hp, C)),
        blocks=blocks,
        neck_conv1_w=nrm((C, OC)),                       # stored as (in, out)
        neck_ln1_w=ones((OC,)), neck_ln1_b=zeros((OC,)),
        neck_conv2_w=nrm((OC, OC, 3, 3)),
        neck_ln2_w=ones((OC,)), neck_ln2_b=zeros((OC,)),
    )

    prompt_enc = dict(
        gauss=jax.random.normal(next(keys), (2, OC // 2)).astype(F32),
        point_embed_2=nrm((OC,)), point_embed_3=nrm((OC,)),
        no_mask_embed=nrm((OC,)),
    )

    def attn_params(dim, downsample):
        internal = dim // downsample
        return dict(q_w=nrm((dim, internal)), q_b=zeros((internal,)),
                    k_w=nrm((dim, internal)), k_b=zeros((internal,)),
                    v_w=nrm((dim, internal)), v_b=zeros((internal,)),
                    out_w=nrm((internal, dim)), out_b=zeros((dim,)))

    layers = []
    for _ in range(cfg["dec_depth"]):
        layers.append(dict(
            self_attn=attn_params(OC, 1),
            norm1_w=ones((OC,)), norm1_b=zeros((OC,)),
            cross_t2i=attn_params(OC, 2),
            norm2_w=ones((OC,)), norm2_b=zeros((OC,)),
            mlp_w1=nrm((OC, cfg["dec_mlp_dim"])),
            mlp_b1=zeros((cfg["dec_mlp_dim"],)),
            mlp_w2=nrm((cfg["dec_mlp_dim"], OC)), mlp_b2=zeros((OC,)),
            norm3_w=ones((OC,)), norm3_b=zeros((OC,)),
            cross_i2t=attn_params(OC, 2),
            norm4_w=ones((OC,)), norm4_b=zeros((OC,)),
        ))
    transformer = dict(layers=layers, final_attn=attn_params(OC, 2),
                       norm_final_w=ones((OC,)), norm_final_b=zeros((OC,)))

    nmt = cfg["num_mask_tokens"]
    hyper = [[(nrm((OC, OC)), zeros((OC,))),
              (nrm((OC, OC)), zeros((OC,))),
              (nrm((OC, OC // 8)), zeros((OC // 8,)))] for _ in range(nmt)]
    hid = cfg["iou_head_hidden"]
    iou_head = [(nrm((OC, hid)), zeros((hid,))),
                (nrm((hid, hid)), zeros((hid,))),
                (nrm((hid, nmt)), zeros((nmt,)))]

    mask_dec = dict(
        iou_token=nrm((1, OC)), mask_tokens=nrm((nmt, OC)),
        transformer=transformer,
        up1_w=nrm((OC, OC // 4, 2, 2)), up1_b=zeros((OC // 4,)),
        up_ln_w=ones((OC // 4,)), up_ln_b=zeros((OC // 4,)),
        up2_w=nrm((OC // 4, OC // 8, 2, 2)), up2_b=zeros((OC // 8,)),
        hyper=hyper, iou_head=iou_head,
    )

    return dict(image_encoder=image_enc, prompt_encoder=prompt_enc,
                mask_decoder=mask_dec,
                class_conv_w=nrm((cfg["num_classes"], 1, 1, 1)),
                class_conv_b=zeros((cfg["num_classes"],)))


# ----------------------------------- main ------------------------------------

if __name__ == "__main__":
    CFG = dict(img_size=64, patch_size=16, in_chans=3,
               embed_dim=32, depth=2, num_heads=2, mlp_ratio=4,
               window_size=2, global_attn_indexes=(1,),
               out_chans=32,                 # prompt_embed_dim / transformer_dim
               dec_depth=2, dec_num_heads=2, dec_mlp_dim=64,
               num_mask_tokens=4, iou_head_hidden=32,
               num_classes=5)

    key = jax.random.PRNGKey(0)
    kp, kx = jax.random.split(key)
    params = init_params(kp, CFG)

    # NOTE: the reference MaskDecoder's repeat_interleave + dense-embedding add
    # only broadcasts correctly for batch size 1 (standard MedSAM usage), so B=1.
    image = jax.random.normal(kx, (1, 3, CFG["img_size"], CFG["img_size"]),
                              dtype=F32)

    fwd = jax.jit(partial(medsam_forward, cfg=CFG))
    out = fwd(image, params)
    out = jax.block_until_ready(out)

    assert out.shape == (1, CFG["num_classes"], CFG["img_size"], CFG["img_size"])
    assert bool(jnp.all(jnp.isfinite(out)))
    print("KERNEL_OK")
</pallas_src>

<mosaic_0001>
module attributes {stable_mosaic.version = 11 : i64} {
  func.func @_linear_kernel(%arg0: i32, %arg1: memref<16x768xf32, #tpu.memory_space<vmem>>, %arg2: memref<768x32xf32, #tpu.memory_space<vmem>>, %arg3: memref<1x32xf32, #tpu.memory_space<vmem>>, %arg4: memref<16x32xf32, #tpu.memory_space<vmem>>, %arg5: memref<16x32xf32, #tpu.memory_space<vmem>>) attributes {dimension_semantics = [#tpu.dimension_semantics<arbitrary>], iteration_bounds = array<i64: 1>, scalar_prefetch = 0 : i64, scratch_operands = 0 : i64, tpu.core_type = #tpu.core_type<tc>, window_params = [{pipeline_mode = #tpu.pipeline_mode<synchronous>, transform_indices = @transform_0, window_bounds = array<i64: 16, 768>}, {pipeline_mode = #tpu.pipeline_mode<synchronous>, transform_indices = @transform_1, window_bounds = array<i64: 768, 32>}, {pipeline_mode = #tpu.pipeline_mode<synchronous>, transform_indices = @transform_2, window_bounds = array<i64: 1, 32>}, {pipeline_mode = #tpu.pipeline_mode<synchronous>, transform_indices = @transform_3, window_bounds = array<i64: 16, 32>}, {pipeline_mode = #tpu.pipeline_mode<synchronous>, transform_indices = @transform_4, window_bounds = array<i64: 16, 32>}]} {
    %c0 = arith.constant 0 : index
    %c0_0 = arith.constant 0 : index
    %0 = vector.load %arg1[%c0, %c0_0] : memref<16x768xf32, #tpu.memory_space<vmem>>, vector<16x768xf32>
    %c0_1 = arith.constant 0 : index
    %c0_2 = arith.constant 0 : index
    %1 = vector.load %arg2[%c0_1, %c0_2] : memref<768x32xf32, #tpu.memory_space<vmem>>, vector<768x32xf32>
    %cst = arith.constant dense<0.000000e+00> : vector<16x32xf32>
    %2 = tpu.matmul %0, %1, %cst {dimension_numbers = #tpu.dot_dimension_numbers<[1], [0], [0], [1], [0, 0, 1, 1], [], []>} : vector<16x768xf32>, vector<768x32xf32>, vector<16x32xf32> -> vector<16x32xf32>
    %c0_3 = arith.constant 0 : index
    %c0_4 = arith.constant 0 : index
    %3 = vector.load %arg3[%c0_3, %c0_4] : memref<1x32xf32, #tpu.memory_space<vmem>>, vector<1x32xf32>
    %4 = vector.broadcast %3 : vector<1x32xf32> to vector<16x32xf32>
    %5 = arith.addf %2, %4 : vector<16x32xf32>
    %c0_5 = arith.constant 0 : index
    %c0_6 = arith.constant 0 : index
    %6 = vector.load %arg4[%c0_5, %c0_6] : memref<16x32xf32, #tpu.memory_space<vmem>>, vector<16x32xf32>
    %7 = arith.addf %5, %6 : vector<16x32xf32>
    %c0_7 = arith.constant 0 : index
    %c0_8 = arith.constant 0 : index
    %8 = vector.load %arg5[%c0_7, %c0_8] : memref<16x32xf32, #tpu.memory_space<vmem>>, vector<16x32xf32>
    tpu.vector_store %arg5[%c0_7, %c0_8], %7 {strides = array<i32>} : memref<16x32xf32, #tpu.memory_space<vmem>>, vector<16x32xf32>,
    return
  }
  func.func @transform_0(%arg0: i32) -> (i32, i32) {
    %c0_i32 = arith.constant 0 : i32
    %c0_i32_0 = arith.constant 0 : i32
    %c0_i32_1 = arith.constant 0 : i32
    return %c0_i32, %c0_i32_0 : i32, i32
  }
  func.func @transform_1(%arg0: i32) -> (i32, i32) {
    %c0_i32 = arith.constant 0 : i32
    %c0_i32_0 = arith.constant 0 : i32
    %c0_i32_1 = arith.constant 0 : i32
    return %c0_i32, %c0_i32_0 : i32, i32
  }
  func.func @transform_2(%arg0: i32) -> (i32, i32) {
    %c0_i32 = arith.constant 0 : i32
    %c0_i32_0 = arith.constant 0 : i32
    %c0_i32_1 = arith.constant 0 : i32
    return %c0_i32, %c0_i32_0 : i32, i32
  }
  func.func @transform_3(%arg0: i32) -> (i32, i32) {
    %c0_i32 = arith.constant 0 : i32
    %c0_i32_0 = arith.constant 0 : i32
    %c0_i32_1 = arith.constant 0 : i32
    return %c0_i32, %c0_i32_0 : i32, i32
  }
  func.func @transform_4(%arg0: i32) -> (i32, i32) {
    %c0_i32 = arith.constant 0 : i32
    %c0_i32_0 = arith.constant 0 : i32
    %c0_i32_1 = arith.constant 0 : i32
    return %c0_i32, %c0_i32_0 : i32, i32
  }
}

module attributes {stable_mosaic.version = 11 : i64} {
  func.func @_ln_linear_kernel(%arg0: i32, %arg1: memref<16x32xf32, #tpu.memory_space<vmem>>, %arg2: memref<1x32xf32, #tpu.memory_space<vmem>>, %arg3: memref<1x32xf32, #tpu.memory_space<vmem>>, %arg4: memref<32x96xf32, #tpu.memory_space<vmem>>, %arg5: memref<1x96xf32, #tpu.memory_space<vmem>>, %arg6: memref<16x96xf32, #tpu.memory_space<vmem>>) attributes {dimension_semantics = [#tpu.dimension_semantics<arbitrary>], iteration_bounds = array<i64: 1>, scalar_prefetch = 0 : i64, scratch_operands = 0 : i64, tpu.core_type = #tpu.core_type<tc>, window_params = [{pipeline_mode = #tpu.pipeline_mode<synchronous>, transform_indices = @transform_0, window_bounds = array<i64: 16, 32>}, {pipeline_mode = #tpu.pipeline_mode<synchronous>, transform_indices = @transform_1, window_bounds = array<i64: 1, 32>}, {pipeline_mode = #tpu.pipeline_mode<synchronous>, transform_indices = @transform_2, window_bounds = array<i64: 1, 32>}, {pipeline_mode = #tpu.pipeline_mode<synchronous>, transform_indices = @transform_3, window_bounds = array<i64: 32, 96>}, {pipeline_mode = #tpu.pipeline_mode<synchronous>, transform_indices = @transform_4, window_bounds = array<i64: 1, 96>}, {pipeline_mode = #tpu.pipeline_mode<synchronous>, transform_indices = @transform_5, window_bounds = array<i64: 16, 96>}]} {
    %c0 = arith.constant 0 : index
    %c0_0 = arith.constant 0 : index
    %0 = vector.load %arg1[%c0, %c0_0] : memref<16x32xf32, #tpu.memory_space<vmem>>, vector<16x32xf32>
    %cst = arith.constant dense<0.000000e+00> : vector<16xf32>
    %1 = vector.multi_reduction <add>, %0, %cst [1] : vector<16x32xf32> to vector<16xf32>
    %2 = vector.shape_cast %1 : vector<16xf32> to vector<16x1xf32>
    %cst_1 = arith.constant 3.200000e+01 : f32
    %3 = vector.broadcast %cst_1 : f32 to vector<16x1xf32>
    %4 = arith.divf %2, %3 : vector<16x1xf32>
    %5 = vector.broadcast %4 : vector<16x1xf32> to vector<16x32xf32>
    %6 = arith.subf %0, %5 : vector<16x32xf32>
    %7 = arith.mulf %6, %6 : vector<16x32xf32>
    %cst_2 = arith.constant dense<0.000000e+00> : vector<16xf32>
    %8 = vector.multi_reduction <add>, %7, %cst_2 [1] : vector<16x32xf32> to vector<16xf32>
    %9 = vector.shape_cast %8 : vector<16xf32> to vector<16x1xf32>
    %cst_3 = arith.constant 3.200000e+01 : f32
    %10 = vector.broadcast %cst_3 : f32 to vector<16x1xf32>
    %11 = arith.divf %9, %10 : vector<16x1xf32>
    %12 = vector.broadcast %4 : vector<16x1xf32> to vector<16x32xf32>
    %13 = arith.subf %0, %12 : vector<16x32xf32>
    %cst_4 = arith.constant 9.99999997E-7 : f32
    %14 = vector.broadcast %cst_4 : f32 to vector<16x1xf32>
    %15 = arith.addf %11, %14 : vector<16x1xf32>
    %16 = math.sqrt %15 : vector<16x1xf32>
    %17 = vector.broadcast %16 : vector<16x1xf32> to vector<16x32xf32>
    %18 = arith.divf %13, %17 : vector<16x32xf32>
    %c0_5 = arith.constant 0 : index
    %c0_6 = arith.constant 0 : index
    %19 = vector.load %arg2[%c0_5, %c0_6] : memref<1x32xf32, #tpu.memory_space<vmem>>, vector<1x32xf32>
    %20 = vector.broadcast %19 : vector<1x32xf32> to vector<16x32xf32>
    %21 = arith.mulf %18, %20 : vector<16x32xf32>
    %c0_7 = arith.constant 0 : index
    %c0_8 = arith.constant 0 : index
    %22 = vector.load %arg3[%c0_7, %c0_8] : memref<1x32xf32, #tpu.memory_space<vmem>>, vector<1x32xf32>
    %23 = vector.broadcast %22 : vector<1x32xf32> to vector<16x32xf32>
    %24 = arith.addf %21, %23 : vector<16x32xf32>
    %c0_9 = arith.constant 0 : index
    %c0_10 = arith.constant 0 : index
    %25 = vector.load %arg4[%c0_9, %c0_10] : memref<32x96xf32, #tpu.memory_space<vmem>>, vector<32x96xf32>
    %cst_11 = arith.constant dense<0.000000e+00> : vector<16x96xf32>
    %26 = tpu.matmul %24, %25, %cst_11 {dimension_numbers = #tpu.dot_dimension_numbers<[1], [0], [0], [1], [0, 0, 1, 1], [], []>} : vector<16x32xf32>, vector<32x96xf32>, vector<16x96xf32> -> vector<16x96xf32>
    %c0_12 = arith.constant 0 : index
    %c0_13 = arith.constant 0 : index
    %27 = vector.load %arg5[%c0_12, %c0_13] : memref<1x96xf32, #tpu.memory_space<vmem>>, vector<1x96xf32>
    %28 = vector.broadcast %27 : vector<1x96xf32> to vector<16x96xf32>
    %29 = arith.addf %26, %28 : vector<16x96xf32>
    %c0_14 = arith.constant 0 : index
    %c0_15 = arith.constant 0 : index
    %30 = vector.load %arg6[%c0_14, %c0_15] : memref<16x96xf32, #tpu.memory_space<vmem>>, vector<16x96xf32>
    tpu.vector_store %arg6[%c0_14, %c0_15], %29 {strides = array<i32>} : memref<16x96xf32, #tpu.memory_space<vmem>>, vector<16x96xf32>,
    return
  }
  func.func @transform_0(%arg0: i32) -> (i32, i32) {
    %c0_i32 = arith.constant 0 : i32
    %c0_i32_0 = arith.constant 0 : i32
    %c0_i32_1 = arith.constant 0 : i32
    return %c0_i32, %c0_i32_0 : i32, i32
  }
  func.func @transform_1(%arg0: i32) -> (i32, i32) {
    %c0_i32 = arith.constant 0 : i32
    %c0_i32_0 = arith.constant 0 : i32
    %c0_i32_1 = arith.constant 0 : i32
    return %c0_i32, %c0_i32_0 : i32, i32
  }
  func.func @transform_2(%arg0: i32) -> (i32, i32) {
    %c0_i32 = arith.constant 0 : i32
    %c0_i32_0 = arith.constant 0 : i32
    %c0_i32_1 = arith.constant 0 : i32
    return %c0_i32, %c0_i32_0 : i32, i32
  }
  func.func @transform_3(%arg0: i32) -> (i32, i32) {
    %c0_i32 = arith.constant 0 : i32
    %c0_i32_0 = arith.constant 0 : i32
    %c0_i32_1 = arith.constant 0 : i32
    return %c0_i32, %c0_i32_0 : i32, i32
  }
  func.func @transform_4(%arg0: i32) -> (i32, i32) {
    %c0_i32 = arith.constant 0 : i32
    %c0_i32_0 = arith.constant 0 : i32
    %c0_i32_1 = arith.constant 0 : i32
    return %c0_i32, %c0_i32_0 : i32, i32
  }
  func.func @transform_5(%arg0: i32) -> (i32, i32) {
    %c0_i32 = arith.constant 0 : i32
    %c0_i32_0 = arith.constant 0 : i32
    %c0_i32_1 = arith.constant 0 : i32
    return %c0_i32, %c0_i32_0 : i32, i32
  }
}

module attributes {stable_mosaic.version = 11 : i64} {
  func.func @_ln_linear_kernel(%arg0: i32, %arg1: memref<16x32xf32, #tpu.memory_space<vmem>>, %arg2: memref<1x32xf32, #tpu.memory_space<vmem>>, %arg3: memref<1x32xf32, #tpu.memory_space<vmem>>, %arg4: memref<32x128xf32, #tpu.memory_space<vmem>>, %arg5: memref<1x128xf32, #tpu.memory_space<vmem>>, %arg6: memref<16x128xf32, #tpu.memory_space<vmem>>) attributes {dimension_semantics = [#tpu.dimension_semantics<arbitrary>], iteration_bounds = array<i64: 1>, scalar_prefetch = 0 : i64, scratch_operands = 0 : i64, tpu.core_type = #tpu.core_type<tc>, window_params = [{pipeline_mode = #tpu.pipeline_mode<synchronous>, transform_indices = @transform_0, window_bounds = array<i64: 16, 32>}, {pipeline_mode = #tpu.pipeline_mode<synchronous>, transform_indices = @transform_1, window_bounds = array<i64: 1, 32>}, {pipeline_mode = #tpu.pipeline_mode<synchronous>, transform_indices = @transform_2, window_bounds = array<i64: 1, 32>}, {pipeline_mode = #tpu.pipeline_mode<synchronous>, transform_indices = @transform_3, window_bounds = array<i64: 32, 128>}, {pipeline_mode = #tpu.pipeline_mode<synchronous>, transform_indices = @transform_4, window_bounds = array<i64: 1, 128>}, {pipeline_mode = #tpu.pipeline_mode<synchronous>, transform_indices = @transform_5, window_bounds = array<i64: 16, 128>}]} {
    %c0 = arith.constant 0 : index
    %c0_0 = arith.constant 0 : index
    %0 = vector.load %arg1[%c0, %c0_0] : memref<16x32xf32, #tpu.memory_space<vmem>>, vector<16x32xf32>
    %cst = arith.constant dense<0.000000e+00> : vector<16xf32>
    %1 = vector.multi_reduction <add>, %0, %cst [1] : vector<16x32xf32> to vector<16xf32>
    %2 = vector.shape_cast %1 : vector<16xf32> to vector<16x1xf32>
    %cst_1 = arith.constant 3.200000e+01 : f32
    %3 = vector.broadcast %cst_1 : f32 to vector<16x1xf32>
    %4 = arith.divf %2, %3 : vector<16x1xf32>
    %5 = vector.broadcast %4 : vector<16x1xf32> to vector<16x32xf32>
    %6 = arith.subf %0, %5 : vector<16x32xf32>
    %7 = arith.mulf %6, %6 : vector<16x32xf32>
    %cst_2 = arith.constant dense<0.000000e+00> : vector<16xf32>
    %8 = vector.multi_reduction <add>, %7, %cst_2 [1] : vector<16x32xf32> to vector<16xf32>
    %9 = vector.shape_cast %8 : vector<16xf32> to vector<16x1xf32>
    %cst_3 = arith.constant 3.200000e+01 : f32
    %10 = vector.broadcast %cst_3 : f32 to vector<16x1xf32>
    %11 = arith.divf %9, %10 : vector<16x1xf32>
    %12 = vector.broadcast %4 : vector<16x1xf32> to vector<16x32xf32>
    %13 = arith.subf %0, %12 : vector<16x32xf32>
    %cst_4 = arith.constant 9.99999997E-7 : f32
    %14 = vector.broadcast %cst_4 : f32 to vector<16x1xf32>
    %15 = arith.addf %11, %14 : vector<16x1xf32>
    %16 = math.sqrt %15 : vector<16x1xf32>
    %17 = vector.broadcast %16 : vector<16x1xf32> to vector<16x32xf32>
    %18 = arith.divf %13, %17 : vector<16x32xf32>
    %c0_5 = arith.constant 0 : index
    %c0_6 = arith.constant 0 : index
    %19 = vector.load %arg2[%c0_5, %c0_6] : memref<1x32xf32, #tpu.memory_space<vmem>>, vector<1x32xf32>
    %20 = vector.broadcast %19 : vector<1x32xf32> to vector<16x32xf32>
    %21 = arith.mulf %18, %20 : vector<16x32xf32>
    %c0_7 = arith.constant 0 : index
    %c0_8 = arith.constant 0 : index
    %22 = vector.load %arg3[%c0_7, %c0_8] : memref<1x32xf32, #tpu.memory_space<vmem>>, vector<1x32xf32>
    %23 = vector.broadcast %22 : vector<1x32xf32> to vector<16x32xf32>
    %24 = arith.addf %21, %23 : vector<16x32xf32>
    %c0_9 = arith.constant 0 : index
    %c0_10 = arith.constant 0 : index
    %25 = vector.load %arg4[%c0_9, %c0_10] : memref<32x128xf32, #tpu.memory_space<vmem>>, vector<32x128xf32>
    %cst_11 = arith.constant dense<0.000000e+00> : vector<16x128xf32>
    %26 = tpu.matmul %24, %25, %cst_11 {dimension_numbers = #tpu.dot_dimension_numbers<[1], [0], [0], [1], [0, 0, 1, 1], [], []>} : vector<16x32xf32>, vector<32x128xf32>, vector<16x128xf32> -> vector<16x128xf32>
    %c0_12 = arith.constant 0 : index
    %c0_13 = arith.constant 0 : index
    %27 = vector.load %arg5[%c0_12, %c0_13] : memref<1x128xf32, #tpu.memory_space<vmem>>, vector<1x128xf32>
    %28 = vector.broadcast %27 : vector<1x128xf32> to vector<16x128xf32>
    %29 = arith.addf %26, %28 : vector<16x128xf32>
    %c0_14 = arith.constant 0 : index
    %c0_15 = arith.constant 0 : index
    %30 = vector.load %arg6[%c0_14, %c0_15] : memref<16x128xf32, #tpu.memory_space<vmem>>, vector<16x128xf32>
    tpu.vector_store %arg6[%c0_14, %c0_15], %29 {strides = array<i32>} : memref<16x128xf32, #tpu.memory_space<vmem>>, vector<16x128xf32>,
    return
  }
  func.func @transform_0(%arg0: i32) -> (i32, i32) {
    %c0_i32 = arith.constant 0 : i32
    %c0_i32_0 = arith.constant 0 : i32
    %c0_i32_1 = arith.constant 0 : i32
    return %c0_i32, %c0_i32_0 : i32, i32
  }
  func.func @transform_1(%arg0: i32) -> (i32, i32) {
    %c0_i32 = arith.constant 0 : i32
    %c0_i32_0 = arith.constant 0 : i32
    %c0_i32_1 = arith.constant 0 : i32
    return %c0_i32, %c0_i32_0 : i32, i32
  }
  func.func @transform_2(%arg0: i32) -> (i32, i32) {
    %c0_i32 = arith.constant 0 : i32
    %c0_i32_0 = arith.constant 0 : i32
    %c0_i32_1 = arith.constant 0 : i32
    return %c0_i32, %c0_i32_0 : i32, i32
  }
  func.func @transform_3(%arg0: i32) -> (i32, i32) {
    %c0_i32 = arith.constant 0 : i32
    %c0_i32_0 = arith.constant 0 : i32
    %c0_i32_1 = arith.constant 0 : i32
    return %c0_i32, %c0_i32_0 : i32, i32
  }
  func.func @transform_4(%arg0: i32) -> (i32, i32) {
    %c0_i32 = arith.constant 0 : i32
    %c0_i32_0 = arith.constant 0 : i32
    %c0_i32_1 = arith.constant 0 : i32
    return %c0_i32, %c0_i32_0 : i32, i32
  }
  func.func @transform_5(%arg0: i32) -> (i32, i32) {
    %c0_i32 = arith.constant 0 : i32
    %c0_i32_0 = arith.constant 0 : i32
    %c0_i32_1 = arith.constant 0 : i32
    return %c0_i32, %c0_i32_0 : i32, i32
  }
}

module attributes {stable_mosaic.version = 11 : i64} {
  func.func @_linear_kernel(%arg0: i32, %arg1: memref<16x32xf32, #tpu.memory_space<vmem>>, %arg2: memref<32x32xf32, #tpu.memory_space<vmem>>, %arg3: memref<1x32xf32, #tpu.memory_space<vmem>>, %arg4: memref<16x32xf32, #tpu.memory_space<vmem>>, %arg5: memref<16x32xf32, #tpu.memory_space<vmem>>) attributes {dimension_semantics = [#tpu.dimension_semantics<arbitrary>], iteration_bounds = array<i64: 1>, scalar_prefetch = 0 : i64, scratch_operands = 0 : i64, tpu.core_type = #tpu.core_type<tc>, window_params = [{pipeline_mode = #tpu.pipeline_mode<synchronous>, transform_indices = @transform_0, window_bounds = array<i64: 16, 32>}, {pipeline_mode = #tpu.pipeline_mode<synchronous>, transform_indices = @transform_1, window_bounds = array<i64: 32, 32>}, {pipeline_mode = #tpu.pipeline_mode<synchronous>, transform_indices = @transform_2, window_bounds = array<i64: 1, 32>}, {pipeline_mode = #tpu.pipeline_mode<synchronous>, transform_indices = @transform_3, window_bounds = array<i64: 16, 32>}, {pipeline_mode = #tpu.pipeline_mode<synchronous>, transform_indices = @transform_4, window_bounds = array<i64: 16, 32>}]} {
    %c0 = arith.constant 0 : index
    %c0_0 = arith.constant 0 : index
    %0 = vector.load %arg1[%c0, %c0_0] : memref<16x32xf32, #tpu.memory_space<vmem>>, vector<16x32xf32>
    %c0_1 = arith.constant 0 : index
    %c0_2 = arith.constant 0 : index
    %1 = vector.load %arg2[%c0_1, %c0_2] : memref<32x32xf32, #tpu.memory_space<vmem>>, vector<32x32xf32>
    %cst = arith.constant dense<0.000000e+00> : vector<16x32xf32>
    %2 = tpu.matmul %0, %1, %cst {dimension_numbers = #tpu.dot_dimension_numbers<[1], [0], [0], [1], [0, 0, 1, 1], [], []>} : vector<16x32xf32>, vector<32x32xf32>, vector<16x32xf32> -> vector<16x32xf32>
    %c0_3 = arith.constant 0 : index
    %c0_4 = arith.constant 0 : index
    %3 = vector.load %arg3[%c0_3, %c0_4] : memref<1x32xf32, #tpu.memory_space<vmem>>, vector<1x32xf32>
    %4 = vector.broadcast %3 : vector<1x32xf32> to vector<16x32xf32>
    %5 = arith.addf %2, %4 : vector<16x32xf32>
    %c0_5 = arith.constant 0 : index
    %c0_6 = arith.constant 0 : index
    %6 = vector.load %arg4[%c0_5, %c0_6] : memref<16x32xf32, #tpu.memory_space<vmem>>, vector<16x32xf32>
    %7 = arith.addf %5, %6 : vector<16x32xf32>
    %c0_7 = arith.constant 0 : index
    %c0_8 = arith.constant 0 : index
    %8 = vector.load %arg5[%c0_7, %c0_8] : memref<16x32xf32, #tpu.memory_space<vmem>>, vector<16x32xf32>
    tpu.vector_store %arg5[%c0_7, %c0_8], %7 {strides = array<i32>} : memref<16x32xf32, #tpu.memory_space<vmem>>, vector<16x32xf32>,
    return
  }
  func.func @transform_0(%arg0: i32) -> (i32, i32) {
    %c0_i32 = arith.constant 0 : i32
    %c0_i32_0 = arith.constant 0 : i32
    %c0_i32_1 = arith.constant 0 : i32
    return %c0_i32, %c0_i32_0 : i32, i32
  }
  func.func @transform_1(%arg0: i32) -> (i32, i32) {
    %c0_i32 = arith.constant 0 : i32
    %c0_i32_0 = arith.constant 0 : i32
    %c0_i32_1 = arith.constant 0 : i32
    return %c0_i32, %c0_i32_0 : i32, i32
  }
  func.func @transform_2(%arg0: i32) -> (i32, i32) {
    %c0_i32 = arith.constant 0 : i32
    %c0_i32_0 = arith.constant 0 : i32
    %c0_i32_1 = arith.constant 0 : i32
    return %c0_i32, %c0_i32_0 : i32, i32
  }
  func.func @transform_3(%arg0: i32) -> (i32, i32) {
    %c0_i32 = arith.constant 0 : i32
    %c0_i32_0 = arith.constant 0 : i32
    %c0_i32_1 = arith.constant 0 : i32
    return %c0_i32, %c0_i32_0 : i32, i32
  }
  func.func @transform_4(%arg0: i32) -> (i32, i32) {
    %c0_i32 = arith.constant 0 : i32
    %c0_i32_0 = arith.constant 0 : i32
    %c0_i32_1 = arith.constant 0 : i32
    return %c0_i32, %c0_i32_0 : i32, i32
  }
}

module attributes {stable_mosaic.version = 11 : i64} {
  func.func @_mha_bias_kernel(%arg0: i32, %arg1: memref<8x4x16xf32, #tpu.memory_space<vmem>>, %arg2: memref<8x4x16xf32, #tpu.memory_space<vmem>>, %arg3: memref<8x4x16xf32, #tpu.memory_space<vmem>>, %arg4: memref<8x4x4xf32, #tpu.memory_space<vmem>>, %arg5: memref<8x4x16xf32, #tpu.memory_space<vmem>>) attributes {dimension_semantics = [#tpu.dimension_semantics<arbitrary>], iteration_bounds = array<i64: 1>, scalar_prefetch = 0 : i64, scratch_operands = 0 : i64, tpu.core_type = #tpu.core_type<tc>, window_params = [{pipeline_mode = #tpu.pipeline_mode<synchronous>, transform_indices = @transform_0, window_bounds = array<i64: 8, 4, 16>}, {pipeline_mode = #tpu.pipeline_mode<synchronous>, transform_indices = @transform_1, window_bounds = array<i64: 8, 4, 16>}, {pipeline_mode = #tpu.pipeline_mode<synchronous>, transform_indices = @transform_2, window_bounds = array<i64: 8, 4, 16>}, {pipeline_mode = #tpu.pipeline_mode<synchronous>, transform_indices = @transform_3, window_bounds = array<i64: 8, 4, 4>}, {pipeline_mode = #tpu.pipeline_mode<synchronous>, transform_indices = @transform_4, window_bounds = array<i64: 8, 4, 16>}]} {
    %c0 = arith.constant 0 : index
    %c0_0 = arith.constant 0 : index
    %c0_1 = arith.constant 0 : index
    %0 = vector.load %arg1[%c0, %c0_0, %c0_1] : memref<8x4x16xf32, #tpu.memory_space<vmem>>, vector<8x4x16xf32>
    %cst = arith.constant 2.500000e-01 : f32
    %1 = vector.broadcast %cst : f32 to vector<8x4x16xf32>
    %2 = arith.mulf %0, %1 : vector<8x4x16xf32>
    %c0_2 = arith.constant 0 : index
    %c0_3 = arith.constant 0 : index
    %c0_4 = arith.constant 0 : index
    %3 = vector.load %arg2[%c0_2, %c0_3, %c0_4] : memref<8x4x16xf32, #tpu.memory_space<vmem>>, vector<8x4x16xf32>
    "tpu.trace_start"() <{level = 10 : i32, message = "bqd,bkd->bqk"}> : () -> ()
    %cst_5 = arith.constant dense<0.000000e+00> : vector<8x4x4xf32>
    %4 = tpu.matmul %2, %3, %cst_5 {dimension_numbers = #tpu.dot_dimension_numbers<[2], [2], [1], [1], [0, 0, 0, 1, 1, 1], [0], [0]>} : vector<8x4x16xf32>, vector<8x4x16xf32>, vector<8x4x4xf32> -> vector<8x4x4xf32>
    "tpu.trace_stop"() : () -> ()
    %c0_6 = arith.constant 0 : index
    %c0_7 = arith.constant 0 : index
    %c0_8 = arith.constant 0 : index
    %5 = vector.load %arg4[%c0_6, %c0_7, %c0_8] : memref<8x4x4xf32, #tpu.memory_space<vmem>>, vector<8x4x4xf32>
    %6 = arith.addf %4, %5 : vector<8x4x4xf32>
    %cst_9 = arith.constant dense<0xFF800000> : vector<8x4xf32>
    %7 = vector.multi_reduction <maximumf>, %6, %cst_9 [2] : vector<8x4x4xf32> to vector<8x4xf32>
    %8 = vector.shape_cast %7 : vector<8x4xf32> to vector<8x4x1xf32>
    %9 = vector.broadcast %8 : vector<8x4x1xf32> to vector<8x4x4xf32>
    %10 = arith.subf %6, %9 : vector<8x4x4xf32>
    %11 = math.exp %10 : vector<8x4x4xf32>
    %cst_10 = arith.constant dense<0.000000e+00> : vector<8x4xf32>
    %12 = vector.multi_reduction <add>, %11, %cst_10 [2] : vector<8x4x4xf32> to vector<8x4xf32>
    %13 = vector.shape_cast %12 : vector<8x4xf32> to vector<8x4x1xf32>
    %14 = vector.broadcast %13 : vector<8x4x1xf32> to vector<8x4x4xf32>
    %15 = arith.divf %11, %14 : vector<8x4x4xf32>
    %c0_11 = arith.constant 0 : index
    %c0_12 = arith.constant 0 : index
    %c0_13 = arith.constant 0 : index
    %16 = vector.load %arg3[%c0_11, %c0_12, %c0_13] : memref<8x4x16xf32, #tpu.memory_space<vmem>>, vector<8x4x16xf32>
    "tpu.trace_start"() <{level = 10 : i32, message = "bqk,bkd->bqd"}> : () -> ()
    %cst_14 = arith.constant dense<0.000000e+00> : vector<8x4x16xf32>
    %17 = tpu.matmul %15, %16, %cst_14 {dimension_numbers = #tpu.dot_dimension_numbers<[2], [1], [1], [2], [0, 0, 0, 1, 1, 2], [0], [0]>} : vector<8x4x4xf32>, vector<8x4x16xf32>, vector<8x4x16xf32> -> vector<8x4x16xf32>
    "tpu.trace_stop"() : () -> ()
    %c0_15 = arith.constant 0 : index
    %c0_16 = arith.constant 0 : index
    %c0_17 = arith.constant 0 : index
    %18 = vector.load %arg5[%c0_15, %c0_16, %c0_17] : memref<8x4x16xf32, #tpu.memory_space<vmem>>, vector<8x4x16xf32>
    tpu.vector_store %arg5[%c0_15, %c0_16, %c0_17], %17 {strides = array<i32>} : memref<8x4x16xf32, #tpu.memory_space<vmem>>, vector<8x4x16xf32>,
    return
  }
  func.func @transform_0(%arg0: i32) -> (i32, i32, i32) {
    %c0_i32 = arith.constant 0 : i32
    %c0_i32_0 = arith.constant 0 : i32
    %c0_i32_1 = arith.constant 0 : i32
    %c0_i32_2 = arith.constant 0 : i32
    return %c0_i32, %c0_i32_0, %c0_i32_1 : i32, i32, i32
  }
  func.func @transform_1(%arg0: i32) -> (i32, i32, i32) {
    %c0_i32 = arith.constant 0 : i32
    %c0_i32_0 = arith.constant 0 : i32
    %c0_i32_1 = arith.constant 0 : i32
    %c0_i32_2 = arith.constant 0 : i32
    return %c0_i32, %c0_i32_0, %c0_i32_1 : i32, i32, i32
  }
  func.func @transform_2(%arg0: i32) -> (i32, i32, i32) {
    %c0_i32 = arith.constant 0 : i32
    %c0_i32_0 = arith.constant 0 : i32
    %c0_i32_1 = arith.constant 0 : i32
    %c0_i32_2 = arith.constant 0 : i32
    return %c0_i32, %c0_i32_0, %c0_i32_1 : i32, i32, i32
  }
  func.func @transform_3(%arg0: i32) -> (i32, i32, i32) {
    %c0_i32 = arith.constant 0 : i32
    %c0_i32_0 = arith.constant 0 : i32
    %c0_i32_1 = arith.constant 0 : i32
    %c0_i32_2 = arith.constant 0 : i32
    return %c0_i32, %c0_i32_0, %c0_i32_1 : i32, i32, i32
  }
  func.func @transform_4(%arg0: i32) -> (i32, i32, i32) {
    %c0_i32 = arith.constant 0 : i32
    %c0_i32_0 = arith.constant 0 : i32
    %c0_i32_1 = arith.constant 0 : i32
    %c0_i32_2 = arith.constant 0 : i32
    return %c0_i32, %c0_i32_0, %c0_i32_1 : i32, i32, i32
  }
}

module attributes {stable_mosaic.version = 11 : i64} {
  func.func @_linear_kernel(%arg0: i32, %arg1: memref<16x128xf32, #tpu.memory_space<vmem>>, %arg2: memref<128x32xf32, #tpu.memory_space<vmem>>, %arg3: memref<1x32xf32, #tpu.memory_space<vmem>>, %arg4: memref<16x32xf32, #tpu.memory_space<vmem>>, %arg5: memref<16x32xf32, #tpu.memory_space<vmem>>) attributes {dimension_semantics = [#tpu.dimension_semantics<arbitrary>], iteration_bounds = array<i64: 1>, scalar_prefetch = 0 : i64, scratch_operands = 0 : i64, tpu.core_type = #tpu.core_type<tc>, window_params = [{pipeline_mode = #tpu.pipeline_mode<synchronous>, transform_indices = @transform_0, window_bounds = array<i64: 16, 128>}, {pipeline_mode = #tpu.pipeline_mode<synchronous>, transform_indices = @transform_1, window_bounds = array<i64: 128, 32>}, {pipeline_mode = #tpu.pipeline_mode<synchronous>, transform_indices = @transform_2, window_bounds = array<i64: 1, 32>}, {pipeline_mode = #tpu.pipeline_mode<synchronous>, transform_indices = @transform_3, window_bounds = array<i64: 16, 32>}, {pipeline_mode = #tpu.pipeline_mode<synchronous>, transform_indices = @transform_4, window_bounds = array<i64: 16, 32>}]} {
    %c0 = arith.constant 0 : index
    %c0_0 = arith.constant 0 : index
    %0 = vector.load %arg1[%c0, %c0_0] : memref<16x128xf32, #tpu.memory_space<vmem>>, vector<16x128xf32>
    %c0_1 = arith.constant 0 : index
    %c0_2 = arith.constant 0 : index
    %1 = vector.load %arg2[%c0_1, %c0_2] : memref<128x32xf32, #tpu.memory_space<vmem>>, vector<128x32xf32>
    %cst = arith.constant dense<0.000000e+00> : vector<16x32xf32>
    %2 = tpu.matmul %0, %1, %cst {dimension_numbers = #tpu.dot_dimension_numbers<[1], [0], [0], [1], [0, 0, 1, 1], [], []>} : vector<16x128xf32>, vector<128x32xf32>, vector<16x32xf32> -> vector<16x32xf32>
    %c0_3 = arith.constant 0 : index
    %c0_4 = arith.constant 0 : index
    %3 = vector.load %arg3[%c0_3, %c0_4] : memref<1x32xf32, #tpu.memory_space<vmem>>, vector<1x32xf32>
    %4 = vector.broadcast %3 : vector<1x32xf32> to vector<16x32xf32>
    %5 = arith.addf %2, %4 : vector<16x32xf32>
    %c0_5 = arith.constant 0 : index
    %c0_6 = arith.constant 0 : index
    %6 = vector.load %arg4[%c0_5, %c0_6] : memref<16x32xf32, #tpu.memory_space<vmem>>, vector<16x32xf32>
    %7 = arith.addf %5, %6 : vector<16x32xf32>
    %c0_7 = arith.constant 0 : index
    %c0_8 = arith.constant 0 : index
    %8 = vector.load %arg5[%c0_7, %c0_8] : memref<16x32xf32, #tpu.memory_space<vmem>>, vector<16x32xf32>
    tpu.vector_store %arg5[%c0_7, %c0_8], %7 {strides = array<i32>} : memref<16x32xf32, #tpu.memory_space<vmem>>, vector<16x32xf32>,
    return
  }
  func.func @transform_0(%arg0: i32) -> (i32, i32) {
    %c0_i32 = arith.constant 0 : i32
    %c0_i32_0 = arith.constant 0 : i32
    %c0_i32_1 = arith.constant 0 : i32
    return %c0_i32, %c0_i32_0 : i32, i32
  }
  func.func @transform_1(%arg0: i32) -> (i32, i32) {
    %c0_i32 = arith.constant 0 : i32
    %c0_i32_0 = arith.constant 0 : i32
    %c0_i32_1 = arith.constant 0 : i32
    return %c0_i32, %c0_i32_0 : i32, i32
  }
  func.func @transform_2(%arg0: i32) -> (i32, i32) {
    %c0_i32 = arith.constant 0 : i32
    %c0_i32_0 = arith.constant 0 : i32
    %c0_i32_1 = arith.constant 0 : i32
    return %c0_i32, %c0_i32_0 : i32, i32
  }
  func.func @transform_3(%arg0: i32) -> (i32, i32) {
    %c0_i32 = arith.constant 0 : i32
    %c0_i32_0 = arith.constant 0 : i32
    %c0_i32_1 = arith.constant 0 : i32
    return %c0_i32, %c0_i32_0 : i32, i32
  }
  func.func @transform_4(%arg0: i32) -> (i32, i32) {
    %c0_i32 = arith.constant 0 : i32
    %c0_i32_0 = arith.constant 0 : i32
    %c0_i32_1 = arith.constant 0 : i32
    return %c0_i32, %c0_i32_0 : i32, i32
  }
}

module attributes {stable_mosaic.version = 11 : i64} {
  func.func @_mha_bias_kernel(%arg0: i32, %arg1: memref<2x16x16xf32, #tpu.memory_space<vmem>>, %arg2: memref<2x16x16xf32, #tpu.memory_space<vmem>>, %arg3: memref<2x16x16xf32, #tpu.memory_space<vmem>>, %arg4: memref<2x16x16xf32, #tpu.memory_space<vmem>>, %arg5: memref<2x16x16xf32, #tpu.memory_space<vmem>>) attributes {dimension_semantics = [#tpu.dimension_semantics<arbitrary>], iteration_bounds = array<i64: 1>, scalar_prefetch = 0 : i64, scratch_operands = 0 : i64, tpu.core_type = #tpu.core_type<tc>, window_params = [{pipeline_mode = #tpu.pipeline_mode<synchronous>, transform_indices = @transform_0, window_bounds = array<i64: 2, 16, 16>}, {pipeline_mode = #tpu.pipeline_mode<synchronous>, transform_indices = @transform_1, window_bounds = array<i64: 2, 16, 16>}, {pipeline_mode = #tpu.pipeline_mode<synchronous>, transform_indices = @transform_2, window_bounds = array<i64: 2, 16, 16>}, {pipeline_mode = #tpu.pipeline_mode<synchronous>, transform_indices = @transform_3, window_bounds = array<i64: 2, 16, 16>}, {pipeline_mode = #tpu.pipeline_mode<synchronous>, transform_indices = @transform_4, window_bounds = array<i64: 2, 16, 16>}]} {
    %c0 = arith.constant 0 : index
    %c0_0 = arith.constant 0 : index
    %c0_1 = arith.constant 0 : index
    %0 = vector.load %arg1[%c0, %c0_0, %c0_1] : memref<2x16x16xf32, #tpu.memory_space<vmem>>, vector<2x16x16xf32>
    %cst = arith.constant 2.500000e-01 : f32
    %1 = vector.broadcast %cst : f32 to vector<2x16x16xf32>
    %2 = arith.mulf %0, %1 : vector<2x16x16xf32>
    %c0_2 = arith.constant 0 : index
    %c0_3 = arith.constant 0 : index
    %c0_4 = arith.constant 0 : index
    %3 = vector.load %arg2[%c0_2, %c0_3, %c0_4] : memref<2x16x16xf32, #tpu.memory_space<vmem>>, vector<2x16x16xf32>
    "tpu.trace_start"() <{level = 10 : i32, message = "bqd,bkd->bqk"}> : () -> ()
    %cst_5 = arith.constant dense<0.000000e+00> : vector<2x16x16xf32>
    %4 = tpu.matmul %2, %3, %cst_5 {dimension_numbers = #tpu.dot_dimension_numbers<[2], [2], [1], [1], [0, 0, 0, 1, 1, 1], [0], [0]>} : vector<2x16x16xf32>, vector<2x16x16xf32>, vector<2x16x16xf32> -> vector<2x16x16xf32>
    "tpu.trace_stop"() : () -> ()
    %c0_6 = arith.constant 0 : index
    %c0_7 = arith.constant 0 : index
    %c0_8 = arith.constant 0 : index
    %5 = vector.load %arg4[%c0_6, %c0_7, %c0_8] : memref<2x16x16xf32, #tpu.memory_space<vmem>>, vector<2x16x16xf32>
    %6 = arith.addf %4, %5 : vector<2x16x16xf32>
    %cst_9 = arith.constant dense<0xFF800000> : vector<2x16xf32>
    %7 = vector.multi_reduction <maximumf>, %6, %cst_9 [2] : vector<2x16x16xf32> to vector<2x16xf32>
    %8 = vector.shape_cast %7 : vector<2x16xf32> to vector<2x16x1xf32>
    %9 = vector.broadcast %8 : vector<2x16x1xf32> to vector<2x16x16xf32>
    %10 = arith.subf %6, %9 : vector<2x16x16xf32>
    %11 = math.exp %10 : vector<2x16x16xf32>
    %cst_10 = arith.constant dense<0.000000e+00> : vector<2x16xf32>
    %12 = vector.multi_reduction <add>, %11, %cst_10 [2] : vector<2x16x16xf32> to vector<2x16xf32>
    %13 = vector.shape_cast %12 : vector<2x16xf32> to vector<2x16x1xf32>
    %14 = vector.broadcast %13 : vector<2x16x1xf32> to vector<2x16x16xf32>
    %15 = arith.divf %11, %14 : vector<2x16x16xf32>
    %c0_11 = arith.constant 0 : index
    %c0_12 = arith.constant 0 : index
    %c0_13 = arith.constant 0 : index
    %16 = vector.load %arg3[%c0_11, %c0_12, %c0_13] : memref<2x16x16xf32, #tpu.memory_space<vmem>>, vector<2x16x16xf32>
    "tpu.trace_start"() <{level = 10 : i32, message = "bqk,bkd->bqd"}> : () -> ()
    %cst_14 = arith.constant dense<0.000000e+00> : vector<2x16x16xf32>
    %17 = tpu.matmul %15, %16, %cst_14 {dimension_numbers = #tpu.dot_dimension_numbers<[2], [1], [1], [2], [0, 0, 0, 1, 1, 2], [0], [0]>} : vector<2x16x16xf32>, vector<2x16x16xf32>, vector<2x16x16xf32> -> vector<2x16x16xf32>
    "tpu.trace_stop"() : () -> ()
    %c0_15 = arith.constant 0 : index
    %c0_16 = arith.constant 0 : index
    %c0_17 = arith.constant 0 : index
    %18 = vector.load %arg5[%c0_15, %c0_16, %c0_17] : memref<2x16x16xf32, #tpu.memory_space<vmem>>, vector<2x16x16xf32>
    tpu.vector_store %arg5[%c0_15, %c0_16, %c0_17], %17 {strides = array<i32>} : memref<2x16x16xf32, #tpu.memory_space<vmem>>, vector<2x16x16xf32>,
    return
  }
  func.func @transform_0(%arg0: i32) -> (i32, i32, i32) {
    %c0_i32 = arith.constant 0 : i32
    %c0_i32_0 = arith.constant 0 : i32
    %c0_i32_1 = arith.constant 0 : i32
    %c0_i32_2 = arith.constant 0 : i32
    return %c0_i32, %c0_i32_0, %c0_i32_1 : i32, i32, i32
  }
  func.func @transform_1(%arg0: i32) -> (i32, i32, i32) {
    %c0_i32 = arith.constant 0 : i32
    %c0_i32_0 = arith.constant 0 : i32
    %c0_i32_1 = arith.constant 0 : i32
    %c0_i32_2 = arith.constant 0 : i32
    return %c0_i32, %c0_i32_0, %c0_i32_1 : i32, i32, i32
  }
  func.func @transform_2(%arg0: i32) -> (i32, i32, i32) {
    %c0_i32 = arith.constant 0 : i32
    %c0_i32_0 = arith.constant 0 : i32
    %c0_i32_1 = arith.constant 0 : i32
    %c0_i32_2 = arith.constant 0 : i32
    return %c0_i32, %c0_i32_0, %c0_i32_1 : i32, i32, i32
  }
  func.func @transform_3(%arg0: i32) -> (i32, i32, i32) {
    %c0_i32 = arith.constant 0 : i32
    %c0_i32_0 = arith.constant 0 : i32
    %c0_i32_1 = arith.constant 0 : i32
    %c0_i32_2 = arith.constant 0 : i32
    return %c0_i32, %c0_i32_0, %c0_i32_1 : i32, i32, i32
  }
  func.func @transform_4(%arg0: i32) -> (i32, i32, i32) {
    %c0_i32 = arith.constant 0 : i32
    %c0_i32_0 = arith.constant 0 : i32
    %c0_i32_1 = arith.constant 0 : i32
    %c0_i32_2 = arith.constant 0 : i32
    return %c0_i32, %c0_i32_0, %c0_i32_1 : i32, i32, i32
  }
}

module attributes {stable_mosaic.version = 11 : i64} {
  func.func @_linear_ln_kernel(%arg0: i32, %arg1: memref<16x32xf32, #tpu.memory_space<vmem>>, %arg2: memref<32x32xf32, #tpu.memory_space<vmem>>, %arg3: memref<1x32xf32, #tpu.memory_space<vmem>>, %arg4: memref<1x32xf32, #tpu.memory_space<vmem>>, %arg5: memref<16x32xf32, #tpu.memory_space<vmem>>) attributes {dimension_semantics = [#tpu.dimension_semantics<arbitrary>], iteration_bounds = array<i64: 1>, scalar_prefetch = 0 : i64, scratch_operands = 0 : i64, tpu.core_type = #tpu.core_type<tc>, window_params = [{pipeline_mode = #tpu.pipeline_mode<synchronous>, transform_indices = @transform_0, window_bounds = array<i64: 16, 32>}, {pipeline_mode = #tpu.pipeline_mode<synchronous>, transform_indices = @transform_1, window_bounds = array<i64: 32, 32>}, {pipeline_mode = #tpu.pipeline_mode<synchronous>, transform_indices = @transform_2, window_bounds = array<i64: 1, 32>}, {pipeline_mode = #tpu.pipeline_mode<synchronous>, transform_indices = @transform_3, window_bounds = array<i64: 1, 32>}, {pipeline_mode = #tpu.pipeline_mode<synchronous>, transform_indices = @transform_4, window_bounds = array<i64: 16, 32>}]} {
    %c0 = arith.constant 0 : index
    %c0_0 = arith.constant 0 : index
    %0 = vector.load %arg1[%c0, %c0_0] : memref<16x32xf32, #tpu.memory_space<vmem>>, vector<16x32xf32>
    %c0_1 = arith.constant 0 : index
    %c0_2 = arith.constant 0 : index
    %1 = vector.load %arg2[%c0_1, %c0_2] : memref<32x32xf32, #tpu.memory_space<vmem>>, vector<32x32xf32>
    %cst = arith.constant dense<0.000000e+00> : vector<16x32xf32>
    %2 = tpu.matmul %0, %1, %cst {dimension_numbers = #tpu.dot_dimension_numbers<[1], [0], [0], [1], [0, 0, 1, 1], [], []>} : vector<16x32xf32>, vector<32x32xf32>, vector<16x32xf32> -> vector<16x32xf32>
    %cst_3 = arith.constant dense<0.000000e+00> : vector<16xf32>
    %3 = vector.multi_reduction <add>, %2, %cst_3 [1] : vector<16x32xf32> to vector<16xf32>
    %4 = vector.shape_cast %3 : vector<16xf32> to vector<16x1xf32>
    %cst_4 = arith.constant 3.200000e+01 : f32
    %5 = vector.broadcast %cst_4 : f32 to vector<16x1xf32>
    %6 = arith.divf %4, %5 : vector<16x1xf32>
    %7 = vector.broadcast %6 : vector<16x1xf32> to vector<16x32xf32>
    %8 = arith.subf %2, %7 : vector<16x32xf32>
    %9 = arith.mulf %8, %8 : vector<16x32xf32>
    %cst_5 = arith.constant dense<0.000000e+00> : vector<16xf32>
    %10 = vector.multi_reduction <add>, %9, %cst_5 [1] : vector<16x32xf32> to vector<16xf32>
    %11 = vector.shape_cast %10 : vector<16xf32> to vector<16x1xf32>
    %cst_6 = arith.constant 3.200000e+01 : f32
    %12 = vector.broadcast %cst_6 : f32 to vector<16x1xf32>
    %13 = arith.divf %11, %12 : vector<16x1xf32>
    %14 = vector.broadcast %6 : vector<16x1xf32> to vector<16x32xf32>
    %15 = arith.subf %2, %14 : vector<16x32xf32>
    %cst_7 = arith.constant 9.99999997E-7 : f32
    %16 = vector.broadcast %cst_7 : f32 to vector<16x1xf32>
    %17 = arith.addf %13, %16 : vector<16x1xf32>
    %18 = math.sqrt %17 : vector<16x1xf32>
    %19 = vector.broadcast %18 : vector<16x1xf32> to vector<16x32xf32>
    %20 = arith.divf %15, %19 : vector<16x32xf32>
    %c0_8 = arith.constant 0 : index
    %c0_9 = arith.constant 0 : index
    %21 = vector.load %arg3[%c0_8, %c0_9] : memref<1x32xf32, #tpu.memory_space<vmem>>, vector<1x32xf32>
    %22 = vector.broadcast %21 : vector<1x32xf32> to vector<16x32xf32>
    %23 = arith.mulf %20, %22 : vector<16x32xf32>
    %c0_10 = arith.constant 0 : index
    %c0_11 = arith.constant 0 : index
    %24 = vector.load %arg4[%c0_10, %c0_11] : memref<1x32xf32, #tpu.memory_space<vmem>>, vector<1x32xf32>
    %25 = vector.broadcast %24 : vector<1x32xf32> to vector<16x32xf32>
    %26 = arith.addf %23, %25 : vector<16x32xf32>
    %c0_12 = arith.constant 0 : index
    %c0_13 = arith.constant 0 : index
    %27 = vector.load %arg5[%c0_12, %c0_13] : memref<16x32xf32, #tpu.memory_space<vmem>>, vector<16x32xf32>
    tpu.vector_store %arg5[%c0_12, %c0_13], %26 {strides = array<i32>} : memref<16x32xf32, #tpu.memory_space<vmem>>, vector<16x32xf32>,
    return
  }
  func.func @transform_0(%arg0: i32) -> (i32, i32) {
    %c0_i32 = arith.constant 0 : i32
    %c0_i32_0 = arith.constant 0 : i32
    %c0_i32_1 = arith.constant 0 : i32
    return %c0_i32, %c0_i32_0 : i32, i32
  }
  func.func @transform_1(%arg0: i32) -> (i32, i32) {
    %c0_i32 = arith.constant 0 : i32
    %c0_i32_0 = arith.constant 0 : i32
    %c0_i32_1 = arith.constant 0 : i32
    return %c0_i32, %c0_i32_0 : i32, i32
  }
  func.func @transform_2(%arg0: i32) -> (i32, i32) {
    %c0_i32 = arith.constant 0 : i32
    %c0_i32_0 = arith.constant 0 : i32
    %c0_i32_1 = arith.constant 0 : i32
    return %c0_i32, %c0_i32_0 : i32, i32
  }
  func.func @transform_3(%arg0: i32) -> (i32, i32) {
    %c0_i32 = arith.constant 0 : i32
    %c0_i32_0 = arith.constant 0 : i32
    %c0_i32_1 = arith.constant 0 : i32
    return %c0_i32, %c0_i32_0 : i32, i32
  }
  func.func @transform_4(%arg0: i32) -> (i32, i32) {
    %c0_i32 = arith.constant 0 : i32
    %c0_i32_0 = arith.constant 0 : i32
    %c0_i32_1 = arith.constant 0 : i32
    return %c0_i32, %c0_i32_0 : i32, i32
  }
}

module attributes {stable_mosaic.version = 11 : i64} {
  func.func @_linear_ln_kernel(%arg0: i32, %arg1: memref<16x288xf32, #tpu.memory_space<vmem>>, %arg2: memref<288x32xf32, #tpu.memory_space<vmem>>, %arg3: memref<1x32xf32, #tpu.memory_space<vmem>>, %arg4: memref<1x32xf32, #tpu.memory_space<vmem>>, %arg5: memref<16x32xf32, #tpu.memory_space<vmem>>) attributes {dimension_semantics = [#tpu.dimension_semantics<arbitrary>], iteration_bounds = array<i64: 1>, scalar_prefetch = 0 : i64, scratch_operands = 0 : i64, tpu.core_type = #tpu.core_type<tc>, window_params = [{pipeline_mode = #tpu.pipeline_mode<synchronous>, transform_indices = @transform_0, window_bounds = array<i64: 16, 288>}, {pipeline_mode = #tpu.pipeline_mode<synchronous>, transform_indices = @transform_1, window_bounds = array<i64: 288, 32>}, {pipeline_mode = #tpu.pipeline_mode<synchronous>, transform_indices = @transform_2, window_bounds = array<i64: 1, 32>}, {pipeline_mode = #tpu.pipeline_mode<synchronous>, transform_indices = @transform_3, window_bounds = array<i64: 1, 32>}, {pipeline_mode = #tpu.pipeline_mode<synchronous>, transform_indices = @transform_4, window_bounds = array<i64: 16, 32>}]} {
    %c0 = arith.constant 0 : index
    %c0_0 = arith.constant 0 : index
    %0 = vector.load %arg1[%c0, %c0_0] : memref<16x288xf32, #tpu.memory_space<vmem>>, vector<16x288xf32>
    %c0_1 = arith.constant 0 : index
    %c0_2 = arith.constant 0 : index
    %1 = vector.load %arg2[%c0_1, %c0_2] : memref<288x32xf32, #tpu.memory_space<vmem>>, vector<288x32xf32>
    %cst = arith.constant dense<0.000000e+00> : vector<16x32xf32>
    %2 = tpu.matmul %0, %1, %cst {dimension_numbers = #tpu.dot_dimension_numbers<[1], [0], [0], [1], [0, 0, 1, 1], [], []>} : vector<16x288xf32>, vector<288x32xf32>, vector<16x32xf32> -> vector<16x32xf32>
    %cst_3 = arith.constant dense<0.000000e+00> : vector<16xf32>
    %3 = vector.multi_reduction <add>, %2, %cst_3 [1] : vector<16x32xf32> to vector<16xf32>
    %4 = vector.shape_cast %3 : vector<16xf32> to vector<16x1xf32>
    %cst_4 = arith.constant 3.200000e+01 : f32
    %5 = vector.broadcast %cst_4 : f32 to vector<16x1xf32>
    %6 = arith.divf %4, %5 : vector<16x1xf32>
    %7 = vector.broadcast %6 : vector<16x1xf32> to vector<16x32xf32>
    %8 = arith.subf %2, %7 : vector<16x32xf32>
    %9 = arith.mulf %8, %8 : vector<16x32xf32>
    %cst_5 = arith.constant dense<0.000000e+00> : vector<16xf32>
    %10 = vector.multi_reduction <add>, %9, %cst_5 [1] : vector<16x32xf32> to vector<16xf32>
    %11 = vector.shape_cast %10 : vector<16xf32> to vector<16x1xf32>
    %cst_6 = arith.constant 3.200000e+01 : f32
    %12 = vector.broadcast %cst_6 : f32 to vector<16x1xf32>
    %13 = arith.divf %11, %12 : vector<16x1xf32>
    %14 = vector.broadcast %6 : vector<16x1xf32> to vector<16x32xf32>
    %15 = arith.subf %2, %14 : vector<16x32xf32>
    %cst_7 = arith.constant 9.99999997E-7 : f32
    %16 = vector.broadcast %cst_7 : f32 to vector<16x1xf32>
    %17 = arith.addf %13, %16 : vector<16x1xf32>
    %18 = math.sqrt %17 : vector<16x1xf32>
    %19 = vector.broadcast %18 : vector<16x1xf32> to vector<16x32xf32>
    %20 = arith.divf %15, %19 : vector<16x32xf32>
    %c0_8 = arith.constant 0 : index
    %c0_9 = arith.constant 0 : index
    %21 = vector.load %arg3[%c0_8, %c0_9] : memref<1x32xf32, #tpu.memory_space<vmem>>, vector<1x32xf32>
    %22 = vector.broadcast %21 : vector<1x32xf32> to vector<16x32xf32>
    %23 = arith.mulf %20, %22 : vector<16x32xf32>
    %c0_10 = arith.constant 0 : index
    %c0_11 = arith.constant 0 : index
    %24 = vector.load %arg4[%c0_10, %c0_11] : memref<1x32xf32, #tpu.memory_space<vmem>>, vector<1x32xf32>
    %25 = vector.broadcast %24 : vector<1x32xf32> to vector<16x32xf32>
    %26 = arith.addf %23, %25 : vector<16x32xf32>
    %c0_12 = arith.constant 0 : index
    %c0_13 = arith.constant 0 : index
    %27 = vector.load %arg5[%c0_12, %c0_13] : memref<16x32xf32, #tpu.memory_space<vmem>>, vector<16x32xf32>
    tpu.vector_store %arg5[%c0_12, %c0_13], %26 {strides = array<i32>} : memref<16x32xf32, #tpu.memory_space<vmem>>, vector<16x32xf32>,
    return
  }
  func.func @transform_0(%arg0: i32) -> (i32, i32) {
    %c0_i32 = arith.constant 0 : i32
    %c0_i32_0 = arith.constant 0 : i32
    %c0_i32_1 = arith.constant 0 : i32
    return %c0_i32, %c0_i32_0 : i32, i32
  }
  func.func @transform_1(%arg0: i32) -> (i32, i32) {
    %c0_i32 = arith.constant 0 : i32
    %c0_i32_0 = arith.constant 0 : i32
    %c0_i32_1 = arith.constant 0 : i32
    return %c0_i32, %c0_i32_0 : i32, i32
  }
  func.func @transform_2(%arg0: i32) -> (i32, i32) {
    %c0_i32 = arith.constant 0 : i32
    %c0_i32_0 = arith.constant 0 : i32
    %c0_i32_1 = arith.constant 0 : i32
    return %c0_i32, %c0_i32_0 : i32, i32
  }
  func.func @transform_3(%arg0: i32) -> (i32, i32) {
    %c0_i32 = arith.constant 0 : i32
    %c0_i32_0 = arith.constant 0 : i32
    %c0_i32_1 = arith.constant 0 : i32
    return %c0_i32, %c0_i32_0 : i32, i32
  }
  func.func @transform_4(%arg0: i32) -> (i32, i32) {
    %c0_i32 = arith.constant 0 : i32
    %c0_i32_0 = arith.constant 0 : i32
    %c0_i32_1 = arith.constant 0 : i32
    return %c0_i32, %c0_i32_0 : i32, i32
  }
}

module attributes {stable_mosaic.version = 11 : i64} {
  func.func @_dec_attn_kernel(%arg0: i32, %arg1: memref<1x7x32xf32, #tpu.memory_space<vmem>>, %arg2: memref<1x7x32xf32, #tpu.memory_space<vmem>>, %arg3: memref<1x7x32xf32, #tpu.memory_space<vmem>>, %arg4: memref<32x32xf32, #tpu.memory_space<vmem>>, %arg5: memref<1x32xf32, #tpu.memory_space<vmem>>, %arg6: memref<32x32xf32, #tpu.memory_space<vmem>>, %arg7: memref<1x32xf32, #tpu.memory_space<vmem>>, %arg8: memref<32x32xf32, #tpu.memory_space<vmem>>, %arg9: memref<1x32xf32, #tpu.memory_space<vmem>>, %arg10: memref<32x32xf32, #tpu.memory_space<vmem>>, %arg11: memref<1x32xf32, #tpu.memory_space<vmem>>, %arg12: memref<1x32xf32, #tpu.memory_space<vmem>>, %arg13: memref<1x32xf32, #tpu.memory_space<vmem>>, %arg14: memref<1x7x32xf32, #tpu.memory_space<vmem>>) attributes {dimension_semantics = [#tpu.dimension_semantics<parallel>], iteration_bounds = array<i64: 1>, scalar_prefetch = 0 : i64, scratch_operands = 0 : i64, tpu.core_type = #tpu.core_type<tc>, window_params = [{transform_indices = @transform_0, window_bounds = array<i64: 1, 7, 32>}, {transform_indices = @transform_1, window_bounds = array<i64: 1, 7, 32>}, {transform_indices = @transform_2, window_bounds = array<i64: 1, 7, 32>}, {pipeline_mode = #tpu.pipeline_mode<synchronous>, transform_indices = @transform_3, window_bounds = array<i64: 32, 32>}, {pipeline_mode = #tpu.pipeline_mode<synchronous>, transform_indices = @transform_4, window_bounds = array<i64: 1, 32>}, {pipeline_mode = #tpu.pipeline_mode<synchronous>, transform_indices = @transform_5, window_bounds = array<i64: 32, 32>}, {pipeline_mode = #tpu.pipeline_mode<synchronous>, transform_indices = @transform_6, window_bounds = array<i64: 1, 32>}, {pipeline_mode = #tpu.pipeline_mode<synchronous>, transform_indices = @transform_7, window_bounds = array<i64: 32, 32>}, {pipeline_mode = #tpu.pipeline_mode<synchronous>, transform_indices = @transform_8, window_bounds = array<i64: 1, 32>}, {pipeline_mode = #tpu.pipeline_mode<synchronous>, transform_indices = @transform_9, window_bounds = array<i64: 32, 32>}, {pipeline_mode = #tpu.pipeline_mode<synchronous>, transform_indices = @transform_10, window_bounds = array<i64: 1, 32>}, {pipeline_mode = #tpu.pipeline_mode<synchronous>, transform_indices = @transform_11, window_bounds = array<i64: 1, 32>}, {pipeline_mode = #tpu.pipeline_mode<synchronous>, transform_indices = @transform_12, window_bounds = array<i64: 1, 32>}, {transform_indices = @transform_13, window_bounds = array<i64: 1, 7, 32>}]} {
    %c0 = arith.constant 0 : index
    %c0_0 = arith.constant 0 : index
    %c0_1 = arith.constant 0 : index
    %0 = vector.load %arg1[%c0, %c0_0, %c0_1] : memref<1x7x32xf32, #tpu.memory_space<vmem>>, vector<1x7x32xf32>
    %1 = vector.shape_cast %0 : vector<1x7x32xf32> to vector<7x32xf32>
    %c0_2 = arith.constant 0 : index
    %c0_3 = arith.constant 0 : index
    %c0_4 = arith.constant 0 : index
    %2 = vector.load %arg2[%c0_2, %c0_3, %c0_4] : memref<1x7x32xf32, #tpu.memory_space<vmem>>, vector<1x7x32xf32>
    %3 = vector.shape_cast %2 : vector<1x7x32xf32> to vector<7x32xf32>
    %c0_5 = arith.constant 0 : index
    %c0_6 = arith.constant 0 : index
    %c0_7 = arith.constant 0 : index
    %4 = vector.load %arg3[%c0_5, %c0_6, %c0_7] : memref<1x7x32xf32, #tpu.memory_space<vmem>>, vector<1x7x32xf32>
    %5 = vector.shape_cast %4 : vector<1x7x32xf32> to vector<7x32xf32>
    %c0_8 = arith.constant 0 : index
    %c0_9 = arith.constant 0 : index
    %6 = vector.load %arg4[%c0_8, %c0_9] : memref<32x32xf32, #tpu.memory_space<vmem>>, vector<32x32xf32>
    %cst = arith.constant dense<0.000000e+00> : vector<7x32xf32>
    %7 = tpu.matmul %1, %6, %cst {dimension_numbers = #tpu.dot_dimension_numbers<[1], [0], [0], [1], [0, 0, 1, 1], [], []>} : vector<7x32xf32>, vector<32x32xf32>, vector<7x32xf32> -> vector<7x32xf32>
    %c0_10 = arith.constant 0 : index
    %c0_11 = arith.constant 0 : index
    %8 = vector.load %arg5[%c0_10, %c0_11] : memref<1x32xf32, #tpu.memory_space<vmem>>, vector<1x32xf32>
    %9 = vector.broadcast %8 : vector<1x32xf32> to vector<7x32xf32>
    %10 = arith.addf %7, %9 : vector<7x32xf32>
    %c0_12 = arith.constant 0 : index
    %c0_13 = arith.constant 0 : index
    %11 = vector.load %arg6[%c0_12, %c0_13] : memref<32x32xf32, #tpu.memory_space<vmem>>, vector<32x32xf32>
    %cst_14 = arith.constant dense<0.000000e+00> : vector<7x32xf32>
    %12 = tpu.matmul %3, %11, %cst_14 {dimension_numbers = #tpu.dot_dimension_numbers<[1], [0], [0], [1], [0, 0, 1, 1], [], []>} : vector<7x32xf32>, vector<32x32xf32>, vector<7x32xf32> -> vector<7x32xf32>
    %c0_15 = arith.constant 0 : index
    %c0_16 = arith.constant 0 : index
    %13 = vector.load %arg7[%c0_15, %c0_16] : memref<1x32xf32, #tpu.memory_space<vmem>>, vector<1x32xf32>
    %14 = vector.broadcast %13 : vector<1x32xf32> to vector<7x32xf32>
    %15 = arith.addf %12, %14 : vector<7x32xf32>
    %c0_17 = arith.constant 0 : index
    %c0_18 = arith.constant 0 : index
    %16 = vector.load %arg8[%c0_17, %c0_18] : memref<32x32xf32, #tpu.memory_space<vmem>>, vector<32x32xf32>
    %cst_19 = arith.constant dense<0.000000e+00> : vector<7x32xf32>
    %17 = tpu.matmul %5, %16, %cst_19 {dimension_numbers = #tpu.dot_dimension_numbers<[1], [0], [0], [1], [0, 0, 1, 1], [], []>} : vector<7x32xf32>, vector<32x32xf32>, vector<7x32xf32> -> vector<7x32xf32>
    %c0_20 = arith.constant 0 : index
    %c0_21 = arith.constant 0 : index
    %18 = vector.load %arg9[%c0_20, %c0_21] : memref<1x32xf32, #tpu.memory_space<vmem>>, vector<1x32xf32>
    %19 = vector.broadcast %18 : vector<1x32xf32> to vector<7x32xf32>
    %20 = arith.addf %17, %19 : vector<7x32xf32>
    %21 = vector.extract_strided_slice %10 {offsets = [0, 0], sizes = [7, 16], strides = [1, 1]} : vector<7x32xf32> to vector<7x16xf32>
    %22 = vector.extract_strided_slice %15 {offsets = [0, 0], sizes = [7, 16], strides = [1, 1]} : vector<7x32xf32> to vector<7x16xf32>
    %23 = vector.extract_strided_slice %20 {offsets = [0, 0], sizes = [7, 16], strides = [1, 1]} : vector<7x32xf32> to vector<7x16xf32>
    %cst_22 = arith.constant dense<0.000000e+00> : vector<7x7xf32>
    %24 = tpu.matmul %21, %22, %cst_22 {dimension_numbers = #tpu.dot_dimension_numbers<[1], [1], [0], [0], [0, 0, 1, 0], [], []>} : vector<7x16xf32>, vector<7x16xf32>, vector<7x7xf32> -> vector<7x7xf32>
    %cst_23 = arith.constant 2.500000e-01 : f32
    %25 = vector.broadcast %cst_23 : f32 to vector<7x7xf32>
    %26 = arith.mulf %24, %25 : vector<7x7xf32>
    %cst_24 = arith.constant dense<0xFF800000> : vector<7xf32>
    %27 = vector.multi_reduction <maximumf>, %26, %cst_24 [1] : vector<7x7xf32> to vector<7xf32>
    %28 = vector.shape_cast %27 : vector<7xf32> to vector<7x1xf32>
    %29 = vector.broadcast %28 : vector<7x1xf32> to vector<7x7xf32>
    %30 = arith.subf %26, %29 : vector<7x7xf32>
    %31 = math.exp %30 : vector<7x7xf32>
    %cst_25 = arith.constant dense<0.000000e+00> : vector<7xf32>
    %32 = vector.multi_reduction <add>, %31, %cst_25 [1] : vector<7x7xf32> to vector<7xf32>
    %33 = vector.shape_cast %32 : vector<7xf32> to vector<7x1xf32>
    %34 = vector.broadcast %33 : vector<7x1xf32> to vector<7x7xf32>
    %35 = arith.divf %31, %34 : vector<7x7xf32>
    %cst_26 = arith.constant dense<0.000000e+00> : vector<7x16xf32>
    %36 = tpu.matmul %35, %23, %cst_26 {dimension_numbers = #tpu.dot_dimension_numbers<[1], [0], [0], [1], [0, 0, 1, 1], [], []>} : vector<7x7xf32>, vector<7x16xf32>, vector<7x16xf32> -> vector<7x16xf32>
    %c0_27 = arith.constant 0 : index
    %c0_28 = arith.constant 0 : index
    %37 = vector.load %arg10[%c0_27, %c0_28] : memref<32x32xf32, #tpu.memory_space<vmem>>, vector<16x32xf32>
    %cst_29 = arith.constant dense<0.000000e+00> : vector<7x32xf32>
    %38 = tpu.matmul %36, %37, %cst_29 {dimension_numbers = #tpu.dot_dimension_numbers<[1], [0], [0], [1], [0, 0, 1, 1], [], []>} : vector<7x16xf32>, vector<16x32xf32>, vector<7x32xf32> -> vector<7x32xf32>
    %39 = vector.extract_strided_slice %10 {offsets = [0, 16], sizes = [7, 16], strides = [1, 1]} : vector<7x32xf32> to vector<7x16xf32>
    %40 = vector.extract_strided_slice %15 {offsets = [0, 16], sizes = [7, 16], strides = [1, 1]} : vector<7x32xf32> to vector<7x16xf32>
    %41 = vector.extract_strided_slice %20 {offsets = [0, 16], sizes = [7, 16], strides = [1, 1]} : vector<7x32xf32> to vector<7x16xf32>
    %cst_30 = arith.constant dense<0.000000e+00> : vector<7x7xf32>
    %42 = tpu.matmul %39, %40, %cst_30 {dimension_numbers = #tpu.dot_dimension_numbers<[1], [1], [0], [0], [0, 0, 1, 0], [], []>} : vector<7x16xf32>, vector<7x16xf32>, vector<7x7xf32> -> vector<7x7xf32>
    %cst_31 = arith.constant 2.500000e-01 : f32
    %43 = vector.broadcast %cst_31 : f32 to vector<7x7xf32>
    %44 = arith.mulf %42, %43 : vector<7x7xf32>
    %cst_32 = arith.constant dense<0xFF800000> : vector<7xf32>
    %45 = vector.multi_reduction <maximumf>, %44, %cst_32 [1] : vector<7x7xf32> to vector<7xf32>
    %46 = vector.shape_cast %45 : vector<7xf32> to vector<7x1xf32>
    %47 = vector.broadcast %46 : vector<7x1xf32> to vector<7x7xf32>
    %48 = arith.subf %44, %47 : vector<7x7xf32>
    %49 = math.exp %48 : vector<7x7xf32>
    %cst_33 = arith.constant dense<0.000000e+00> : vector<7xf32>
    %50 = vector.multi_reduction <add>, %49, %cst_33 [1] : vector<7x7xf32> to vector<7xf32>
    %51 = vector.shape_cast %50 : vector<7xf32> to vector<7x1xf32>
    %52 = vector.broadcast %51 : vector<7x1xf32> to vector<7x7xf32>
    %53 = arith.divf %49, %52 : vector<7x7xf32>
    %cst_34 = arith.constant dense<0.000000e+00> : vector<7x16xf32>
    %54 = tpu.matmul %53, %41, %cst_34 {dimension_numbers = #tpu.dot_dimension_numbers<[1], [0], [0], [1], [0, 0, 1, 1], [], []>} : vector<7x7xf32>, vector<7x16xf32>, vector<7x16xf32> -> vector<7x16xf32>
    %c16 = arith.constant 16 : index
    %c0_35 = arith.constant 0 : index
    %55 = vector.load %arg10[%c16, %c0_35] : memref<32x32xf32, #tpu.memory_space<vmem>>, vector<16x32xf32>
    %cst_36 = arith.constant dense<0.000000e+00> : vector<7x32xf32>
    %56 = tpu.matmul %54, %55, %cst_36 {dimension_numbers = #tpu.dot_dimension_numbers<[1], [0], [0], [1], [0, 0, 1, 1], [], []>} : vector<7x16xf32>, vector<16x32xf32>, vector<7x32xf32> -> vector<7x32xf32>
    %57 = arith.addf %38, %56 : vector<7x32xf32>
    %c0_37 = arith.constant 0 : index
    %c0_38 = arith.constant 0 : index
    %58 = vector.load %arg11[%c0_37, %c0_38] : memref<1x32xf32, #tpu.memory_space<vmem>>, vector<1x32xf32>
    %59 = vector.broadcast %58 : vector<1x32xf32> to vector<7x32xf32>
    %60 = arith.addf %57, %59 : vector<7x32xf32>
    %cst_39 = arith.constant dense<0.000000e+00> : vector<7xf32>
    %61 = vector.multi_reduction <add>, %60, %cst_39 [1] : vector<7x32xf32> to vector<7xf32>
    %62 = vector.shape_cast %61 : vector<7xf32> to vector<7x1xf32>
    %cst_40 = arith.constant 3.200000e+01 : f32
    %63 = vector.broadcast %cst_40 : f32 to vector<7x1xf32>
    %64 = arith.divf %62, %63 : vector<7x1xf32>
    %65 = vector.broadcast %64 : vector<7x1xf32> to vector<7x32xf32>
    %66 = arith.subf %60, %65 : vector<7x32xf32>
    %67 = arith.mulf %66, %66 : vector<7x32xf32>
    %cst_41 = arith.constant dense<0.000000e+00> : vector<7xf32>
    %68 = vector.multi_reduction <add>, %67, %cst_41 [1] : vector<7x32xf32> to vector<7xf32>
    %69 = vector.shape_cast %68 : vector<7xf32> to vector<7x1xf32>
    %cst_42 = arith.constant 3.200000e+01 : f32
    %70 = vector.broadcast %cst_42 : f32 to vector<7x1xf32>
    %71 = arith.divf %69, %70 : vector<7x1xf32>
    %72 = vector.broadcast %64 : vector<7x1xf32> to vector<7x32xf32>
    %73 = arith.subf %60, %72 : vector<7x32xf32>
    %cst_43 = arith.constant 9.99999974E-6 : f32
    %74 = vector.broadcast %cst_43 : f32 to vector<7x1xf32>
    %75 = arith.addf %71, %74 : vector<7x1xf32>
    %76 = math.sqrt %75 : vector<7x1xf32>
    %77 = vector.broadcast %76 : vector<7x1xf32> to vector<7x32xf32>
    %78 = arith.divf %73, %77 : vector<7x32xf32>
    %c0_44 = arith.constant 0 : index
    %c0_45 = arith.constant 0 : index
    %79 = vector.load %arg12[%c0_44, %c0_45] : memref<1x32xf32, #tpu.memory_space<vmem>>, vector<1x32xf32>
    %80 = vector.broadcast %79 : vector<1x32xf32> to vector<7x32xf32>
    %81 = arith.mulf %78, %80 : vector<7x32xf32>
    %c0_46 = arith.constant 0 : index
    %c0_47 = arith.constant 0 : index
    %82 = vector.load %arg13[%c0_46, %c0_47] : memref<1x32xf32, #tpu.memory_space<vmem>>, vector<1x32xf32>
    %83 = vector.broadcast %82 : vector<1x32xf32> to vector<7x32xf32>
    %84 = arith.addf %81, %83 : vector<7x32xf32>
    %c0_48 = arith.constant 0 : index
    %c0_49 = arith.constant 0 : index
    %c0_50 = arith.constant 0 : index
    %85 = vector.load %arg14[%c0_48, %c0_49, %c0_50] : memref<1x7x32xf32, #tpu.memory_space<vmem>>, vector<1x7x32xf32>
    %86 = vector.shape_cast %85 : vector<1x7x32xf32> to vector<7x32xf32>
    %87 = vector.shape_cast %84 : vector<7x32xf32> to vector<1x7x32xf32>
    tpu.vector_store %arg14[%c0_48, %c0_49, %c0_50], %87 {strides = array<i32>} : memref<1x7x32xf32, #tpu.memory_space<vmem>>, vector<1x7x32xf32>,
    return
  }
  func.func @transform_0(%arg0: i32) -> (i32, i32, i32) {
    %c0_i32 = arith.constant 0 : i32
    %c0_i32_0 = arith.constant 0 : i32
    %c0_i32_1 = arith.constant 0 : i32
    return %arg0, %c0_i32, %c0_i32_0 : i32, i32, i32
  }
  func.func @transform_1(%arg0: i32) -> (i32, i32, i32) {
    %c0_i32 = arith.constant 0 : i32
    %c0_i32_0 = arith.constant 0 : i32
    %c0_i32_1 = arith.constant 0 : i32
    return %arg0, %c0_i32, %c0_i32_0 : i32, i32, i32
  }
  func.func @transform_2(%arg0: i32) -> (i32, i32, i32) {
    %c0_i32 = arith.constant 0 : i32
    %c0_i32_0 = arith.constant 0 : i32
    %c0_i32_1 = arith.constant 0 : i32
    return %arg0, %c0_i32, %c0_i32_0 : i32, i32, i32
  }
  func.func @transform_3(%arg0: i32) -> (i32, i32) {
    %c0_i32 = arith.constant 0 : i32
    %c0_i32_0 = arith.constant 0 : i32
    %c0_i32_1 = arith.constant 0 : i32
    return %c0_i32, %c0_i32_0 : i32, i32
  }
  func.func @transform_4(%arg0: i32) -> (i32, i32) {
    %c0_i32 = arith.constant 0 : i32
    %c0_i32_0 = arith.constant 0 : i32
    %c0_i32_1 = arith.constant 0 : i32
    return %c0_i32, %c0_i32_0 : i32, i32
  }
  func.func @transform_5(%arg0: i32) -> (i32, i32) {
    %c0_i32 = arith.constant 0 : i32
    %c0_i32_0 = arith.constant 0 : i32
    %c0_i32_1 = arith.constant 0 : i32
    return %c0_i32, %c0_i32_0 : i32, i32
  }
  func.func @transform_6(%arg0: i32) -> (i32, i32) {
    %c0_i32 = arith.constant 0 : i32
    %c0_i32_0 = arith.constant 0 : i32
    %c0_i32_1 = arith.constant 0 : i32
    return %c0_i32, %c0_i32_0 : i32, i32
  }
  func.func @transform_7(%arg0: i32) -> (i32, i32) {
    %c0_i32 = arith.constant 0 : i32
    %c0_i32_0 = arith.constant 0 : i32
    %c0_i32_1 = arith.constant 0 : i32
    return %c0_i32, %c0_i32_0 : i32, i32
  }
  func.func @transform_8(%arg0: i32) -> (i32, i32) {
    %c0_i32 = arith.constant 0 : i32
    %c0_i32_0 = arith.constant 0 : i32
    %c0_i32_1 = arith.constant 0 : i32
    return %c0_i32, %c0_i32_0 : i32, i32
  }
  func.func @transform_9(%arg0: i32) -> (i32, i32) {
    %c0_i32 = arith.constant 0 : i32
    %c0_i32_0 = arith.constant 0 : i32
    %c0_i32_1 = arith.constant 0 : i32
    return %c0_i32, %c0_i32_0 : i32, i32
  }
  func.func @transform_10(%arg0: i32) -> (i32, i32) {
    %c0_i32 = arith.constant 0 : i32
    %c0_i32_0 = arith.constant 0 : i32
    %c0_i32_1 = arith.constant 0 : i32
    return %c0_i32, %c0_i32_0 : i32, i32
  }
  func.func @transform_11(%arg0: i32) -> (i32, i32) {
    %c0_i32 = arith.constant 0 : i32
    %c0_i32_0 = arith.constant 0 : i32
    %c0_i32_1 = arith.constant 0 : i32
    return %c0_i32, %c0_i32_0 : i32, i32
  }
  func.func @transform_12(%arg0: i32) -> (i32, i32) {
    %c0_i32 = arith.constant 0 : i32
    %c0_i32_0 = arith.constant 0 : i32
    %c0_i32_1 = arith.constant 0 : i32
    return %c0_i32, %c0_i32_0 : i32, i32
  }
  func.func @transform_13(%arg0: i32) -> (i32, i32, i32) {
    %c0_i32 = arith.constant 0 : i32
    %c0_i32_0 = arith.constant 0 : i32
    %c0_i32_1 = arith.constant 0 : i32
    return %arg0, %c0_i32, %c0_i32_0 : i32, i32, i32
  }
}

module attributes {stable_mosaic.version = 11 : i64} {
  func.func @_mlp_block_kernel(%arg0: i32, %arg1: memref<1x7x32xf32, #tpu.memory_space<vmem>>, %arg2: memref<32x64xf32, #tpu.memory_space<vmem>>, %arg3: memref<1x64xf32, #tpu.memory_space<vmem>>, %arg4: memref<64x32xf32, #tpu.memory_space<vmem>>, %arg5: memref<1x32xf32, #tpu.memory_space<vmem>>, %arg6: memref<1x32xf32, #tpu.memory_space<vmem>>, %arg7: memref<1x32xf32, #tpu.memory_space<vmem>>, %arg8: memref<1x7x32xf32, #tpu.memory_space<vmem>>) attributes {dimension_semantics = [#tpu.dimension_semantics<parallel>], iteration_bounds = array<i64: 1>, scalar_prefetch = 0 : i64, scratch_operands = 0 : i64, tpu.core_type = #tpu.core_type<tc>, window_params = [{transform_indices = @transform_0, window_bounds = array<i64: 1, 7, 32>}, {pipeline_mode = #tpu.pipeline_mode<synchronous>, transform_indices = @transform_1, window_bounds = array<i64: 32, 64>}, {pipeline_mode = #tpu.pipeline_mode<synchronous>, transform_indices = @transform_2, window_bounds = array<i64: 1, 64>}, {pipeline_mode = #tpu.pipeline_mode<synchronous>, transform_indices = @transform_3, window_bounds = array<i64: 64, 32>}, {pipeline_mode = #tpu.pipeline_mode<synchronous>, transform_indices = @transform_4, window_bounds = array<i64: 1, 32>}, {pipeline_mode = #tpu.pipeline_mode<synchronous>, transform_indices = @transform_5, window_bounds = array<i64: 1, 32>}, {pipeline_mode = #tpu.pipeline_mode<synchronous>, transform_indices = @transform_6, window_bounds = array<i64: 1, 32>}, {transform_indices = @transform_7, window_bounds = array<i64: 1, 7, 32>}]} {
    %c0 = arith.constant 0 : index
    %c0_0 = arith.constant 0 : index
    %c0_1 = arith.constant 0 : index
    %0 = vector.load %arg1[%c0, %c0_0, %c0_1] : memref<1x7x32xf32, #tpu.memory_space<vmem>>, vector<1x7x32xf32>
    %1 = vector.shape_cast %0 : vector<1x7x32xf32> to vector<7x32xf32>
    %c0_2 = arith.constant 0 : index
    %c0_3 = arith.constant 0 : index
    %2 = vector.load %arg2[%c0_2, %c0_3] : memref<32x64xf32, #tpu.memory_space<vmem>>, vector<32x64xf32>
    %cst = arith.constant dense<0.000000e+00> : vector<7x64xf32>
    %3 = tpu.matmul %1, %2, %cst {dimension_numbers = #tpu.dot_dimension_numbers<[1], [0], [0], [1], [0, 0, 1, 1], [], []>} : vector<7x32xf32>, vector<32x64xf32>, vector<7x64xf32> -> vector<7x64xf32>
    %c0_4 = arith.constant 0 : index
    %c0_5 = arith.constant 0 : index
    %4 = vector.load %arg3[%c0_4, %c0_5] : memref<1x64xf32, #tpu.memory_space<vmem>>, vector<1x64xf32>
    %5 = vector.broadcast %4 : vector<1x64xf32> to vector<7x64xf32>
    %6 = arith.addf %3, %5 : vector<7x64xf32>
    %cst_6 = arith.constant 0.000000e+00 : f32
    %7 = vector.broadcast %cst_6 : f32 to vector<7x64xf32>
    %8 = arith.maximumf %6, %7 : vector<7x64xf32>
    %c0_7 = arith.constant 0 : index
    %c0_8 = arith.constant 0 : index
    %9 = vector.load %arg4[%c0_7, %c0_8] : memref<64x32xf32, #tpu.memory_space<vmem>>, vector<64x32xf32>
    %cst_9 = arith.constant dense<0.000000e+00> : vector<7x32xf32>
    %10 = tpu.matmul %8, %9, %cst_9 {dimension_numbers = #tpu.dot_dimension_numbers<[1], [0], [0], [1], [0, 0, 1, 1], [], []>} : vector<7x64xf32>, vector<64x32xf32>, vector<7x32xf32> -> vector<7x32xf32>
    %11 = arith.addf %1, %10 : vector<7x32xf32>
    %c0_10 = arith.constant 0 : index
    %c0_11 = arith.constant 0 : index
    %12 = vector.load %arg5[%c0_10, %c0_11] : memref<1x32xf32, #tpu.memory_space<vmem>>, vector<1x32xf32>
    %13 = vector.broadcast %12 : vector<1x32xf32> to vector<7x32xf32>
    %14 = arith.addf %11, %13 : vector<7x32xf32>
    %cst_12 = arith.constant dense<0.000000e+00> : vector<7xf32>
    %15 = vector.multi_reduction <add>, %14, %cst_12 [1] : vector<7x32xf32> to vector<7xf32>
    %16 = vector.shape_cast %15 : vector<7xf32> to vector<7x1xf32>
    %cst_13 = arith.constant 3.200000e+01 : f32
    %17 = vector.broadcast %cst_13 : f32 to vector<7x1xf32>
    %18 = arith.divf %16, %17 : vector<7x1xf32>
    %19 = vector.broadcast %18 : vector<7x1xf32> to vector<7x32xf32>
    %20 = arith.subf %14, %19 : vector<7x32xf32>
    %21 = arith.mulf %20, %20 : vector<7x32xf32>
    %cst_14 = arith.constant dense<0.000000e+00> : vector<7xf32>
    %22 = vector.multi_reduction <add>, %21, %cst_14 [1] : vector<7x32xf32> to vector<7xf32>
    %23 = vector.shape_cast %22 : vector<7xf32> to vector<7x1xf32>
    %cst_15 = arith.constant 3.200000e+01 : f32
    %24 = vector.broadcast %cst_15 : f32 to vector<7x1xf32>
    %25 = arith.divf %23, %24 : vector<7x1xf32>
    %26 = vector.broadcast %18 : vector<7x1xf32> to vector<7x32xf32>
    %27 = arith.subf %14, %26 : vector<7x32xf32>
    %cst_16 = arith.constant 9.99999974E-6 : f32
    %28 = vector.broadcast %cst_16 : f32 to vector<7x1xf32>
    %29 = arith.addf %25, %28 : vector<7x1xf32>
    %30 = math.sqrt %29 : vector<7x1xf32>
    %31 = vector.broadcast %30 : vector<7x1xf32> to vector<7x32xf32>
    %32 = arith.divf %27, %31 : vector<7x32xf32>
    %c0_17 = arith.constant 0 : index
    %c0_18 = arith.constant 0 : index
    %33 = vector.load %arg6[%c0_17, %c0_18] : memref<1x32xf32, #tpu.memory_space<vmem>>, vector<1x32xf32>
    %34 = vector.broadcast %33 : vector<1x32xf32> to vector<7x32xf32>
    %35 = arith.mulf %32, %34 : vector<7x32xf32>
    %c0_19 = arith.constant 0 : index
    %c0_20 = arith.constant 0 : index
    %36 = vector.load %arg7[%c0_19, %c0_20] : memref<1x32xf32, #tpu.memory_space<vmem>>, vector<1x32xf32>
    %37 = vector.broadcast %36 : vector<1x32xf32> to vector<7x32xf32>
    %38 = arith.addf %35, %37 : vector<7x32xf32>
    %c0_21 = arith.constant 0 : index
    %c0_22 = arith.constant 0 : index
    %c0_23 = arith.constant 0 : index
    %39 = vector.load %arg8[%c0_21, %c0_22, %c0_23] : memref<1x7x32xf32, #tpu.memory_space<vmem>>, vector<1x7x32xf32>
    %40 = vector.shape_cast %39 : vector<1x7x32xf32> to vector<7x32xf32>
    %41 = vector.shape_cast %38 : vector<7x32xf32> to vector<1x7x32xf32>
    tpu.vector_store %arg8[%c0_21, %c0_22, %c0_23], %41 {strides = array<i32>} : memref<1x7x32xf32, #tpu.memory_space<vmem>>, vector<1x7x32xf32>,
    return
  }
  func.func @transform_0(%arg0: i32) -> (i32, i32, i32) {
    %c0_i32 = arith.constant 0 : i32
    %c0_i32_0 = arith.constant 0 : i32
    %c0_i32_1 = arith.constant 0 : i32
    return %arg0, %c0_i32, %c0_i32_0 : i32, i32, i32
  }
  func.func @transform_1(%arg0: i32) -> (i32, i32) {
    %c0_i32 = arith.constant 0 : i32
    %c0_i32_0 = arith.constant 0 : i32
    %c0_i32_1 = arith.constant 0 : i32
    return %c0_i32, %c0_i32_0 : i32, i32
  }
  func.func @transform_2(%arg0: i32) -> (i32, i32) {
    %c0_i32 = arith.constant 0 : i32
    %c0_i32_0 = arith.constant 0 : i32
    %c0_i32_1 = arith.constant 0 : i32
    return %c0_i32, %c0_i32_0 : i32, i32
  }
  func.func @transform_3(%arg0: i32) -> (i32, i32) {
    %c0_i32 = arith.constant 0 : i32
    %c0_i32_0 = arith.constant 0 : i32
    %c0_i32_1 = arith.constant 0 : i32
    return %c0_i32, %c0_i32_0 : i32, i32
  }
  func.func @transform_4(%arg0: i32) -> (i32, i32) {
    %c0_i32 = arith.constant 0 : i32
    %c0_i32_0 = arith.constant 0 : i32
    %c0_i32_1 = arith.constant 0 : i32
    return %c0_i32, %c0_i32_0 : i32, i32
  }
  func.func @transform_5(%arg0: i32) -> (i32, i32) {
    %c0_i32 = arith.constant 0 : i32
    %c0_i32_0 = arith.constant 0 : i32
    %c0_i32_1 = arith.constant 0 : i32
    return %c0_i32, %c0_i32_0 : i32, i32
  }
  func.func @transform_6(%arg0: i32) -> (i32, i32) {
    %c0_i32 = arith.constant 0 : i32
    %c0_i32_0 = arith.constant 0 : i32
    %c0_i32_1 = arith.constant 0 : i32
    return %c0_i32, %c0_i32_0 : i32, i32
  }
  func.func @transform_7(%arg0: i32) -> (i32, i32, i32) {
    %c0_i32 = arith.constant 0 : i32
    %c0_i32_0 = arith.constant 0 : i32
    %c0_i32_1 = arith.constant 0 : i32
    return %arg0, %c0_i32, %c0_i32_0 : i32, i32, i32
  }
}

module attributes {stable_mosaic.version = 11 : i64} {
  func.func @_dec_attn_kernel(%arg0: i32, %arg1: memref<1x16x32xf32, #tpu.memory_space<vmem>>, %arg2: memref<1x7x32xf32, #tpu.memory_space<vmem>>, %arg3: memref<1x7x32xf32, #tpu.memory_space<vmem>>, %arg4: memref<32x16xf32, #tpu.memory_space<vmem>>, %arg5: memref<1x16xf32, #tpu.memory_space<vmem>>, %arg6: memref<32x16xf32, #tpu.memory_space<vmem>>, %arg7: memref<1x16xf32, #tpu.memory_space<vmem>>, %arg8: memref<32x16xf32, #tpu.memory_space<vmem>>, %arg9: memref<1x16xf32, #tpu.memory_space<vmem>>, %arg10: memref<16x32xf32, #tpu.memory_space<vmem>>, %arg11: memref<1x32xf32, #tpu.memory_space<vmem>>, %arg12: memref<1x32xf32, #tpu.memory_space<vmem>>, %arg13: memref<1x32xf32, #tpu.memory_space<vmem>>, %arg14: memref<1x16x32xf32, #tpu.memory_space<vmem>>, %arg15: memref<1x16x32xf32, #tpu.memory_space<vmem>>) attributes {dimension_semantics = [#tpu.dimension_semantics<parallel>], iteration_bounds = array<i64: 1>, scalar_prefetch = 0 : i64, scratch_operands = 0 : i64, tpu.core_type = #tpu.core_type<tc>, window_params = [{transform_indices = @transform_0, window_bounds = array<i64: 1, 16, 32>}, {transform_indices = @transform_1, window_bounds = array<i64: 1, 7, 32>}, {transform_indices = @transform_2, window_bounds = array<i64: 1, 7, 32>}, {pipeline_mode = #tpu.pipeline_mode<synchronous>, transform_indices = @transform_3, window_bounds = array<i64: 32, 16>}, {pipeline_mode = #tpu.pipeline_mode<synchronous>, transform_indices = @transform_4, window_bounds = array<i64: 1, 16>}, {pipeline_mode = #tpu.pipeline_mode<synchronous>, transform_indices = @transform_5, window_bounds = array<i64: 32, 16>}, {pipeline_mode = #tpu.pipeline_mode<synchronous>, transform_indices = @transform_6, window_bounds = array<i64: 1, 16>}, {pipeline_mode = #tpu.pipeline_mode<synchronous>, transform_indices = @transform_7, window_bounds = array<i64: 32, 16>}, {pipeline_mode = #tpu.pipeline_mode<synchronous>, transform_indices = @transform_8, window_bounds = array<i64: 1, 16>}, {pipeline_mode = #tpu.pipeline_mode<synchronous>, transform_indices = @transform_9, window_bounds = array<i64: 16, 32>}, {pipeline_mode = #tpu.pipeline_mode<synchronous>, transform_indices = @transform_10, window_bounds = array<i64: 1, 32>}, {pipeline_mode = #tpu.pipeline_mode<synchronous>, transform_indices = @transform_11, window_bounds = array<i64: 1, 32>}, {pipeline_mode = #tpu.pipeline_mode<synchronous>, transform_indices = @transform_12, window_bounds = array<i64: 1, 32>}, {transform_indices = @transform_13, window_bounds = array<i64: 1, 16, 32>}, {transform_indices = @transform_14, window_bounds = array<i64: 1, 16, 32>}]} {
    %c0 = arith.constant 0 : index
    %c0_0 = arith.constant 0 : index
    %c0_1 = arith.constant 0 : index
    %0 = vector.load %arg1[%c0, %c0_0, %c0_1] : memref<1x16x32xf32, #tpu.memory_space<vmem>>, vector<1x16x32xf32>
    %1 = vector.shape_cast %0 : vector<1x16x32xf32> to vector<16x32xf32>
    %c0_2 = arith.constant 0 : index
    %c0_3 = arith.constant 0 : index
    %c0_4 = arith.constant 0 : index
    %2 = vector.load %arg2[%c0_2, %c0_3, %c0_4] : memref<1x7x32xf32, #tpu.memory_space<vmem>>, vector<1x7x32xf32>
    %3 = vector.shape_cast %2 : vector<1x7x32xf32> to vector<7x32xf32>
    %c0_5 = arith.constant 0 : index
    %c0_6 = arith.constant 0 : index
    %c0_7 = arith.constant 0 : index
    %4 = vector.load %arg3[%c0_5, %c0_6, %c0_7] : memref<1x7x32xf32, #tpu.memory_space<vmem>>, vector<1x7x32xf32>
    %5 = vector.shape_cast %4 : vector<1x7x32xf32> to vector<7x32xf32>
    %c0_8 = arith.constant 0 : index
    %c0_9 = arith.constant 0 : index
    %6 = vector.load %arg4[%c0_8, %c0_9] : memref<32x16xf32, #tpu.memory_space<vmem>>, vector<32x16xf32>
    %cst = arith.constant dense<0.000000e+00> : vector<16x16xf32>
    %7 = tpu.matmul %1, %6, %cst {dimension_numbers = #tpu.dot_dimension_numbers<[1], [0], [0], [1], [0, 0, 1, 1], [], []>} : vector<16x32xf32>, vector<32x16xf32>, vector<16x16xf32> -> vector<16x16xf32>
    %c0_10 = arith.constant 0 : index
    %c0_11 = arith.constant 0 : index
    %8 = vector.load %arg5[%c0_10, %c0_11] : memref<1x16xf32, #tpu.memory_space<vmem>>, vector<1x16xf32>
    %9 = vector.broadcast %8 : vector<1x16xf32> to vector<16x16xf32>
    %10 = arith.addf %7, %9 : vector<16x16xf32>
    %c0_12 = arith.constant 0 : index
    %c0_13 = arith.constant 0 : index
    %11 = vector.load %arg6[%c0_12, %c0_13] : memref<32x16xf32, #tpu.memory_space<vmem>>, vector<32x16xf32>
    %cst_14 = arith.constant dense<0.000000e+00> : vector<7x16xf32>
    %12 = tpu.matmul %3, %11, %cst_14 {dimension_numbers = #tpu.dot_dimension_numbers<[1], [0], [0], [1], [0, 0, 1, 1], [], []>} : vector<7x32xf32>, vector<32x16xf32>, vector<7x16xf32> -> vector<7x16xf32>
    %c0_15 = arith.constant 0 : index
    %c0_16 = arith.constant 0 : index
    %13 = vector.load %arg7[%c0_15, %c0_16] : memref<1x16xf32, #tpu.memory_space<vmem>>, vector<1x16xf32>
    %14 = vector.broadcast %13 : vector<1x16xf32> to vector<7x16xf32>
    %15 = arith.addf %12, %14 : vector<7x16xf32>
    %c0_17 = arith.constant 0 : index
    %c0_18 = arith.constant 0 : index
    %16 = vector.load %arg8[%c0_17, %c0_18] : memref<32x16xf32, #tpu.memory_space<vmem>>, vector<32x16xf32>
    %cst_19 = arith.constant dense<0.000000e+00> : vector<7x16xf32>
    %17 = tpu.matmul %5, %16, %cst_19 {dimension_numbers = #tpu.dot_dimension_numbers<[1], [0], [0], [1], [0, 0, 1, 1], [], []>} : vector<7x32xf32>, vector<32x16xf32>, vector<7x16xf32> -> vector<7x16xf32>
    %c0_20 = arith.constant 0 : index
    %c0_21 = arith.constant 0 : index
    %18 = vector.load %arg9[%c0_20, %c0_21] : memref<1x16xf32, #tpu.memory_space<vmem>>, vector<1x16xf32>
    %19 = vector.broadcast %18 : vector<1x16xf32> to vector<7x16xf32>
    %20 = arith.addf %17, %19 : vector<7x16xf32>
    %21 = vector.extract_strided_slice %10 {offsets = [0, 0], sizes = [16, 8], strides = [1, 1]} : vector<16x16xf32> to vector<16x8xf32>
    %22 = vector.extract_strided_slice %15 {offsets = [0, 0], sizes = [7, 8], strides = [1, 1]} : vector<7x16xf32> to vector<7x8xf32>
    %23 = vector.extract_strided_slice %20 {offsets = [0, 0], sizes = [7, 8], strides = [1, 1]} : vector<7x16xf32> to vector<7x8xf32>
    %cst_22 = arith.constant dense<0.000000e+00> : vector<16x7xf32>
    %24 = tpu.matmul %21, %22, %cst_22 {dimension_numbers = #tpu.dot_dimension_numbers<[1], [1], [0], [0], [0, 0, 1, 0], [], []>} : vector<16x8xf32>, vector<7x8xf32>, vector<16x7xf32> -> vector<16x7xf32>
    %cst_23 = arith.constant 0.353553385 : f32
    %25 = vector.broadcast %cst_23 : f32 to vector<16x7xf32>
    %26 = arith.mulf %24, %25 : vector<16x7xf32>
    %cst_24 = arith.constant dense<0xFF800000> : vector<16xf32>
    %27 = vector.multi_reduction <maximumf>, %26, %cst_24 [1] : vector<16x7xf32> to vector<16xf32>
    %28 = vector.shape_cast %27 : vector<16xf32> to vector<16x1xf32>
    %29 = vector.broadcast %28 : vector<16x1xf32> to vector<16x7xf32>
    %30 = arith.subf %26, %29 : vector<16x7xf32>
    %31 = math.exp %30 : vector<16x7xf32>
    %cst_25 = arith.constant dense<0.000000e+00> : vector<16xf32>
    %32 = vector.multi_reduction <add>, %31, %cst_25 [1] : vector<16x7xf32> to vector<16xf32>
    %33 = vector.shape_cast %32 : vector<16xf32> to vector<16x1xf32>
    %34 = vector.broadcast %33 : vector<16x1xf32> to vector<16x7xf32>
    %35 = arith.divf %31, %34 : vector<16x7xf32>
    %cst_26 = arith.constant dense<0.000000e+00> : vector<16x8xf32>
    %36 = tpu.matmul %35, %23, %cst_26 {dimension_numbers = #tpu.dot_dimension_numbers<[1], [0], [0], [1], [0, 0, 1, 1], [], []>} : vector<16x7xf32>, vector<7x8xf32>, vector<16x8xf32> -> vector<16x8xf32>
    %c0_27 = arith.constant 0 : index
    %c0_28 = arith.constant 0 : index
    %37 = vector.load %arg10[%c0_27, %c0_28] : memref<16x32xf32, #tpu.memory_space<vmem>>, vector<8x32xf32>
    %cst_29 = arith.constant dense<0.000000e+00> : vector<16x32xf32>
    %38 = tpu.matmul %36, %37, %cst_29 {dimension_numbers = #tpu.dot_dimension_numbers<[1], [0], [0], [1], [0, 0, 1, 1], [], []>} : vector<16x8xf32>, vector<8x32xf32>, vector<16x32xf32> -> vector<16x32xf32>
    %39 = vector.extract_strided_slice %10 {offsets = [0, 8], sizes = [16, 8], strides = [1, 1]} : vector<16x16xf32> to vector<16x8xf32>
    %40 = vector.extract_strided_slice %15 {offsets = [0, 8], sizes = [7, 8], strides = [1, 1]} : vector<7x16xf32> to vector<7x8xf32>
    %41 = vector.extract_strided_slice %20 {offsets = [0, 8], sizes = [7, 8], strides = [1, 1]} : vector<7x16xf32> to vector<7x8xf32>
    %cst_30 = arith.constant dense<0.000000e+00> : vector<16x7xf32>
    %42 = tpu.matmul %39, %40, %cst_30 {dimension_numbers = #tpu.dot_dimension_numbers<[1], [1], [0], [0], [0, 0, 1, 0], [], []>} : vector<16x8xf32>, vector<7x8xf32>, vector<16x7xf32> -> vector<16x7xf32>
    %cst_31 = arith.constant 0.353553385 : f32
    %43 = vector.broadcast %cst_31 : f32 to vector<16x7xf32>
    %44 = arith.mulf %42, %43 : vector<16x7xf32>
    %cst_32 = arith.constant dense<0xFF800000> : vector<16xf32>
    %45 = vector.multi_reduction <maximumf>, %44, %cst_32 [1] : vector<16x7xf32> to vector<16xf32>
    %46 = vector.shape_cast %45 : vector<16xf32> to vector<16x1xf32>
    %47 = vector.broadcast %46 : vector<16x1xf32> to vector<16x7xf32>
    %48 = arith.subf %44, %47 : vector<16x7xf32>
    %49 = math.exp %48 : vector<16x7xf32>
    %cst_33 = arith.constant dense<0.000000e+00> : vector<16xf32>
    %50 = vector.multi_reduction <add>, %49, %cst_33 [1] : vector<16x7xf32> to vector<16xf32>
    %51 = vector.shape_cast %50 : vector<16xf32> to vector<16x1xf32>
    %52 = vector.broadcast %51 : vector<16x1xf32> to vector<16x7xf32>
    %53 = arith.divf %49, %52 : vector<16x7xf32>
    %cst_34 = arith.constant dense<0.000000e+00> : vector<16x8xf32>
    %54 = tpu.matmul %53, %41, %cst_34 {dimension_numbers = #tpu.dot_dimension_numbers<[1], [0], [0], [1], [0, 0, 1, 1], [], []>} : vector<16x7xf32>, vector<7x8xf32>, vector<16x8xf32> -> vector<16x8xf32>
    %c8 = arith.constant 8 : index
    %c0_35 = arith.constant 0 : index
    %55 = vector.load %arg10[%c8, %c0_35] : memref<16x32xf32, #tpu.memory_space<vmem>>, vector<8x32xf32>
    %cst_36 = arith.constant dense<0.000000e+00> : vector<16x32xf32>
    %56 = tpu.matmul %54, %55, %cst_36 {dimension_numbers = #tpu.dot_dimension_numbers<[1], [0], [0], [1], [0, 0, 1, 1], [], []>} : vector<16x8xf32>, vector<8x32xf32>, vector<16x32xf32> -> vector<16x32xf32>
    %57 = arith.addf %38, %56 : vector<16x32xf32>
    %c0_37 = arith.constant 0 : index
    %c0_38 = arith.constant 0 : index
    %58 = vector.load %arg11[%c0_37, %c0_38] : memref<1x32xf32, #tpu.memory_space<vmem>>, vector<1x32xf32>
    %59 = vector.broadcast %58 : vector<1x32xf32> to vector<16x32xf32>
    %60 = arith.addf %57, %59 : vector<16x32xf32>
    %c0_39 = arith.constant 0 : index
    %c0_40 = arith.constant 0 : index
    %c0_41 = arith.constant 0 : index
    %61 = vector.load %arg14[%c0_39, %c0_40, %c0_41] : memref<1x16x32xf32, #tpu.memory_space<vmem>>, vector<1x16x32xf32>
    %62 = vector.shape_cast %61 : vector<1x16x32xf32> to vector<16x32xf32>
    %63 = arith.addf %60, %62 : vector<16x32xf32>
    %cst_42 = arith.constant dense<0.000000e+00> : vector<16xf32>
    %64 = vector.multi_reduction <add>, %63, %cst_42 [1] : vector<16x32xf32> to vector<16xf32>
    %65 = vector.shape_cast %64 : vector<16xf32> to vector<16x1xf32>
    %cst_43 = arith.constant 3.200000e+01 : f32
    %66 = vector.broadcast %cst_43 : f32 to vector<16x1xf32>
    %67 = arith.divf %65, %66 : vector<16x1xf32>
    %68 = vector.broadcast %67 : vector<16x1xf32> to vector<16x32xf32>
    %69 = arith.subf %63, %68 : vector<16x32xf32>
    %70 = arith.mulf %69, %69 : vector<16x32xf32>
    %cst_44 = arith.constant dense<0.000000e+00> : vector<16xf32>
    %71 = vector.multi_reduction <add>, %70, %cst_44 [1] : vector<16x32xf32> to vector<16xf32>
    %72 = vector.shape_cast %71 : vector<16xf32> to vector<16x1xf32>
    %cst_45 = arith.constant 3.200000e+01 : f32
    %73 = vector.broadcast %cst_45 : f32 to vector<16x1xf32>
    %74 = arith.divf %72, %73 : vector<16x1xf32>
    %75 = vector.broadcast %67 : vector<16x1xf32> to vector<16x32xf32>
    %76 = arith.subf %63, %75 : vector<16x32xf32>
    %cst_46 = arith.constant 9.99999974E-6 : f32
    %77 = vector.broadcast %cst_46 : f32 to vector<16x1xf32>
    %78 = arith.addf %74, %77 : vector<16x1xf32>
    %79 = math.sqrt %78 : vector<16x1xf32>
    %80 = vector.broadcast %79 : vector<16x1xf32> to vector<16x32xf32>
    %81 = arith.divf %76, %80 : vector<16x32xf32>
    %c0_47 = arith.constant 0 : index
    %c0_48 = arith.constant 0 : index
    %82 = vector.load %arg12[%c0_47, %c0_48] : memref<1x32xf32, #tpu.memory_space<vmem>>, vector<1x32xf32>
    %83 = vector.broadcast %82 : vector<1x32xf32> to vector<16x32xf32>
    %84 = arith.mulf %81, %83 : vector<16x32xf32>
    %c0_49 = arith.constant 0 : index
    %c0_50 = arith.constant 0 : index
    %85 = vector.load %arg13[%c0_49, %c0_50] : memref<1x32xf32, #tpu.memory_space<vmem>>, vector<1x32xf32>
    %86 = vector.broadcast %85 : vector<1x32xf32> to vector<16x32xf32>
    %87 = arith.addf %84, %86 : vector<16x32xf32>
    %c0_51 = arith.constant 0 : index
    %c0_52 = arith.constant 0 : index
    %c0_53 = arith.constant 0 : index
    %88 = vector.load %arg15[%c0_51, %c0_52, %c0_53] : memref<1x16x32xf32, #tpu.memory_space<vmem>>, vector<1x16x32xf32>
    %89 = vector.shape_cast %88 : vector<1x16x32xf32> to vector<16x32xf32>
    %90 = vector.shape_cast %87 : vector<16x32xf32> to vector<1x16x32xf32>
    tpu.vector_store %arg15[%c0_51, %c0_52, %c0_53], %90 {strides = array<i32>} : memref<1x16x32xf32, #tpu.memory_space<vmem>>, vector<1x16x32xf32>,
    return
  }
  func.func @transform_0(%arg0: i32) -> (i32, i32, i32) {
    %c0_i32 = arith.constant 0 : i32
    %c0_i32_0 = arith.constant 0 : i32
    %c0_i32_1 = arith.constant 0 : i32
    return %arg0, %c0_i32, %c0_i32_0 : i32, i32, i32
  }
  func.func @transform_1(%arg0: i32) -> (i32, i32, i32) {
    %c0_i32 = arith.constant 0 : i32
    %c0_i32_0 = arith.constant 0 : i32
    %c0_i32_1 = arith.constant 0 : i32
    return %arg0, %c0_i32, %c0_i32_0 : i32, i32, i32
  }
  func.func @transform_2(%arg0: i32) -> (i32, i32, i32) {
    %c0_i32 = arith.constant 0 : i32
    %c0_i32_0 = arith.constant 0 : i32
    %c0_i32_1 = arith.constant 0 : i32
    return %arg0, %c0_i32, %c0_i32_0 : i32, i32, i32
  }
  func.func @transform_3(%arg0: i32) -> (i32, i32) {
    %c0_i32 = arith.constant 0 : i32
    %c0_i32_0 = arith.constant 0 : i32
    %c0_i32_1 = arith.constant 0 : i32
    return %c0_i32, %c0_i32_0 : i32, i32
  }
  func.func @transform_4(%arg0: i32) -> (i32, i32) {
    %c0_i32 = arith.constant 0 : i32
    %c0_i32_0 = arith.constant 0 : i32
    %c0_i32_1 = arith.constant 0 : i32
    return %c0_i32, %c0_i32_0 : i32, i32
  }
  func.func @transform_5(%arg0: i32) -> (i32, i32) {
    %c0_i32 = arith.constant 0 : i32
    %c0_i32_0 = arith.constant 0 : i32
    %c0_i32_1 = arith.constant 0 : i32
    return %c0_i32, %c0_i32_0 : i32, i32
  }
  func.func @transform_6(%arg0: i32) -> (i32, i32) {
    %c0_i32 = arith.constant 0 : i32
    %c0_i32_0 = arith.constant 0 : i32
    %c0_i32_1 = arith.constant 0 : i32
    return %c0_i32, %c0_i32_0 : i32, i32
  }
  func.func @transform_7(%arg0: i32) -> (i32, i32) {
    %c0_i32 = arith.constant 0 : i32
    %c0_i32_0 = arith.constant 0 : i32
    %c0_i32_1 = arith.constant 0 : i32
    return %c0_i32, %c0_i32_0 : i32, i32
  }
  func.func @transform_8(%arg0: i32) -> (i32, i32) {
    %c0_i32 = arith.constant 0 : i32
    %c0_i32_0 = arith.constant 0 : i32
    %c0_i32_1 = arith.constant 0 : i32
    return %c0_i32, %c0_i32_0 : i32, i32
  }
  func.func @transform_9(%arg0: i32) -> (i32, i32) {
    %c0_i32 = arith.constant 0 : i32
    %c0_i32_0 = arith.constant 0 : i32
    %c0_i32_1 = arith.constant 0 : i32
    return %c0_i32, %c0_i32_0 : i32, i32
  }
  func.func @transform_10(%arg0: i32) -> (i32, i32) {
    %c0_i32 = arith.constant 0 : i32
    %c0_i32_0 = arith.constant 0 : i32
    %c0_i32_1 = arith.constant 0 : i32
    return %c0_i32, %c0_i32_0 : i32, i32
  }
  func.func @transform_11(%arg0: i32) -> (i32, i32) {
    %c0_i32 = arith.constant 0 : i32
    %c0_i32_0 = arith.constant 0 : i32
    %c0_i32_1 = arith.constant 0 : i32
    return %c0_i32, %c0_i32_0 : i32, i32
  }
  func.func @transform_12(%arg0: i32) -> (i32, i32) {
    %c0_i32 = arith.constant 0 : i32
    %c0_i32_0 = arith.constant 0 : i32
    %c0_i32_1 = arith.constant 0 : i32
    return %c0_i32, %c0_i32_0 : i32, i32
  }
  func.func @transform_13(%arg0: i32) -> (i32, i32, i32) {
    %c0_i32 = arith.constant 0 : i32
    %c0_i32_0 = arith.constant 0 : i32
    %c0_i32_1 = arith.constant 0 : i32
    return %arg0, %c0_i32, %c0_i32_0 : i32, i32, i32
  }
  func.func @transform_14(%arg0: i32) -> (i32, i32, i32) {
    %c0_i32 = arith.constant 0 : i32
    %c0_i32_0 = arith.constant 0 : i32
    %c0_i32_1 = arith.constant 0 : i32
    return %arg0, %c0_i32, %c0_i32_0 : i32, i32, i32
  }
}

module attributes {stable_mosaic.version = 11 : i64} {
  func.func @_dec_attn_kernel(%arg0: i32, %arg1: memref<1x7x32xf32, #tpu.memory_space<vmem>>, %arg2: memref<1x16x32xf32, #tpu.memory_space<vmem>>, %arg3: memref<1x16x32xf32, #tpu.memory_space<vmem>>, %arg4: memref<32x16xf32, #tpu.memory_space<vmem>>, %arg5: memref<1x16xf32, #tpu.memory_space<vmem>>, %arg6: memref<32x16xf32, #tpu.memory_space<vmem>>, %arg7: memref<1x16xf32, #tpu.memory_space<vmem>>, %arg8: memref<32x16xf32, #tpu.memory_space<vmem>>, %arg9: memref<1x16xf32, #tpu.memory_space<vmem>>, %arg10: memref<16x32xf32, #tpu.memory_space<vmem>>, %arg11: memref<1x32xf32, #tpu.memory_space<vmem>>, %arg12: memref<1x32xf32, #tpu.memory_space<vmem>>, %arg13: memref<1x32xf32, #tpu.memory_space<vmem>>, %arg14: memref<1x7x32xf32, #tpu.memory_space<vmem>>, %arg15: memref<1x7x32xf32, #tpu.memory_space<vmem>>) attributes {dimension_semantics = [#tpu.dimension_semantics<parallel>], iteration_bounds = array<i64: 1>, scalar_prefetch = 0 : i64, scratch_operands = 0 : i64, tpu.core_type = #tpu.core_type<tc>, window_params = [{transform_indices = @transform_0, window_bounds = array<i64: 1, 7, 32>}, {transform_indices = @transform_1, window_bounds = array<i64: 1, 16, 32>}, {transform_indices = @transform_2, window_bounds = array<i64: 1, 16, 32>}, {pipeline_mode = #tpu.pipeline_mode<synchronous>, transform_indices = @transform_3, window_bounds = array<i64: 32, 16>}, {pipeline_mode = #tpu.pipeline_mode<synchronous>, transform_indices = @transform_4, window_bounds = array<i64: 1, 16>}, {pipeline_mode = #tpu.pipeline_mode<synchronous>, transform_indices = @transform_5, window_bounds = array<i64: 32, 16>}, {pipeline_mode = #tpu.pipeline_mode<synchronous>, transform_indices = @transform_6, window_bounds = array<i64: 1, 16>}, {pipeline_mode = #tpu.pipeline_mode<synchronous>, transform_indices = @transform_7, window_bounds = array<i64: 32, 16>}, {pipeline_mode = #tpu.pipeline_mode<synchronous>, transform_indices = @transform_8, window_bounds = array<i64: 1, 16>}, {pipeline_mode = #tpu.pipeline_mode<synchronous>, transform_indices = @transform_9, window_bounds = array<i64: 16, 32>}, {pipeline_mode = #tpu.pipeline_mode<synchronous>, transform_indices = @transform_10, window_bounds = array<i64: 1, 32>}, {pipeline_mode = #tpu.pipeline_mode<synchronous>, transform_indices = @transform_11, window_bounds = array<i64: 1, 32>}, {pipeline_mode = #tpu.pipeline_mode<synchronous>, transform_indices = @transform_12, window_bounds = array<i64: 1, 32>}, {transform_indices = @transform_13, window_bounds = array<i64: 1, 7, 32>}, {transform_indices = @transform_14, window_bounds = array<i64: 1, 7, 32>}]} {
    %c0 = arith.constant 0 : index
    %c0_0 = arith.constant 0 : index
    %c0_1 = arith.constant 0 : index
    %0 = vector.load %arg1[%c0, %c0_0, %c0_1] : memref<1x7x32xf32, #tpu.memory_space<vmem>>, vector<1x7x32xf32>
    %1 = vector.shape_cast %0 : vector<1x7x32xf32> to vector<7x32xf32>
    %c0_2 = arith.constant 0 : index
    %c0_3 = arith.constant 0 : index
    %c0_4 = arith.constant 0 : index
    %2 = vector.load %arg2[%c0_2, %c0_3, %c0_4] : memref<1x16x32xf32, #tpu.memory_space<vmem>>, vector<1x16x32xf32>
    %3 = vector.shape_cast %2 : vector<1x16x32xf32> to vector<16x32xf32>
    %c0_5 = arith.constant 0 : index
    %c0_6 = arith.constant 0 : index
    %c0_7 = arith.constant 0 : index
    %4 = vector.load %arg3[%c0_5, %c0_6, %c0_7] : memref<1x16x32xf32, #tpu.memory_space<vmem>>, vector<1x16x32xf32>
    %5 = vector.shape_cast %4 : vector<1x16x32xf32> to vector<16x32xf32>
    %c0_8 = arith.constant 0 : index
    %c0_9 = arith.constant 0 : index
    %6 = vector.load %arg4[%c0_8, %c0_9] : memref<32x16xf32, #tpu.memory_space<vmem>>, vector<32x16xf32>
    %cst = arith.constant dense<0.000000e+00> : vector<7x16xf32>
    %7 = tpu.matmul %1, %6, %cst {dimension_numbers = #tpu.dot_dimension_numbers<[1], [0], [0], [1], [0, 0, 1, 1], [], []>} : vector<7x32xf32>, vector<32x16xf32>, vector<7x16xf32> -> vector<7x16xf32>
    %c0_10 = arith.constant 0 : index
    %c0_11 = arith.constant 0 : index
    %8 = vector.load %arg5[%c0_10, %c0_11] : memref<1x16xf32, #tpu.memory_space<vmem>>, vector<1x16xf32>
    %9 = vector.broadcast %8 : vector<1x16xf32> to vector<7x16xf32>
    %10 = arith.addf %7, %9 : vector<7x16xf32>
    %c0_12 = arith.constant 0 : index
    %c0_13 = arith.constant 0 : index
    %11 = vector.load %arg6[%c0_12, %c0_13] : memref<32x16xf32, #tpu.memory_space<vmem>>, vector<32x16xf32>
    %cst_14 = arith.constant dense<0.000000e+00> : vector<16x16xf32>
    %12 = tpu.matmul %3, %11, %cst_14 {dimension_numbers = #tpu.dot_dimension_numbers<[1], [0], [0], [1], [0, 0, 1, 1], [], []>} : vector<16x32xf32>, vector<32x16xf32>, vector<16x16xf32> -> vector<16x16xf32>
    %c0_15 = arith.constant 0 : index
    %c0_16 = arith.constant 0 : index
    %13 = vector.load %arg7[%c0_15, %c0_16] : memref<1x16xf32, #tpu.memory_space<vmem>>, vector<1x16xf32>
    %14 = vector.broadcast %13 : vector<1x16xf32> to vector<16x16xf32>
    %15 = arith.addf %12, %14 : vector<16x16xf32>
    %c0_17 = arith.constant 0 : index
    %c0_18 = arith.constant 0 : index
    %16 = vector.load %arg8[%c0_17, %c0_18] : memref<32x16xf32, #tpu.memory_space<vmem>>, vector<32x16xf32>
    %cst_19 = arith.constant dense<0.000000e+00> : vector<16x16xf32>
    %17 = tpu.matmul %5, %16, %cst_19 {dimension_numbers = #tpu.dot_dimension_numbers<[1], [0], [0], [1], [0, 0, 1, 1], [], []>} : vector<16x32xf32>, vector<32x16xf32>, vector<16x16xf32> -> vector<16x16xf32>
    %c0_20 = arith.constant 0 : index
    %c0_21 = arith.constant 0 : index
    %18 = vector.load %arg9[%c0_20, %c0_21] : memref<1x16xf32, #tpu.memory_space<vmem>>, vector<1x16xf32>
    %19 = vector.broadcast %18 : vector<1x16xf32> to vector<16x16xf32>
    %20 = arith.addf %17, %19 : vector<16x16xf32>
    %21 = vector.extract_strided_slice %10 {offsets = [0, 0], sizes = [7, 8], strides = [1, 1]} : vector<7x16xf32> to vector<7x8xf32>
    %22 = vector.extract_strided_slice %15 {offsets = [0, 0], sizes = [16, 8], strides = [1, 1]} : vector<16x16xf32> to vector<16x8xf32>
    %23 = vector.extract_strided_slice %20 {offsets = [0, 0], sizes = [16, 8], strides = [1, 1]} : vector<16x16xf32> to vector<16x8xf32>
    %cst_22 = arith.constant dense<0.000000e+00> : vector<7x16xf32>
    %24 = tpu.matmul %21, %22, %cst_22 {dimension_numbers = #tpu.dot_dimension_numbers<[1], [1], [0], [0], [0, 0, 1, 0], [], []>} : vector<7x8xf32>, vector<16x8xf32>, vector<7x16xf32> -> vector<7x16xf32>
    %cst_23 = arith.constant 0.353553385 : f32
    %25 = vector.broadcast %cst_23 : f32 to vector<7x16xf32>
    %26 = arith.mulf %24, %25 : vector<7x16xf32>
    %cst_24 = arith.constant dense<0xFF800000> : vector<7xf32>
    %27 = vector.multi_reduction <maximumf>, %26, %cst_24 [1] : vector<7x16xf32> to vector<7xf32>
    %28 = vector.shape_cast %27 : vector<7xf32> to vector<7x1xf32>
    %29 = vector.broadcast %28 : vector<7x1xf32> to vector<7x16xf32>
    %30 = arith.subf %26, %29 : vector<7x16xf32>
    %31 = math.exp %30 : vector<7x16xf32>
    %cst_25 = arith.constant dense<0.000000e+00> : vector<7xf32>
    %32 = vector.multi_reduction <add>, %31, %cst_25 [1] : vector<7x16xf32> to vector<7xf32>
    %33 = vector.shape_cast %32 : vector<7xf32> to vector<7x1xf32>
    %34 = vector.broadcast %33 : vector<7x1xf32> to vector<7x16xf32>
    %35 = arith.divf %31, %34 : vector<7x16xf32>
    %cst_26 = arith.constant dense<0.000000e+00> : vector<7x8xf32>
    %36 = tpu.matmul %35, %23, %cst_26 {dimension_numbers = #tpu.dot_dimension_numbers<[1], [0], [0], [1], [0, 0, 1, 1], [], []>} : vector<7x16xf32>, vector<16x8xf32>, vector<7x8xf32> -> vector<7x8xf32>
    %c0_27 = arith.constant 0 : index
    %c0_28 = arith.constant 0 : index
    %37 = vector.load %arg10[%c0_27, %c0_28] : memref<16x32xf32, #tpu.memory_space<vmem>>, vector<8x32xf32>
    %cst_29 = arith.constant dense<0.000000e+00> : vector<7x32xf32>
    %38 = tpu.matmul %36, %37, %cst_29 {dimension_numbers = #tpu.dot_dimension_numbers<[1], [0], [0], [1], [0, 0, 1, 1], [], []>} : vector<7x8xf32>, vector<8x32xf32>, vector<7x32xf32> -> vector<7x32xf32>
    %39 = vector.extract_strided_slice %10 {offsets = [0, 8], sizes = [7, 8], strides = [1, 1]} : vector<7x16xf32> to vector<7x8xf32>
    %40 = vector.extract_strided_slice %15 {offsets = [0, 8], sizes = [16, 8], strides = [1, 1]} : vector<16x16xf32> to vector<16x8xf32>
    %41 = vector.extract_strided_slice %20 {offsets = [0, 8], sizes = [16, 8], strides = [1, 1]} : vector<16x16xf32> to vector<16x8xf32>
    %cst_30 = arith.constant dense<0.000000e+00> : vector<7x16xf32>
    %42 = tpu.matmul %39, %40, %cst_30 {dimension_numbers = #tpu.dot_dimension_numbers<[1], [1], [0], [0], [0, 0, 1, 0], [], []>} : vector<7x8xf32>, vector<16x8xf32>, vector<7x16xf32> -> vector<7x16xf32>
    %cst_31 = arith.constant 0.353553385 : f32
    %43 = vector.broadcast %cst_31 : f32 to vector<7x16xf32>
    %44 = arith.mulf %42, %43 : vector<7x16xf32>
    %cst_32 = arith.constant dense<0xFF800000> : vector<7xf32>
    %45 = vector.multi_reduction <maximumf>, %44, %cst_32 [1] : vector<7x16xf32> to vector<7xf32>
    %46 = vector.shape_cast %45 : vector<7xf32> to vector<7x1xf32>
    %47 = vector.broadcast %46 : vector<7x1xf32> to vector<7x16xf32>
    %48 = arith.subf %44, %47 : vector<7x16xf32>
    %49 = math.exp %48 : vector<7x16xf32>
    %cst_33 = arith.constant dense<0.000000e+00> : vector<7xf32>
    %50 = vector.multi_reduction <add>, %49, %cst_33 [1] : vector<7x16xf32> to vector<7xf32>
    %51 = vector.shape_cast %50 : vector<7xf32> to vector<7x1xf32>
    %52 = vector.broadcast %51 : vector<7x1xf32> to vector<7x16xf32>
    %53 = arith.divf %49, %52 : vector<7x16xf32>
    %cst_34 = arith.constant dense<0.000000e+00> : vector<7x8xf32>
    %54 = tpu.matmul %53, %41, %cst_34 {dimension_numbers = #tpu.dot_dimension_numbers<[1], [0], [0], [1], [0, 0, 1, 1], [], []>} : vector<7x16xf32>, vector<16x8xf32>, vector<7x8xf32> -> vector<7x8xf32>
    %c8 = arith.constant 8 : index
    %c0_35 = arith.constant 0 : index
    %55 = vector.load %arg10[%c8, %c0_35] : memref<16x32xf32, #tpu.memory_space<vmem>>, vector<8x32xf32>
    %cst_36 = arith.constant dense<0.000000e+00> : vector<7x32xf32>
    %56 = tpu.matmul %54, %55, %cst_36 {dimension_numbers = #tpu.dot_dimension_numbers<[1], [0], [0], [1], [0, 0, 1, 1], [], []>} : vector<7x8xf32>, vector<8x32xf32>, vector<7x32xf32> -> vector<7x32xf32>
    %57 = arith.addf %38, %56 : vector<7x32xf32>
    %c0_37 = arith.constant 0 : index
    %c0_38 = arith.constant 0 : index
    %58 = vector.load %arg11[%c0_37, %c0_38] : memref<1x32xf32, #tpu.memory_space<vmem>>, vector<1x32xf32>
    %59 = vector.broadcast %58 : vector<1x32xf32> to vector<7x32xf32>
    %60 = arith.addf %57, %59 : vector<7x32xf32>
    %c0_39 = arith.constant 0 : index
    %c0_40 = arith.constant 0 : index
    %c0_41 = arith.constant 0 : index
    %61 = vector.load %arg14[%c0_39, %c0_40, %c0_41] : memref<1x7x32xf32, #tpu.memory_space<vmem>>, vector<1x7x32xf32>
    %62 = vector.shape_cast %61 : vector<1x7x32xf32> to vector<7x32xf32>
    %63 = arith.addf %60, %62 : vector<7x32xf32>
    %cst_42 = arith.constant dense<0.000000e+00> : vector<7xf32>
    %64 = vector.multi_reduction <add>, %63, %cst_42 [1] : vector<7x32xf32> to vector<7xf32>
    %65 = vector.shape_cast %64 : vector<7xf32> to vector<7x1xf32>
    %cst_43 = arith.constant 3.200000e+01 : f32
    %66 = vector.broadcast %cst_43 : f32 to vector<7x1xf32>
    %67 = arith.divf %65, %66 : vector<7x1xf32>
    %68 = vector.broadcast %67 : vector<7x1xf32> to vector<7x32xf32>
    %69 = arith.subf %63, %68 : vector<7x32xf32>
    %70 = arith.mulf %69, %69 : vector<7x32xf32>
    %cst_44 = arith.constant dense<0.000000e+00> : vector<7xf32>
    %71 = vector.multi_reduction <add>, %70, %cst_44 [1] : vector<7x32xf32> to vector<7xf32>
    %72 = vector.shape_cast %71 : vector<7xf32> to vector<7x1xf32>
    %cst_45 = arith.constant 3.200000e+01 : f32
    %73 = vector.broadcast %cst_45 : f32 to vector<7x1xf32>
    %74 = arith.divf %72, %73 : vector<7x1xf32>
    %75 = vector.broadcast %67 : vector<7x1xf32> to vector<7x32xf32>
    %76 = arith.subf %63, %75 : vector<7x32xf32>
    %cst_46 = arith.constant 9.99999974E-6 : f32
    %77 = vector.broadcast %cst_46 : f32 to vector<7x1xf32>
    %78 = arith.addf %74, %77 : vector<7x1xf32>
    %79 = math.sqrt %78 : vector<7x1xf32>
    %80 = vector.broadcast %79 : vector<7x1xf32> to vector<7x32xf32>
    %81 = arith.divf %76, %80 : vector<7x32xf32>
    %c0_47 = arith.constant 0 : index
    %c0_48 = arith.constant 0 : index
    %82 = vector.load %arg12[%c0_47, %c0_48] : memref<1x32xf32, #tpu.memory_space<vmem>>, vector<1x32xf32>
    %83 = vector.broadcast %82 : vector<1x32xf32> to vector<7x32xf32>
    %84 = arith.mulf %81, %83 : vector<7x32xf32>
    %c0_49 = arith.constant 0 : index
    %c0_50 = arith.constant 0 : index
    %85 = vector.load %arg13[%c0_49, %c0_50] : memref<1x32xf32, #tpu.memory_space<vmem>>, vector<1x32xf32>
    %86 = vector.broadcast %85 : vector<1x32xf32> to vector<7x32xf32>
    %87 = arith.addf %84, %86 : vector<7x32xf32>
    %c0_51 = arith.constant 0 : index
    %c0_52 = arith.constant 0 : index
    %c0_53 = arith.constant 0 : index
    %88 = vector.load %arg15[%c0_51, %c0_52, %c0_53] : memref<1x7x32xf32, #tpu.memory_space<vmem>>, vector<1x7x32xf32>
    %89 = vector.shape_cast %88 : vector<1x7x32xf32> to vector<7x32xf32>
    %90 = vector.shape_cast %87 : vector<7x32xf32> to vector<1x7x32xf32>
    tpu.vector_store %arg15[%c0_51, %c0_52, %c0_53], %90 {strides = array<i32>} : memref<1x7x32xf32, #tpu.memory_space<vmem>>, vector<1x7x32xf32>,
    return
  }
  func.func @transform_0(%arg0: i32) -> (i32, i32, i32) {
    %c0_i32 = arith.constant 0 : i32
    %c0_i32_0 = arith.constant 0 : i32
    %c0_i32_1 = arith.constant 0 : i32
    return %arg0, %c0_i32, %c0_i32_0 : i32, i32, i32
  }
  func.func @transform_1(%arg0: i32) -> (i32, i32, i32) {
    %c0_i32 = arith.constant 0 : i32
    %c0_i32_0 = arith.constant 0 : i32
    %c0_i32_1 = arith.constant 0 : i32
    return %arg0, %c0_i32, %c0_i32_0 : i32, i32, i32
  }
  func.func @transform_2(%arg0: i32) -> (i32, i32, i32) {
    %c0_i32 = arith.constant 0 : i32
    %c0_i32_0 = arith.constant 0 : i32
    %c0_i32_1 = arith.constant 0 : i32
    return %arg0, %c0_i32, %c0_i32_0 : i32, i32, i32
  }
  func.func @transform_3(%arg0: i32) -> (i32, i32) {
    %c0_i32 = arith.constant 0 : i32
    %c0_i32_0 = arith.constant 0 : i32
    %c0_i32_1 = arith.constant 0 : i32
    return %c0_i32, %c0_i32_0 : i32, i32
  }
  func.func @transform_4(%arg0: i32) -> (i32, i32) {
    %c0_i32 = arith.constant 0 : i32
    %c0_i32_0 = arith.constant 0 : i32
    %c0_i32_1 = arith.constant 0 : i32
    return %c0_i32, %c0_i32_0 : i32, i32
  }
  func.func @transform_5(%arg0: i32) -> (i32, i32) {
    %c0_i32 = arith.constant 0 : i32
    %c0_i32_0 = arith.constant 0 : i32
    %c0_i32_1 = arith.constant 0 : i32
    return %c0_i32, %c0_i32_0 : i32, i32
  }
  func.func @transform_6(%arg0: i32) -> (i32, i32) {
    %c0_i32 = arith.constant 0 : i32
    %c0_i32_0 = arith.constant 0 : i32
    %c0_i32_1 = arith.constant 0 : i32
    return %c0_i32, %c0_i32_0 : i32, i32
  }
  func.func @transform_7(%arg0: i32) -> (i32, i32) {
    %c0_i32 = arith.constant 0 : i32
    %c0_i32_0 = arith.constant 0 : i32
    %c0_i32_1 = arith.constant 0 : i32
    return %c0_i32, %c0_i32_0 : i32, i32
  }
  func.func @transform_8(%arg0: i32) -> (i32, i32) {
    %c0_i32 = arith.constant 0 : i32
    %c0_i32_0 = arith.constant 0 : i32
    %c0_i32_1 = arith.constant 0 : i32
    return %c0_i32, %c0_i32_0 : i32, i32
  }
  func.func @transform_9(%arg0: i32) -> (i32, i32) {
    %c0_i32 = arith.constant 0 : i32
    %c0_i32_0 = arith.constant 0 : i32
    %c0_i32_1 = arith.constant 0 : i32
    return %c0_i32, %c0_i32_0 : i32, i32
  }
  func.func @transform_10(%arg0: i32) -> (i32, i32) {
    %c0_i32 = arith.constant 0 : i32
    %c0_i32_0 = arith.constant 0 : i32
    %c0_i32_1 = arith.constant 0 : i32
    return %c0_i32, %c0_i32_0 : i32, i32
  }
  func.func @transform_11(%arg0: i32) -> (i32, i32) {
    %c0_i32 = arith.constant 0 : i32
    %c0_i32_0 = arith.constant 0 : i32
    %c0_i32_1 = arith.constant 0 : i32
    return %c0_i32, %c0_i32_0 : i32, i32
  }
  func.func @transform_12(%arg0: i32) -> (i32, i32) {
    %c0_i32 = arith.constant 0 : i32
    %c0_i32_0 = arith.constant 0 : i32
    %c0_i32_1 = arith.constant 0 : i32
    return %c0_i32, %c0_i32_0 : i32, i32
  }
  func.func @transform_13(%arg0: i32) -> (i32, i32, i32) {
    %c0_i32 = arith.constant 0 : i32
    %c0_i32_0 = arith.constant 0 : i32
    %c0_i32_1 = arith.constant 0 : i32
    return %arg0, %c0_i32, %c0_i32_0 : i32, i32, i32
  }
  func.func @transform_14(%arg0: i32) -> (i32, i32, i32) {
    %c0_i32 = arith.constant 0 : i32
    %c0_i32_0 = arith.constant 0 : i32
    %c0_i32_1 = arith.constant 0 : i32
    return %arg0, %c0_i32, %c0_i32_0 : i32, i32, i32
  }
}

module attributes {stable_mosaic.version = 11 : i64} {
  func.func @_dec_attn_kernel(%arg0: i32, %arg1: memref<1x7x32xf32, #tpu.memory_space<vmem>>, %arg2: memref<1x7x32xf32, #tpu.memory_space<vmem>>, %arg3: memref<1x7x32xf32, #tpu.memory_space<vmem>>, %arg4: memref<32x32xf32, #tpu.memory_space<vmem>>, %arg5: memref<1x32xf32, #tpu.memory_space<vmem>>, %arg6: memref<32x32xf32, #tpu.memory_space<vmem>>, %arg7: memref<1x32xf32, #tpu.memory_space<vmem>>, %arg8: memref<32x32xf32, #tpu.memory_space<vmem>>, %arg9: memref<1x32xf32, #tpu.memory_space<vmem>>, %arg10: memref<32x32xf32, #tpu.memory_space<vmem>>, %arg11: memref<1x32xf32, #tpu.memory_space<vmem>>, %arg12: memref<1x32xf32, #tpu.memory_space<vmem>>, %arg13: memref<1x32xf32, #tpu.memory_space<vmem>>, %arg14: memref<1x7x32xf32, #tpu.memory_space<vmem>>, %arg15: memref<1x7x32xf32, #tpu.memory_space<vmem>>) attributes {dimension_semantics = [#tpu.dimension_semantics<parallel>], iteration_bounds = array<i64: 1>, scalar_prefetch = 0 : i64, scratch_operands = 0 : i64, tpu.core_type = #tpu.core_type<tc>, window_params = [{transform_indices = @transform_0, window_bounds = array<i64: 1, 7, 32>}, {transform_indices = @transform_1, window_bounds = array<i64: 1, 7, 32>}, {transform_indices = @transform_2, window_bounds = array<i64: 1, 7, 32>}, {pipeline_mode = #tpu.pipeline_mode<synchronous>, transform_indices = @transform_3, window_bounds = array<i64: 32, 32>}, {pipeline_mode = #tpu.pipeline_mode<synchronous>, transform_indices = @transform_4, window_bounds = array<i64: 1, 32>}, {pipeline_mode = #tpu.pipeline_mode<synchronous>, transform_indices = @transform_5, window_bounds = array<i64: 32, 32>}, {pipeline_mode = #tpu.pipeline_mode<synchronous>, transform_indices = @transform_6, window_bounds = array<i64: 1, 32>}, {pipeline_mode = #tpu.pipeline_mode<synchronous>, transform_indices = @transform_7, window_bounds = array<i64: 32, 32>}, {pipeline_mode = #tpu.pipeline_mode<synchronous>, transform_indices = @transform_8, window_bounds = array<i64: 1, 32>}, {pipeline_mode = #tpu.pipeline_mode<synchronous>, transform_indices = @transform_9, window_bounds = array<i64: 32, 32>}, {pipeline_mode = #tpu.pipeline_mode<synchronous>, transform_indices = @transform_10, window_bounds = array<i64: 1, 32>}, {pipeline_mode = #tpu.pipeline_mode<synchronous>, transform_indices = @transform_11, window_bounds = array<i64: 1, 32>}, {pipeline_mode = #tpu.pipeline_mode<synchronous>, transform_indices = @transform_12, window_bounds = array<i64: 1, 32>}, {transform_indices = @transform_13, window_bounds = array<i64: 1, 7, 32>}, {transform_indices = @transform_14, window_bounds = array<i64: 1, 7, 32>}]} {
    %c0 = arith.constant 0 : index
    %c0_0 = arith.constant 0 : index
    %c0_1 = arith.constant 0 : index
    %0 = vector.load %arg1[%c0, %c0_0, %c0_1] : memref<1x7x32xf32, #tpu.memory_space<vmem>>, vector<1x7x32xf32>
    %1 = vector.shape_cast %0 : vector<1x7x32xf32> to vector<7x32xf32>
    %c0_2 = arith.constant 0 : index
    %c0_3 = arith.constant 0 : index
    %c0_4 = arith.constant 0 : index
    %2 = vector.load %arg2[%c0_2, %c0_3, %c0_4] : memref<1x7x32xf32, #tpu.memory_space<vmem>>, vector<1x7x32xf32>
    %3 = vector.shape_cast %2 : vector<1x7x32xf32> to vector<7x32xf32>
    %c0_5 = arith.constant 0 : index
    %c0_6 = arith.constant 0 : index
    %c0_7 = arith.constant 0 : index
    %4 = vector.load %arg3[%c0_5, %c0_6, %c0_7] : memref<1x7x32xf32, #tpu.memory_space<vmem>>, vector<1x7x32xf32>
    %5 = vector.shape_cast %4 : vector<1x7x32xf32> to vector<7x32xf32>
    %c0_8 = arith.constant 0 : index
    %c0_9 = arith.constant 0 : index
    %6 = vector.load %arg4[%c0_8, %c0_9] : memref<32x32xf32, #tpu.memory_space<vmem>>, vector<32x32xf32>
    %cst = arith.constant dense<0.000000e+00> : vector<7x32xf32>
    %7 = tpu.matmul %1, %6, %cst {dimension_numbers = #tpu.dot_dimension_numbers<[1], [0], [0], [1], [0, 0, 1, 1], [], []>} : vector<7x32xf32>, vector<32x32xf32>, vector<7x32xf32> -> vector<7x32xf32>
    %c0_10 = arith.constant 0 : index
    %c0_11 = arith.constant 0 : index
    %8 = vector.load %arg5[%c0_10, %c0_11] : memref<1x32xf32, #tpu.memory_space<vmem>>, vector<1x32xf32>
    %9 = vector.broadcast %8 : vector<1x32xf32> to vector<7x32xf32>
    %10 = arith.addf %7, %9 : vector<7x32xf32>
    %c0_12 = arith.constant 0 : index
    %c0_13 = arith.constant 0 : index
    %11 = vector.load %arg6[%c0_12, %c0_13] : memref<32x32xf32, #tpu.memory_space<vmem>>, vector<32x32xf32>
    %cst_14 = arith.constant dense<0.000000e+00> : vector<7x32xf32>
    %12 = tpu.matmul %3, %11, %cst_14 {dimension_numbers = #tpu.dot_dimension_numbers<[1], [0], [0], [1], [0, 0, 1, 1], [], []>} : vector<7x32xf32>, vector<32x32xf32>, vector<7x32xf32> -> vector<7x32xf32>
    %c0_15 = arith.constant 0 : index
    %c0_16 = arith.constant 0 : index
    %13 = vector.load %arg7[%c0_15, %c0_16] : memref<1x32xf32, #tpu.memory_space<vmem>>, vector<1x32xf32>
    %14 = vector.broadcast %13 : vector<1x32xf32> to vector<7x32xf32>
    %15 = arith.addf %12, %14 : vector<7x32xf32>
    %c0_17 = arith.constant 0 : index
    %c0_18 = arith.constant 0 : index
    %16 = vector.load %arg8[%c0_17, %c0_18] : memref<32x32xf32, #tpu.memory_space<vmem>>, vector<32x32xf32>
    %cst_19 = arith.constant dense<0.000000e+00> : vector<7x32xf32>
    %17 = tpu.matmul %5, %16, %cst_19 {dimension_numbers = #tpu.dot_dimension_numbers<[1], [0], [0], [1], [0, 0, 1, 1], [], []>} : vector<7x32xf32>, vector<32x32xf32>, vector<7x32xf32> -> vector<7x32xf32>
    %c0_20 = arith.constant 0 : index
    %c0_21 = arith.constant 0 : index
    %18 = vector.load %arg9[%c0_20, %c0_21] : memref<1x32xf32, #tpu.memory_space<vmem>>, vector<1x32xf32>
    %19 = vector.broadcast %18 : vector<1x32xf32> to vector<7x32xf32>
    %20 = arith.addf %17, %19 : vector<7x32xf32>
    %21 = vector.extract_strided_slice %10 {offsets = [0, 0], sizes = [7, 16], strides = [1, 1]} : vector<7x32xf32> to vector<7x16xf32>
    %22 = vector.extract_strided_slice %15 {offsets = [0, 0], sizes = [7, 16], strides = [1, 1]} : vector<7x32xf32> to vector<7x16xf32>
    %23 = vector.extract_strided_slice %20 {offsets = [0, 0], sizes = [7, 16], strides = [1, 1]} : vector<7x32xf32> to vector<7x16xf32>
    %cst_22 = arith.constant dense<0.000000e+00> : vector<7x7xf32>
    %24 = tpu.matmul %21, %22, %cst_22 {dimension_numbers = #tpu.dot_dimension_numbers<[1], [1], [0], [0], [0, 0, 1, 0], [], []>} : vector<7x16xf32>, vector<7x16xf32>, vector<7x7xf32> -> vector<7x7xf32>
    %cst_23 = arith.constant 2.500000e-01 : f32
    %25 = vector.broadcast %cst_23 : f32 to vector<7x7xf32>
    %26 = arith.mulf %24, %25 : vector<7x7xf32>
    %cst_24 = arith.constant dense<0xFF800000> : vector<7xf32>
    %27 = vector.multi_reduction <maximumf>, %26, %cst_24 [1] : vector<7x7xf32> to vector<7xf32>
    %28 = vector.shape_cast %27 : vector<7xf32> to vector<7x1xf32>
    %29 = vector.broadcast %28 : vector<7x1xf32> to vector<7x7xf32>
    %30 = arith.subf %26, %29 : vector<7x7xf32>
    %31 = math.exp %30 : vector<7x7xf32>
    %cst_25 = arith.constant dense<0.000000e+00> : vector<7xf32>
    %32 = vector.multi_reduction <add>, %31, %cst_25 [1] : vector<7x7xf32> to vector<7xf32>
    %33 = vector.shape_cast %32 : vector<7xf32> to vector<7x1xf32>
    %34 = vector.broadcast %33 : vector<7x1xf32> to vector<7x7xf32>
    %35 = arith.divf %31, %34 : vector<7x7xf32>
    %cst_26 = arith.constant dense<0.000000e+00> : vector<7x16xf32>
    %36 = tpu.matmul %35, %23, %cst_26 {dimension_numbers = #tpu.dot_dimension_numbers<[1], [0], [0], [1], [0, 0, 1, 1], [], []>} : vector<7x7xf32>, vector<7x16xf32>, vector<7x16xf32> -> vector<7x16xf32>
    %c0_27 = arith.constant 0 : index
    %c0_28 = arith.constant 0 : index
    %37 = vector.load %arg10[%c0_27, %c0_28] : memref<32x32xf32, #tpu.memory_space<vmem>>, vector<16x32xf32>
    %cst_29 = arith.constant dense<0.000000e+00> : vector<7x32xf32>
    %38 = tpu.matmul %36, %37, %cst_29 {dimension_numbers = #tpu.dot_dimension_numbers<[1], [0], [0], [1], [0, 0, 1, 1], [], []>} : vector<7x16xf32>, vector<16x32xf32>, vector<7x32xf32> -> vector<7x32xf32>
    %39 = vector.extract_strided_slice %10 {offsets = [0, 16], sizes = [7, 16], strides = [1, 1]} : vector<7x32xf32> to vector<7x16xf32>
    %40 = vector.extract_strided_slice %15 {offsets = [0, 16], sizes = [7, 16], strides = [1, 1]} : vector<7x32xf32> to vector<7x16xf32>
    %41 = vector.extract_strided_slice %20 {offsets = [0, 16], sizes = [7, 16], strides = [1, 1]} : vector<7x32xf32> to vector<7x16xf32>
    %cst_30 = arith.constant dense<0.000000e+00> : vector<7x7xf32>
    %42 = tpu.matmul %39, %40, %cst_30 {dimension_numbers = #tpu.dot_dimension_numbers<[1], [1], [0], [0], [0, 0, 1, 0], [], []>} : vector<7x16xf32>, vector<7x16xf32>, vector<7x7xf32> -> vector<7x7xf32>
    %cst_31 = arith.constant 2.500000e-01 : f32
    %43 = vector.broadcast %cst_31 : f32 to vector<7x7xf32>
    %44 = arith.mulf %42, %43 : vector<7x7xf32>
    %cst_32 = arith.constant dense<0xFF800000> : vector<7xf32>
    %45 = vector.multi_reduction <maximumf>, %44, %cst_32 [1] : vector<7x7xf32> to vector<7xf32>
    %46 = vector.shape_cast %45 : vector<7xf32> to vector<7x1xf32>
    %47 = vector.broadcast %46 : vector<7x1xf32> to vector<7x7xf32>
    %48 = arith.subf %44, %47 : vector<7x7xf32>
    %49 = math.exp %48 : vector<7x7xf32>
    %cst_33 = arith.constant dense<0.000000e+00> : vector<7xf32>
    %50 = vector.multi_reduction <add>, %49, %cst_33 [1] : vector<7x7xf32> to vector<7xf32>
    %51 = vector.shape_cast %50 : vector<7xf32> to vector<7x1xf32>
    %52 = vector.broadcast %51 : vector<7x1xf32> to vector<7x7xf32>
    %53 = arith.divf %49, %52 : vector<7x7xf32>
    %cst_34 = arith.constant dense<0.000000e+00> : vector<7x16xf32>
    %54 = tpu.matmul %53, %41, %cst_34 {dimension_numbers = #tpu.dot_dimension_numbers<[1], [0], [0], [1], [0, 0, 1, 1], [], []>} : vector<7x7xf32>, vector<7x16xf32>, vector<7x16xf32> -> vector<7x16xf32>
    %c16 = arith.constant 16 : index
    %c0_35 = arith.constant 0 : index
    %55 = vector.load %arg10[%c16, %c0_35] : memref<32x32xf32, #tpu.memory_space<vmem>>, vector<16x32xf32>
    %cst_36 = arith.constant dense<0.000000e+00> : vector<7x32xf32>
    %56 = tpu.matmul %54, %55, %cst_36 {dimension_numbers = #tpu.dot_dimension_numbers<[1], [0], [0], [1], [0, 0, 1, 1], [], []>} : vector<7x16xf32>, vector<16x32xf32>, vector<7x32xf32> -> vector<7x32xf32>
    %57 = arith.addf %38, %56 : vector<7x32xf32>
    %c0_37 = arith.constant 0 : index
    %c0_38 = arith.constant 0 : index
    %58 = vector.load %arg11[%c0_37, %c0_38] : memref<1x32xf32, #tpu.memory_space<vmem>>, vector<1x32xf32>
    %59 = vector.broadcast %58 : vector<1x32xf32> to vector<7x32xf32>
    %60 = arith.addf %57, %59 : vector<7x32xf32>
    %c0_39 = arith.constant 0 : index
    %c0_40 = arith.constant 0 : index
    %c0_41 = arith.constant 0 : index
    %61 = vector.load %arg14[%c0_39, %c0_40, %c0_41] : memref<1x7x32xf32, #tpu.memory_space<vmem>>, vector<1x7x32xf32>
    %62 = vector.shape_cast %61 : vector<1x7x32xf32> to vector<7x32xf32>
    %63 = arith.addf %60, %62 : vector<7x32xf32>
    %cst_42 = arith.constant dense<0.000000e+00> : vector<7xf32>
    %64 = vector.multi_reduction <add>, %63, %cst_42 [1] : vector<7x32xf32> to vector<7xf32>
    %65 = vector.shape_cast %64 : vector<7xf32> to vector<7x1xf32>
    %cst_43 = arith.constant 3.200000e+01 : f32
    %66 = vector.broadcast %cst_43 : f32 to vector<7x1xf32>
    %67 = arith.divf %65, %66 : vector<7x1xf32>
    %68 = vector.broadcast %67 : vector<7x1xf32> to vector<7x32xf32>
    %69 = arith.subf %63, %68 : vector<7x32xf32>
    %70 = arith.mulf %69, %69 : vector<7x32xf32>
    %cst_44 = arith.constant dense<0.000000e+00> : vector<7xf32>
    %71 = vector.multi_reduction <add>, %70, %cst_44 [1] : vector<7x32xf32> to vector<7xf32>
    %72 = vector.shape_cast %71 : vector<7xf32> to vector<7x1xf32>
    %cst_45 = arith.constant 3.200000e+01 : f32
    %73 = vector.broadcast %cst_45 : f32 to vector<7x1xf32>
    %74 = arith.divf %72, %73 : vector<7x1xf32>
    %75 = vector.broadcast %67 : vector<7x1xf32> to vector<7x32xf32>
    %76 = arith.subf %63, %75 : vector<7x32xf32>
    %cst_46 = arith.constant 9.99999974E-6 : f32
    %77 = vector.broadcast %cst_46 : f32 to vector<7x1xf32>
    %78 = arith.addf %74, %77 : vector<7x1xf32>
    %79 = math.sqrt %78 : vector<7x1xf32>
    %80 = vector.broadcast %79 : vector<7x1xf32> to vector<7x32xf32>
    %81 = arith.divf %76, %80 : vector<7x32xf32>
    %c0_47 = arith.constant 0 : index
    %c0_48 = arith.constant 0 : index
    %82 = vector.load %arg12[%c0_47, %c0_48] : memref<1x32xf32, #tpu.memory_space<vmem>>, vector<1x32xf32>
    %83 = vector.broadcast %82 : vector<1x32xf32> to vector<7x32xf32>
    %84 = arith.mulf %81, %83 : vector<7x32xf32>
    %c0_49 = arith.constant 0 : index
    %c0_50 = arith.constant 0 : index
    %85 = vector.load %arg13[%c0_49, %c0_50] : memref<1x32xf32, #tpu.memory_space<vmem>>, vector<1x32xf32>
    %86 = vector.broadcast %85 : vector<1x32xf32> to vector<7x32xf32>
    %87 = arith.addf %84, %86 : vector<7x32xf32>
    %c0_51 = arith.constant 0 : index
    %c0_52 = arith.constant 0 : index
    %c0_53 = arith.constant 0 : index
    %88 = vector.load %arg15[%c0_51, %c0_52, %c0_53] : memref<1x7x32xf32, #tpu.memory_space<vmem>>, vector<1x7x32xf32>
    %89 = vector.shape_cast %88 : vector<1x7x32xf32> to vector<7x32xf32>
    %90 = vector.shape_cast %87 : vector<7x32xf32> to vector<1x7x32xf32>
    tpu.vector_store %arg15[%c0_51, %c0_52, %c0_53], %90 {strides = array<i32>} : memref<1x7x32xf32, #tpu.memory_space<vmem>>, vector<1x7x32xf32>,
    return
  }
  func.func @transform_0(%arg0: i32) -> (i32, i32, i32) {
    %c0_i32 = arith.constant 0 : i32
    %c0_i32_0 = arith.constant 0 : i32
    %c0_i32_1 = arith.constant 0 : i32
    return %arg0, %c0_i32, %c0_i32_0 : i32, i32, i32
  }
  func.func @transform_1(%arg0: i32) -> (i32, i32, i32) {
    %c0_i32 = arith.constant 0 : i32
    %c0_i32_0 = arith.constant 0 : i32
    %c0_i32_1 = arith.constant 0 : i32
    return %arg0, %c0_i32, %c0_i32_0 : i32, i32, i32
  }
  func.func @transform_2(%arg0: i32) -> (i32, i32, i32) {
    %c0_i32 = arith.constant 0 : i32
    %c0_i32_0 = arith.constant 0 : i32
    %c0_i32_1 = arith.constant 0 : i32
    return %arg0, %c0_i32, %c0_i32_0 : i32, i32, i32
  }
  func.func @transform_3(%arg0: i32) -> (i32, i32) {
    %c0_i32 = arith.constant 0 : i32
    %c0_i32_0 = arith.constant 0 : i32
    %c0_i32_1 = arith.constant 0 : i32
    return %c0_i32, %c0_i32_0 : i32, i32
  }
  func.func @transform_4(%arg0: i32) -> (i32, i32) {
    %c0_i32 = arith.constant 0 : i32
    %c0_i32_0 = arith.constant 0 : i32
    %c0_i32_1 = arith.constant 0 : i32
    return %c0_i32, %c0_i32_0 : i32, i32
  }
  func.func @transform_5(%arg0: i32) -> (i32, i32) {
    %c0_i32 = arith.constant 0 : i32
    %c0_i32_0 = arith.constant 0 : i32
    %c0_i32_1 = arith.constant 0 : i32
    return %c0_i32, %c0_i32_0 : i32, i32
  }
  func.func @transform_6(%arg0: i32) -> (i32, i32) {
    %c0_i32 = arith.constant 0 : i32
    %c0_i32_0 = arith.constant 0 : i32
    %c0_i32_1 = arith.constant 0 : i32
    return %c0_i32, %c0_i32_0 : i32, i32
  }
  func.func @transform_7(%arg0: i32) -> (i32, i32) {
    %c0_i32 = arith.constant 0 : i32
    %c0_i32_0 = arith.constant 0 : i32
    %c0_i32_1 = arith.constant 0 : i32
    return %c0_i32, %c0_i32_0 : i32, i32
  }
  func.func @transform_8(%arg0: i32) -> (i32, i32) {
    %c0_i32 = arith.constant 0 : i32
    %c0_i32_0 = arith.constant 0 : i32
    %c0_i32_1 = arith.constant 0 : i32
    return %c0_i32, %c0_i32_0 : i32, i32
  }
  func.func @transform_9(%arg0: i32) -> (i32, i32) {
    %c0_i32 = arith.constant 0 : i32
    %c0_i32_0 = arith.constant 0 : i32
    %c0_i32_1 = arith.constant 0 : i32
    return %c0_i32, %c0_i32_0 : i32, i32
  }
  func.func @transform_10(%arg0: i32) -> (i32, i32) {
    %c0_i32 = arith.constant 0 : i32
    %c0_i32_0 = arith.constant 0 : i32
    %c0_i32_1 = arith.constant 0 : i32
    return %c0_i32, %c0_i32_0 : i32, i32
  }
  func.func @transform_11(%arg0: i32) -> (i32, i32) {
    %c0_i32 = arith.constant 0 : i32
    %c0_i32_0 = arith.constant 0 : i32
    %c0_i32_1 = arith.constant 0 : i32
    return %c0_i32, %c0_i32_0 : i32, i32
  }
  func.func @transform_12(%arg0: i32) -> (i32, i32) {
    %c0_i32 = arith.constant 0 : i32
    %c0_i32_0 = arith.constant 0 : i32
    %c0_i32_1 = arith.constant 0 : i32
    return %c0_i32, %c0_i32_0 : i32, i32
  }
  func.func @transform_13(%arg0: i32) -> (i32, i32, i32) {
    %c0_i32 = arith.constant 0 : i32
    %c0_i32_0 = arith.constant 0 : i32
    %c0_i32_1 = arith.constant 0 : i32
    return %arg0, %c0_i32, %c0_i32_0 : i32, i32, i32
  }
  func.func @transform_14(%arg0: i32) -> (i32, i32, i32) {
    %c0_i32 = arith.constant 0 : i32
    %c0_i32_0 = arith.constant 0 : i32
    %c0_i32_1 = arith.constant 0 : i32
    return %arg0, %c0_i32, %c0_i32_0 : i32, i32, i32
  }
}

module attributes {stable_mosaic.version = 11 : i64} {
  func.func @_linear_kernel(%arg0: i32, %arg1: memref<16x32xf32, #tpu.memory_space<vmem>>, %arg2: memref<32x32xf32, #tpu.memory_space<vmem>>, %arg3: memref<1x32xf32, #tpu.memory_space<vmem>>, %arg4: memref<16x32xf32, #tpu.memory_space<vmem>>) attributes {dimension_semantics = [#tpu.dimension_semantics<arbitrary>], iteration_bounds = array<i64: 1>, scalar_prefetch = 0 : i64, scratch_operands = 0 : i64, tpu.core_type = #tpu.core_type<tc>, window_params = [{pipeline_mode = #tpu.pipeline_mode<synchronous>, transform_indices = @transform_0, window_bounds = array<i64: 16, 32>}, {pipeline_mode = #tpu.pipeline_mode<synchronous>, transform_indices = @transform_1, window_bounds = array<i64: 32, 32>}, {pipeline_mode = #tpu.pipeline_mode<synchronous>, transform_indices = @transform_2, window_bounds = array<i64: 1, 32>}, {pipeline_mode = #tpu.pipeline_mode<synchronous>, transform_indices = @transform_3, window_bounds = array<i64: 16, 32>}]} {
    %c0 = arith.constant 0 : index
    %c0_0 = arith.constant 0 : index
    %0 = vector.load %arg1[%c0, %c0_0] : memref<16x32xf32, #tpu.memory_space<vmem>>, vector<16x32xf32>
    %c0_1 = arith.constant 0 : index
    %c0_2 = arith.constant 0 : index
    %1 = vector.load %arg2[%c0_1, %c0_2] : memref<32x32xf32, #tpu.memory_space<vmem>>, vector<32x32xf32>
    %cst = arith.constant dense<0.000000e+00> : vector<16x32xf32>
    %2 = tpu.matmul %0, %1, %cst {dimension_numbers = #tpu.dot_dimension_numbers<[1], [0], [0], [1], [0, 0, 1, 1], [], []>} : vector<16x32xf32>, vector<32x32xf32>, vector<16x32xf32> -> vector<16x32xf32>
    %c0_3 = arith.constant 0 : index
    %c0_4 = arith.constant 0 : index
    %3 = vector.load %arg3[%c0_3, %c0_4] : memref<1x32xf32, #tpu.memory_space<vmem>>, vector<1x32xf32>
    %4 = vector.broadcast %3 : vector<1x32xf32> to vector<16x32xf32>
    %5 = arith.addf %2, %4 : vector<16x32xf32>
    %c0_5 = arith.constant 0 : index
    %c0_6 = arith.constant 0 : index
    %6 = vector.load %arg4[%c0_5, %c0_6] : memref<16x32xf32, #tpu.memory_space<vmem>>, vector<16x32xf32>
    tpu.vector_store %arg4[%c0_5, %c0_6], %5 {strides = array<i32>} : memref<16x32xf32, #tpu.memory_space<vmem>>, vector<16x32xf32>,
    return
  }
  func.func @transform_0(%arg0: i32) -> (i32, i32) {
    %c0_i32 = arith.constant 0 : i32
    %c0_i32_0 = arith.constant 0 : i32
    %c0_i32_1 = arith.constant 0 : i32
    return %c0_i32, %c0_i32_0 : i32, i32
  }
  func.func @transform_1(%arg0: i32) -> (i32, i32) {
    %c0_i32 = arith.constant 0 : i32
    %c0_i32_0 = arith.constant 0 : i32
    %c0_i32_1 = arith.constant 0 : i32
    return %c0_i32, %c0_i32_0 : i32, i32
  }
  func.func @transform_2(%arg0: i32) -> (i32, i32) {
    %c0_i32 = arith.constant 0 : i32
    %c0_i32_0 = arith.constant 0 : i32
    %c0_i32_1 = arith.constant 0 : i32
    return %c0_i32, %c0_i32_0 : i32, i32
  }
  func.func @transform_3(%arg0: i32) -> (i32, i32) {
    %c0_i32 = arith.constant 0 : i32
    %c0_i32_0 = arith.constant 0 : i32
    %c0_i32_1 = arith.constant 0 : i32
    return %c0_i32, %c0_i32_0 : i32, i32
  }
}

module attributes {stable_mosaic.version = 11 : i64} {
  func.func @_layernorm_kernel(%arg0: i32, %arg1: memref<64x8xf32, #tpu.memory_space<vmem>>, %arg2: memref<1x8xf32, #tpu.memory_space<vmem>>, %arg3: memref<1x8xf32, #tpu.memory_space<vmem>>, %arg4: memref<64x8xf32, #tpu.memory_space<vmem>>) attributes {dimension_semantics = [#tpu.dimension_semantics<arbitrary>], iteration_bounds = array<i64: 1>, scalar_prefetch = 0 : i64, scratch_operands = 0 : i64, tpu.core_type = #tpu.core_type<tc>, window_params = [{pipeline_mode = #tpu.pipeline_mode<synchronous>, transform_indices = @transform_0, window_bounds = array<i64: 64, 8>}, {pipeline_mode = #tpu.pipeline_mode<synchronous>, transform_indices = @transform_1, window_bounds = array<i64: 1, 8>}, {pipeline_mode = #tpu.pipeline_mode<synchronous>, transform_indices = @transform_2, window_bounds = array<i64: 1, 8>}, {pipeline_mode = #tpu.pipeline_mode<synchronous>, transform_indices = @transform_3, window_bounds = array<i64: 64, 8>}]} {
    %c0 = arith.constant 0 : index
    %c0_0 = arith.constant 0 : index
    %0 = vector.load %arg1[%c0, %c0_0] : memref<64x8xf32, #tpu.memory_space<vmem>>, vector<64x8xf32>
    %cst = arith.constant dense<0.000000e+00> : vector<64xf32>
    %1 = vector.multi_reduction <add>, %0, %cst [1] : vector<64x8xf32> to vector<64xf32>
    %2 = vector.shape_cast %1 : vector<64xf32> to vector<64x1xf32>
    %cst_1 = arith.constant 8.000000e+00 : f32
    %3 = vector.broadcast %cst_1 : f32 to vector<64x1xf32>
    %4 = arith.divf %2, %3 : vector<64x1xf32>
    %5 = vector.broadcast %4 : vector<64x1xf32> to vector<64x8xf32>
    %6 = arith.subf %0, %5 : vector<64x8xf32>
    %7 = arith.mulf %6, %6 : vector<64x8xf32>
    %cst_2 = arith.constant dense<0.000000e+00> : vector<64xf32>
    %8 = vector.multi_reduction <add>, %7, %cst_2 [1] : vector<64x8xf32> to vector<64xf32>
    %9 = vector.shape_cast %8 : vector<64xf32> to vector<64x1xf32>
    %cst_3 = arith.constant 8.000000e+00 : f32
    %10 = vector.broadcast %cst_3 : f32 to vector<64x1xf32>
    %11 = arith.divf %9, %10 : vector<64x1xf32>
    %12 = vector.broadcast %4 : vector<64x1xf32> to vector<64x8xf32>
    %13 = arith.subf %0, %12 : vector<64x8xf32>
    %cst_4 = arith.constant 9.99999997E-7 : f32
    %14 = vector.broadcast %cst_4 : f32 to vector<64x1xf32>
    %15 = arith.addf %11, %14 : vector<64x1xf32>
    %16 = math.sqrt %15 : vector<64x1xf32>
    %17 = vector.broadcast %16 : vector<64x1xf32> to vector<64x8xf32>
    %18 = arith.divf %13, %17 : vector<64x8xf32>
    %c0_5 = arith.constant 0 : index
    %c0_6 = arith.constant 0 : index
    %19 = vector.load %arg2[%c0_5, %c0_6] : memref<1x8xf32, #tpu.memory_space<vmem>>, vector<1x8xf32>
    %20 = vector.broadcast %19 : vector<1x8xf32> to vector<64x8xf32>
    %21 = arith.mulf %18, %20 : vector<64x8xf32>
    %c0_7 = arith.constant 0 : index
    %c0_8 = arith.constant 0 : index
    %22 = vector.load %arg3[%c0_7, %c0_8] : memref<1x8xf32, #tpu.memory_space<vmem>>, vector<1x8xf32>
    %23 = vector.broadcast %22 : vector<1x8xf32> to vector<64x8xf32>
    %24 = arith.addf %21, %23 : vector<64x8xf32>
    %c0_9 = arith.constant 0 : index
    %c0_10 = arith.constant 0 : index
    %25 = vector.load %arg4[%c0_9, %c0_10] : memref<64x8xf32, #tpu.memory_space<vmem>>, vector<64x8xf32>
    tpu.vector_store %arg4[%c0_9, %c0_10], %24 {strides = array<i32>} : memref<64x8xf32, #tpu.memory_space<vmem>>, vector<64x8xf32>,
    return
  }
  func.func @transform_0(%arg0: i32) -> (i32, i32) {
    %c0_i32 = arith.constant 0 : i32
    %c0_i32_0 = arith.constant 0 : i32
    %c0_i32_1 = arith.constant 0 : i32
    return %c0_i32, %c0_i32_0 : i32, i32
  }
  func.func @transform_1(%arg0: i32) -> (i32, i32) {
    %c0_i32 = arith.constant 0 : i32
    %c0_i32_0 = arith.constant 0 : i32
    %c0_i32_1 = arith.constant 0 : i32
    return %c0_i32, %c0_i32_0 : i32, i32
  }
  func.func @transform_2(%arg0: i32) -> (i32, i32) {
    %c0_i32 = arith.constant 0 : i32
    %c0_i32_0 = arith.constant 0 : i32
    %c0_i32_1 = arith.constant 0 : i32
    return %c0_i32, %c0_i32_0 : i32, i32
  }
  func.func @transform_3(%arg0: i32) -> (i32, i32) {
    %c0_i32 = arith.constant 0 : i32
    %c0_i32_0 = arith.constant 0 : i32
    %c0_i32_1 = arith.constant 0 : i32
    return %c0_i32, %c0_i32_0 : i32, i32
  }
}

module attributes {stable_mosaic.version = 11 : i64} {
  func.func @_linear_kernel(%arg0: i32, %arg1: memref<64x8xf32, #tpu.memory_space<vmem>>, %arg2: memref<8x16xf32, #tpu.memory_space<vmem>>, %arg3: memref<1x16xf32, #tpu.memory_space<vmem>>, %arg4: memref<64x16xf32, #tpu.memory_space<vmem>>) attributes {dimension_semantics = [#tpu.dimension_semantics<arbitrary>], iteration_bounds = array<i64: 1>, scalar_prefetch = 0 : i64, scratch_operands = 0 : i64, tpu.core_type = #tpu.core_type<tc>, window_params = [{pipeline_mode = #tpu.pipeline_mode<synchronous>, transform_indices = @transform_0, window_bounds = array<i64: 64, 8>}, {pipeline_mode = #tpu.pipeline_mode<synchronous>, transform_indices = @transform_1, window_bounds = array<i64: 8, 16>}, {pipeline_mode = #tpu.pipeline_mode<synchronous>, transform_indices = @transform_2, window_bounds = array<i64: 1, 16>}, {pipeline_mode = #tpu.pipeline_mode<synchronous>, transform_indices = @transform_3, window_bounds = array<i64: 64, 16>}]} {
    %c0 = arith.constant 0 : index
    %c0_0 = arith.constant 0 : index
    %0 = vector.load %arg1[%c0, %c0_0] : memref<64x8xf32, #tpu.memory_space<vmem>>, vector<64x8xf32>
    %c0_1 = arith.constant 0 : index
    %c0_2 = arith.constant 0 : index
    %1 = vector.load %arg2[%c0_1, %c0_2] : memref<8x16xf32, #tpu.memory_space<vmem>>, vector<8x16xf32>
    %cst = arith.constant dense<0.000000e+00> : vector<64x16xf32>
    %2 = tpu.matmul %0, %1, %cst {dimension_numbers = #tpu.dot_dimension_numbers<[1], [0], [0], [1], [0, 0, 1, 1], [], []>} : vector<64x8xf32>, vector<8x16xf32>, vector<64x16xf32> -> vector<64x16xf32>
    %c0_3 = arith.constant 0 : index
    %c0_4 = arith.constant 0 : index
    %3 = vector.load %arg3[%c0_3, %c0_4] : memref<1x16xf32, #tpu.memory_space<vmem>>, vector<1x16xf32>
    %4 = vector.broadcast %3 : vector<1x16xf32> to vector<64x16xf32>
    %5 = arith.addf %2, %4 : vector<64x16xf32>
    %c0_5 = arith.constant 0 : index
    %c0_6 = arith.constant 0 : index
    %6 = vector.load %arg4[%c0_5, %c0_6] : memref<64x16xf32, #tpu.memory_space<vmem>>, vector<64x16xf32>
    tpu.vector_store %arg4[%c0_5, %c0_6], %5 {strides = array<i32>} : memref<64x16xf32, #tpu.memory_space<vmem>>, vector<64x16xf32>,
    return
  }
  func.func @transform_0(%arg0: i32) -> (i32, i32) {
    %c0_i32 = arith.constant 0 : i32
    %c0_i32_0 = arith.constant 0 : i32
    %c0_i32_1 = arith.constant 0 : i32
    return %c0_i32, %c0_i32_0 : i32, i32
  }
  func.func @transform_1(%arg0: i32) -> (i32, i32) {
    %c0_i32 = arith.constant 0 : i32
    %c0_i32_0 = arith.constant 0 : i32
    %c0_i32_1 = arith.constant 0 : i32
    return %c0_i32, %c0_i32_0 : i32, i32
  }
  func.func @transform_2(%arg0: i32) -> (i32, i32) {
    %c0_i32 = arith.constant 0 : i32
    %c0_i32_0 = arith.constant 0 : i32
    %c0_i32_1 = arith.constant 0 : i32
    return %c0_i32, %c0_i32_0 : i32, i32
  }
  func.func @transform_3(%arg0: i32) -> (i32, i32) {
    %c0_i32 = arith.constant 0 : i32
    %c0_i32_0 = arith.constant 0 : i32
    %c0_i32_1 = arith.constant 0 : i32
    return %c0_i32, %c0_i32_0 : i32, i32
  }
}

module attributes {stable_mosaic.version = 11 : i64} {
  func.func @_mlp3_kernel(%arg0: i32, %arg1: memref<1x1x32xf32, #tpu.memory_space<vmem>>, %arg2: memref<1x32x32xf32, #tpu.memory_space<vmem>>, %arg3: memref<1x1x32xf32, #tpu.memory_space<vmem>>, %arg4: memref<1x32x32xf32, #tpu.memory_space<vmem>>, %arg5: memref<1x1x32xf32, #tpu.memory_space<vmem>>, %arg6: memref<1x32x4xf32, #tpu.memory_space<vmem>>, %arg7: memref<1x1x4xf32, #tpu.memory_space<vmem>>, %arg8: memref<1x1x4xf32, #tpu.memory_space<vmem>>) attributes {dimension_semantics = [#tpu.dimension_semantics<parallel>], iteration_bounds = array<i64: 4>, scalar_prefetch = 0 : i64, scratch_operands = 0 : i64, tpu.core_type = #tpu.core_type<tc>, window_params = [{transform_indices = @transform_0, window_bounds = array<i64: 1, 1, 32>}, {transform_indices = @transform_1, window_bounds = array<i64: 1, 32, 32>}, {transform_indices = @transform_2, window_bounds = array<i64: 1, 1, 32>}, {transform_indices = @transform_3, window_bounds = array<i64: 1, 32, 32>}, {transform_indices = @transform_4, window_bounds = array<i64: 1, 1, 32>}, {transform_indices = @transform_5, window_bounds = array<i64: 1, 32, 4>}, {transform_indices = @transform_6, window_bounds = array<i64: 1, 1, 4>}, {transform_indices = @transform_7, window_bounds = array<i64: 1, 1, 4>}]} {
    %c0 = arith.constant 0 : index
    %c0_0 = arith.constant 0 : index
    %c0_1 = arith.constant 0 : index
    %0 = vector.load %arg1[%c0, %c0_0, %c0_1] : memref<1x1x32xf32, #tpu.memory_space<vmem>>, vector<1x1x32xf32>
    %1 = vector.shape_cast %0 : vector<1x1x32xf32> to vector<1x32xf32>
    %c0_2 = arith.constant 0 : index
    %c0_3 = arith.constant 0 : index
    %c0_4 = arith.constant 0 : index
    %2 = vector.load %arg2[%c0_2, %c0_3, %c0_4] : memref<1x32x32xf32, #tpu.memory_space<vmem>>, vector<1x32x32xf32>
    %3 = vector.shape_cast %2 : vector<1x32x32xf32> to vector<32x32xf32>
    %cst = arith.constant dense<0.000000e+00> : vector<1x32xf32>
    %4 = tpu.matmul %1, %3, %cst {dimension_numbers = #tpu.dot_dimension_numbers<[1], [0], [0], [1], [0, 0, 1, 1], [], []>} : vector<1x32xf32>, vector<32x32xf32>, vector<1x32xf32> -> vector<1x32xf32>
    %c0_5 = arith.constant 0 : index
    %c0_6 = arith.constant 0 : index
    %c0_7 = arith.constant 0 : index
    %5 = vector.load %arg3[%c0_5, %c0_6, %c0_7] : memref<1x1x32xf32, #tpu.memory_space<vmem>>, vector<1x1x32xf32>
    %6 = vector.shape_cast %5 : vector<1x1x32xf32> to vector<1x32xf32>
    %7 = arith.addf %4, %6 : vector<1x32xf32>
    %cst_8 = arith.constant 0.000000e+00 : f32
    %8 = vector.broadcast %cst_8 : f32 to vector<1x32xf32>
    %9 = arith.maximumf %7, %8 : vector<1x32xf32>
    %c0_9 = arith.constant 0 : index
    %c0_10 = arith.constant 0 : index
    %c0_11 = arith.constant 0 : index
    %10 = vector.load %arg4[%c0_9, %c0_10, %c0_11] : memref<1x32x32xf32, #tpu.memory_space<vmem>>, vector<1x32x32xf32>
    %11 = vector.shape_cast %10 : vector<1x32x32xf32> to vector<32x32xf32>
    %cst_12 = arith.constant dense<0.000000e+00> : vector<1x32xf32>
    %12 = tpu.matmul %9, %11, %cst_12 {dimension_numbers = #tpu.dot_dimension_numbers<[1], [0], [0], [1], [0, 0, 1, 1], [], []>} : vector<1x32xf32>, vector<32x32xf32>, vector<1x32xf32> -> vector<1x32xf32>
    %c0_13 = arith.constant 0 : index
    %c0_14 = arith.constant 0 : index
    %c0_15 = arith.constant 0 : index
    %13 = vector.load %arg5[%c0_13, %c0_14, %c0_15] : memref<1x1x32xf32, #tpu.memory_space<vmem>>, vector<1x1x32xf32>
    %14 = vector.shape_cast %13 : vector<1x1x32xf32> to vector<1x32xf32>
    %15 = arith.addf %12, %14 : vector<1x32xf32>
    %cst_16 = arith.constant 0.000000e+00 : f32
    %16 = vector.broadcast %cst_16 : f32 to vector<1x32xf32>
    %17 = arith.maximumf %15, %16 : vector<1x32xf32>
    %c0_17 = arith.constant 0 : index
    %c0_18 = arith.constant 0 : index
    %c0_19 = arith.constant 0 : index
    %18 = vector.load %arg6[%c0_17, %c0_18, %c0_19] : memref<1x32x4xf32, #tpu.memory_space<vmem>>, vector<1x32x4xf32>
    %19 = vector.shape_cast %18 : vector<1x32x4xf32> to vector<32x4xf32>
    %cst_20 = arith.constant dense<0.000000e+00> : vector<1x4xf32>
    %20 = tpu.matmul %17, %19, %cst_20 {dimension_numbers = #tpu.dot_dimension_numbers<[1], [0], [0], [1], [0, 0, 1, 1], [], []>} : vector<1x32xf32>, vector<32x4xf32>, vector<1x4xf32> -> vector<1x4xf32>
    %c0_21 = arith.constant 0 : index
    %c0_22 = arith.constant 0 : index
    %c0_23 = arith.constant 0 : index
    %21 = vector.load %arg7[%c0_21, %c0_22, %c0_23] : memref<1x1x4xf32, #tpu.memory_space<vmem>>, vector<1x1x4xf32>
    %22 = vector.shape_cast %21 : vector<1x1x4xf32> to vector<1x4xf32>
    %23 = arith.addf %20, %22 : vector<1x4xf32>
    %c0_24 = arith.constant 0 : index
    %c0_25 = arith.constant 0 : index
    %c0_26 = arith.constant 0 : index
    %24 = vector.load %arg8[%c0_24, %c0_25, %c0_26] : memref<1x1x4xf32, #tpu.memory_space<vmem>>, vector<1x1x4xf32>
    %25 = vector.shape_cast %24 : vector<1x1x4xf32> to vector<1x4xf32>
    %26 = vector.shape_cast %23 : vector<1x4xf32> to vector<1x1x4xf32>
    tpu.vector_store %arg8[%c0_24, %c0_25, %c0_26], %26 {strides = array<i32>} : memref<1x1x4xf32, #tpu.memory_space<vmem>>, vector<1x1x4xf32>,
    return
  }
  func.func @transform_0(%arg0: i32) -> (i32, i32, i32) {
    %c0_i32 = arith.constant 0 : i32
    %c0_i32_0 = arith.constant 0 : i32
    %c0_i32_1 = arith.constant 0 : i32
    return %arg0, %c0_i32, %c0_i32_0 : i32, i32, i32
  }
  func.func @transform_1(%arg0: i32) -> (i32, i32, i32) {
    %c0_i32 = arith.constant 0 : i32
    %c0_i32_0 = arith.constant 0 : i32
    %c0_i32_1 = arith.constant 0 : i32
    return %arg0, %c0_i32, %c0_i32_0 : i32, i32, i32
  }
  func.func @transform_2(%arg0: i32) -> (i32, i32, i32) {
    %c0_i32 = arith.constant 0 : i32
    %c0_i32_0 = arith.constant 0 : i32
    %c0_i32_1 = arith.constant 0 : i32
    return %arg0, %c0_i32, %c0_i32_0 : i32, i32, i32
  }
  func.func @transform_3(%arg0: i32) -> (i32, i32, i32) {
    %c0_i32 = arith.constant 0 : i32
    %c0_i32_0 = arith.constant 0 : i32
    %c0_i32_1 = arith.constant 0 : i32
    return %arg0, %c0_i32, %c0_i32_0 : i32, i32, i32
  }
  func.func @transform_4(%arg0: i32) -> (i32, i32, i32) {
    %c0_i32 = arith.constant 0 : i32
    %c0_i32_0 = arith.constant 0 : i32
    %c0_i32_1 = arith.constant 0 : i32
    return %arg0, %c0_i32, %c0_i32_0 : i32, i32, i32
  }
  func.func @transform_5(%arg0: i32) -> (i32, i32, i32) {
    %c0_i32 = arith.constant 0 : i32
    %c0_i32_0 = arith.constant 0 : i32
    %c0_i32_1 = arith.constant 0 : i32
    return %arg0, %c0_i32, %c0_i32_0 : i32, i32, i32
  }
  func.func @transform_6(%arg0: i32) -> (i32, i32, i32) {
    %c0_i32 = arith.constant 0 : i32
    %c0_i32_0 = arith.constant 0 : i32
    %c0_i32_1 = arith.constant 0 : i32
    return %arg0, %c0_i32, %c0_i32_0 : i32, i32, i32
  }
  func.func @transform_7(%arg0: i32) -> (i32, i32, i32) {
    %c0_i32 = arith.constant 0 : i32
    %c0_i32_0 = arith.constant 0 : i32
    %c0_i32_1 = arith.constant 0 : i32
    return %arg0, %c0_i32, %c0_i32_0 : i32, i32, i32
  }
}

module attributes {stable_mosaic.version = 11 : i64} {
  func.func @_bmm_kernel(%arg0: i32, %arg1: memref<1x4x4xf32, #tpu.memory_space<vmem>>, %arg2: memref<1x4x256xf32, #tpu.memory_space<vmem>>, %arg3: memref<1x4x256xf32, #tpu.memory_space<vmem>>) attributes {dimension_semantics = [#tpu.dimension_semantics<parallel>], iteration_bounds = array<i64: 1>, scalar_prefetch = 0 : i64, scratch_operands = 0 : i64, tpu.core_type = #tpu.core_type<tc>, window_params = [{transform_indices = @transform_0, window_bounds = array<i64: 1, 4, 4>}, {transform_indices = @transform_1, window_bounds = array<i64: 1, 4, 256>}, {transform_indices = @transform_2, window_bounds = array<i64: 1, 4, 256>}]} {
    %c0 = arith.constant 0 : index
    %c0_0 = arith.constant 0 : index
    %c0_1 = arith.constant 0 : index
    %0 = vector.load %arg1[%c0, %c0_0, %c0_1] : memref<1x4x4xf32, #tpu.memory_space<vmem>>, vector<1x4x4xf32>
    %1 = vector.shape_cast %0 : vector<1x4x4xf32> to vector<4x4xf32>
    %c0_2 = arith.constant 0 : index
    %c0_3 = arith.constant 0 : index
    %c0_4 = arith.constant 0 : index
    %2 = vector.load %arg2[%c0_2, %c0_3, %c0_4] : memref<1x4x256xf32, #tpu.memory_space<vmem>>, vector<1x4x256xf32>
    %3 = vector.shape_cast %2 : vector<1x4x256xf32> to vector<4x256xf32>
    %cst = arith.constant dense<0.000000e+00> : vector<4x256xf32>
    %4 = tpu.matmul %1, %3, %cst {dimension_numbers = #tpu.dot_dimension_numbers<[1], [0], [0], [1], [0, 0, 1, 1], [], []>} : vector<4x4xf32>, vector<4x256xf32>, vector<4x256xf32> -> vector<4x256xf32>
    %c0_5 = arith.constant 0 : index
    %c0_6 = arith.constant 0 : index
    %c0_7 = arith.constant 0 : index
    %5 = vector.load %arg3[%c0_5, %c0_6, %c0_7] : memref<1x4x256xf32, #tpu.memory_space<vmem>>, vector<1x4x256xf32>
    %6 = vector.shape_cast %5 : vector<1x4x256xf32> to vector<4x256xf32>
    %7 = vector.shape_cast %4 : vector<4x256xf32> to vector<1x4x256xf32>
    tpu.vector_store %arg3[%c0_5, %c0_6, %c0_7], %7 {strides = array<i32>} : memref<1x4x256xf32, #tpu.memory_space<vmem>>, vector<1x4x256xf32>,
    return
  }
  func.func @transform_0(%arg0: i32) -> (i32, i32, i32) {
    %c0_i32 = arith.constant 0 : i32
    %c0_i32_0 = arith.constant 0 : i32
    %c0_i32_1 = arith.constant 0 : i32
    return %arg0, %c0_i32, %c0_i32_0 : i32, i32, i32
  }
  func.func @transform_1(%arg0: i32) -> (i32, i32, i32) {
    %c0_i32 = arith.constant 0 : i32
    %c0_i32_0 = arith.constant 0 : i32
    %c0_i32_1 = arith.constant 0 : i32
    return %arg0, %c0_i32, %c0_i32_0 : i32, i32, i32
  }
  func.func @transform_2(%arg0: i32) -> (i32, i32, i32) {
    %c0_i32 = arith.constant 0 : i32
    %c0_i32_0 = arith.constant 0 : i32
    %c0_i32_1 = arith.constant 0 : i32
    return %arg0, %c0_i32, %c0_i32_0 : i32, i32, i32
  }
}

module attributes {stable_mosaic.version = 11 : i64} {
  func.func @_class_conv_kernel(%arg0: i32, %arg1: memref<1x4096xf32, #tpu.memory_space<vmem>>, %arg2: memref<5x1xf32, #tpu.memory_space<vmem>>, %arg3: memref<5x1xf32, #tpu.memory_space<vmem>>, %arg4: memref<5x4096xf32, #tpu.memory_space<vmem>>) attributes {dimension_semantics = [#tpu.dimension_semantics<arbitrary>], iteration_bounds = array<i64: 1>, scalar_prefetch = 0 : i64, scratch_operands = 0 : i64, tpu.core_type = #tpu.core_type<tc>, window_params = [{pipeline_mode = #tpu.pipeline_mode<synchronous>, transform_indices = @transform_0, window_bounds = array<i64: 1, 4096>}, {pipeline_mode = #tpu.pipeline_mode<synchronous>, transform_indices = @transform_1, window_bounds = array<i64: 5, 1>}, {pipeline_mode = #tpu.pipeline_mode<synchronous>, transform_indices = @transform_2, window_bounds = array<i64: 5, 1>}, {pipeline_mode = #tpu.pipeline_mode<synchronous>, transform_indices = @transform_3, window_bounds = array<i64: 5, 4096>}]} {
    %c0 = arith.constant 0 : index
    %c0_0 = arith.constant 0 : index
    %0 = vector.load %arg1[%c0, %c0_0] : memref<1x4096xf32, #tpu.memory_space<vmem>>, vector<1x4096xf32>
    %c0_1 = arith.constant 0 : index
    %c0_2 = arith.constant 0 : index
    %1 = vector.load %arg2[%c0_1, %c0_2] : memref<5x1xf32, #tpu.memory_space<vmem>>, vector<5x1xf32>
    %2 = vector.broadcast %0 : vector<1x4096xf32> to vector<5x4096xf32>
    %3 = vector.broadcast %1 : vector<5x1xf32> to vector<5x4096xf32>
    %4 = arith.mulf %2, %3 : vector<5x4096xf32>
    %c0_3 = arith.constant 0 : index
    %c0_4 = arith.constant 0 : index
    %5 = vector.load %arg3[%c0_3, %c0_4] : memref<5x1xf32, #tpu.memory_space<vmem>>, vector<5x1xf32>
    %6 = vector.broadcast %5 : vector<5x1xf32> to vector<5x4096xf32>
    %7 = arith.addf %4, %6 : vector<5x4096xf32>
    %c0_5 = arith.constant 0 : index
    %c0_6 = arith.constant 0 : index
    %8 = vector.load %arg4[%c0_5, %c0_6] : memref<5x4096xf32, #tpu.memory_space<vmem>>, vector<5x4096xf32>
    tpu.vector_store %arg4[%c0_5, %c0_6], %7 {strides = array<i32>} : memref<5x4096xf32, #tpu.memory_space<vmem>>, vector<5x4096xf32>,
    return
  }
  func.func @transform_0(%arg0: i32) -> (i32, i32) {
    %c0_i32 = arith.constant 0 : i32
    %c0_i32_0 = arith.constant 0 : i32
    %c0_i32_1 = arith.constant 0 : i32
    return %c0_i32, %c0_i32_0 : i32, i32
  }
  func.func @transform_1(%arg0: i32) -> (i32, i32) {
    %c0_i32 = arith.constant 0 : i32
    %c0_i32_0 = arith.constant 0 : i32
    %c0_i32_1 = arith.constant 0 : i32
    return %c0_i32, %c0_i32_0 : i32, i32
  }
  func.func @transform_2(%arg0: i32) -> (i32, i32) {
    %c0_i32 = arith.constant 0 : i32
    %c0_i32_0 = arith.constant 0 : i32
    %c0_i32_1 = arith.constant 0 : i32
    return %c0_i32, %c0_i32_0 : i32, i32
  }
  func.func @transform_3(%arg0: i32) -> (i32, i32) {
    %c0_i32 = arith.constant 0 : i32
    %c0_i32_0 = arith.constant 0 : i32
    %c0_i32_1 = arith.constant 0 : i32
    return %c0_i32, %c0_i32_0 : i32, i32
  }
}

</mosaic_0001>

<bundles_post_ra>
// kernel: medsam_forward.28
= control target key start
LH: loop header
LB: loop body
LE: loop exit
PB: predicated region body
PF: predicated region fallthrough
CT: control target
= control target key end

     0   :  { %vm361_vm0 = vcmask 261120   ;;  %s959_s1 = inlined_call_operand.vmem [shape: f32[768,32], index: 1, kind: input, shape index: {}]   ;;  %s960_s0 = inlined_call_operand.vmem [shape: f32[16,768], index: 0, kind: input, shape index: {}]   ;;  %s961_s2 = inlined_call_operand.vmem [shape: f32[1,32], index: 2, kind: input, shape index: {}]   ;;  %s962_s3 = inlined_call_operand.vmem [shape: f32[16,32], index: 3, kind: input, shape index: {}]   ;;  %s963_s4 = inlined_call_operand.vmem [shape: f32[16,32], index: 4, kind: output, shape index: {}]  }
   0x1   :  { %v45_v0 = vld [vmem:[%s959_s1 + $0x80] sm:$0xff]  ;;  %v46_v1 = vld [vmem:[%s959_s1 + $0x88] sm:$0xff]  ;;  %v47_v11 = vld [vmem:[%s959_s1 + $0x90] sm:$0xff] }
   0x2   :  { %v77_v2 = vld [vmem:[%s959_s1 + $0x180] sm:$0xff]  ;;  %v483_v3 = vpack.c.bf16 %v46_v1, %v45_v0  ;;  %v78_v4 = vld [vmem:[%s959_s1 + $0x188] sm:$0xff]  ;;  %v48_v13 = vld [vmem:[%s959_s1 + $0x98] sm:$0xff] }
   0x3   :  { %v29_v5 = vld [vmem:[%s959_s1] sm:$0xff]  ;;  %v30_v6 = vld [vmem:[%s959_s1 + $0x8] sm:$0xff]  ;;  %v515_v7 = vpack.c.bf16 %v78_v4, %v77_v2  ;;  %v79_v14 = vld [vmem:[%s959_s1 + $0x190] sm:$0xff]  ;;  %v487_v16 = vpack.c.bf16 %v48_v13, %v47_v11 }
   0x4   :  { %v485_v8 = vpack.c.bf16 %v30_v6, %v29_v5  ;;  %v61_v9 = vld [vmem:[%s959_s1 + $0x100] sm:$0xff]  ;;  %v62_v10 = vld [vmem:[%s959_s1 + $0x108] sm:$0xff]  ;;  %484 = vmatprep.subr.bf16.mxu0 %v483_v3  ;;  %v80_v15 = vld [vmem:[%s959_s1 + $0x198] sm:$0xff] }
   0x5   :  { %v517_v12 = vpack.c.bf16 %v62_v10, %v61_v9  ;;  %516 = vmatprep.subr.bf16.mxu1 %v515_v7  ;;  %v519_v17 = vpack.c.bf16 %v80_v15, %v79_v14  ;;  %v31_v18 = vld [vmem:[%s959_s1 + $0x10] sm:$0xff]  ;;  %v32_v19 = vld [vmem:[%s959_s1 + $0x18] sm:$0xff]  ;;  %v49_v23 = vld [vmem:[%s959_s1 + $0xa0] sm:$0xff] }
   0x6   :  { %486 = vmatpush3.bf16.msra.mxu0 %v485_v8  ;;  %v63_v20 = vld [vmem:[%s959_s1 + $0x110] sm:$0xff]  ;;  %v489_v21 = vpack.c.bf16 %v32_v19, %v31_v18  ;;  %v64_v22 = vld [vmem:[%s959_s1 + $0x118] sm:$0xff]  ;;  %v50_v24 = vld [vmem:[%s959_s1 + $0xa8] sm:$0xff] }
   0x7   :  { %518 = vmatpush3.bf16.msra.mxu1 %v517_v12  ;;  %488 = vmatprep.subr.bf16.mxu0 %v487_v16  ;;  %v521_v25 = vpack.c.bf16 %v64_v22, %v63_v20  ;;  %v491_v26 = vpack.c.bf16 %v50_v24, %v49_v23  ;;  %v81_v27 = vld [vmem:[%s959_s1 + $0x1a0] sm:$0xff]  ;;  %v82_v28 = vld [vmem:[%s959_s1 + $0x1a8] sm:$0xff]  ;;  %v51_v35 = vld [vmem:[%s959_s1 + $0xb0] sm:$0xff] }
   0x8   :  { %520 = vmatprep.subr.bf16.mxu1 %v519_v17  ;;  %v33_v29 = vld [vmem:[%s959_s1 + $0x20] sm:$0xff]  ;;  %v523_v30 = vpack.c.bf16 %v82_v28, %v81_v27  ;;  %v34_v31 = vld [vmem:[%s959_s1 + $0x28] sm:$0xff]  ;;  %v52_v36 = vld [vmem:[%s959_s1 + $0xb8] sm:$0xff] }
   0x9   :  { %v65_v32 = vld [vmem:[%s959_s1 + $0x120] sm:$0xff]  ;;  %v66_v33 = vld [vmem:[%s959_s1 + $0x128] sm:$0xff]  ;;  %v493_v34 = vpack.c.bf16 %v34_v31, %v33_v29  ;;  %v83_v37 = vld [vmem:[%s959_s1 + $0x1b0] sm:$0xff]  ;;  %v495_v39 = vpack.c.bf16 %v52_v36, %v51_v35 }
   0xa   :  { %490 = vmatpush3.bf16.msra.mxu0 %v489_v21  ;;  %v525_v38 = vpack.c.bf16 %v66_v33, %v65_v32  ;;  %v84_v40 = vld [vmem:[%s959_s1 + $0x1b8] sm:$0xff]  ;;  %v35_v41 = vld [vmem:[%s959_s1 + $0x30] sm:$0xff]  ;;  %v53_v46 = vld [vmem:[%s959_s1 + $0xc0] sm:$0xff] }
   0xb   :  { %522 = vmatpush3.bf16.msra.mxu1 %v521_v25  ;;  %492 = vmatprep.subr.bf16.mxu0 %v491_v26  ;;  %v36_v42 = vld [vmem:[%s959_s1 + $0x38] sm:$0xff]  ;;  %v527_v43 = vpack.c.bf16 %v84_v40, %v83_v37  ;;  %v67_v44 = vld [vmem:[%s959_s1 + $0x130] sm:$0xff]  ;;  %v54_v47 = vld [vmem:[%s959_s1 + $0xc8] sm:$0xff] }
   0xc   :  { %524 = vmatprep.subr.bf16.mxu1 %v523_v30  ;;  %v68_v45 = vld [vmem:[%s959_s1 + $0x138] sm:$0xff]  ;;  %v85_v48 = vld [vmem:[%s959_s1 + $0x1c0] sm:$0xff]  ;;  %v86_v49 = vld [vmem:[%s959_s1 + $0x1c8] sm:$0xff]  ;;  %v497_v50 = vpack.c.bf16 %v36_v42, %v35_v41  ;;  %v499_v52 = vpack.c.bf16 %v54_v47, %v53_v46 }
   0xd   :  { %v529_v51 = vpack.c.bf16 %v68_v45, %v67_v44  ;;  %v37_v53 = vld [vmem:[%s959_s1 + $0x40] sm:$0xff]  ;;  %v38_v54 = vld [vmem:[%s959_s1 + $0x48] sm:$0xff]  ;;  %v531_v56 = vpack.c.bf16 %v86_v49, %v85_v48  ;;  %v55_v58 = vld [vmem:[%s959_s1 + $0xd0] sm:$0xff] }
   0xe   :  { %494 = vmatpush3.bf16.msra.mxu0 %v493_v34  ;;  %v69_v55 = vld [vmem:[%s959_s1 + $0x140] sm:$0xff]  ;;  %v70_v57 = vld [vmem:[%s959_s1 + $0x148] sm:$0xff]  ;;  %v56_v59 = vld [vmem:[%s959_s1 + $0xd8] sm:$0xff]  ;;  %v501_v62 = vpack.c.bf16 %v38_v54, %v37_v53 }
   0xf   :  { %526 = vmatpush3.bf16.msra.mxu1 %v525_v38  ;;  %496 = vmatprep.subr.bf16.mxu0 %v495_v39  ;;  %v87_v60 = vld [vmem:[%s959_s1 + $0x1d0] sm:$0xff]  ;;  %v88_v61 = vld [vmem:[%s959_s1 + $0x1d8] sm:$0xff]  ;;  %v533_v63 = vpack.c.bf16 %v70_v57, %v69_v55  ;;  %v503_v0 = vpack.c.bf16 %v56_v59, %v55_v58  ;;  %v57_v6 = vld [vmem:[%s959_s1 + $0xe0] sm:$0xff] }
  0x10   :  { %528 = vmatprep.subr.bf16.mxu1 %v527_v43  ;;  %v39_v1 = vld [vmem:[%s959_s1 + $0x50] sm:$0xff]  ;;  %v40_v2 = vld [vmem:[%s959_s1 + $0x58] sm:$0xff]  ;;  %v535_v4 = vpack.c.bf16 %v88_v61, %v87_v60  ;;  %v58_v7 = vld [vmem:[%s959_s1 + $0xe8] sm:$0xff] }
  0x11   :  { %v71_v3 = vld [vmem:[%s959_s1 + $0x150] sm:$0xff]  ;;  %v72_v5 = vld [vmem:[%s959_s1 + $0x158] sm:$0xff]  ;;  %v89_v8 = vld [vmem:[%s959_s1 + $0x1e0] sm:$0xff]  ;;  %v505_v10 = vpack.c.bf16 %v40_v2, %v39_v1  ;;  %v507_v14 = vpack.c.bf16 %v58_v7, %v57_v6 }
  0x12   :  { %498 = vmatpush3.bf16.msra.mxu0 %v497_v50  ;;  %v90_v9 = vld [vmem:[%s959_s1 + $0x1e8] sm:$0xff]  ;;  %v41_v11 = vld [vmem:[%s959_s1 + $0x60] sm:$0xff]  ;;  %v537_v13 = vpack.c.bf16 %v72_v5, %v71_v3  ;;  %v20_v17 = vld [vmem:[%s960_s0 + $0x18] sm:$0xff] }
  0x13   :  { %530 = vmatpush3.bf16.msra.mxu1 %v529_v51  ;;  %500 = vmatprep.subr.bf16.mxu0 %v499_v52  ;;  %v42_v12 = vld [vmem:[%s959_s1 + $0x68] sm:$0xff]  ;;  %v73_v15 = vld [vmem:[%s959_s1 + $0x160] sm:$0xff]  ;;  %v539_v18 = vpack.c.bf16 %v90_v9, %v89_v8  ;;  %v59_v20 = vld [vmem:[%s959_s1 + $0xf0] sm:$0xff] }
  0x14   :  { %532 = vmatprep.subr.bf16.mxu1 %v531_v56  ;;  %v18_v16 = vld [vmem:[%s960_s0 + $0x8] sm:$0xff]  ;;  %v60_v21 = vld [vmem:[%s959_s1 + $0xf8] sm:$0xff]  ;;  %v91_v22 = vld [vmem:[%s959_s1 + $0x1f0] sm:$0xff]  ;;  %271 = vmatprep.mubr.f32.mxu1 %v20_v17  ;;  %v509_v24 = vpack.c.bf16 %v42_v12, %v41_v11 }
  0x15   :  { %v74_v19 = vld [vmem:[%s959_s1 + $0x168] sm:$0xff]  ;;  %196 = vmatprep.mubr.f32.mxu0 %v18_v16  ;;  %v92_v23 = vld [vmem:[%s959_s1 + $0x1f8] sm:$0xff]  ;;  %v511_v26 = vpack.c.bf16 %v60_v21, %v59_v20  ;;  %v43_v27 = vld [vmem:[%s959_s1 + $0x70] sm:$0xff] }
  0x16   :  { %502 = vmatpush3.bf16.msra.mxu0 %v501_v62  ;;  %v541_v25 = vpack.c.bf16 %v74_v19, %v73_v15  ;;  %v44_v28 = vld [vmem:[%s959_s1 + $0x78] sm:$0xff]  ;;  %v75_v29 = vld [vmem:[%s959_s1 + $0x170] sm:$0xff]  ;;  %v543_v30 = vpack.c.bf16 %v92_v23, %v91_v22  ;;  %v109_v32 = vld [vmem:[%s959_s1 + $0x280] sm:$0xff] }
  0x17   :  { %534 = vmatpush3.bf16.msra.mxu1 %v533_v63  ;;  %504 = vmatprep.subr.bf16.mxu0 %v503_v0  ;;  %v76_v31 = vld [vmem:[%s959_s1 + $0x178] sm:$0xff]  ;;  %v110_v33 = vld [vmem:[%s959_s1 + $0x288] sm:$0xff]  ;;  %v513_v34 = vpack.c.bf16 %v44_v28, %v43_v27  ;;  %v93_v37 = vld [vmem:[%s959_s1 + $0x200] sm:$0xff] }
  0x18   :  { %536 = vmatprep.subr.bf16.mxu1 %v535_v4  ;;  %v545_v35 = vpack.c.bf16 %v76_v31, %v75_v29  ;;  %v547_v36 = vpack.c.bf16 %v110_v33, %v109_v32  ;;  %v94_v38 = vld [vmem:[%s959_s1 + $0x208] sm:$0xff]  ;;  %v111_v39 = vld [vmem:[%s959_s1 + $0x290] sm:$0xff]  ;;  %v112_v40 = vld [vmem:[%s959_s1 + $0x298] sm:$0xff] }
  0x19   :  { %v17_v41 = vld [vmem:[%s960_s0] sm:$0xff]  ;;  %v549_v42 = vpack.c.bf16 %v94_v38, %v93_v37  ;;  %v19_v43 = vld [vmem:[%s960_s0 + $0x10] sm:$0xff]  ;;  %v551_v44 = vpack.c.bf16 %v112_v40, %v111_v39  ;;  %v96_v46 = vld [vmem:[%s959_s1 + $0x218] sm:$0xff] }
  0x1a   :  { %506 = vmatpush3.bf16.msra.mxu0 %v505_v10  ;;  %v95_v45 = vld [vmem:[%s959_s1 + $0x210] sm:$0xff]  ;;  %v113_v47 = vld [vmem:[%s959_s1 + $0x2a0] sm:$0xff]  ;;  %v114_v48 = vld [vmem:[%s959_s1 + $0x2a8] sm:$0xff] }
  0x1b   :  { %538 = vmatpush3.bf16.msra.mxu1 %v537_v13  ;;  %508 = vmatprep.subr.bf16.mxu0 %v507_v14  ;;  %v24_v49 = vld [vmem:[%s960_s0 + $0x38] sm:$0xff]  ;;  %v553_v50 = vpack.c.bf16 %v96_v46, %v95_v45  ;;  %v23_v51 = vld [vmem:[%s960_s0 + $0x30] sm:$0xff]  ;;  %v26_v52 = vld [vmem:[%s960_s0 + $0x48] sm:$0xff]  ;;  %v555_v53 = vpack.c.bf16 %v114_v48, %v113_v47 }
  0x1c   :  { %540 = vmatprep.subr.bf16.mxu1 %v539_v18  ;;  %v97_v54 = vld [vmem:[%s959_s1 + $0x220] sm:$0xff]  ;;  %v98_v55 = vld [vmem:[%s959_s1 + $0x228] sm:$0xff]  ;;  %v115_v57 = vld [vmem:[%s959_s1 + $0x2b0] sm:$0xff] }
  0x1d   :  { %v25_v56 = vld [vmem:[%s960_s0 + $0x40] sm:$0xff]  ;;  %v116_v58 = vld [vmem:[%s959_s1 + $0x2b8] sm:$0xff]  ;;  %v22_v59 = vld [vmem:[%s960_s0 + $0x28] sm:$0xff]  ;;  %v557_v60 = vpack.c.bf16 %v98_v55, %v97_v54 }
  0x1e   :  { %510 = vmatpush3.bf16.msra.mxu0 %v509_v24  ;;  %v28_v61 = vld [vmem:[%s960_s0 + $0x58] sm:$0xff]  ;;  %v559_v62 = vpack.c.bf16 %v116_v58, %v115_v57  ;;  %v99_v63 = vld [vmem:[%s959_s1 + $0x230] sm:$0xff]  ;;  %v117_v1 = vld [vmem:[%s959_s1 + $0x2c0] sm:$0xff] }
  0x1f   :  { %542 = vmatpush3.bf16.msra.mxu1 %v541_v25  ;;  %512 = vmatprep.subr.bf16.mxu0 %v511_v26  ;;  %v100_v0 = vld [vmem:[%s959_s1 + $0x238] sm:$0xff]  ;;  %v118_v2 = vld [vmem:[%s959_s1 + $0x2c8] sm:$0xff]  ;;  %v101_v5 = vld [vmem:[%s959_s1 + $0x240] sm:$0xff] }
  0x20   :  { %544 = vmatprep.subr.bf16.mxu1 %v543_v30  ;;  %v561_v3 = vpack.c.bf16 %v100_v0, %v99_v63  ;;  %v563_v4 = vpack.c.bf16 %v118_v2, %v117_v1  ;;  %v102_v6 = vld [vmem:[%s959_s1 + $0x248] sm:$0xff]  ;;  %v119_v7 = vld [vmem:[%s959_s1 + $0x2d0] sm:$0xff]  ;;  %v120_v8 = vld [vmem:[%s959_s1 + $0x2d8] sm:$0xff] }
  0x21   :  { %v565_v9 = vpack.c.bf16 %v102_v6, %v101_v5  ;;  %v567_v10 = vpack.c.bf16 %v120_v8, %v119_v7  ;;  %v103_v11 = vld [vmem:[%s959_s1 + $0x250] sm:$0xff]  ;;  %v104_v12 = vld [vmem:[%s959_s1 + $0x258] sm:$0xff]  ;;  %v121_v13 = vld [vmem:[%s959_s1 + $0x2e0] sm:$0xff] }
  0x22   :  { %514 = vmatpush3.bf16.msra.mxu0 %v513_v34  ;;  %v122_v14 = vld [vmem:[%s959_s1 + $0x2e8] sm:$0xff]  ;;  %v569_v15 = vpack.c.bf16 %v104_v12, %v103_v11  ;;  %v105_v17 = vld [vmem:[%s959_s1 + $0x260] sm:$0xff]  ;;  %v123_v19 = vld [vmem:[%s959_s1 + $0x2f0] sm:$0xff] }
  0x23   :  { %546 = vmatpush3.bf16.msra.mxu1 %v545_v35  ;;  %548 = vmatprep.subr.bf16.mxu0 %v547_v36  ;;  %v571_v16 = vpack.c.bf16 %v122_v14, %v121_v13  ;;  %v106_v18 = vld [vmem:[%s959_s1 + $0x268] sm:$0xff]  ;;  %v124_v20 = vld [vmem:[%s959_s1 + $0x2f8] sm:$0xff]  ;;  %v107_v23 = vld [vmem:[%s959_s1 + $0x270] sm:$0xff] }
  0x24   :  { %579 = vmatprep.subr.bf16.mxu1 %v547_v36  ;;  %v573_v21 = vpack.c.bf16 %v106_v18, %v105_v17  ;;  %v575_v22 = vpack.c.bf16 %v124_v20, %v123_v19  ;;  %v108_v24 = vld [vmem:[%s959_s1 + $0x278] sm:$0xff]  ;;  %v21_v26 = vld [vmem:[%s960_s0 + $0x20] sm:$0xff]  ;;  %v27_v27 = vld [vmem:[%s960_s0 + $0x50] sm:$0xff] }
  0x25   :  { %197 = vmatmul.mubr.f32.vlgmr.msra.gmra.mrb[0].mxu0 %v17_v41  ;;  %v577_v25 = vpack.c.bf16 %v108_v24, %v107_v23  ;;  %v368_v30 = vld [vmem:[%s961_s2] ss:$0 sm:$0xff] }
  0x26   :  { %272 = vmatmul.mubr.f32.vlgmr.msra.gmra.mrb[0].mxu1 %v19_v43  ;;  %550 = vmatpush3.bf16.msra.mxu0 %v549_v42 }
  0x27   :  { %587 = vmatpush3.bf16.msra.mxu1 %v549_v42  ;;  %552 = vmatprep.subr.bf16.mxu0 %v551_v44 }
  0x28   :  { %580 = vmatprep.subr.bf16.mxu1 %v551_v44  ;;  %201 = vmatprep.mubr.f32.mxu0 %v24_v49 }
  0x29   :  { %202 = vmatmul.mubr.f32.gmra.mrb[2].mxu0 %v23_v51  ;;  %276 = vmatprep.mubr.f32.mxu1 %v26_v52 }
  0x2a   :  { %554 = vmatpush3.bf16.msra.mxu0 %v553_v50  ;;  %277 = vmatmul.mubr.f32.gmra.mrb[2].mxu1 %v25_v56 }
  0x2b   :  { %588 = vmatpush3.bf16.msra.mxu1 %v553_v50  ;;  %556 = vmatprep.subr.bf16.mxu0 %v555_v53  ;;  %v357_v50 = vld [vmem:[%s962_s3] sm:$0xff] }
  0x2c   :  { %581 = vmatprep.subr.bf16.mxu1 %v555_v53  ;;  %346 = vmatprep.mubr.f32.mxu0 %v22_v59  ;;  %v358_v53 = vld [vmem:[%s962_s3 + $0x8] sm:$0xff] }
  0x2d   :  { %351 = vmatprep.mubr.f32.mxu1 %v28_v61 }
  0x2e   :  { %558 = vmatpush3.bf16.msra.mxu0 %v557_v60 }
  0x2f   :  { %589 = vmatpush3.bf16.msra.mxu1 %v557_v60  ;;  %560 = vmatprep.subr.bf16.mxu0 %v559_v62 }
  0x30   :  { %582 = vmatprep.subr.bf16.mxu1 %v559_v62 }
  0x32   :  { %562 = vmatpush3.bf16.msra.mxu0 %v561_v3 }
  0x33   :  { %590 = vmatpush3.bf16.msra.mxu1 %v561_v3  ;;  %564 = vmatprep.subr.bf16.mxu0 %v563_v4 }
  0x34   :  { %583 = vmatprep.subr.bf16.mxu1 %v563_v4 }
  0x36   :  { %566 = vmatpush3.bf16.msra.mxu0 %v565_v9 }
  0x37   :  { %591 = vmatpush3.bf16.msra.mxu1 %v565_v9  ;;  %568 = vmatprep.subr.bf16.mxu0 %v567_v10 }
  0x38   :  { %584 = vmatprep.subr.bf16.mxu1 %v567_v10 }
  0x3a   :  { %570 = vmatpush3.bf16.msra.mxu0 %v569_v15 }
  0x3b   :  { %592 = vmatpush3.bf16.msra.mxu1 %v569_v15  ;;  %572 = vmatprep.subr.bf16.mxu0 %v571_v16 }
  0x3c   :  { %585 = vmatprep.subr.bf16.mxu1 %v571_v16 }
  0x3e   :  { %574 = vmatpush3.bf16.msra.mxu0 %v573_v21 }
  0x3f   :  { %593 = vmatpush3.bf16.msra.mxu1 %v573_v21  ;;  %576 = vmatprep.subr.bf16.mxu0 %v575_v22 }
  0x40   :  { %586 = vmatprep.subr.bf16.mxu1 %v575_v22 }
  0x42   :  { %578 = vmatpush3.bf16.msra.mxu0 %v577_v25 }
  0x43   :  { %594 = vmatpush3.bf16.msra.mxu1 %v577_v25 }
  0x45   :  { %347 = vmatmul.mubr.f32.vlgmr.msra.gmra.mrb[4].mxu0 %v21_v26 }
  0x46   :  { %352 = vmatmul.mubr.f32.vlgmr.msra.gmra.mrb[4].mxu1 %v27_v27 }
  0xf8   :  { %v401_v28 = vpop.f32.mrb[0].mxu0 }
  0xf9   :  { %v439_v29 = vpop.f32.mrb[0].mxu1  ;;  %v402_v31 = vpop.f32.mrb[1].mxu0 }
  0xfa   :  { %v403_v32 = vadd.f32 %v402_v31, %v401_v28  ;;  %v440_v33 = vpop.f32.mrb[1].mxu1 }
  0xfb   :  { %v441_v34 = vadd.f32 %v440_v33, %v439_v29 }
  0xfc   :  { %v199_v35 = vadd.f32 %v403_v32, %v368_v30  ;;  %v404_v36 = vpop.f32.mrb[2].mxu0 }
  0xfd   :  { %v405_v37 = vpop.f32.mrb[3].mxu0  ;;  %v442_v38 = vpop.f32.mrb[2].mxu1 }
  0xfe   :  { %v274_v39 = vadd.f32 %v441_v34, %v199_v35  ;;  %v406_v40 = vadd.f32 %v405_v37, %v404_v36  ;;  %v443_v41 = vpop.f32.mrb[3].mxu1 }
  0xff   :  { %v444_v42 = vadd.f32 %v443_v41, %v442_v38 }
 0x100   :  { %v204_v43 = vadd.f32 %v406_v40, %v368_v30 }
 0x102   :  { %v279_v44 = vadd.f32 %v444_v42, %v204_v43 }
 0x118   :  { %v477_v45 = vpop.f32.mrb[4].mxu0 }
 0x119   :  { %v480_v46 = vpop.f32.mrb[4].mxu1  ;;  %v478_v47 = vpop.f32.mrb[5].mxu0 }
 0x11a   :  { %v479_v48 = vadd.f32 %v478_v47, %v477_v45  ;;  %v481_v49 = vpop.f32.mrb[5].mxu1 }
 0x11b   :  { %v482_v51 = vadd.f32 %v481_v49, %v480_v46 }
 0x11c   :  { %v349_v52 = vadd.f32 %v479_v48, %v274_v39 }
 0x11d   :  { %v354_v54 = vadd.f32 %v482_v51, %v279_v44 }
 0x11e   :  { %v359_v55 = vadd.f32 %v357_v50, %v349_v52 }
 0x11f   :  { %v360_v56 = vadd.f32 %v358_v53, %v354_v54 }
 0x120   :  { %362 = vst.msk [vmem:[%s963_s4] sm:$0xff] %vm361_vm0, %v359_v55 }
 0x121   :  { %363 = vst.msk [vmem:[%s963_s4 + $0x8] sm:$0xff] %vm361_vm0, %v360_v56 }

// kernel: medsam_forward.29
= control target key start
LH: loop header
LB: loop body
LE: loop exit
PB: predicated region body
PF: predicated region fallthrough
CT: control target
= control target key end

     0   :  { %vm22_vm0 = vcmask 261120   ;;  %vm174_vm5 = vcmask 785408   ;;  %s288_s0 = inlined_call_operand.vmem [shape: f32[16,32], index: 0, kind: input, shape index: {}]   ;;  %s289_s3 = inlined_call_operand.vmem [shape: f32[32,96], index: 3, kind: input, shape index: {}]   ;;  %s290_s1 = inlined_call_operand.vmem [shape: f32[1,32], index: 1, kind: input, shape index: {}]   ;;  %s291_s2 = inlined_call_operand.vmem [shape: f32[1,32], index: 2, kind: input, shape index: {}]   ;;  %s292_s4 = inlined_call_operand.vmem [shape: f32[1,96], index: 4, kind: input, shape index: {}]   ;;  %s293_s5 = inlined_call_operand.vmem [shape: f32[16,96], index: 5, kind: output, shape index: {}]  }
   0x1   :  { %v20_v0 = vld [vmem:[%s288_s0] sm:$0xff]  ;;  %v21_v1 = vld [vmem:[%s288_s0 + $0x8] sm:$0xff]  ;;  %v84_v16 = vld [vmem:[%s289_s3 + $0x10] sm:$0xff] }
   0x2   :  { %v23_v2 = vsel %vm22_vm0, %v20_v0, 0.0  ;;  %v26_v3 = vsel %vm22_vm0, %v21_v1, 0.0  ;;  %v82_v14 = vld [vmem:[%s289_s3] sm:$0xff]  ;;  %v83_v15 = vld [vmem:[%s289_s3 + $0x8] sm:$0xff]  ;;  %v85_v18 = vld [vmem:[%s289_s3 + $0x18] sm:$0xff] }
   0x3   :  { %24 = vadd.xlane.f32.xlu0 %v23_v2  ;;  %v203_v17 = vpack.c.bf16 %v83_v15, %v82_v14  ;;  %v207_v19 = vpack.c.bf16 %v85_v18, %v84_v16  ;;  %v181_v37 = vld [vmem:[%s290_s1] ss:$0 sm:$0xff] }
   0x4   :  { %v182_v39 = vld [vmem:[%s291_s2] ss:$0 sm:$0xff] }
   0x5   :  { %204 = vmatprep.subr.bf16.mxu0 %v203_v17  ;;  %v183_v46 = vld [vmem:[%s292_s4] ss:$0 sm:$0xff] }
   0x6   :  { %206 = vmatpush3.bf16.msra.mxu0 %v203_v17 }
   0x7   :  { %27 = vadd.xlane.f32.xlu0 %v26_v3  ;;  %208 = vmatprep.subr.bf16.mxu0 %v207_v19 }
   0xa   :  { %210 = vmatpush3.bf16.msra.mxu0 %v207_v19 }
  0x90   :  { %v25_v4 = vpop.xlane.xlu0 %24 }
  0x91   :  { %v30_v5 = vmul.f32 0.03125, %v25_v4 }
  0x93   :  { %v32_v6 = vsub.f32 %v20_v0, %v30_v5 }
  0x94   :  { %v28_v7 = vpop.xlane.xlu0 %27 }
  0x95   :  { %v31_v8 = vmul.f32 0.03125, %v28_v7  ;;  %v34_v9 = vmul.f32 %v32_v6, %v32_v6 }
  0x97   :  { %v33_v10 = vsub.f32 %v21_v1, %v31_v8  ;;  %v36_v11 = vsel %vm22_vm0, %v34_v9, 0.0 }
  0x98   :  { %37 = vadd.xlane.f32.xlu1 %v36_v11 }
  0x99   :  { %v35_v12 = vmul.f32 %v33_v10, %v33_v10 }
  0x9b   :  { %v39_v13 = vsel %vm22_vm0, %v35_v12, 0.0 }
  0x9c   :  { %40 = vadd.xlane.f32.xlu1 %v39_v13 }
 0x125   :  { %v38_v20 = vpop.xlane.xlu1 %37 }
 0x126   :  { %v42_v21 = vmul.f32 0.03125, %v38_v20 }
 0x128   :  { %v44_v22 = vadd.f32 1e-06, %v42_v21 }
 0x129   :  { %v41_v23 = vpop.xlane.xlu1 %40 }
 0x12a   :  { %211 = vrsqrt.f32 %v44_v22  ;;  %v43_v24 = vmul.f32 0.03125, %v41_v23  ;;  %vm48_vm1 = vcmp.eq.f32.partialorder %v44_v22, inf  ;;  %v51_v28 = vand.u32 2147483648, %v44_v22 }
 0x12b   :  { %vm50_vm2 = vcmp.eq.f32.partialorder %v44_v22, 0.0 }
 0x12c   :  { %v45_v25 = vadd.f32 1e-06, %v43_v24 }
 0x12e   :  { %213 = vrsqrt.f32 %v45_v25  ;;  %vm55_vm3 = vcmp.eq.f32.partialorder %v45_v25, inf  ;;  %v58_v33 = vand.u32 2147483648, %v45_v25  ;;  %vm57_vm4 = vcmp.eq.f32.partialorder %v45_v25, 0.0 }
 0x134   :  { %v212_v26 = vpop.eup %211 }
 0x135   :  { %v47_v27 = vmul.f32 %v212_v26, %v44_v22 }
 0x137   :  { %v49_v29 = vsel %vm48_vm1, %v44_v22, %v47_v27 }
 0x138   :  { %v214_v30 = vpop.eup %213  ;;  %v52_v31 = vsel %vm50_vm2, %v51_v28, %v49_v29 }
 0x139   :  { %v54_v32 = vmul.f32 %v214_v30, %v45_v25  ;;  %215 = vrcp.f32 %v52_v31 }
 0x13b   :  { %v56_v34 = vsel %vm55_vm3, %v45_v25, %v54_v32 }
 0x13c   :  { %v59_v35 = vsel %vm57_vm4, %v58_v33, %v56_v34 }
 0x13d   :  { %217 = vrcp.f32 %v59_v35 }
 0x143   :  { %v216_v36 = vpop.eup %215 }
 0x144   :  { %v61_v38 = vmul.f32 %v216_v36, %v32_v6 }
 0x146   :  { %v71_v40 = vmul.f32 %v181_v37, %v61_v38 }
 0x147   :  { %v218_v41 = vpop.eup %217 }
 0x148   :  { %v63_v42 = vmul.f32 %v218_v41, %v33_v10  ;;  %v80_v43 = vadd.f32 %v182_v39, %v71_v40 }
 0x14a   :  { %v72_v44 = vmul.f32 %v181_v37, %v63_v42  ;;  %200 = vmatprep.mubr.msk.f32.mxu0 %vm22_vm0, %v80_v43 }
 0x14c   :  { %v81_v45 = vadd.f32 %v182_v39, %v72_v44 }
 0x14e   :  { %201 = vmatmul.mubr.msk.f32.vlgmr.msra.gmra.mrb[0].mxu0 %vm22_vm0, %v81_v45 }
 0x221   :  { %v202_v47 = vpop.f32.mrb[0].mxu0 }
 0x222   :  { %v171_v48 = vadd.f32 %v202_v47, %v183_v46  ;;  %v165_v49 = vpop.f32.mrb[1].mxu0 }
 0x223   :  { %v166_v50 = vadd.f32 %v183_v46, %v165_v49 }
 0x224   :  { %176 = vst.msk [vmem:[%s293_s5 + $0x8] sm:$0xff] %vm174_vm5, %v171_v48 }
 0x225   :  { %175 = vst.msk [vmem:[%s293_s5] sm:$0xff] %vm174_vm5, %v166_v50 }

// kernel: medsam_forward.32
= control target key start
LH: loop header
LB: loop body
LE: loop exit
PB: predicated region body
PF: predicated region fallthrough
CT: control target
= control target key end

     0   :  { %vm22_vm0 = vcmask 261120   ;;  %s287_s0 = inlined_call_operand.vmem [shape: f32[16,32], index: 0, kind: input, shape index: {}]   ;;  %s288_s3 = inlined_call_operand.vmem [shape: f32[32,128], index: 3, kind: input, shape index: {}]   ;;  %s289_s1 = inlined_call_operand.vmem [shape: f32[1,32], index: 1, kind: input, shape index: {}]   ;;  %s290_s2 = inlined_call_operand.vmem [shape: f32[1,32], index: 2, kind: input, shape index: {}]   ;;  %s291_s4 = inlined_call_operand.vmem [shape: f32[1,128], index: 4, kind: input, shape index: {}]   ;;  %s292_s5 = inlined_call_operand.vmem [shape: f32[16,128], index: 5, kind: output, shape index: {}]  }
   0x1   :  { %v20_v0 = vld [vmem:[%s287_s0] sm:$0xff]  ;;  %v21_v1 = vld [vmem:[%s287_s0 + $0x8] sm:$0xff]  ;;  %v84_v16 = vld [vmem:[%s288_s3 + $0x10] sm:$0xff] }
   0x2   :  { %v23_v2 = vsel %vm22_vm0, %v20_v0, 0.0  ;;  %v26_v3 = vsel %vm22_vm0, %v21_v1, 0.0  ;;  %v82_v14 = vld [vmem:[%s288_s3] sm:$0xff]  ;;  %v83_v15 = vld [vmem:[%s288_s3 + $0x8] sm:$0xff]  ;;  %v85_v18 = vld [vmem:[%s288_s3 + $0x18] sm:$0xff] }
   0x3   :  { %24 = vadd.xlane.f32.xlu0 %v23_v2  ;;  %v202_v17 = vpack.c.bf16 %v83_v15, %v82_v14  ;;  %v206_v19 = vpack.c.bf16 %v85_v18, %v84_v16  ;;  %v180_v37 = vld [vmem:[%s289_s1] ss:$0 sm:$0xff] }
   0x4   :  { %v181_v39 = vld [vmem:[%s290_s2] ss:$0 sm:$0xff] }
   0x5   :  { %203 = vmatprep.subr.bf16.mxu0 %v202_v17  ;;  %v182_v46 = vld [vmem:[%s291_s4] ss:$0 sm:$0xff] }
   0x6   :  { %205 = vmatpush3.bf16.msra.mxu0 %v202_v17 }
   0x7   :  { %27 = vadd.xlane.f32.xlu0 %v26_v3  ;;  %207 = vmatprep.subr.bf16.mxu0 %v206_v19 }
   0xa   :  { %209 = vmatpush3.bf16.msra.mxu0 %v206_v19 }
  0x90   :  { %v25_v4 = vpop.xlane.xlu0 %24 }
  0x91   :  { %v30_v5 = vmul.f32 0.03125, %v25_v4 }
  0x93   :  { %v32_v6 = vsub.f32 %v20_v0, %v30_v5 }
  0x94   :  { %v28_v7 = vpop.xlane.xlu0 %27 }
  0x95   :  { %v31_v8 = vmul.f32 0.03125, %v28_v7  ;;  %v34_v9 = vmul.f32 %v32_v6, %v32_v6 }
  0x97   :  { %v33_v10 = vsub.f32 %v21_v1, %v31_v8  ;;  %v36_v11 = vsel %vm22_vm0, %v34_v9, 0.0 }
  0x98   :  { %37 = vadd.xlane.f32.xlu1 %v36_v11 }
  0x99   :  { %v35_v12 = vmul.f32 %v33_v10, %v33_v10 }
  0x9b   :  { %v39_v13 = vsel %vm22_vm0, %v35_v12, 0.0 }
  0x9c   :  { %40 = vadd.xlane.f32.xlu1 %v39_v13 }
 0x125   :  { %v38_v20 = vpop.xlane.xlu1 %37 }
 0x126   :  { %v42_v21 = vmul.f32 0.03125, %v38_v20 }
 0x128   :  { %v44_v22 = vadd.f32 1e-06, %v42_v21 }
 0x129   :  { %v41_v23 = vpop.xlane.xlu1 %40 }
 0x12a   :  { %210 = vrsqrt.f32 %v44_v22  ;;  %v43_v24 = vmul.f32 0.03125, %v41_v23  ;;  %vm48_vm1 = vcmp.eq.f32.partialorder %v44_v22, inf  ;;  %v51_v28 = vand.u32 2147483648, %v44_v22 }
 0x12b   :  { %vm50_vm2 = vcmp.eq.f32.partialorder %v44_v22, 0.0 }
 0x12c   :  { %v45_v25 = vadd.f32 1e-06, %v43_v24 }
 0x12e   :  { %212 = vrsqrt.f32 %v45_v25  ;;  %vm55_vm3 = vcmp.eq.f32.partialorder %v45_v25, inf  ;;  %v58_v33 = vand.u32 2147483648, %v45_v25  ;;  %vm57_vm4 = vcmp.eq.f32.partialorder %v45_v25, 0.0 }
 0x134   :  { %v211_v26 = vpop.eup %210 }
 0x135   :  { %v47_v27 = vmul.f32 %v211_v26, %v44_v22 }
 0x137   :  { %v49_v29 = vsel %vm48_vm1, %v44_v22, %v47_v27 }
 0x138   :  { %v213_v30 = vpop.eup %212  ;;  %v52_v31 = vsel %vm50_vm2, %v51_v28, %v49_v29 }
 0x139   :  { %v54_v32 = vmul.f32 %v213_v30, %v45_v25  ;;  %214 = vrcp.f32 %v52_v31 }
 0x13b   :  { %v56_v34 = vsel %vm55_vm3, %v45_v25, %v54_v32 }
 0x13c   :  { %v59_v35 = vsel %vm57_vm4, %v58_v33, %v56_v34 }
 0x13d   :  { %216 = vrcp.f32 %v59_v35 }
 0x143   :  { %v215_v36 = vpop.eup %214 }
 0x144   :  { %v61_v38 = vmul.f32 %v215_v36, %v32_v6 }
 0x146   :  { %v71_v40 = vmul.f32 %v180_v37, %v61_v38 }
 0x147   :  { %v217_v41 = vpop.eup %216 }
 0x148   :  { %v63_v42 = vmul.f32 %v217_v41, %v33_v10  ;;  %v80_v43 = vadd.f32 %v181_v39, %v71_v40 }
 0x14a   :  { %v72_v44 = vmul.f32 %v180_v37, %v63_v42  ;;  %199 = vmatprep.mubr.msk.f32.mxu0 %vm22_vm0, %v80_v43 }
 0x14c   :  { %v81_v45 = vadd.f32 %v181_v39, %v72_v44 }
 0x14e   :  { %200 = vmatmul.mubr.msk.f32.vlgmr.msra.gmra.mrb[0].mxu0 %vm22_vm0, %v81_v45 }
 0x221   :  { %v201_v47 = vpop.f32.mrb[0].mxu0 }
 0x222   :  { %v171_v48 = vadd.f32 %v201_v47, %v182_v46  ;;  %v165_v49 = vpop.f32.mrb[1].mxu0 }
 0x223   :  { %v166_v50 = vadd.f32 %v182_v46, %v165_v49 }
 0x224   :  { %175 = vst [vmem:[%s292_s5 + $0x8] sm:$0xff] %v171_v48 }
 0x225   :  { %174 = vst [vmem:[%s292_s5] sm:$0xff] %v166_v50 }

// kernel: medsam_forward.31
= control target key start
LH: loop header
LB: loop body
LE: loop exit
PB: predicated region body
PF: predicated region fallthrough
CT: control target
= control target key end

     0   :  { %vm30_vm0 = vcmask 261120   ;;  %s212_s1 = inlined_call_operand.vmem [shape: f32[32,32], index: 1, kind: input, shape index: {}]   ;;  %s213_s0 = inlined_call_operand.vmem [shape: f32[16,32], index: 0, kind: input, shape index: {}]   ;;  %s214_s2 = inlined_call_operand.vmem [shape: f32[1,32], index: 2, kind: input, shape index: {}]   ;;  %s215_s3 = inlined_call_operand.vmem [shape: f32[16,32], index: 3, kind: input, shape index: {}]   ;;  %s216_s4 = inlined_call_operand.vmem [shape: f32[16,32], index: 4, kind: output, shape index: {}]  }
   0x1   :  { %v19_v0 = vld [vmem:[%s212_s1] sm:$0xff]  ;;  %v20_v1 = vld [vmem:[%s212_s1 + $0x8] sm:$0xff]  ;;  %v21_v2 = vld [vmem:[%s212_s1 + $0x10] sm:$0xff] }
   0x2   :  { %v142_v3 = vpack.c.bf16 %v20_v1, %v19_v0  ;;  %v22_v4 = vld [vmem:[%s212_s1 + $0x18] sm:$0xff]  ;;  %v17_v5 = vld [vmem:[%s213_s0] sm:$0xff]  ;;  %v18_v7 = vld [vmem:[%s213_s0 + $0x8] sm:$0xff] }
   0x3   :  { %v146_v6 = vpack.c.bf16 %v22_v4, %v21_v2  ;;  %139 = vmatprep.mubr.msk.f32.mxu0 %vm30_vm0, %v17_v5  ;;  %v122_v8 = vld [vmem:[%s214_s2] ss:$0 sm:$0xff]  ;;  %v113_v10 = vld [vmem:[%s215_s3 + $0x8] sm:$0xff] }
   0x4   :  { %143 = vmatprep.subr.bf16.mxu0 %v142_v3  ;;  %v112_v13 = vld [vmem:[%s215_s3] sm:$0xff] }
   0x5   :  { %145 = vmatpush3.bf16.msra.mxu0 %v142_v3 }
   0x6   :  { %147 = vmatprep.subr.bf16.mxu0 %v146_v6 }
   0x9   :  { %149 = vmatpush3.bf16.msra.mxu0 %v146_v6 }
   0xc   :  { %140 = vmatmul.mubr.msk.f32.vlgmr.msra.gmra.mrb[0].mxu0 %vm30_vm0, %v18_v7 }
  0xdf   :  { %v141_v9 = vpop.f32.mrb[0].mxu0 }
  0xe0   :  { %v109_v11 = vadd.f32 %v141_v9, %v122_v8  ;;  %v103_v12 = vpop.f32.mrb[1].mxu0 }
  0xe1   :  { %v104_v14 = vadd.f32 %v122_v8, %v103_v12 }
  0xe2   :  { %v115_v15 = vadd.f32 %v113_v10, %v109_v11 }
  0xe3   :  { %v114_v16 = vadd.f32 %v112_v13, %v104_v14 }
  0xe4   :  { %117 = vst.msk [vmem:[%s216_s4 + $0x8] sm:$0xff] %vm30_vm0, %v115_v15 }
  0xe5   :  { %116 = vst.msk [vmem:[%s216_s4] sm:$0xff] %vm30_vm0, %v114_v16 }

// kernel: medsam_forward.33
= control target key start
LH: loop header
LB: loop body
LE: loop exit
PB: predicated region body
PF: predicated region fallthrough
CT: control target
= control target key end

     0   :  { %vm121_vm0 = vcmask 261120   ;;  %s308_s1 = inlined_call_operand.vmem [shape: f32[128,32], index: 1, kind: input, shape index: {}]   ;;  %s309_s0 = inlined_call_operand.vmem [shape: f32[16,128], index: 0, kind: input, shape index: {}]   ;;  %s310_s2 = inlined_call_operand.vmem [shape: f32[1,32], index: 2, kind: input, shape index: {}]   ;;  %s311_s3 = inlined_call_operand.vmem [shape: f32[16,32], index: 3, kind: input, shape index: {}]   ;;  %s312_s4 = inlined_call_operand.vmem [shape: f32[16,32], index: 4, kind: output, shape index: {}]  }
   0x1   :  { %v19_v0 = vld [vmem:[%s308_s1] sm:$0xff]  ;;  %v20_v1 = vld [vmem:[%s308_s1 + $0x8] sm:$0xff]  ;;  %v21_v2 = vld [vmem:[%s308_s1 + $0x10] sm:$0xff] }
   0x2   :  { %v182_v3 = vpack.c.bf16 %v20_v1, %v19_v0  ;;  %v22_v4 = vld [vmem:[%s308_s1 + $0x18] sm:$0xff]  ;;  %v23_v6 = vld [vmem:[%s308_s1 + $0x20] sm:$0xff]  ;;  %v24_v7 = vld [vmem:[%s308_s1 + $0x28] sm:$0xff] }
   0x3   :  { %v186_v5 = vpack.c.bf16 %v22_v4, %v21_v2  ;;  %v190_v8 = vpack.c.bf16 %v24_v7, %v23_v6  ;;  %v17_v9 = vld [vmem:[%s309_s0] sm:$0xff]  ;;  %v25_v10 = vld [vmem:[%s308_s1 + $0x30] sm:$0xff]  ;;  %v26_v11 = vld [vmem:[%s308_s1 + $0x38] sm:$0xff] }
   0x4   :  { %183 = vmatprep.subr.bf16.mxu0 %v182_v3  ;;  %179 = vmatprep.mubr.f32.mxu0 %v17_v9  ;;  %v194_v12 = vpack.c.bf16 %v26_v11, %v25_v10  ;;  %v27_v13 = vld [vmem:[%s308_s1 + $0x40] sm:$0xff]  ;;  %v28_v14 = vld [vmem:[%s308_s1 + $0x48] sm:$0xff]  ;;  %v29_v16 = vld [vmem:[%s308_s1 + $0x50] sm:$0xff] }
   0x5   :  { %185 = vmatpush3.bf16.msra.mxu0 %v182_v3  ;;  %v198_v15 = vpack.c.bf16 %v28_v14, %v27_v13  ;;  %v30_v17 = vld [vmem:[%s308_s1 + $0x58] sm:$0xff]  ;;  %v31_v19 = vld [vmem:[%s308_s1 + $0x60] sm:$0xff]  ;;  %v32_v20 = vld [vmem:[%s308_s1 + $0x68] sm:$0xff] }
   0x6   :  { %187 = vmatprep.subr.bf16.mxu0 %v186_v5  ;;  %v202_v18 = vpack.c.bf16 %v30_v17, %v29_v16  ;;  %v206_v21 = vpack.c.bf16 %v32_v20, %v31_v19  ;;  %v33_v22 = vld [vmem:[%s308_s1 + $0x70] sm:$0xff]  ;;  %v34_v23 = vld [vmem:[%s308_s1 + $0x78] sm:$0xff]  ;;  %v18_v25 = vld [vmem:[%s309_s0 + $0x8] sm:$0xff] }
   0x7   :  { %v210_v24 = vpack.c.bf16 %v34_v23, %v33_v22  ;;  %v128_v26 = vld [vmem:[%s310_s2] ss:$0 sm:$0xff]  ;;  %v118_v28 = vld [vmem:[%s311_s3 + $0x8] sm:$0xff] }
   0x8   :  { %v117_v31 = vld [vmem:[%s311_s3] sm:$0xff] }
   0x9   :  { %189 = vmatpush3.bf16.msra.mxu0 %v186_v5 }
   0xa   :  { %191 = vmatprep.subr.bf16.mxu0 %v190_v8 }
   0xd   :  { %193 = vmatpush3.bf16.msra.mxu0 %v190_v8 }
   0xe   :  { %195 = vmatprep.subr.bf16.mxu0 %v194_v12 }
  0x11   :  { %197 = vmatpush3.bf16.msra.mxu0 %v194_v12 }
  0x12   :  { %199 = vmatprep.subr.bf16.mxu0 %v198_v15 }
  0x15   :  { %201 = vmatpush3.bf16.msra.mxu0 %v198_v15 }
  0x16   :  { %203 = vmatprep.subr.bf16.mxu0 %v202_v18 }
  0x19   :  { %205 = vmatpush3.bf16.msra.mxu0 %v202_v18 }
  0x1a   :  { %207 = vmatprep.subr.bf16.mxu0 %v206_v21 }
  0x1d   :  { %209 = vmatpush3.bf16.msra.mxu0 %v206_v21 }
  0x1e   :  { %211 = vmatprep.subr.bf16.mxu0 %v210_v24 }
  0x21   :  { %213 = vmatpush3.bf16.msra.mxu0 %v210_v24 }
  0x24   :  { %180 = vmatmul.mubr.f32.vlgmr.msra.gmra.mrb[0].mxu0 %v18_v25 }
  0xf7   :  { %v181_v27 = vpop.f32.mrb[0].mxu0 }
  0xf8   :  { %v114_v29 = vadd.f32 %v181_v27, %v128_v26  ;;  %v108_v30 = vpop.f32.mrb[1].mxu0 }
  0xf9   :  { %v109_v32 = vadd.f32 %v128_v26, %v108_v30 }
  0xfa   :  { %v120_v33 = vadd.f32 %v118_v28, %v114_v29 }
  0xfb   :  { %v119_v34 = vadd.f32 %v117_v31, %v109_v32 }
  0xfc   :  { %123 = vst.msk [vmem:[%s312_s4 + $0x8] sm:$0xff] %vm121_vm0, %v120_v33 }
  0xfd   :  { %122 = vst.msk [vmem:[%s312_s4] sm:$0xff] %vm121_vm0, %v119_v34 }

// kernel: medsam_forward.30
= control target key start
LH: loop header
LB: loop body
LE: loop exit
PB: predicated region body
PF: predicated region fallthrough
CT: control target
= control target key end

     0   :  { %vm49_vm0 = vcmask 130048   ;;  %v1556_v0 = vmov 0.0   ;;  %vm1557_vm1 = vmmov 0   ;;  %vm658_vm2 = vcmask 27648   ;;  %s1819_s1 = inlined_call_operand.vmem [shape: f32[8,4,16], index: 1, kind: input, shape index: {}]   ;;  %s1820_s0 = inlined_call_operand.vmem [shape: f32[8,4,16], index: 0, kind: input, shape index: {}]   ;;  %s1821_s3 = inlined_call_operand.vmem [shape: f32[8,4,4], index: 3, kind: input, shape index: {}]   ;;  %s1822_s2 = inlined_call_operand.vmem [shape: f32[8,4,16], index: 2, kind: input, shape index: {}]   ;;  %s1823_s4 = inlined_call_operand.vmem [shape: f32[8,4,16], index: 4, kind: output, shape index: {}]  }
   0x1   :  { %1442 = vmatprep.subr.mxu0 %v1556_v0  ;;  %v33_v1 = vld [vmem:[%s1819_s1] sm:$0xf]  ;;  %1444 = vmatprep.mubr.msk.f32.mxu0 %vm1557_vm1, %v1556_v0  ;;  %v34_v3 = vld [vmem:[%s1819_s1 + $0x4] sm:$0xf]  ;;  %v35_v6 = vld [vmem:[%s1819_s1 + $0x8] sm:$0xf] }
   0x2   :  { %v17_v2 = vld [vmem:[%s1820_s0] sm:$0xf]  ;;  %1443 = vmatpush3.xpose.msk.msra.mxu0 %vm49_vm0, %v33_v1  ;;  %1447 = vmatprep.subr.mxu1 %v1556_v0  ;;  %v18_v5 = vld [vmem:[%s1820_s0 + $0x4] sm:$0xf]  ;;  %v19_v8 = vld [vmem:[%s1820_s0 + $0x8] sm:$0xf] }
   0x3   :  { %v25_v4 = vmul.f32 0.25, %v17_v2  ;;  %1452 = vmatprep.subr.mxu0 %v1556_v0  ;;  %1448 = vmatpush3.xpose.msk.msra.mxu1 %vm49_vm0, %v34_v3  ;;  %v26_v7 = vmul.f32 0.25, %v18_v5  ;;  %v20_v9 = vld [vmem:[%s1820_s0 + $0xc] sm:$0xf]  ;;  %v27_v10 = vmul.f32 0.25, %v19_v8  ;;  %vm759_vm3 = vcmask 1043456  }
   0x4   :  { %1449 = vmatprep.mubr.msk.f32.mxu1 %vm1557_vm1, %v1556_v0  ;;  %1457 = vmatprep.subr.mxu1 %v1556_v0  ;;  %v36_v11 = vld [vmem:[%s1819_s1 + $0xc] sm:$0xf]  ;;  %v21_v12 = vld [vmem:[%s1820_s0 + $0x10] sm:$0xf]  ;;  %v28_v14 = vmul.f32 0.25, %v20_v9  ;;  %vm755_vm4 = vcmask 31744  }
   0x5   :  { %1445 = vmatmul.mubr.msk.f32.vlgmr.msra.gmra.mrb[0].mxu0 %vm49_vm0, %v25_v4  ;;  %v37_v13 = vld [vmem:[%s1819_s1 + $0x10] sm:$0xf]  ;;  %v22_v15 = vld [vmem:[%s1820_s0 + $0x14] sm:$0xf]  ;;  %v29_v16 = vmul.f32 0.25, %v21_v12  ;;  %vm1365_vm5 = vcmask 125952  }
   0x6   :  { %1453 = vmatpush3.xpose.msk.msra.mxu0 %vm49_vm0, %v35_v6  ;;  %1454 = vmatprep.mubr.msk.f32.mxu0 %vm1557_vm1, %v1556_v0  ;;  %v38_v17 = vld [vmem:[%s1819_s1 + $0x14] sm:$0xf]  ;;  %v23_v18 = vld [vmem:[%s1820_s0 + $0x18] sm:$0xf]  ;;  %v30_v20 = vmul.f32 0.25, %v22_v15 }
   0x7   :  { %1450 = vmatmul.mubr.msk.f32.vlgmr.msra.gmra.mrb[0].mxu1 %vm49_vm0, %v26_v7  ;;  %1462 = vmatprep.subr.mxu0 %v1556_v0  ;;  %v39_v19 = vld [vmem:[%s1819_s1 + $0x18] sm:$0xf]  ;;  %v24_v21 = vld [vmem:[%s1820_s0 + $0x1c] sm:$0xf]  ;;  %v31_v22 = vmul.f32 0.25, %v23_v18 }
   0x8   :  { %1458 = vmatpush3.xpose.msk.msra.mxu1 %vm49_vm0, %v36_v11  ;;  %1459 = vmatprep.mubr.msk.f32.mxu1 %vm1557_vm1, %v1556_v0  ;;  %v40_v23 = vld [vmem:[%s1819_s1 + $0x1c] sm:$0xf]  ;;  %v32_v24 = vmul.f32 0.25, %v24_v21  ;;  %v41_v25 = vld [vmem:[%s1821_s3] sm:$0xf] }
   0x9   :  { %1455 = vmatmul.mubr.msk.f32.vlgmr.msra.gmra.mrb[2].mxu0 %vm49_vm0, %v27_v10  ;;  %1467 = vmatprep.subr.mxu1 %v1556_v0  ;;  %v42_v27 = vld [vmem:[%s1821_s3 + $0x4] sm:$0xf]  ;;  %v43_v31 = vld [vmem:[%s1821_s3 + $0x8] sm:$0xf]  ;;  %v44_v36 = vld [vmem:[%s1821_s3 + $0xc] sm:$0xf] }
   0xa   :  { %1463 = vmatpush3.xpose.msk.msra.mxu0 %vm49_vm0, %v37_v13  ;;  %1464 = vmatprep.mubr.msk.f32.mxu0 %vm1557_vm1, %v1556_v0  ;;  %v45_v41 = vld [vmem:[%s1821_s3 + $0x10] sm:$0xf]  ;;  %v46_v46 = vld [vmem:[%s1821_s3 + $0x14] sm:$0xf]  ;;  %v47_v51 = vld [vmem:[%s1821_s3 + $0x18] sm:$0xf] }
   0xb   :  { %1460 = vmatmul.mubr.msk.f32.vlgmr.msra.gmra.mrb[2].mxu1 %vm49_vm0, %v28_v14  ;;  %1472 = vmatprep.subr.mxu0 %v1556_v0  ;;  %v48_v56 = vld [vmem:[%s1821_s3 + $0x1c] sm:$0xf] }
   0xc   :  { %1468 = vmatpush3.xpose.msk.msra.mxu1 %vm49_vm0, %v38_v17  ;;  %1469 = vmatprep.mubr.msk.f32.mxu1 %vm1557_vm1, %v1556_v0 }
   0xd   :  { %1465 = vmatmul.mubr.msk.f32.vlgmr.msra.gmra.mrb[4].mxu0 %vm49_vm0, %v29_v16  ;;  %1477 = vmatprep.subr.mxu1 %v1556_v0 }
   0xe   :  { %1473 = vmatpush3.xpose.msk.msra.mxu0 %vm49_vm0, %v39_v19  ;;  %1474 = vmatprep.mubr.msk.f32.mxu0 %vm1557_vm1, %v1556_v0 }
   0xf   :  { %1470 = vmatmul.mubr.msk.f32.vlgmr.msra.gmra.mrb[4].mxu1 %vm49_vm0, %v30_v20  ;;  %1482 = vmatprep.subr.mxu0 %v1556_v0 }
  0x10   :  { %1478 = vmatpush3.xpose.msk.msra.mxu1 %vm49_vm0, %v40_v23  ;;  %1479 = vmatprep.mubr.msk.f32.mxu1 %vm1557_vm1, %v1556_v0 }
  0x11   :  { %1475 = vmatmul.mubr.msk.f32.vlgmr.msra.gmra.mrb[6].mxu0 %vm49_vm0, %v31_v22  ;;  %1487 = vmatprep.subr.mxu1 %v1556_v0 }
  0x12   :  { %1484 = vmatprep.mubr.msk.f32.mxu0 %vm1557_vm1, %v1556_v0 }
  0x13   :  { %1480 = vmatmul.mubr.msk.f32.vlgmr.msra.gmra.mrb[6].mxu1 %vm49_vm0, %v32_v24 }
  0x14   :  { %1489 = vmatprep.mubr.msk.f32.mxu1 %vm1557_vm1, %v1556_v0 }
  0xd8   :  { %v122_v26 = vpop.f32.mrb[0].mxu0 }
  0xd9   :  { %v123_v28 = vadd.f32 %v122_v26, %v41_v25  ;;  %v1446_v29 = vpop.f32.mrb[1].mxu0 }
  0xda   :  { %v198_v30 = vpop.f32.mrb[0].mxu1 }
  0xdb   :  { %v199_v32 = vadd.f32 %v198_v30, %v42_v27  ;;  %v659_v33 = vsel %vm658_vm2, %v123_v28, -inf  ;;  %v1451_v34 = vpop.f32.mrb[1].mxu1 }
  0xdc   :  { %660 = vmax.xlane.f32.xlu0 %v659_v33  ;;  %v274_v35 = vpop.f32.mrb[2].mxu0 }
  0xdd   :  { %v275_v37 = vadd.f32 %v274_v35, %v43_v31  ;;  %v1456_v38 = vpop.f32.mrb[3].mxu0  ;;  %v662_v39 = vsel %vm658_vm2, %v199_v32, -inf }
  0xde   :  { %v350_v40 = vpop.f32.mrb[2].mxu1 }
  0xdf   :  { %v351_v42 = vadd.f32 %v350_v40, %v44_v36  ;;  %v665_v43 = vsel %vm658_vm2, %v275_v37, -inf  ;;  %v1461_v44 = vpop.f32.mrb[3].mxu1 }
  0xe0   :  { %663 = vmax.xlane.f32.xlu0 %v662_v39  ;;  %666 = vmax.xlane.f32.xlu1 %v665_v43  ;;  %v426_v45 = vpop.f32.mrb[4].mxu0  ;;  %v748_v43 = vld [vmem:[%s1822_s2 + $0x4] sm:$0xf] }
  0xe1   :  { %v427_v47 = vadd.f32 %v426_v45, %v45_v41  ;;  %v1466_v48 = vpop.f32.mrb[5].mxu0  ;;  %v668_v49 = vsel %vm658_vm2, %v351_v42, -inf  ;;  %1488 = vmatpush3.msk.msra.mxu1 %vm759_vm3, %v748_v43 }
  0xe2   :  { %v502_v50 = vpop.f32.mrb[4].mxu1  ;;  %1497 = vmatprep.subr.mxu1 %v1556_v0 }
  0xe3   :  { %v503_v52 = vadd.f32 %v502_v50, %v46_v46  ;;  %v671_v53 = vsel %vm658_vm2, %v427_v47, -inf  ;;  %v1471_v54 = vpop.f32.mrb[5].mxu1 }
  0xe4   :  { %669 = vmax.xlane.f32.xlu1 %v668_v49  ;;  %672 = vmax.xlane.f32.xlu0 %v671_v53  ;;  %v578_v55 = vpop.f32.mrb[6].mxu0 }
  0xe5   :  { %v579_v57 = vadd.f32 %v578_v55, %v47_v51  ;;  %v674_v58 = vsel %vm658_vm2, %v503_v52, -inf  ;;  %v1476_v59 = vpop.f32.mrb[7].mxu0 }
  0xe6   :  { %v654_v60 = vpop.f32.mrb[6].mxu1 }
  0xe7   :  { %v655_v61 = vadd.f32 %v654_v60, %v48_v56  ;;  %v677_v62 = vsel %vm658_vm2, %v579_v57, -inf  ;;  %v1481_v63 = vpop.f32.mrb[7].mxu1  ;;  %v751_v60 = vld [vmem:[%s1822_s2 + $0x10] sm:$0xf] }
  0xe8   :  { %675 = vmax.xlane.f32.xlu1 %v674_v58  ;;  %678 = vmax.xlane.f32.xlu0 %v677_v62  ;;  %v750_v58 = vld [vmem:[%s1822_s2 + $0xc] sm:$0xf] }
  0xe9   :  { %v680_v1 = vsel %vm658_vm2, %v655_v61, -inf }
  0xec   :  { %681 = vmax.xlane.f32.xlu1 %v680_v1  ;;  %v752_v1 = vld [vmem:[%s1822_s2 + $0x14] sm:$0xf] }
 0x169   :  { %v661_v2 = vpop.xlane.xlu0 %660 }
 0x16a   :  { %v683_v3 = vsub.f32 %v123_v28, %v661_v2 }
 0x16c   :  { %v691_v4 = vmul.f32 1.442695, %v683_v3  ;;  %v753_v3 = vld [vmem:[%s1822_s2 + $0x18] sm:$0xf] }
 0x16d   :  { %v664_v5 = vpop.xlane.xlu0 %663  ;;  %v667_v6 = vpop.xlane.xlu1 %666 }
 0x16e   :  { %1524 = vpow2.f32 %v691_v4  ;;  %v684_v7 = vsub.f32 %v199_v32, %v664_v5  ;;  %v685_v8 = vsub.f32 %v275_v37, %v667_v6 }
 0x170   :  { %v693_v9 = vmul.f32 1.442695, %v684_v7  ;;  %v695_v10 = vmul.f32 1.442695, %v685_v8  ;;  %v754_v7 = vld [vmem:[%s1822_s2 + $0x1c] sm:$0xf] }
 0x171   :  { %v670_v11 = vpop.xlane.xlu1 %669  ;;  %v673_v12 = vpop.xlane.xlu0 %672 }
 0x172   :  { %1526 = vpow2.f32 %v693_v9  ;;  %v686_v13 = vsub.f32 %v351_v42, %v670_v11  ;;  %v687_v14 = vsub.f32 %v427_v47, %v673_v12  ;;  %v747_v42 = vld [vmem:[%s1822_s2] sm:$0xf] }
 0x173   :  { %1528 = vpow2.f32 %v695_v10  ;;  %1483 = vmatpush3.msk.msra.mxu0 %vm759_vm3, %v747_v42 }
 0x174   :  { %v697_v15 = vmul.f32 1.442695, %v686_v13  ;;  %v699_v16 = vmul.f32 1.442695, %v687_v14  ;;  %1492 = vmatprep.subr.mxu0 %v1556_v0 }
 0x175   :  { %v676_v17 = vpop.xlane.xlu1 %675  ;;  %v679_v18 = vpop.xlane.xlu0 %678 }
 0x176   :  { %1530 = vpow2.f32 %v697_v15  ;;  %v688_v19 = vsub.f32 %v503_v52, %v676_v17  ;;  %v689_v20 = vsub.f32 %v579_v57, %v679_v18  ;;  %v749_v52 = vld [vmem:[%s1822_s2 + $0x8] sm:$0xf] }
 0x177   :  { %1532 = vpow2.f32 %v699_v16 }
 0x178   :  { %v1525_v21 = vpop.eup %1524  ;;  %v701_v22 = vmul.f32 1.442695, %v688_v19  ;;  %v703_v23 = vmul.f32 1.442695, %v689_v20 }
 0x179   :  { %v682_v24 = vpop.xlane.xlu1 %681  ;;  %v707_v25 = vsel %vm658_vm2, %v1525_v21, 0.0 }
 0x17a   :  { %1534 = vpow2.f32 %v701_v22  ;;  %v690_v26 = vsub.f32 %v655_v61, %v682_v24  ;;  %708 = vadd.xlane.f32.xlu0 %v707_v25 }
 0x17b   :  { %1536 = vpow2.f32 %v703_v23 }
 0x17c   :  { %v1527_v27 = vpop.eup %1526  ;;  %v705_v28 = vmul.f32 1.442695, %v690_v26 }
 0x17d   :  { %v1529_v29 = vpop.eup %1528  ;;  %v710_v30 = vsel %vm658_vm2, %v1527_v27, 0.0 }
 0x17e   :  { %1538 = vpow2.f32 %v705_v28  ;;  %711 = vadd.xlane.f32.xlu1 %v710_v30  ;;  %v713_v31 = vsel %vm658_vm2, %v1529_v29, 0.0 }
 0x17f   :  { %714 = vadd.xlane.f32.xlu0 %v713_v31 }
 0x180   :  { %v1531_v32 = vpop.eup %1530 }
 0x181   :  { %v1533_v33 = vpop.eup %1532  ;;  %v716_v34 = vsel %vm658_vm2, %v1531_v32, 0.0 }
 0x182   :  { %717 = vadd.xlane.f32.xlu1 %v716_v34  ;;  %v719_v35 = vsel %vm658_vm2, %v1533_v33, 0.0 }
 0x183   :  { %720 = vadd.xlane.f32.xlu0 %v719_v35 }
 0x184   :  { %v1714_v36 = vpop.eup %1534 }
 0x185   :  { %v1716_v37 = vpop.eup %1536  ;;  %v722_v38 = vsel %vm658_vm2, %v1714_v36, 0.0 }
 0x186   :  { %723 = vadd.xlane.f32.xlu1 %v722_v38  ;;  %v725_v39 = vsel %vm658_vm2, %v1716_v37, 0.0 }
 0x187   :  { %726 = vadd.xlane.f32.xlu0 %v725_v39 }
 0x188   :  { %v1722_v40 = vpop.eup %1538 }
 0x189   :  { %v728_v41 = vsel %vm658_vm2, %v1722_v40, 0.0 }
 0x18a   :  { %729 = vadd.xlane.f32.xlu1 %v728_v41 }
 0x207   :  { %v709_v44 = vpop.xlane.xlu0 %708 }
 0x208   :  { %1540 = vrcp.f32 %v709_v44 }
 0x20b   :  { %v712_v45 = vpop.xlane.xlu1 %711 }
 0x20c   :  { %1542 = vrcp.f32 %v712_v45  ;;  %v715_v46 = vpop.xlane.xlu0 %714 }
 0x20d   :  { %1544 = vrcp.f32 %v715_v46 }
 0x20f   :  { %v718_v47 = vpop.xlane.xlu1 %717 }
 0x210   :  { %1546 = vrcp.f32 %v718_v47  ;;  %v721_v48 = vpop.xlane.xlu0 %720 }
 0x211   :  { %1548 = vrcp.f32 %v721_v48 }
 0x212   :  { %v1541_v49 = vpop.eup %1540 }
 0x213   :  { %v732_v50 = vmul.f32 %v1541_v49, %v1525_v21  ;;  %v724_v51 = vpop.xlane.xlu1 %723 }
 0x214   :  { %1550 = vrcp.f32 %v724_v51  ;;  %v727_v53 = vpop.xlane.xlu0 %726 }
 0x215   :  { %1552 = vrcp.f32 %v727_v53  ;;  %1485 = vmatmul.mubr.msk.f32.vlgmr.msra.gmra.mrb[8].mxu0 %vm755_vm4, %v732_v50 }
 0x216   :  { %v1543_v54 = vpop.eup %1542  ;;  %1493 = vmatpush3.msk.msra.mxu0 %vm759_vm3, %v749_v52  ;;  %1494 = vmatprep.mubr.msk.f32.mxu0 %vm1557_vm1, %v1556_v0 }
 0x217   :  { %v1545_v55 = vpop.eup %1544  ;;  %v734_v56 = vmul.f32 %v1543_v54, %v1527_v27  ;;  %v730_v57 = vpop.xlane.xlu1 %729  ;;  %1502 = vmatprep.subr.mxu0 %v1556_v0 }
 0x218   :  { %v736_v59 = vmul.f32 %v1545_v55, %v1529_v29  ;;  %1554 = vrcp.f32 %v730_v57 }
 0x219   :  { %1490 = vmatmul.mubr.msk.f32.vlgmr.msra.gmra.mrb[8].mxu1 %vm755_vm4, %v734_v56 }
 0x21a   :  { %v1547_v61 = vpop.eup %1546  ;;  %1495 = vmatmul.mubr.msk.f32.vlgmr.msra.gmra.mrb[10].mxu0 %vm755_vm4, %v736_v59  ;;  %1498 = vmatpush3.msk.msra.mxu1 %vm759_vm3, %v750_v58 }
 0x21b   :  { %v1549_v62 = vpop.eup %1548  ;;  %v738_v63 = vmul.f32 %v1547_v61, %v1531_v32  ;;  %1499 = vmatprep.mubr.msk.f32.mxu1 %vm1557_vm1, %v1556_v0  ;;  %1503 = vmatpush3.msk.msra.mxu0 %vm759_vm3, %v751_v60 }
 0x21c   :  { %v740_v2 = vmul.f32 %v1549_v62, %v1533_v33  ;;  %1504 = vmatprep.mubr.msk.f32.mxu0 %vm1557_vm1, %v1556_v0  ;;  %1507 = vmatprep.subr.mxu1 %v1556_v0 }
 0x21d   :  { %1500 = vmatmul.mubr.msk.f32.vlgmr.msra.gmra.mrb[10].mxu1 %vm755_vm4, %v738_v63  ;;  %1512 = vmatprep.subr.mxu0 %v1556_v0 }
 0x21e   :  { %v1551_v4 = vpop.eup %1550  ;;  %1505 = vmatmul.mubr.msk.f32.vlgmr.msra.gmra.mrb[12].mxu0 %vm755_vm4, %v740_v2  ;;  %1508 = vmatpush3.msk.msra.mxu1 %vm759_vm3, %v752_v1 }
 0x21f   :  { %v1553_v5 = vpop.eup %1552  ;;  %v742_v6 = vmul.f32 %v1551_v4, %v1714_v36  ;;  %1509 = vmatprep.mubr.msk.f32.mxu1 %vm1557_vm1, %v1556_v0  ;;  %1513 = vmatpush3.msk.msra.mxu0 %vm759_vm3, %v753_v3 }
 0x220   :  { %v744_v8 = vmul.f32 %v1553_v5, %v1716_v37  ;;  %1514 = vmatprep.mubr.msk.f32.mxu0 %vm1557_vm1, %v1556_v0  ;;  %1517 = vmatprep.subr.mxu1 %v1556_v0 }
 0x221   :  { %1510 = vmatmul.mubr.msk.f32.vlgmr.msra.gmra.mrb[12].mxu1 %vm755_vm4, %v742_v6 }
 0x222   :  { %v1555_v9 = vpop.eup %1554  ;;  %1515 = vmatmul.mubr.msk.f32.vlgmr.msra.gmra.mrb[14].mxu0 %vm755_vm4, %v744_v8  ;;  %1518 = vmatpush3.msk.msra.mxu1 %vm759_vm3, %v754_v7 }
 0x223   :  { %v746_v10 = vmul.f32 %v1555_v9, %v1722_v40  ;;  %1519 = vmatprep.mubr.msk.f32.mxu1 %vm1557_vm1, %v1556_v0 }
 0x225   :  { %1520 = vmatmul.mubr.msk.f32.vlgmr.msra.gmra.mrb[14].mxu1 %vm755_vm4, %v746_v10 }
 0x2e8   :  { %v829_v11 = vpop.f32.mrb[8].mxu0 }
 0x2e9   :  { %1366 = vst.msk [vmem:[%s1823_s4] sm:$0xf] %vm1365_vm5, %v829_v11  ;;  %v1486_v12 = vpop.f32.mrb[9].mxu0 }
 0x2ec   :  { %v905_v13 = vpop.f32.mrb[8].mxu1 }
 0x2ed   :  { %1367 = vst.msk [vmem:[%s1823_s4 + $0x4] sm:$0xf] %vm1365_vm5, %v905_v13  ;;  %v981_v14 = vpop.f32.mrb[10].mxu0  ;;  %v1491_v15 = vpop.f32.mrb[9].mxu1 }
 0x2ee   :  { %1368 = vst.msk [vmem:[%s1823_s4 + $0x8] sm:$0xf] %vm1365_vm5, %v981_v14  ;;  %v1496_v0 = vpop.f32.mrb[11].mxu0 }
 0x2f0   :  { %v1057_v16 = vpop.f32.mrb[10].mxu1 }
 0x2f1   :  { %1369 = vst.msk [vmem:[%s1823_s4 + $0xc] sm:$0xf] %vm1365_vm5, %v1057_v16  ;;  %v1133_v17 = vpop.f32.mrb[12].mxu0  ;;  %v1501_v18 = vpop.f32.mrb[11].mxu1 }
 0x2f2   :  { %1370 = vst.msk [vmem:[%s1823_s4 + $0x10] sm:$0xf] %vm1365_vm5, %v1133_v17  ;;  %v1506_v19 = vpop.f32.mrb[13].mxu0 }
 0x2f4   :  { %v1209_v20 = vpop.f32.mrb[12].mxu1 }
 0x2f5   :  { %1371 = vst.msk [vmem:[%s1823_s4 + $0x14] sm:$0xf] %vm1365_vm5, %v1209_v20  ;;  %v1285_v21 = vpop.f32.mrb[14].mxu0  ;;  %v1511_v22 = vpop.f32.mrb[13].mxu1 }
 0x2f6   :  { %1372 = vst.msk [vmem:[%s1823_s4 + $0x18] sm:$0xf] %vm1365_vm5, %v1285_v21  ;;  %v1516_v23 = vpop.f32.mrb[15].mxu0 }
 0x2f8   :  { %v1361_v24 = vpop.f32.mrb[14].mxu1 }
 0x2f9   :  { %1373 = vst.msk [vmem:[%s1823_s4 + $0x1c] sm:$0xf] %vm1365_vm5, %v1361_v24  ;;  %v1521_v25 = vpop.f32.mrb[15].mxu1 }

// kernel: medsam_forward.35
= control target key start
LH: loop header
LB: loop body
LE: loop exit
PB: predicated region body
PF: predicated region fallthrough
CT: control target
= control target key end

     0   :  { %vm33_vm0 = vcmask 130048   ;;  %s625_s1 = inlined_call_operand.vmem [shape: f32[2,16,16], index: 1, kind: input, shape index: {}]   ;;  %s626_s0 = inlined_call_operand.vmem [shape: f32[2,16,16], index: 0, kind: input, shape index: {}]   ;;  %s627_s3 = inlined_call_operand.vmem [shape: f32[2,16,16], index: 3, kind: input, shape index: {}]   ;;  %s628_s2 = inlined_call_operand.vmem [shape: f32[2,16,16], index: 2, kind: input, shape index: {}]   ;;  %s629_s4 = inlined_call_operand.vmem [shape: f32[2,16,16], index: 4, kind: output, shape index: {}]  }
   0x1   :  { %v25_v0 = vld [vmem:[%s625_s1] sm:$0xff]  ;;  %v26_v1 = vld [vmem:[%s625_s1 + $0x8] sm:$0xff]  ;;  %vm483_vm1 = vmpackc.low %vm33_vm0, %vm33_vm0 }
   0x2   :  { %v482_v2 = vpack.c.bf16 %v26_v1, %v25_v0  ;;  %v27_v3 = vld [vmem:[%s625_s1 + $0x10] sm:$0xff]  ;;  %v28_v4 = vld [vmem:[%s625_s1 + $0x18] sm:$0xff]  ;;  %v17_v5 = vld [vmem:[%s626_s0] sm:$0xff] }
   0x3   :  { %v488_v6 = vpack.c.bf16 %v28_v4, %v27_v3  ;;  %v21_v7 = vmul.f32 0.25, %v17_v5  ;;  %v19_v8 = vld [vmem:[%s626_s0 + $0x10] sm:$0xff]  ;;  %v18_v10 = vld [vmem:[%s626_s0 + $0x8] sm:$0xff]  ;;  %v20_v11 = vld [vmem:[%s626_s0 + $0x18] sm:$0xff] }
   0x4   :  { %484 = vmatprep.subr.msk.bf16.mxu0 %vm483_vm1, %v482_v2  ;;  %v23_v9 = vmul.f32 0.25, %v19_v8  ;;  %v22_v12 = vmul.f32 0.25, %v18_v10  ;;  %v24_v13 = vmul.f32 0.25, %v20_v11  ;;  %v30_v14 = vld [vmem:[%s627_s3 + $0x8] sm:$0xff]  ;;  %v29_v15 = vld [vmem:[%s627_s3] sm:$0xff]  ;;  %v32_v16 = vld [vmem:[%s627_s3 + $0x18] sm:$0xff] }
   0x5   :  { %487 = vmatpush3.bf16.xpose.msk.msra.mxu0 %vm483_vm1, %v482_v2  ;;  %490 = vmatprep.subr.msk.bf16.mxu1 %vm483_vm1, %v488_v6  ;;  %v31_v18 = vld [vmem:[%s627_s3 + $0x10] sm:$0xff]  ;;  %v252_v50 = vld [vmem:[%s628_s2] sm:$0xff]  ;;  %v253_v51 = vld [vmem:[%s628_s2 + $0x8] sm:$0xff] }
   0x6   :  { %493 = vmatpush3.bf16.xpose.msk.msra.mxu1 %vm483_vm1, %v488_v6  ;;  %458 = vmatprep.mubr.msk.f32.mxu0 %vm33_vm0, %v21_v7  ;;  %v494_v52 = vpack.c.bf16 %v253_v51, %v252_v50  ;;  %v254_v53 = vld [vmem:[%s628_s2 + $0x10] sm:$0xff]  ;;  %v255_v54 = vld [vmem:[%s628_s2 + $0x18] sm:$0xff] }
   0x7   :  { %465 = vmatprep.mubr.msk.f32.mxu1 %vm33_vm0, %v23_v9  ;;  %v498_v55 = vpack.c.bf16 %v255_v54, %v254_v53 }
   0x8   :  { %495 = vmatprep.subr.bf16.mxu0 %v494_v52 }
   0x9   :  { %499 = vmatprep.subr.bf16.mxu1 %v498_v55 }
   0xc   :  { %459 = vmatmul.mubr.msk.f32.vlgmr.msra.gmra.mrb[0].mxu0 %vm33_vm0, %v22_v12 }
   0xd   :  { %466 = vmatmul.mubr.msk.f32.vlgmr.msra.gmra.mrb[0].mxu1 %vm33_vm0, %v24_v13  ;;  %497 = vmatpush3.bf16.msra.mxu0 %v494_v52 }
   0xe   :  { %501 = vmatpush3.bf16.msra.mxu1 %v498_v55 }
  0xdf   :  { %v460_v17 = vpop.f32.mrb[0].mxu0 }
  0xe0   :  { %v118_v19 = vadd.f32 %v460_v17, %v30_v14  ;;  %v112_v20 = vpop.f32.mrb[1].mxu0  ;;  %v467_v21 = vpop.f32.mrb[0].mxu1 }
  0xe1   :  { %v113_v22 = vadd.f32 %v112_v20, %v29_v15  ;;  %v205_v23 = vadd.f32 %v467_v21, %v32_v16  ;;  %v199_v24 = vpop.f32.mrb[1].mxu1 }
  0xe2   :  { %v200_v25 = vadd.f32 %v199_v24, %v31_v18  ;;  %v211_v26 = vsel %vm33_vm0, %v118_v19, -inf }
  0xe3   :  { %212 = vmax.xlane.f32.xlu1 %v211_v26  ;;  %v208_v27 = vsel %vm33_vm0, %v113_v22, -inf  ;;  %v217_v28 = vsel %vm33_vm0, %v205_v23, -inf }
  0xe4   :  { %209 = vmax.xlane.f32.xlu0 %v208_v27  ;;  %v214_v29 = vsel %vm33_vm0, %v200_v25, -inf }
  0xe7   :  { %218 = vmax.xlane.f32.xlu1 %v217_v28 }
  0xe8   :  { %215 = vmax.xlane.f32.xlu0 %v214_v29 }
 0x170   :  { %v213_v30 = vpop.xlane.xlu1 %212 }
 0x171   :  { %v221_v31 = vsub.f32 %v118_v19, %v213_v30  ;;  %v210_v32 = vpop.xlane.xlu0 %209 }
 0x172   :  { %v220_v33 = vsub.f32 %v113_v22, %v210_v32 }
 0x173   :  { %v226_v34 = vmul.f32 1.442695, %v221_v31 }
 0x174   :  { %v224_v35 = vmul.f32 1.442695, %v220_v33  ;;  %v219_v36 = vpop.xlane.xlu1 %218 }
 0x175   :  { %v223_v37 = vsub.f32 %v205_v23, %v219_v36  ;;  %v216_v38 = vpop.xlane.xlu0 %215 }
 0x176   :  { %502 = vpow2.f32 %v224_v35  ;;  %v222_v39 = vsub.f32 %v200_v25, %v216_v38 }
 0x177   :  { %504 = vpow2.f32 %v226_v34  ;;  %v230_v40 = vmul.f32 1.442695, %v223_v37 }
 0x178   :  { %v228_v41 = vmul.f32 1.442695, %v222_v39 }
 0x17a   :  { %506 = vpow2.f32 %v228_v41 }
 0x17b   :  { %508 = vpow2.f32 %v230_v40 }
 0x180   :  { %v503_v42 = vpop.eup %502 }
 0x181   :  { %v232_v43 = vsel %vm33_vm0, %v503_v42, 0.0  ;;  %v505_v44 = vpop.eup %504 }
 0x182   :  { %233 = vadd.xlane.f32.xlu0 %v232_v43  ;;  %v235_v46 = vsel %vm33_vm0, %v505_v44, 0.0 }
 0x184   :  { %v507_v45 = vpop.eup %506 }
 0x185   :  { %v238_v47 = vsel %vm33_vm0, %v507_v45, 0.0  ;;  %v509_v48 = vpop.eup %508 }
 0x186   :  { %236 = vadd.xlane.f32.xlu0 %v235_v46  ;;  %239 = vadd.xlane.f32.xlu1 %v238_v47  ;;  %v241_v49 = vsel %vm33_vm0, %v509_v48, 0.0 }
 0x18a   :  { %242 = vadd.xlane.f32.xlu1 %v241_v49 }
 0x20f   :  { %v234_v56 = vpop.xlane.xlu0 %233 }
 0x210   :  { %510 = vrcp.f32 %v234_v56 }
 0x213   :  { %v240_v57 = vpop.xlane.xlu1 %239  ;;  %v237_v58 = vpop.xlane.xlu0 %236 }
 0x214   :  { %512 = vrcp.f32 %v240_v57 }
 0x215   :  { %514 = vrcp.f32 %v237_v58 }
 0x217   :  { %v243_v59 = vpop.xlane.xlu1 %242 }
 0x218   :  { %516 = vrcp.f32 %v243_v59 }
 0x21a   :  { %v511_v60 = vpop.eup %510 }
 0x21b   :  { %v245_v61 = vmul.f32 %v511_v60, %v503_v42 }
 0x21d   :  { %472 = vmatprep.mubr.msk.f32.mxu0 %vm33_vm0, %v245_v61 }
 0x21e   :  { %v513_v62 = vpop.eup %512 }
 0x21f   :  { %v515_v63 = vpop.eup %514  ;;  %v249_v0 = vmul.f32 %v513_v62, %v507_v45 }
 0x220   :  { %v247_v1 = vmul.f32 %v515_v63, %v505_v44 }
 0x221   :  { %479 = vmatprep.mubr.msk.f32.mxu1 %vm33_vm0, %v249_v0 }
 0x222   :  { %v517_v2 = vpop.eup %516  ;;  %473 = vmatmul.mubr.msk.f32.vlgmr.msra.gmra.mrb[2].mxu0 %vm33_vm0, %v247_v1 }
 0x223   :  { %v251_v3 = vmul.f32 %v517_v2, %v509_v48 }
 0x225   :  { %480 = vmatmul.mubr.msk.f32.vlgmr.msra.gmra.mrb[2].mxu1 %vm33_vm0, %v251_v3 }
 0x2f5   :  { %v474_v4 = vpop.f32.mrb[2].mxu0 }
 0x2f6   :  { %419 = vst.msk [vmem:[%s629_s4 + $0x8] sm:$0xff] %vm33_vm0, %v474_v4  ;;  %v328_v5 = vpop.f32.mrb[3].mxu0 }
 0x2f7   :  { %418 = vst.msk [vmem:[%s629_s4] sm:$0xff] %vm33_vm0, %v328_v5 }
 0x2f8   :  { %v481_v6 = vpop.f32.mrb[2].mxu1 }
 0x2f9   :  { %421 = vst.msk [vmem:[%s629_s4 + $0x18] sm:$0xff] %vm33_vm0, %v481_v6  ;;  %v409_v7 = vpop.f32.mrb[3].mxu1 }
 0x2fa   :  { %420 = vst.msk [vmem:[%s629_s4 + $0x10] sm:$0xff] %vm33_vm0, %v409_v7 }

// kernel: medsam_forward.39
= control target key start
LH: loop header
LB: loop body
LE: loop exit
PB: predicated region body
PF: predicated region fallthrough
CT: control target
= control target key end

     0   :  { %vm23_vm0 = vcmask 261120   ;;  %s270_s1 = inlined_call_operand.vmem [shape: f32[32,32], index: 1, kind: input, shape index: {}]   ;;  %s271_s0 = inlined_call_operand.vmem [shape: f32[16,32], index: 0, kind: input, shape index: {}]   ;;  %s272_s2 = inlined_call_operand.vmem [shape: f32[1,32], index: 2, kind: input, shape index: {}]   ;;  %s273_s3 = inlined_call_operand.vmem [shape: f32[1,32], index: 3, kind: input, shape index: {}]   ;;  %s274_s4 = inlined_call_operand.vmem [shape: f32[16,32], index: 4, kind: output, shape index: {}]  }
   0x1   :  { %v19_v0 = vld [vmem:[%s270_s1] sm:$0xff]  ;;  %v20_v1 = vld [vmem:[%s270_s1 + $0x8] sm:$0xff]  ;;  %v21_v2 = vld [vmem:[%s270_s1 + $0x10] sm:$0xff] }
   0x2   :  { %v191_v3 = vpack.c.bf16 %v20_v1, %v19_v0  ;;  %v22_v4 = vld [vmem:[%s270_s1 + $0x18] sm:$0xff]  ;;  %v17_v5 = vld [vmem:[%s271_s0] sm:$0xff]  ;;  %v18_v7 = vld [vmem:[%s271_s0 + $0x8] sm:$0xff] }
   0x3   :  { %v195_v6 = vpack.c.bf16 %v22_v4, %v21_v2  ;;  %188 = vmatprep.mubr.msk.f32.mxu0 %vm23_vm0, %v17_v5  ;;  %v172_v39 = vld [vmem:[%s272_s2] ss:$0 sm:$0xff] }
   0x4   :  { %192 = vmatprep.subr.bf16.mxu0 %v191_v3  ;;  %v173_v41 = vld [vmem:[%s273_s3] ss:$0 sm:$0xff] }
   0x5   :  { %194 = vmatpush3.bf16.msra.mxu0 %v191_v3 }
   0x6   :  { %196 = vmatprep.subr.bf16.mxu0 %v195_v6 }
   0x9   :  { %198 = vmatpush3.bf16.msra.mxu0 %v195_v6 }
   0xc   :  { %189 = vmatmul.mubr.msk.f32.vlgmr.msra.gmra.mrb[0].mxu0 %vm23_vm0, %v18_v7 }
  0xdf   :  { %v190_v8 = vpop.f32.mrb[0].mxu0 }
  0xe0   :  { %v96_v9 = vpop.f32.mrb[1].mxu0  ;;  %v108_v11 = vsel %vm23_vm0, %v190_v8, 0.0 }
  0xe1   :  { %v105_v10 = vsel %vm23_vm0, %v96_v9, 0.0 }
  0xe2   :  { %106 = vadd.xlane.f32.xlu0 %v105_v10 }
  0xe6   :  { %109 = vadd.xlane.f32.xlu0 %v108_v11 }
 0x16f   :  { %v107_v12 = vpop.xlane.xlu0 %106 }
 0x170   :  { %v112_v13 = vmul.f32 0.03125, %v107_v12 }
 0x172   :  { %v114_v14 = vsub.f32 %v96_v9, %v112_v13 }
 0x173   :  { %v110_v15 = vpop.xlane.xlu0 %109 }
 0x174   :  { %v113_v16 = vmul.f32 0.03125, %v110_v15  ;;  %v116_v17 = vmul.f32 %v114_v14, %v114_v14 }
 0x176   :  { %v115_v18 = vsub.f32 %v190_v8, %v113_v16  ;;  %v118_v19 = vsel %vm23_vm0, %v116_v17, 0.0 }
 0x177   :  { %119 = vadd.xlane.f32.xlu1 %v118_v19 }
 0x178   :  { %v117_v20 = vmul.f32 %v115_v18, %v115_v18 }
 0x17a   :  { %v121_v21 = vsel %vm23_vm0, %v117_v20, 0.0 }
 0x17b   :  { %122 = vadd.xlane.f32.xlu1 %v121_v21 }
 0x204   :  { %v120_v22 = vpop.xlane.xlu1 %119 }
 0x205   :  { %v124_v23 = vmul.f32 0.03125, %v120_v22 }
 0x207   :  { %v126_v24 = vadd.f32 1e-06, %v124_v23 }
 0x208   :  { %v123_v25 = vpop.xlane.xlu1 %122 }
 0x209   :  { %199 = vrsqrt.f32 %v126_v24  ;;  %v125_v26 = vmul.f32 0.03125, %v123_v25  ;;  %vm130_vm1 = vcmp.eq.f32.partialorder %v126_v24, inf  ;;  %v133_v30 = vand.u32 2147483648, %v126_v24 }
 0x20a   :  { %vm132_vm2 = vcmp.eq.f32.partialorder %v126_v24, 0.0 }
 0x20b   :  { %v127_v27 = vadd.f32 1e-06, %v125_v26 }
 0x20d   :  { %201 = vrsqrt.f32 %v127_v27  ;;  %vm137_vm3 = vcmp.eq.f32.partialorder %v127_v27, inf  ;;  %v140_v35 = vand.u32 2147483648, %v127_v27  ;;  %vm139_vm4 = vcmp.eq.f32.partialorder %v127_v27, 0.0 }
 0x213   :  { %v200_v28 = vpop.eup %199 }
 0x214   :  { %v129_v29 = vmul.f32 %v200_v28, %v126_v24 }
 0x216   :  { %v131_v31 = vsel %vm130_vm1, %v126_v24, %v129_v29 }
 0x217   :  { %v134_v32 = vsel %vm132_vm2, %v133_v30, %v131_v31  ;;  %v202_v33 = vpop.eup %201 }
 0x218   :  { %203 = vrcp.f32 %v134_v32  ;;  %v136_v34 = vmul.f32 %v202_v33, %v127_v27 }
 0x21a   :  { %v138_v36 = vsel %vm137_vm3, %v127_v27, %v136_v34 }
 0x21b   :  { %v141_v37 = vsel %vm139_vm4, %v140_v35, %v138_v36 }
 0x21c   :  { %205 = vrcp.f32 %v141_v37 }
 0x222   :  { %v204_v38 = vpop.eup %203 }
 0x223   :  { %v143_v40 = vmul.f32 %v204_v38, %v114_v14 }
 0x225   :  { %v153_v42 = vmul.f32 %v172_v39, %v143_v40 }
 0x226   :  { %v206_v43 = vpop.eup %205 }
 0x227   :  { %v162_v44 = vadd.f32 %v173_v41, %v153_v42  ;;  %v145_v45 = vmul.f32 %v206_v43, %v115_v18 }
 0x229   :  { %164 = vst.msk [vmem:[%s274_s4] sm:$0xff] %vm23_vm0, %v162_v44  ;;  %v154_v46 = vmul.f32 %v172_v39, %v145_v45 }
 0x22b   :  { %v163_v47 = vadd.f32 %v173_v41, %v154_v46 }
 0x22d   :  { %165 = vst.msk [vmem:[%s274_s4 + $0x8] sm:$0xff] %vm23_vm0, %v163_v47 }

// kernel: medsam_forward.40
= control target key start
LH: loop header
LB: loop body
LE: loop exit
PB: predicated region body
PF: predicated region fallthrough
CT: control target
= control target key end

     0   :  { %vm59_vm0 = vcmask 261120   ;;  %s559_s1 = inlined_call_operand.vmem [shape: f32[288,32], index: 1, kind: input, shape index: {}]   ;;  %s560_s0 = inlined_call_operand.vmem [shape: f32[16,288], index: 0, kind: input, shape index: {}]   ;;  %s561_s2 = inlined_call_operand.vmem [shape: f32[1,32], index: 2, kind: input, shape index: {}]   ;;  %s562_s3 = inlined_call_operand.vmem [shape: f32[1,32], index: 3, kind: input, shape index: {}]   ;;  %s563_s4 = inlined_call_operand.vmem [shape: f32[16,32], index: 4, kind: output, shape index: {}]  }
   0x1   :  { %v39_v0 = vld [vmem:[%s559_s1 + $0x80] sm:$0xff]  ;;  %v40_v1 = vld [vmem:[%s559_s1 + $0x88] sm:$0xff]  ;;  %v41_v5 = vld [vmem:[%s559_s1 + $0x90] sm:$0xff] }
   0x2   :  { %v23_v2 = vld [vmem:[%s559_s1] sm:$0xff]  ;;  %v340_v3 = vpack.c.bf16 %v40_v1, %v39_v0  ;;  %v24_v4 = vld [vmem:[%s559_s1 + $0x8] sm:$0xff]  ;;  %v42_v6 = vld [vmem:[%s559_s1 + $0x98] sm:$0xff] }
   0x3   :  { %v342_v7 = vpack.c.bf16 %v24_v4, %v23_v2  ;;  %v344_v8 = vpack.c.bf16 %v42_v6, %v41_v5  ;;  %v25_v9 = vld [vmem:[%s559_s1 + $0x10] sm:$0xff]  ;;  %v26_v10 = vld [vmem:[%s559_s1 + $0x18] sm:$0xff]  ;;  %v43_v11 = vld [vmem:[%s559_s1 + $0xa0] sm:$0xff] }
   0x4   :  { %341 = vmatprep.subr.bf16.mxu0 %v340_v3  ;;  %v44_v12 = vld [vmem:[%s559_s1 + $0xa8] sm:$0xff]  ;;  %v346_v13 = vpack.c.bf16 %v26_v10, %v25_v9  ;;  %v27_v15 = vld [vmem:[%s559_s1 + $0x20] sm:$0xff]  ;;  %v45_v17 = vld [vmem:[%s559_s1 + $0xb0] sm:$0xff] }
   0x5   :  { %343 = vmatpush3.bf16.msra.mxu0 %v342_v7  ;;  %v348_v14 = vpack.c.bf16 %v44_v12, %v43_v11  ;;  %v28_v16 = vld [vmem:[%s559_s1 + $0x28] sm:$0xff]  ;;  %v46_v18 = vld [vmem:[%s559_s1 + $0xb8] sm:$0xff]  ;;  %v29_v20 = vld [vmem:[%s559_s1 + $0x30] sm:$0xff] }
   0x6   :  { %345 = vmatprep.subr.bf16.mxu0 %v344_v8  ;;  %v350_v19 = vpack.c.bf16 %v28_v16, %v27_v15  ;;  %v352_v21 = vpack.c.bf16 %v46_v18, %v45_v17  ;;  %v30_v22 = vld [vmem:[%s559_s1 + $0x38] sm:$0xff]  ;;  %v55_v23 = vld [vmem:[%s559_s1 + $0x100] sm:$0xff]  ;;  %v56_v24 = vld [vmem:[%s559_s1 + $0x108] sm:$0xff] }
   0x7   :  { %v47_v25 = vld [vmem:[%s559_s1 + $0xc0] sm:$0xff]  ;;  %v48_v26 = vld [vmem:[%s559_s1 + $0xc8] sm:$0xff]  ;;  %v372_v27 = vpack.c.bf16 %v56_v24, %v55_v23  ;;  %v57_v28 = vld [vmem:[%s559_s1 + $0x110] sm:$0xff]  ;;  %v354_v30 = vpack.c.bf16 %v30_v22, %v29_v20 }
   0x8   :  { %v58_v29 = vld [vmem:[%s559_s1 + $0x118] sm:$0xff]  ;;  %v18_v32 = vld [vmem:[%s560_s0 + $0x8] sm:$0xff]  ;;  %v19_v33 = vld [vmem:[%s560_s0 + $0x10] sm:$0xff]  ;;  %v356_v34 = vpack.c.bf16 %v48_v26, %v47_v25 }
   0x9   :  { %347 = vmatpush3.bf16.msra.mxu0 %v346_v13  ;;  %373 = vmatprep.subr.bf16.mxu1 %v372_v27  ;;  %v376_v31 = vpack.c.bf16 %v58_v29, %v57_v28  ;;  %v31_v35 = vld [vmem:[%s559_s1 + $0x40] sm:$0xff]  ;;  %v32_v36 = vld [vmem:[%s559_s1 + $0x48] sm:$0xff]  ;;  %v49_v37 = vld [vmem:[%s559_s1 + $0xd0] sm:$0xff] }
   0xa   :  { %349 = vmatprep.subr.bf16.mxu0 %v348_v14  ;;  %375 = vmatpush3.bf16.msra.mxu1 %v372_v27  ;;  %v50_v38 = vld [vmem:[%s559_s1 + $0xd8] sm:$0xff]  ;;  %v358_v39 = vpack.c.bf16 %v32_v36, %v31_v35  ;;  %v33_v41 = vld [vmem:[%s559_s1 + $0x50] sm:$0xff]  ;;  %v22_v43 = vld [vmem:[%s560_s0 + $0x28] sm:$0xff] }
   0xb   :  { %377 = vmatprep.subr.bf16.mxu1 %v376_v31  ;;  %130 = vmatprep.mubr.f32.mxu0 %v18_v32  ;;  %v360_v40 = vpack.c.bf16 %v50_v38, %v49_v37  ;;  %v34_v42 = vld [vmem:[%s559_s1 + $0x58] sm:$0xff]  ;;  %v51_v44 = vld [vmem:[%s559_s1 + $0xe0] sm:$0xff]  ;;  %v52_v45 = vld [vmem:[%s559_s1 + $0xe8] sm:$0xff] }
   0xc   :  { %337 = vmatprep.mubr.msk.f32.mxu1 %vm59_vm0, %v19_v33  ;;  %v362_v46 = vpack.c.bf16 %v34_v42, %v33_v41  ;;  %v364_v47 = vpack.c.bf16 %v52_v45, %v51_v44  ;;  %v35_v48 = vld [vmem:[%s559_s1 + $0x60] sm:$0xff]  ;;  %v36_v49 = vld [vmem:[%s559_s1 + $0x68] sm:$0xff]  ;;  %v53_v50 = vld [vmem:[%s559_s1 + $0xf0] sm:$0xff] }
   0xd   :  { %351 = vmatpush3.bf16.msra.mxu0 %v350_v19  ;;  %v54_v51 = vld [vmem:[%s559_s1 + $0xf8] sm:$0xff]  ;;  %v366_v52 = vpack.c.bf16 %v36_v49, %v35_v48  ;;  %v37_v54 = vld [vmem:[%s559_s1 + $0x70] sm:$0xff]  ;;  %v17_v57 = vld [vmem:[%s560_s0] sm:$0xff] }
   0xe   :  { %353 = vmatprep.subr.bf16.mxu0 %v352_v21  ;;  %379 = vmatpush3.bf16.msra.mxu1 %v376_v31  ;;  %v368_v53 = vpack.c.bf16 %v54_v51, %v53_v50  ;;  %v38_v55 = vld [vmem:[%s559_s1 + $0x78] sm:$0xff]  ;;  %v21_v58 = vld [vmem:[%s560_s0 + $0x20] sm:$0xff] }
   0xf   :  { %v370_v56 = vpack.c.bf16 %v38_v55, %v37_v54  ;;  %v20_v59 = vld [vmem:[%s560_s0 + $0x18] sm:$0xff]  ;;  %v283_v35 = vld [vmem:[%s561_s2] ss:$0 sm:$0xff] }
  0x10   :  { %v284_v37 = vld [vmem:[%s562_s3] ss:$0 sm:$0xff] }
  0x11   :  { %355 = vmatpush3.bf16.msra.mxu0 %v354_v30  ;;  %338 = vmatmul.mubr.msk.f32.vlgmr.msra.gmra.mrb[0].mxu1 %vm59_vm0, %v22_v43 }
  0x12   :  { %357 = vmatprep.subr.bf16.mxu0 %v356_v34 }
  0x15   :  { %359 = vmatpush3.bf16.msra.mxu0 %v358_v39 }
  0x16   :  { %361 = vmatprep.subr.bf16.mxu0 %v360_v40 }
  0x19   :  { %363 = vmatpush3.bf16.msra.mxu0 %v362_v46 }
  0x1a   :  { %365 = vmatprep.subr.bf16.mxu0 %v364_v47 }
  0x1d   :  { %367 = vmatpush3.bf16.msra.mxu0 %v366_v52 }
  0x1e   :  { %369 = vmatprep.subr.bf16.mxu0 %v368_v53 }
  0x21   :  { %371 = vmatpush3.bf16.msra.mxu0 %v370_v56 }
  0x24   :  { %131 = vmatmul.mubr.f32.vlgmr.msra.gmra.mrb[0].mxu0 %v17_v57 }
  0x25   :  { %135 = vmatprep.mubr.f32.mxu0 %v21_v58 }
  0x28   :  { %136 = vmatmul.mubr.f32.gmra.mrb[2].mxu0 %v20_v59 }
  0xe4   :  { %v339_v60 = vpop.f32.mrb[0].mxu1 }
  0xe5   :  { %v207_v61 = vpop.f32.mrb[1].mxu1 }
  0xf7   :  { %v317_v62 = vpop.f32.mrb[0].mxu0 }
  0xf8   :  { %v318_v63 = vpop.f32.mrb[1].mxu0 }
  0xf9   :  { %v319_v0 = vadd.f32 %v318_v63, %v317_v62 }
  0xfb   :  { %v208_v1 = vadd.f32 %v319_v0, %v207_v61  ;;  %v320_v2 = vpop.f32.mrb[2].mxu0 }
  0xfc   :  { %v321_v3 = vpop.f32.mrb[3].mxu0 }
  0xfd   :  { %v322_v4 = vadd.f32 %v321_v3, %v320_v2  ;;  %v216_v5 = vsel %vm59_vm0, %v208_v1, 0.0 }
  0xfe   :  { %217 = vadd.xlane.f32.xlu0 %v216_v5 }
  0xff   :  { %v213_v6 = vadd.f32 %v339_v60, %v322_v4 }
 0x101   :  { %v219_v7 = vsel %vm59_vm0, %v213_v6, 0.0 }
 0x102   :  { %220 = vadd.xlane.f32.xlu0 %v219_v7 }
 0x18b   :  { %v218_v8 = vpop.xlane.xlu0 %217 }
 0x18c   :  { %v223_v9 = vmul.f32 0.03125, %v218_v8 }
 0x18e   :  { %v225_v10 = vsub.f32 %v208_v1, %v223_v9 }
 0x18f   :  { %v221_v11 = vpop.xlane.xlu0 %220 }
 0x190   :  { %v224_v12 = vmul.f32 0.03125, %v221_v11  ;;  %v227_v13 = vmul.f32 %v225_v10, %v225_v10 }
 0x192   :  { %v226_v14 = vsub.f32 %v213_v6, %v224_v12  ;;  %v229_v15 = vsel %vm59_vm0, %v227_v13, 0.0 }
 0x193   :  { %230 = vadd.xlane.f32.xlu1 %v229_v15 }
 0x194   :  { %v228_v16 = vmul.f32 %v226_v14, %v226_v14 }
 0x196   :  { %v232_v17 = vsel %vm59_vm0, %v228_v16, 0.0 }
 0x197   :  { %233 = vadd.xlane.f32.xlu1 %v232_v17 }
 0x220   :  { %v231_v18 = vpop.xlane.xlu1 %230 }
 0x221   :  { %v235_v19 = vmul.f32 0.03125, %v231_v18 }
 0x223   :  { %v237_v20 = vadd.f32 1e-06, %v235_v19 }
 0x224   :  { %v234_v21 = vpop.xlane.xlu1 %233 }
 0x225   :  { %380 = vrsqrt.f32 %v237_v20  ;;  %v236_v22 = vmul.f32 0.03125, %v234_v21  ;;  %vm241_vm1 = vcmp.eq.f32.partialorder %v237_v20, inf  ;;  %v244_v26 = vand.u32 2147483648, %v237_v20 }
 0x226   :  { %vm243_vm2 = vcmp.eq.f32.partialorder %v237_v20, 0.0 }
 0x227   :  { %v238_v23 = vadd.f32 1e-06, %v236_v22 }
 0x229   :  { %382 = vrsqrt.f32 %v238_v23  ;;  %vm248_vm3 = vcmp.eq.f32.partialorder %v238_v23, inf  ;;  %v251_v31 = vand.u32 2147483648, %v238_v23  ;;  %vm250_vm4 = vcmp.eq.f32.partialorder %v238_v23, 0.0 }
 0x22f   :  { %v381_v24 = vpop.eup %380 }
 0x230   :  { %v240_v25 = vmul.f32 %v381_v24, %v237_v20 }
 0x232   :  { %v242_v27 = vsel %vm241_vm1, %v237_v20, %v240_v25 }
 0x233   :  { %v245_v28 = vsel %vm243_vm2, %v244_v26, %v242_v27  ;;  %v383_v29 = vpop.eup %382 }
 0x234   :  { %384 = vrcp.f32 %v245_v28  ;;  %v247_v30 = vmul.f32 %v383_v29, %v238_v23 }
 0x236   :  { %v249_v32 = vsel %vm248_vm3, %v238_v23, %v247_v30 }
 0x237   :  { %v252_v33 = vsel %vm250_vm4, %v251_v31, %v249_v32 }
 0x238   :  { %386 = vrcp.f32 %v252_v33 }
 0x23e   :  { %v385_v34 = vpop.eup %384 }
 0x23f   :  { %v254_v36 = vmul.f32 %v385_v34, %v225_v10 }
 0x241   :  { %v264_v38 = vmul.f32 %v283_v35, %v254_v36 }
 0x242   :  { %v387_v39 = vpop.eup %386 }
 0x243   :  { %v273_v40 = vadd.f32 %v284_v37, %v264_v38  ;;  %v256_v41 = vmul.f32 %v387_v39, %v226_v14 }
 0x245   :  { %275 = vst.msk [vmem:[%s563_s4] sm:$0xff] %vm59_vm0, %v273_v40  ;;  %v265_v42 = vmul.f32 %v283_v35, %v256_v41 }
 0x247   :  { %v274_v43 = vadd.f32 %v284_v37, %v265_v42 }
 0x249   :  { %276 = vst.msk [vmem:[%s563_s4 + $0x8] sm:$0xff] %vm59_vm0, %v274_v43 }

// kernel: medsam_forward.43
= control target key start
LH: loop header
LB: loop body
LE: loop exit
PB: predicated region body
PF: predicated region fallthrough
CT: control target
= control target key end

     0   :  { %v322_v0 = vmov 0.0|0.0   ;;  %vm323_vm0 = vmmov 0   ;;  %v324_v4 = vmov 0.0   ;;  %vm38_vm1 = vcmask 261120   ;;  %s422_s1 = inlined_call_operand.vmem [shape: f32[32,64], index: 1, kind: input, shape index: {}]   ;;  %s423_s3 = inlined_call_operand.vmem [shape: f32[64,32], index: 3, kind: input, shape index: {}]   ;;  %s424_s0 = inlined_call_operand.vmem [shape: f32[1,7,32], index: 0, kind: input, shape index: {}]   ;;  %s425_s2 = inlined_call_operand.vmem [shape: f32[1,64], index: 2, kind: input, shape index: {}]   ;;  %s426_s4 = inlined_call_operand.vmem [shape: f32[1,32], index: 4, kind: input, shape index: {}]   ;;  %s427_s5 = inlined_call_operand.vmem [shape: f32[1,32], index: 5, kind: input, shape index: {}]   ;;  %s428_s6 = inlined_call_operand.vmem [shape: f32[1,32], index: 6, kind: input, shape index: {}]   ;;  %s429_s7 = inlined_call_operand.vmem [shape: f32[1,7,32], index: 7, kind: output, shape index: {}]  }
   0x1   :  { %297 = vmatprep.subr.bf16.mxu0 %v322_v0  ;;  %v27_v1 = vld [vmem:[%s422_s1] sm:$0xff]  ;;  %v28_v2 = vld [vmem:[%s422_s1 + $0x8] sm:$0xff]  ;;  %v29_v3 = vld [vmem:[%s422_s1 + $0x10] sm:$0xff]  ;;  %275 = vmatprep.mubr.msk.f32.mxu0 %vm323_vm0, %v324_v4  ;;  %vm121_vm2 = vcmask 523264   ;;  %vm204_vm3 = vcmask 260096  }
   0x2   :  { %v298_v5 = vpack.c.bf16 %v28_v2, %v27_v1  ;;  %v30_v6 = vld [vmem:[%s422_s1 + $0x18] sm:$0xff]  ;;  %303 = vmatprep.subr.bf16.mxu1 %v322_v0  ;;  %v113_v7 = vld [vmem:[%s423_s3] sm:$0xff]  ;;  %294 = vmatprep.mubr.msk.f32.mxu1 %vm323_vm0, %v324_v4  ;;  %v114_v8 = vld [vmem:[%s423_s3 + $0x8] sm:$0xff] }
   0x3   :  { %v115_v9 = vld [vmem:[%s423_s3 + $0x10] sm:$0xff]  ;;  %v116_v10 = vld [vmem:[%s423_s3 + $0x18] sm:$0xff]  ;;  %v301_v11 = vpack.c.bf16 %v30_v6, %v29_v3  ;;  %v304_v12 = vpack.c.bf16 %v114_v8, %v113_v7  ;;  %v117_v14 = vld [vmem:[%s423_s3 + $0x20] sm:$0xff] }
   0x4   :  { %299 = vmatpush3.bf16.msra.mxu0 %v298_v5  ;;  %v307_v13 = vpack.c.bf16 %v116_v10, %v115_v9  ;;  %v118_v15 = vld [vmem:[%s423_s3 + $0x28] sm:$0xff]  ;;  %v26_v16 = vld [vmem:[%s424_s0] sm:$0x7f]  ;;  %v119_v18 = vld [vmem:[%s423_s3 + $0x30] sm:$0xff] }
   0x5   :  { %300 = vmatprep.subr.bf16.mxu0 %v322_v0  ;;  %305 = vmatpush3.bf16.msra.mxu1 %v304_v12  ;;  %v310_v17 = vpack.c.bf16 %v118_v15, %v117_v14  ;;  %v120_v19 = vld [vmem:[%s423_s3 + $0x38] sm:$0xff]  ;;  %v247_v21 = vld [vmem:[%s425_s2] ss:$0 sm:$0xff] }
   0x6   :  { %306 = vmatprep.subr.bf16.mxu1 %v322_v0  ;;  %v313_v20 = vpack.c.bf16 %v120_v19, %v119_v18  ;;  %v250_v27 = vld [vmem:[%s426_s4] ss:$0 sm:$0xff] }
   0x7   :  { %v251_v46 = vld [vmem:[%s427_s5] ss:$0 sm:$0xff] }
   0x8   :  { %302 = vmatpush3.bf16.msra.mxu0 %v301_v11  ;;  %v252_v48 = vld [vmem:[%s428_s6] ss:$0 sm:$0xff] }
   0x9   :  { %308 = vmatpush3.bf16.msra.mxu1 %v307_v13 }
   0xa   :  { %309 = vmatprep.subr.bf16.mxu1 %v322_v0 }
   0xb   :  { %276 = vmatmul.mubr.msk.f32.vlgmr.msra.gmra.mrb[0].mxu0 %vm38_vm1, %v26_v16 }
   0xd   :  { %311 = vmatpush3.bf16.msra.mxu1 %v310_v17 }
   0xe   :  { %312 = vmatprep.subr.bf16.mxu1 %v322_v0 }
  0x11   :  { %314 = vmatpush3.bf16.msra.mxu1 %v313_v20 }
  0xde   :  { %v108_v22 = vpop.f32.mrb[0].mxu0 }
  0xdf   :  { %v109_v23 = vadd.f32 %v247_v21, %v108_v22  ;;  %v277_v24 = vpop.f32.mrb[1].mxu0 }
  0xe1   :  { %v112_v25 = vmax.f32 %v109_v23, 0.0 }
  0xe3   :  { %295 = vmatmul.mubr.msk.f32.vlgmr.msra.gmra.mrb[0].mxu1 %vm121_vm2, %v112_v25 }
 0x1b6   :  { %v191_v26 = vpop.f32.mrb[0].mxu1 }
 0x1b7   :  { %v195_v28 = vadd.f32 %v191_v26, %v26_v16  ;;  %v296_v29 = vpop.f32.mrb[1].mxu1 }
 0x1b9   :  { %v203_v30 = vadd.f32 %v250_v27, %v195_v28 }
 0x1bb   :  { %v205_v31 = vsel %vm204_vm3, %v203_v30, 0.0 }
 0x1bc   :  { %206 = vadd.xlane.f32.xlu0 %v205_v31 }
 0x249   :  { %v207_v32 = vpop.xlane.xlu0 %206 }
 0x24a   :  { %v209_v33 = vmul.f32 0.03125, %v207_v32 }
 0x24c   :  { %v210_v34 = vsub.f32 %v203_v30, %v209_v33 }
 0x24e   :  { %v211_v35 = vmul.f32 %v210_v34, %v210_v34 }
 0x250   :  { %v212_v36 = vsel %vm204_vm3, %v211_v35, 0.0 }
 0x251   :  { %213 = vadd.xlane.f32.xlu0 %v212_v36 }
 0x2de   :  { %v214_v37 = vpop.xlane.xlu0 %213 }
 0x2df   :  { %v215_v38 = vmul.f32 0.03125, %v214_v37 }
 0x2e1   :  { %v216_v39 = vadd.f32 1e-05, %v215_v38 }
 0x2e3   :  { %318 = vrsqrt.f32 %v216_v39  ;;  %vm219_vm4 = vcmp.eq.f32.partialorder %v216_v39, inf  ;;  %v222_v42 = vand.u32 2147483648, %v216_v39  ;;  %vm221_vm5 = vcmp.eq.f32.partialorder %v216_v39, 0.0 }
 0x2ed   :  { %v319_v40 = vpop.eup %318 }
 0x2ee   :  { %v218_v41 = vmul.f32 %v319_v40, %v216_v39 }
 0x2f0   :  { %v220_v43 = vsel %vm219_vm4, %v216_v39, %v218_v41 }
 0x2f1   :  { %v223_v44 = vsel %vm221_vm5, %v222_v42, %v220_v43 }
 0x2f2   :  { %320 = vrcp.f32 %v223_v44 }
 0x2fc   :  { %v321_v45 = vpop.eup %320 }
 0x2fd   :  { %v225_v47 = vmul.f32 %v321_v45, %v210_v34 }
 0x2ff   :  { %v233_v49 = vmul.f32 %v251_v46, %v225_v47 }
 0x301   :  { %v241_v50 = vadd.f32 %v252_v48, %v233_v49 }
 0x303   :  { %242 = vst.msk [vmem:[%s429_s7] sm:$0x7f] %vm204_vm3, %v241_v50 }

// kernel: medsam_forward.41
= control target key start
LH: loop header
LB: loop body
LE: loop exit
PB: predicated region body
PF: predicated region fallthrough
CT: control target
= control target key end

     0   :  { %v991_v0 = vmov 0.0|0.0   ;;  %vm992_vm0 = vmmov 0   ;;  %v993_v8 = vmov 0.0   ;;  %vm58_vm1 = vcmask 261120   ;;  %s1196_s5 = inlined_call_operand.vmem [shape: f32[32,32], index: 5, kind: input, shape index: {}]   ;;  %s1197_s3 = inlined_call_operand.vmem [shape: f32[32,32], index: 3, kind: input, shape index: {}]   ;;  %s1198_s1 = inlined_call_operand.vmem [shape: f32[1,7,32], index: 1, kind: input, shape index: {}, may-alias: {0,1,2}]   ;;  %s1199_s0 = inlined_call_operand.vmem [shape: f32[1,7,32], index: 0, kind: input, shape index: {}, may-alias: {0,1,2}]   ;;  %s1200_s7 = inlined_call_operand.vmem [shape: f32[32,32], index: 7, kind: input, shape index: {}]   ;;  %s1201_s2 = inlined_call_operand.vmem [shape: f32[1,7,32], index: 2, kind: input, shape index: {}, may-alias: {0,1,2}]   ;;  %s1202_s6 = inlined_call_operand.vmem [shape: f32[1,32], index: 6, kind: input, shape index: {}]   ;;  %s1203_s4 = inlined_call_operand.vmem [shape: f32[1,32], index: 4, kind: input, shape index: {}]   ;;  %s1204_s8 = inlined_call_operand.vmem [shape: f32[1,32], index: 8, kind: input, shape index: {}]   ;;  %s1205_s9 = inlined_call_operand.vmem [shape: f32[32,32], index: 9, kind: input, shape index: {}]   ;;  %s1206_s10 = inlined_call_operand.vmem [shape: f32[1,32], index: 10, kind: input, shape index: {}]   ;;  %s1207_s11 = inlined_call_operand.vmem [shape: f32[1,32], index: 11, kind: input, shape index: {}]   ;;  %s1208_s12 = inlined_call_operand.vmem [shape: f32[1,32], index: 12, kind: input, shape index: {}]   ;;  %s1209_s13 = inlined_call_operand.vmem [shape: f32[1,7,32], index: 13, kind: output, shape index: {}]  }
   0x1   :  { %957 = vmatprep.subr.bf16.mxu1 %v991_v0  ;;  %v132_v1 = vld [vmem:[%s1196_s5] sm:$0xff]  ;;  %v133_v2 = vld [vmem:[%s1196_s5 + $0x8] sm:$0xff]  ;;  %951 = vmatprep.subr.bf16.mxu0 %v991_v0  ;;  %v134_v6 = vld [vmem:[%s1196_s5 + $0x10] sm:$0xff]  ;;  %vm300_vm2 = vcmask 130048   ;;  %vm394_vm3 = vcmask 1046528   ;;  %vm378_vm4 = vcmask 55296  }
   0x2   :  { %v47_v3 = vld [vmem:[%s1197_s3] sm:$0xff]  ;;  %v958_v4 = vpack.c.bf16 %v133_v2, %v132_v1  ;;  %v48_v5 = vld [vmem:[%s1197_s3 + $0x8] sm:$0xff]  ;;  %v135_v7 = vld [vmem:[%s1196_s5 + $0x18] sm:$0xff]  ;;  %903 = vmatprep.mubr.msk.f32.mxu1 %vm992_vm0, %v993_v8  ;;  %892 = vmatprep.mubr.msk.f32.mxu0 %vm992_vm0, %v993_v8  ;;  %vm390_vm5 = vcmask 56320   ;;  %vm793_vm6 = vcmask 260096  }
   0x3   :  { %v952_v9 = vpack.c.bf16 %v48_v5, %v47_v3  ;;  %v49_v10 = vld [vmem:[%s1197_s3 + $0x10] sm:$0xff]  ;;  %v50_v11 = vld [vmem:[%s1197_s3 + $0x18] sm:$0xff]  ;;  %v961_v12 = vpack.c.bf16 %v135_v7, %v134_v6  ;;  %v45_v14 = vld [vmem:[%s1198_s1] sm:$0x7f] }
   0x4   :  { %959 = vmatpush3.bf16.msra.mxu1 %v958_v4  ;;  %v955_v13 = vpack.c.bf16 %v50_v11, %v49_v10  ;;  %v44_v15 = vld [vmem:[%s1199_s0] sm:$0x7f]  ;;  %v217_v17 = vld [vmem:[%s1200_s7 + $0x8] sm:$0xff]  ;;  %v218_v18 = vld [vmem:[%s1200_s7 + $0x10] sm:$0xff] }
   0x5   :  { %953 = vmatpush3.bf16.msra.mxu0 %v952_v9  ;;  %960 = vmatprep.subr.bf16.mxu1 %v991_v0  ;;  %v216_v16 = vld [vmem:[%s1200_s7] sm:$0xff]  ;;  %v219_v20 = vld [vmem:[%s1200_s7 + $0x18] sm:$0xff]  ;;  %v637_v58 = vld [vmem:[%s1205_s9 + $0x10] sm:$0xff] }
   0x6   :  { %954 = vmatprep.subr.bf16.mxu0 %v991_v0  ;;  %v964_v19 = vpack.c.bf16 %v217_v17, %v216_v16  ;;  %v967_v21 = vpack.c.bf16 %v219_v20, %v218_v18  ;;  %v46_v22 = vld [vmem:[%s1201_s2] sm:$0x7f]  ;;  %s994_s2 = smov 112   ;;  %v638_v59 = vld [vmem:[%s1205_s9 + $0x18] sm:$0xff]  ;;  %v469_v1 = vld [vmem:[%s1205_s9 + $0x8] sm:$0xff] }
   0x7   :  { %v838_v23 = vld [vmem:[%s1202_s6] ss:$0 sm:$0xff]  ;;  %v970_v60 = vpack.c.bf16 %v638_v59, %v637_v58 }
   0x8   :  { %962 = vmatpush3.bf16.msra.mxu1 %v961_v12  ;;  %v836_v24 = vld [vmem:[%s1203_s4] ss:$0 sm:$0xff] }
   0x9   :  { %956 = vmatpush3.bf16.msra.mxu0 %v955_v13  ;;  %917 = vmatprep.subr.mxu1 %v993_v8  ;;  %v840_v33 = vld [vmem:[%s1204_s8] ss:$0 sm:$0xff] }
   0xa   :  { %963 = vmatprep.subr.bf16.mxu0 %v991_v0  ;;  %v468_v63 = vld [vmem:[%s1205_s9] sm:$0xff] }
   0xb   :  { %904 = vmatmul.mubr.msk.f32.vlgmr.msra.gmra.mrb[0].mxu1 %vm58_vm1, %v45_v14  ;;  %v973_v3 = vpack.c.bf16 %v469_v1, %v468_v63  ;;  %v852_v12 = vld [vmem:[%s1206_s10] ss:$0 sm:$0xff] }
   0xc   :  { %893 = vmatmul.mubr.msk.f32.vlgmr.msra.gmra.mrb[0].mxu0 %vm58_vm1, %v44_v15  ;;  %919 = vmatprep.mubr.msk.f32.mxu1 %vm992_vm0, %v993_v8 }
   0xd   :  { %914 = vmatprep.mubr.msk.f32.mxu0 %vm992_vm0, %v993_v8  ;;  %965 = vmatpush3.bf16.msra.mxu0 %v964_v19 }
   0xe   :  { %966 = vmatprep.subr.bf16.mxu0 %v991_v0 }
  0x11   :  { %968 = vmatpush3.bf16.msra.mxu0 %v967_v21 }
  0x12   :  { %927 = vmatprep.subr.mxu0 %v993_v8 }
  0x14   :  { %915 = vmatmul.mubr.msk.f32.vlgmr.msra.gmra.mrb[2].mxu0 %vm58_vm1, %v46_v22 }
  0x15   :  { %929 = vmatprep.mubr.msk.f32.mxu0 %vm992_vm0, %v993_v8 }
  0xde   :  { %v212_v25 = vpop.f32.mrb[0].mxu1 }
  0xdf   :  { %v213_v26 = vadd.f32 %v838_v23, %v212_v25  ;;  %v905_v27 = vpop.f32.mrb[1].mxu1  ;;  %v128_v28 = vpop.f32.mrb[0].mxu0 }
  0xe0   :  { %v129_v29 = vadd.f32 %v836_v24, %v128_v28  ;;  %v894_v30 = vpop.f32.mrb[1].mxu0 }
  0xe1   :  { %472 = vrot.lane.b32.xlu0 %v213_v26, %s994_s2  ;;  %918 = vmatpush3.xpose.msk.msra.mxu1 %vm300_vm2, %v213_v26  ;;  %v853_v30 = vld [vmem:[%s1207_s11] ss:$0 sm:$0xff] }
  0xe2   :  { %922 = vmatprep.subr.mxu1 %v993_v8 }
  0xe4   :  { %920 = vmatmul.mubr.msk.f32.vlgmr.msra.gmra.mrb[2].mxu1 %vm300_vm2, %v129_v29 }
  0xe5   :  { %470 = vrot.lane.b32.xlu0 %v129_v29, %s994_s2  ;;  %924 = vmatprep.mubr.msk.f32.mxu1 %vm992_vm0, %v993_v8 }
  0xe7   :  { %v296_v34 = vpop.f32.mrb[2].mxu0 }
  0xe8   :  { %v297_v35 = vadd.f32 %v840_v33, %v296_v34  ;;  %v916_v36 = vpop.f32.mrb[3].mxu0 }
  0xea   :  { %923 = vmatpush3.msk.msra.mxu1 %vm394_vm3, %v297_v35 }
  0xeb   :  { %932 = vmatprep.subr.mxu1 %v993_v8 }
 0x153   :  { %v473_v31 = vpop.permute.xlu0 %472 }
 0x154   :  { %928 = vmatpush3.xpose.msk.msra.mxu0 %vm300_vm2, %v473_v31 }
 0x155   :  { %969 = vmatprep.subr.bf16.mxu0 %v991_v0 }
 0x157   :  { %v471_v32 = vpop.permute.xlu0 %470 }
 0x158   :  { %930 = vmatmul.mubr.msk.f32.vlgmr.msra.gmra.mrb[4].mxu0 %vm300_vm2, %v471_v32  ;;  %v854_v32 = vld [vmem:[%s1208_s12] ss:$0 sm:$0xff] }
 0x159   :  { %941 = vmatprep.mubr.msk.f32.mxu0 %vm992_vm0, %v993_v8  ;;  %971 = vmatpush3.bf16.msra.mxu0 %v970_v60 }
 0x1b7   :  { %v373_v37 = vpop.f32.mrb[2].mxu1 }
 0x1b8   :  { %v377_v38 = vmul.f32 0.25, %v373_v37  ;;  %v921_v39 = vpop.f32.mrb[3].mxu1 }
 0x1ba   :  { %v379_v40 = vsel %vm378_vm4, %v377_v38, -inf }
 0x1bb   :  { %380 = vmax.xlane.f32.xlu1 %v379_v40 }
 0x22b   :  { %v544_v41 = vpop.f32.mrb[4].mxu0 }
 0x22c   :  { %v548_v42 = vmul.f32 0.25, %v544_v41  ;;  %v931_v43 = vpop.f32.mrb[5].mxu0 }
 0x22e   :  { %v549_v44 = vsel %vm378_vm4, %v548_v42, -inf }
 0x22f   :  { %550 = vmax.xlane.f32.xlu1 %v549_v44 }
 0x248   :  { %v381_v45 = vpop.xlane.xlu1 %380 }
 0x249   :  { %v382_v46 = vsub.f32 %v377_v38, %v381_v45 }
 0x24b   :  { %v383_v47 = vmul.f32 1.442695, %v382_v46 }
 0x24d   :  { %979 = vpow2.f32 %v383_v47 }
 0x257   :  { %v980_v48 = vpop.eup %979 }
 0x258   :  { %v385_v49 = vsel %vm378_vm4, %v980_v48, 0.0 }
 0x259   :  { %386 = vadd.xlane.f32.xlu0 %v385_v49 }
 0x2bc   :  { %v551_v50 = vpop.xlane.xlu1 %550 }
 0x2bd   :  { %v552_v51 = vsub.f32 %v548_v42, %v551_v50 }
 0x2bf   :  { %v553_v52 = vmul.f32 1.442695, %v552_v51 }
 0x2c1   :  { %981 = vpow2.f32 %v553_v52 }
 0x2cb   :  { %v982_v53 = vpop.eup %981 }
 0x2cc   :  { %v555_v54 = vsel %vm378_vm4, %v982_v53, 0.0 }
 0x2cd   :  { %556 = vadd.xlane.f32.xlu1 %v555_v54 }
 0x2de   :  { %560 = vrot.lane.b32.xlu1 %v297_v35, %s994_s2 }
 0x2e6   :  { %v387_v55 = vpop.xlane.xlu0 %386 }
 0x2e7   :  { %983 = vrcp.f32 %v387_v55 }
 0x2f1   :  { %v984_v56 = vpop.eup %983 }
 0x2f2   :  { %v389_v57 = vmul.f32 %v984_v56, %v980_v48 }
 0x2f4   :  { %925 = vmatmul.mubr.msk.f32.vlgmr.msra.gmra.mrb[4].mxu1 %vm390_vm5, %v389_v57 }
 0x2f5   :  { %934 = vmatprep.mubr.msk.f32.mxu1 %vm992_vm0, %v993_v8 }
 0x35a   :  { %v557_v61 = vpop.xlane.xlu1 %556 }
 0x35b   :  { %985 = vrcp.f32 %v557_v61 }
 0x35e   :  { %v561_v62 = vpop.permute.xlu1 %560 }
 0x35f   :  { %933 = vmatpush3.msk.msra.mxu1 %vm394_vm3, %v561_v62 }
 0x360   :  { %972 = vmatprep.subr.bf16.mxu1 %v991_v0 }
 0x365   :  { %v986_v2 = vpop.eup %985 }
 0x366   :  { %v559_v4 = vmul.f32 %v986_v2, %v982_v53 }
 0x368   :  { %935 = vmatmul.mubr.msk.f32.vlgmr.msra.gmra.mrb[6].mxu1 %vm390_vm5, %v559_v4 }
 0x369   :  { %974 = vmatpush3.bf16.msra.mxu1 %v973_v3  ;;  %948 = vmatprep.mubr.msk.f32.mxu1 %vm992_vm0, %v993_v8 }
 0x3c7   :  { %v464_v5 = vpop.f32.mrb[4].mxu1 }
 0x3c8   :  { %v926_v6 = vpop.f32.mrb[5].mxu1  ;;  %949 = vmatmul.mubr.msk.f32.vlgmr.msra.gmra.mrb[8].mxu1 %vm300_vm2, %v464_v5 }
 0x43b   :  { %v633_v0 = vpop.f32.mrb[6].mxu1 }
 0x43c   :  { %v936_v7 = vpop.f32.mrb[7].mxu1  ;;  %942 = vmatmul.mubr.msk.f32.vlgmr.msra.gmra.mrb[6].mxu0 %vm300_vm2, %v633_v0 }
 0x49b   :  { %v781_v9 = vpop.f32.mrb[8].mxu1 }
 0x49c   :  { %v950_v10 = vpop.f32.mrb[9].mxu1 }
 0x50f   :  { %v708_v11 = vpop.f32.mrb[6].mxu0 }
 0x510   :  { %v782_v13 = vadd.f32 %v781_v9, %v708_v11  ;;  %v943_v14 = vpop.f32.mrb[7].mxu0 }
 0x512   :  { %v792_v15 = vadd.f32 %v852_v12, %v782_v13 }
 0x514   :  { %v794_v8 = vsel %vm793_vm6, %v792_v15, 0.0 }
 0x515   :  { %795 = vadd.xlane.f32.xlu1 %v794_v8 }
 0x5a2   :  { %v796_v16 = vpop.xlane.xlu1 %795 }
 0x5a3   :  { %v798_v17 = vmul.f32 0.03125, %v796_v16 }
 0x5a5   :  { %v799_v18 = vsub.f32 %v792_v15, %v798_v17 }
 0x5a7   :  { %v800_v19 = vmul.f32 %v799_v18, %v799_v18 }
 0x5a9   :  { %v801_v20 = vsel %vm793_vm6, %v800_v19, 0.0 }
 0x5aa   :  { %802 = vadd.xlane.f32.xlu0 %v801_v20 }
 0x637   :  { %v803_v21 = vpop.xlane.xlu0 %802 }
 0x638   :  { %v804_v22 = vmul.f32 0.03125, %v803_v21 }
 0x63a   :  { %v805_v23 = vadd.f32 1e-05, %v804_v22 }
 0x63c   :  { %987 = vrsqrt.f32 %v805_v23  ;;  %vm808_vm7 = vcmp.eq.f32.partialorder %v805_v23, inf  ;;  %v811_v26 = vand.u32 2147483648, %v805_v23  ;;  %vm810_vm8 = vcmp.eq.f32.partialorder %v805_v23, 0.0 }
 0x646   :  { %v988_v24 = vpop.eup %987 }
 0x647   :  { %v807_v25 = vmul.f32 %v988_v24, %v805_v23 }
 0x649   :  { %v809_v27 = vsel %vm808_vm7, %v805_v23, %v807_v25 }
 0x64a   :  { %v812_v28 = vsel %vm810_vm8, %v811_v26, %v809_v27 }
 0x64b   :  { %989 = vrcp.f32 %v812_v28 }
 0x655   :  { %v990_v29 = vpop.eup %989 }
 0x656   :  { %v814_v31 = vmul.f32 %v990_v29, %v799_v18 }
 0x658   :  { %v822_v33 = vmul.f32 %v853_v30, %v814_v31 }
 0x65a   :  { %v830_v34 = vadd.f32 %v854_v32, %v822_v33 }
 0x65c   :  { %831 = vst.msk [vmem:[%s1209_s13] sm:$0x7f] %vm793_vm6, %v830_v34 }

// kernel: medsam_forward.44
= control target key start
LH: loop header
LB: loop body
LE: loop exit
PB: predicated region body
PF: predicated region fallthrough
CT: control target
= control target key end

     0   :  { %v1118_v0 = vmov 0.0|0.0   ;;  %vm1119_vm0 = vmmov 0   ;;  %v1120_v4 = vmov 0.0   ;;  %vm62_vm1 = vcmask 261120   ;;  %s1325_s5 = inlined_call_operand.vmem [shape: f32[32,16], index: 5, kind: input, shape index: {}]   ;;  %s1326_s3 = inlined_call_operand.vmem [shape: f32[32,16], index: 3, kind: input, shape index: {}]   ;;  %s1327_s0 = inlined_call_operand.vmem [shape: f32[1,16,32], index: 0, kind: input, shape index: {}]   ;;  %s1328_s1 = inlined_call_operand.vmem [shape: f32[1,7,32], index: 1, kind: input, shape index: {}]   ;;  %s1329_s7 = inlined_call_operand.vmem [shape: f32[32,16], index: 7, kind: input, shape index: {}]   ;;  %s1330_s6 = inlined_call_operand.vmem [shape: f32[1,16], index: 6, kind: input, shape index: {}]   ;;  %s1331_s2 = inlined_call_operand.vmem [shape: f32[1,7,32], index: 2, kind: input, shape index: {}]   ;;  %s1332_s4 = inlined_call_operand.vmem [shape: f32[1,16], index: 4, kind: input, shape index: {}]   ;;  %s1333_s8 = inlined_call_operand.vmem [shape: f32[1,16], index: 8, kind: input, shape index: {}]   ;;  %s1334_s9 = inlined_call_operand.vmem [shape: f32[16,32], index: 9, kind: input, shape index: {}]   ;;  %s1335_s10 = inlined_call_operand.vmem [shape: f32[1,32], index: 10, kind: input, shape index: {}]   ;;  %s1336_s13 = inlined_call_operand.vmem [shape: f32[1,16,32], index: 13, kind: input, shape index: {}]   ;;  %s1337_s11 = inlined_call_operand.vmem [shape: f32[1,32], index: 11, kind: input, shape index: {}]   ;;  %s1338_s12 = inlined_call_operand.vmem [shape: f32[1,32], index: 12, kind: input, shape index: {}]   ;;  %s1339_s14 = inlined_call_operand.vmem [shape: f32[1,16,32], index: 14, kind: output, shape index: {}]  }
   0x1   :  { %1076 = vmatprep.subr.bf16.mxu1 %v1118_v0  ;;  %v144_v1 = vld [vmem:[%s1325_s5] sm:$0xff]  ;;  %v145_v2 = vld [vmem:[%s1325_s5 + $0x8] sm:$0xff]  ;;  %1024 = vmatprep.mubr.msk.f32.mxu1 %vm1119_vm0, %v1120_v4  ;;  %v146_v7 = vld [vmem:[%s1325_s5 + $0x10] sm:$0xff]  ;;  %vm312_vm2 = vcmask 64512   ;;  %vm399_vm3 = vcmask 56320   ;;  %vm428_vm4 = vcmask 1046528  }
   0x2   :  { %v51_v3 = vld [vmem:[%s1326_s3] sm:$0xff]  ;;  %v1077_v5 = vpack.c.bf16 %v145_v2, %v144_v1  ;;  %v52_v6 = vld [vmem:[%s1326_s3 + $0x8] sm:$0xff]  ;;  %v147_v8 = vld [vmem:[%s1325_s5 + $0x18] sm:$0xff] }
   0x3   :  { %v1068_v9 = vpack.c.bf16 %v52_v6, %v51_v3  ;;  %v53_v10 = vld [vmem:[%s1326_s3 + $0x10] sm:$0xff]  ;;  %v54_v11 = vld [vmem:[%s1326_s3 + $0x18] sm:$0xff]  ;;  %v1080_v12 = vpack.c.bf16 %v147_v8, %v146_v7  ;;  %v47_v14 = vld [vmem:[%s1327_s0] sm:$0xff] }
   0x4   :  { %1078 = vmatpush3.bf16.msra.mxu1 %v1077_v5  ;;  %v1072_v13 = vpack.c.bf16 %v54_v11, %v53_v10  ;;  %1013 = vmatprep.mubr.msk.f32.mxu0 %vm62_vm1, %v47_v14  ;;  %v49_v15 = vld [vmem:[%s1328_s1] sm:$0x7f]  ;;  %v48_v16 = vld [vmem:[%s1327_s0 + $0x8] sm:$0xff]  ;;  %v230_v19 = vld [vmem:[%s1329_s7 + $0x10] sm:$0xff] }
   0x5   :  { %1069 = vmatprep.subr.bf16.mxu0 %v1068_v9  ;;  %1079 = vmatprep.subr.bf16.mxu1 %v1118_v0  ;;  %v228_v17 = vld [vmem:[%s1329_s7] sm:$0xff]  ;;  %v229_v18 = vld [vmem:[%s1329_s7 + $0x8] sm:$0xff]  ;;  %v231_v21 = vld [vmem:[%s1329_s7 + $0x18] sm:$0xff] }
   0x6   :  { %1071 = vmatpush3.bf16.msra.mxu0 %v1068_v9  ;;  %v1083_v20 = vpack.c.bf16 %v229_v18, %v228_v17  ;;  %v1086_v22 = vpack.c.bf16 %v231_v21, %v230_v19  ;;  %v948_v23 = vld [vmem:[%s1330_s6] ss:$0 sm:$0xff]  ;;  %s1121_s6 = smov 120   ;;  %v704_v17 = vld [vmem:[%s1334_s9 + $0x8] sm:$0xff] }
   0x7   :  { %1073 = vmatprep.subr.bf16.mxu0 %v1072_v13  ;;  %v50_v25 = vld [vmem:[%s1331_s2] sm:$0x7f] }
   0x8   :  { %1081 = vmatpush3.bf16.msra.mxu1 %v1080_v12  ;;  %v945_v28 = vld [vmem:[%s1332_s4] ss:$0 sm:$0xff] }
   0x9   :  { %v950_v39 = vld [vmem:[%s1333_s8] ss:$0 sm:$0xff] }
   0xa   :  { %1075 = vmatpush3.bf16.msra.mxu0 %v1072_v13 }
   0xb   :  { %1025 = vmatmul.mubr.msk.f32.vlgmr.msra.gmra.mrb[0].mxu1 %vm62_vm1, %v49_v15  ;;  %1082 = vmatprep.subr.bf16.mxu0 %v1118_v0 }
   0xd   :  { %1014 = vmatmul.mubr.msk.f32.vlgmr.msra.gmra.mrb[0].mxu0 %vm62_vm1, %v48_v16 }
   0xe   :  { %1035 = vmatprep.mubr.msk.f32.mxu0 %vm1119_vm0, %v1120_v4  ;;  %1084 = vmatpush3.bf16.msra.mxu0 %v1083_v20 }
   0xf   :  { %1085 = vmatprep.subr.bf16.mxu0 %v1118_v0 }
  0x12   :  { %1087 = vmatpush3.bf16.msra.mxu0 %v1086_v22 }
  0x13   :  { %1058 = vmatprep.subr.mxu0 %v704_v17 }
  0x15   :  { %1036 = vmatmul.mubr.msk.f32.vlgmr.msra.gmra.mrb[2].mxu0 %vm62_vm1, %v50_v25 }
  0x16   :  { %1059 = vmatpush3.msra.mxu0 %v704_v17 }
  0xde   :  { %v224_v24 = vpop.f32.mrb[0].mxu1 }
  0xdf   :  { %v225_v26 = vadd.f32 %v948_v23, %v224_v24  ;;  %v1026_v27 = vpop.f32.mrb[1].mxu1  ;;  %v507_v24 = vld [vmem:[%s1334_s9] sm:$0xff] }
  0xe0   :  { %v1015_v29 = vpop.f32.mrb[0].mxu0  ;;  %1063 = vmatprep.subr.mxu0 %v507_v24  ;;  %v968_v27 = vld [vmem:[%s1335_s10] ss:$0 sm:$0xff] }
  0xe1   :  { %v135_v30 = vpop.f32.mrb[1].mxu0  ;;  %1038 = vmatprep.subr.msk.mxu1 %vm312_vm2, %v225_v26  ;;  %v141_v32 = vadd.f32 %v1015_v29, %v945_v28 }
  0xe2   :  { %v136_v31 = vadd.f32 %v945_v28, %v135_v30  ;;  %1039 = vmatpush3.xpose.msk.msra.mxu1 %vm312_vm2, %v225_v26  ;;  %v876_v30 = vld [vmem:[%s1336_s13] sm:$0xff] }
  0xe4   :  { %508 = vrot.lane.b32.xlu1 %v136_v31, %s1121_s6  ;;  %1040 = vmatprep.mubr.msk.f32.mxu1 %vm312_vm2, %v136_v31 }
  0xe5   :  { %1041 = vmatmul.mubr.msk.f32.vlgmr.msra.gmra.mrb[2].mxu1 %vm312_vm2, %v141_v32 }
  0xe8   :  { %v308_v40 = vpop.f32.mrb[2].mxu0 }
  0xe9   :  { %v309_v41 = vadd.f32 %v950_v39, %v308_v40  ;;  %v1037_v42 = vpop.f32.mrb[3].mxu0 }
  0xeb   :  { %1043 = vmatprep.subr.msk.mxu1 %vm428_vm4, %v309_v41 }
  0xec   :  { %1044 = vmatpush3.msk.msra.mxu1 %vm428_vm4, %v309_v41 }
 0x156   :  { %v509_v54 = vpop.permute.xlu1 %508 }
 0x1b8   :  { %v1042_v33 = vpop.f32.mrb[2].mxu1 }
 0x1b9   :  { %v388_v34 = vpop.f32.mrb[3].mxu1  ;;  %v398_v36 = vmul.f32 0.35355338, %v1042_v33  ;;  %v877_v33 = vld [vmem:[%s1336_s13 + $0x8] sm:$0xff] }
 0x1ba   :  { %v397_v35 = vmul.f32 0.35355338, %v388_v34 }
 0x1bb   :  { %v403_v38 = vsel %vm399_vm3, %v398_v36, -inf }
 0x1bc   :  { %v400_v37 = vsel %vm399_vm3, %v397_v35, -inf }
 0x1bd   :  { %401 = vmax.xlane.f32.xlu0 %v400_v37 }
 0x1c1   :  { %404 = vmax.xlane.f32.xlu0 %v403_v38 }
 0x1d7   :  { %512 = vrot.lane.b32.xlu0 %v225_v26, %s1121_s6 }
 0x24a   :  { %v402_v43 = vpop.xlane.xlu0 %401 }
 0x24b   :  { %v406_v44 = vsub.f32 %v397_v35, %v402_v43 }
 0x24d   :  { %v408_v47 = vmul.f32 1.442695, %v406_v44 }
 0x24e   :  { %v405_v45 = vpop.xlane.xlu0 %404 }
 0x24f   :  { %v407_v46 = vsub.f32 %v398_v36, %v405_v45 }
 0x251   :  { %v410_v48 = vmul.f32 1.442695, %v407_v46 }
 0x252   :  { %v513_v49 = vpop.permute.xlu0 %512 }
 0x253   :  { %1094 = vpow2.f32 %v410_v48  ;;  %1048 = vmatprep.subr.msk.mxu1 %vm312_vm2, %v513_v49 }
 0x254   :  { %1096 = vpow2.f32 %v408_v47 }
 0x25d   :  { %v1095_v50 = vpop.eup %1094 }
 0x25e   :  { %v415_v51 = vsel %vm399_vm3, %v1095_v50, 0.0  ;;  %v1097_v52 = vpop.eup %1096 }
 0x25f   :  { %416 = vadd.xlane.f32.xlu1 %v415_v51  ;;  %v412_v53 = vsel %vm399_vm3, %v1097_v52, 0.0 }
 0x263   :  { %413 = vadd.xlane.f32.xlu1 %v412_v53 }
 0x274   :  { %510 = vrot.lane.b32.xlu1 %v141_v32, %s1121_s6 }
 0x2ec   :  { %v417_v55 = vpop.xlane.xlu1 %416 }
 0x2ed   :  { %1098 = vrcp.f32 %v417_v55 }
 0x2f0   :  { %v414_v56 = vpop.xlane.xlu1 %413 }
 0x2f1   :  { %1100 = vrcp.f32 %v414_v56 }
 0x2f4   :  { %v511_v61 = vpop.permute.xlu1 %510 }
 0x2f7   :  { %v1099_v57 = vpop.eup %1098 }
 0x2f8   :  { %v421_v60 = vmul.f32 %v1099_v57, %v1095_v50 }
 0x2fb   :  { %v1101_v58 = vpop.eup %1100 }
 0x2fc   :  { %v419_v59 = vmul.f32 %v1101_v58, %v1097_v52 }
 0x2fe   :  { %1045 = vmatprep.mubr.msk.f32.mxu1 %vm399_vm3, %v419_v59 }
 0x2ff   :  { %1046 = vmatmul.mubr.msk.f32.vlgmr.msra.gmra.mrb[4].mxu1 %vm399_vm3, %v421_v60 }
 0x300   :  { %1049 = vmatpush3.xpose.msk.msra.mxu1 %vm312_vm2, %v513_v49  ;;  %1050 = vmatprep.mubr.msk.f32.mxu1 %vm312_vm2, %v509_v54 }
 0x303   :  { %1051 = vmatmul.mubr.msk.f32.vlgmr.msra.gmra.mrb[6].mxu1 %vm312_vm2, %v511_v61 }
 0x3d2   :  { %v1047_v62 = vpop.f32.mrb[4].mxu1 }
 0x3d3   :  { %v498_v63 = vpop.f32.mrb[5].mxu1 }
 0x3d6   :  { %v1052_v0 = vpop.f32.mrb[6].mxu1 }
 0x3d7   :  { %v596_v1 = vmul.f32 0.35355338, %v1052_v0  ;;  %v586_v2 = vpop.f32.mrb[7].mxu1 }
 0x3d8   :  { %v595_v3 = vmul.f32 0.35355338, %v586_v2 }
 0x3d9   :  { %v600_v4 = vsel %vm399_vm3, %v596_v1, -inf }
 0x3da   :  { %601 = vmax.xlane.f32.xlu0 %v600_v4  ;;  %v597_v5 = vsel %vm399_vm3, %v595_v3, -inf }
 0x3db   :  { %598 = vmax.xlane.f32.xlu1 %v597_v5 }
 0x3ec   :  { %619 = vrot.lane.b32.xlu1 %v309_v41, %s1121_s6 }
 0x467   :  { %v602_v6 = vpop.xlane.xlu0 %601 }
 0x468   :  { %v604_v7 = vsub.f32 %v596_v1, %v602_v6  ;;  %v599_v8 = vpop.xlane.xlu1 %598  ;;  %v969_v1 = vld [vmem:[%s1337_s11] ss:$0 sm:$0xff] }
 0x469   :  { %v603_v9 = vsub.f32 %v595_v3, %v599_v8  ;;  %v970_v3 = vld [vmem:[%s1338_s12] ss:$0 sm:$0xff] }
 0x46a   :  { %v607_v10 = vmul.f32 1.442695, %v604_v7 }
 0x46b   :  { %v605_v11 = vmul.f32 1.442695, %v603_v9 }
 0x46c   :  { %v620_v12 = vpop.permute.xlu1 %619 }
 0x46d   :  { %1102 = vpow2.f32 %v605_v11  ;;  %1053 = vmatprep.subr.msk.mxu1 %vm428_vm4, %v620_v12 }
 0x46e   :  { %1054 = vmatpush3.msk.msra.mxu1 %vm428_vm4, %v620_v12  ;;  %1104 = vpow2.f32 %v607_v10 }
 0x477   :  { %v1103_v13 = vpop.eup %1102 }
 0x478   :  { %v609_v14 = vsel %vm399_vm3, %v1103_v13, 0.0  ;;  %v1105_v15 = vpop.eup %1104 }
 0x479   :  { %610 = vadd.xlane.f32.xlu0 %v609_v14  ;;  %v612_v16 = vsel %vm399_vm3, %v1105_v15, 0.0 }
 0x47d   :  { %613 = vadd.xlane.f32.xlu0 %v612_v16 }
 0x506   :  { %v611_v18 = vpop.xlane.xlu0 %610 }
 0x507   :  { %1106 = vrcp.f32 %v611_v18 }
 0x50a   :  { %v614_v19 = vpop.xlane.xlu0 %613 }
 0x50b   :  { %1108 = vrcp.f32 %v614_v19 }
 0x511   :  { %v1107_v20 = vpop.eup %1106 }
 0x512   :  { %v616_v21 = vmul.f32 %v1107_v20, %v1103_v13 }
 0x514   :  { %1055 = vmatprep.mubr.msk.f32.mxu1 %vm399_vm3, %v616_v21 }
 0x515   :  { %v1109_v22 = vpop.eup %1108 }
 0x516   :  { %v618_v23 = vmul.f32 %v1109_v22, %v1105_v15 }
 0x518   :  { %1056 = vmatmul.mubr.msk.f32.vlgmr.msra.gmra.mrb[8].mxu1 %vm399_vm3, %v618_v23 }
 0x5eb   :  { %v1057_v25 = vpop.f32.mrb[8].mxu1 }
 0x5ec   :  { %v695_v26 = vpop.f32.mrb[9].mxu1 }
 0x5ed   :  { %1060 = vmatprep.mubr.msk.f32.mxu0 %vm312_vm2, %v695_v26 }
 0x5ee   :  { %1061 = vmatmul.mubr.msk.f32.vlgmr.msra.gmra.mrb[4].mxu0 %vm312_vm2, %v1057_v25 }
 0x5ef   :  { %1064 = vmatpush3.msra.mxu0 %v507_v24  ;;  %1065 = vmatprep.mubr.msk.f32.mxu0 %vm312_vm2, %v498_v63 }
 0x5f6   :  { %1066 = vmatmul.mubr.msk.f32.vlgmr.msra.gmra.mrb[4].mxu0 %vm312_vm2, %v1047_v62 }
 0x6c9   :  { %v1067_v28 = vpop.f32.mrb[4].mxu0 }
 0x6ca   :  { %v858_v29 = vpop.f32.mrb[5].mxu0  ;;  %v875_v31 = vadd.f32 %v1067_v28, %v968_v27 }
 0x6cb   :  { %v874_v32 = vadd.f32 %v968_v27, %v858_v29 }
 0x6cc   :  { %v879_v36 = vadd.f32 %v877_v33, %v875_v31 }
 0x6cd   :  { %v878_v34 = vadd.f32 %v876_v30, %v874_v32 }
 0x6ce   :  { %v883_v37 = vsel %vm62_vm1, %v879_v36, 0.0 }
 0x6cf   :  { %v880_v35 = vsel %vm62_vm1, %v878_v34, 0.0 }
 0x6d0   :  { %881 = vadd.xlane.f32.xlu0 %v880_v35 }
 0x6d4   :  { %884 = vadd.xlane.f32.xlu0 %v883_v37 }
 0x75d   :  { %v882_v38 = vpop.xlane.xlu0 %881 }
 0x75e   :  { %v887_v39 = vmul.f32 0.03125, %v882_v38 }
 0x760   :  { %v889_v40 = vsub.f32 %v878_v34, %v887_v39 }
 0x761   :  { %v885_v41 = vpop.xlane.xlu0 %884 }
 0x762   :  { %v888_v42 = vmul.f32 0.03125, %v885_v41  ;;  %v891_v43 = vmul.f32 %v889_v40, %v889_v40 }
 0x764   :  { %v890_v44 = vsub.f32 %v879_v36, %v888_v42  ;;  %v893_v45 = vsel %vm62_vm1, %v891_v43, 0.0 }
 0x765   :  { %894 = vadd.xlane.f32.xlu0 %v893_v45 }
 0x766   :  { %v892_v46 = vmul.f32 %v890_v44, %v890_v44 }
 0x768   :  { %v896_v47 = vsel %vm62_vm1, %v892_v46, 0.0 }
 0x769   :  { %897 = vadd.xlane.f32.xlu0 %v896_v47 }
 0x7f2   :  { %v895_v48 = vpop.xlane.xlu0 %894 }
 0x7f3   :  { %v899_v49 = vmul.f32 0.03125, %v895_v48 }
 0x7f5   :  { %v901_v50 = vadd.f32 1e-05, %v899_v49 }
 0x7f6   :  { %v898_v51 = vpop.xlane.xlu0 %897 }
 0x7f7   :  { %1110 = vrsqrt.f32 %v901_v50  ;;  %v900_v52 = vmul.f32 0.03125, %v898_v51  ;;  %vm905_vm5 = vcmp.eq.f32.partialorder %v901_v50, inf  ;;  %v908_v56 = vand.u32 2147483648, %v901_v50 }
 0x7f8   :  { %vm907_vm6 = vcmp.eq.f32.partialorder %v901_v50, 0.0 }
 0x7f9   :  { %v902_v53 = vadd.f32 1e-05, %v900_v52 }
 0x7fb   :  { %1112 = vrsqrt.f32 %v902_v53  ;;  %vm912_vm7 = vcmp.eq.f32.partialorder %v902_v53, inf  ;;  %v915_v61 = vand.u32 2147483648, %v902_v53  ;;  %vm914_vm8 = vcmp.eq.f32.partialorder %v902_v53, 0.0 }
 0x801   :  { %v1111_v54 = vpop.eup %1110 }
 0x802   :  { %v904_v55 = vmul.f32 %v1111_v54, %v901_v50 }
 0x804   :  { %v906_v57 = vsel %vm905_vm5, %v901_v50, %v904_v55 }
 0x805   :  { %v909_v58 = vsel %vm907_vm6, %v908_v56, %v906_v57  ;;  %v1113_v59 = vpop.eup %1112 }
 0x806   :  { %1114 = vrcp.f32 %v909_v58  ;;  %v911_v60 = vmul.f32 %v1113_v59, %v902_v53 }
 0x808   :  { %v913_v62 = vsel %vm912_vm7, %v902_v53, %v911_v60 }
 0x809   :  { %v916_v63 = vsel %vm914_vm8, %v915_v61, %v913_v62 }
 0x80a   :  { %1116 = vrcp.f32 %v916_v63 }
 0x810   :  { %v1115_v0 = vpop.eup %1114 }
 0x811   :  { %v918_v2 = vmul.f32 %v1115_v0, %v889_v40 }
 0x813   :  { %v928_v4 = vmul.f32 %v969_v1, %v918_v2 }
 0x814   :  { %v1117_v5 = vpop.eup %1116 }
 0x815   :  { %v937_v6 = vadd.f32 %v970_v3, %v928_v4  ;;  %v920_v7 = vmul.f32 %v1117_v5, %v890_v44 }
 0x817   :  { %939 = vst.msk [vmem:[%s1339_s14] sm:$0xff] %vm62_vm1, %v937_v6  ;;  %v929_v8 = vmul.f32 %v969_v1, %v920_v7 }
 0x819   :  { %v938_v9 = vadd.f32 %v970_v3, %v929_v8 }
 0x81b   :  { %940 = vst.msk [vmem:[%s1339_s14 + $0x8] sm:$0xff] %vm62_vm1, %v938_v9 }

// kernel: medsam_forward.42
= control target key start
LH: loop header
LB: loop body
LE: loop exit
PB: predicated region body
PF: predicated region fallthrough
CT: control target
= control target key end

     0   :  { %vm63_vm0 = vcmask 261120   ;;  %v1051_v3 = vmov 0.0|0.0   ;;  %vm1052_vm1 = vmmov 0   ;;  %v1053_v4 = vmov 0.0   ;;  %s1264_s5 = inlined_call_operand.vmem [shape: f32[32,16], index: 5, kind: input, shape index: {}]   ;;  %s1265_s1 = inlined_call_operand.vmem [shape: f32[1,16,32], index: 1, kind: input, shape index: {}]   ;;  %s1266_s3 = inlined_call_operand.vmem [shape: f32[32,16], index: 3, kind: input, shape index: {}]   ;;  %s1267_s0 = inlined_call_operand.vmem [shape: f32[1,7,32], index: 0, kind: input, shape index: {}]   ;;  %s1268_s6 = inlined_call_operand.vmem [shape: f32[1,16], index: 6, kind: input, shape index: {}]   ;;  %s1269_s4 = inlined_call_operand.vmem [shape: f32[1,16], index: 4, kind: input, shape index: {}]   ;;  %s1270_s7 = inlined_call_operand.vmem [shape: f32[32,16], index: 7, kind: input, shape index: {}]   ;;  %s1271_s2 = inlined_call_operand.vmem [shape: f32[1,16,32], index: 2, kind: input, shape index: {}]   ;;  %s1272_s8 = inlined_call_operand.vmem [shape: f32[1,16], index: 8, kind: input, shape index: {}]   ;;  %s1273_s9 = inlined_call_operand.vmem [shape: f32[16,32], index: 9, kind: input, shape index: {}]   ;;  %s1274_s10 = inlined_call_operand.vmem [shape: f32[1,32], index: 10, kind: input, shape index: {}]   ;;  %s1275_s13 = inlined_call_operand.vmem [shape: f32[1,7,32], index: 13, kind: input, shape index: {}]   ;;  %s1276_s11 = inlined_call_operand.vmem [shape: f32[1,32], index: 11, kind: input, shape index: {}]   ;;  %s1277_s12 = inlined_call_operand.vmem [shape: f32[1,32], index: 12, kind: input, shape index: {}]   ;;  %s1278_s14 = inlined_call_operand.vmem [shape: f32[1,7,32], index: 14, kind: output, shape index: {}]  }
   0x1   :  { %v137_v0 = vld [vmem:[%s1264_s5] sm:$0xff]  ;;  %v138_v1 = vld [vmem:[%s1264_s5 + $0x8] sm:$0xff]  ;;  %v139_v2 = vld [vmem:[%s1264_s5 + $0x10] sm:$0xff]  ;;  %989 = vmatprep.subr.bf16.mxu0 %v1051_v3  ;;  %926 = vmatprep.mubr.msk.f32.mxu0 %vm1052_vm1, %v1053_v4  ;;  %vm321_vm2 = vcmask 64512   ;;  %vm402_vm4 = vcmask 129024   ;;  %vm414_vm5 = vcmask 130048  }
   0x2   :  { %v995_v5 = vpack.c.bf16 %v138_v1, %v137_v0  ;;  %v140_v6 = vld [vmem:[%s1264_s5 + $0x18] sm:$0xff]  ;;  %v48_v7 = vld [vmem:[%s1265_s1] sm:$0xff]  ;;  %v53_v10 = vld [vmem:[%s1266_s3 + $0x8] sm:$0xff]  ;;  %vm821_vm6 = vcmask 260096  }
   0x3   :  { %v999_v8 = vpack.c.bf16 %v140_v6, %v139_v2  ;;  %937 = vmatprep.mubr.msk.f32.mxu1 %vm63_vm0, %v48_v7  ;;  %v52_v9 = vld [vmem:[%s1266_s3] sm:$0xff]  ;;  %v54_v11 = vld [vmem:[%s1266_s3 + $0x10] sm:$0xff]  ;;  %v55_v13 = vld [vmem:[%s1266_s3 + $0x18] sm:$0xff] }
   0x4   :  { %996 = vmatprep.subr.bf16.mxu1 %v995_v5  ;;  %v990_v12 = vpack.c.bf16 %v53_v10, %v52_v9  ;;  %v993_v14 = vpack.c.bf16 %v55_v13, %v54_v11  ;;  %v49_v15 = vld [vmem:[%s1265_s1 + $0x8] sm:$0xff]  ;;  %v47_v16 = vld [vmem:[%s1267_s0] sm:$0x7f]  ;;  %vm1178_vm3 = vmpackc.low %vm321_vm2, %vm321_vm2 }
   0x5   :  { %998 = vmatpush3.bf16.msra.mxu1 %v995_v5  ;;  %v866_v17 = vld [vmem:[%s1268_s6] ss:$0 sm:$0xff]  ;;  %s1054_s6 = smov 120   ;;  %v230_v30 = vld [vmem:[%s1270_s7 + $0x8] sm:$0xff]  ;;  %v231_v31 = vld [vmem:[%s1270_s7 + $0x10] sm:$0xff] }
   0x6   :  { %1000 = vmatprep.subr.bf16.mxu1 %v999_v8  ;;  %991 = vmatpush3.bf16.msra.mxu0 %v990_v12  ;;  %v864_v27 = vld [vmem:[%s1269_s4] ss:$0 sm:$0xff]  ;;  %v232_v33 = vld [vmem:[%s1270_s7 + $0x18] sm:$0xff]  ;;  %v51_v36 = vld [vmem:[%s1271_s2 + $0x8] sm:$0xff] }
   0x7   :  { %992 = vmatprep.subr.bf16.mxu0 %v1051_v3  ;;  %v229_v29 = vld [vmem:[%s1270_s7] sm:$0xff]  ;;  %v1007_v35 = vpack.c.bf16 %v232_v33, %v231_v31 }
   0x8   :  { %v1003_v32 = vpack.c.bf16 %v230_v30, %v229_v29  ;;  %v50_v34 = vld [vmem:[%s1271_s2] sm:$0xff] }
   0x9   :  { %1002 = vmatpush3.bf16.msra.mxu1 %v999_v8  ;;  %v869_v56 = vld [vmem:[%s1272_s8] ss:$0 sm:$0xff] }
   0xa   :  { %994 = vmatpush3.bf16.msra.mxu0 %v993_v14  ;;  %1011 = vmatprep.subr.bf16.mxu1 %v1051_v3 }
   0xb   :  { %1004 = vmatprep.subr.bf16.mxu0 %v1003_v32 }
   0xc   :  { %938 = vmatmul.mubr.msk.f32.vlgmr.msra.gmra.mrb[0].mxu1 %vm63_vm0, %v49_v15  ;;  %v664_v15 = vld [vmem:[%s1273_s9 + $0x8] sm:$0xff] }
   0xd   :  { %927 = vmatmul.mubr.msk.f32.vlgmr.msra.gmra.mrb[0].mxu0 %vm63_vm0, %v47_v16  ;;  %955 = vmatprep.mubr.msk.f32.mxu1 %vm1052_vm1, %v1053_v4 }
   0xe   :  { %948 = vmatprep.mubr.msk.f32.mxu0 %vm63_vm0, %v50_v34  ;;  %1006 = vmatpush3.bf16.msra.mxu0 %v1003_v32 }
   0xf   :  { %1008 = vmatprep.subr.bf16.mxu0 %v1007_v35 }
  0x12   :  { %1010 = vmatpush3.bf16.msra.mxu0 %v1007_v35 }
  0x13   :  { %1015 = vmatprep.subr.bf16.mxu0 %v1051_v3 }
  0x15   :  { %949 = vmatmul.mubr.msk.f32.vlgmr.msra.gmra.mrb[2].mxu0 %vm63_vm0, %v51_v36 }
  0x16   :  { %962 = vmatprep.mubr.msk.f32.mxu0 %vm1052_vm1, %v1053_v4 }
  0xdf   :  { %v939_v18 = vpop.f32.mrb[0].mxu1 }
  0xe0   :  { %v226_v19 = vadd.f32 %v939_v18, %v866_v17  ;;  %v220_v20 = vpop.f32.mrb[1].mxu1  ;;  %v133_v21 = vpop.f32.mrb[0].mxu0 }
  0xe1   :  { %v221_v22 = vadd.f32 %v866_v17, %v220_v20  ;;  %v928_v23 = vpop.f32.mrb[1].mxu0  ;;  %v134_v28 = vadd.f32 %v864_v27, %v133_v21 }
  0xe2   :  { %v882_v23 = vld [vmem:[%s1274_s10] ss:$0 sm:$0xff] }
  0xe3   :  { %v1012_v25 = vpack.c.bf16 %v226_v19, %v221_v22  ;;  %v1029_v26 = vpack.i.bf16 %v226_v19, %v221_v22 }
  0xe5   :  { %1030 = vrot.lane.b32.xlu0 %v1029_v26, %s1054_s6  ;;  %1014 = vmatpush3.bf16.xpose.msk.msra.mxu1 %vm1178_vm3, %v1012_v25 }
  0xe6   :  { %1018 = vmatprep.subr.bf16.mxu1 %v1051_v3 }
  0xe8   :  { %v950_v55 = vpop.f32.mrb[2].mxu0 }
  0xe9   :  { %489 = vrot.lane.b32.xlu0 %v134_v28, %s1054_s6  ;;  %v312_v57 = vpop.f32.mrb[3].mxu0  ;;  %v318_v58 = vadd.f32 %v950_v55, %v869_v56 }
  0xea   :  { %v313_v59 = vadd.f32 %v869_v56, %v312_v57 }
  0xec   :  { %956 = vmatmul.mubr.msk.f32.vlgmr.msra.gmra.mrb[2].mxu1 %vm321_vm2, %v134_v28  ;;  %v1034_v60 = vpack.i.bf16 %v318_v58, %v313_v59  ;;  %v1016_v61 = vpack.c.bf16 %v318_v58, %v313_v59 }
  0xed   :  { %969 = vmatprep.mubr.msk.f32.mxu1 %vm1052_vm1, %v1053_v4 }
  0xee   :  { %1017 = vmatpush3.bf16.msra.mxu0 %v1016_v61 }
  0xef   :  { %1022 = vmatprep.subr.bf16.mxu0 %v1051_v3  ;;  %v488_v3 = vld [vmem:[%s1273_s9] sm:$0xff] }
 0x157   :  { %v1031_v37 = vpop.permute.xlu0 %1030 }
 0x158   :  { %v1033_v38 = vunpack.i.h.bf16 %v1031_v37  ;;  %v1032_v39 = vunpack.i.l.bf16 %v1031_v37 }
 0x15a   :  { %v1019_v40 = vpack.c.bf16 %v1033_v38, %v1032_v39 }
 0x15b   :  { %v490_v41 = vpop.permute.xlu0 %489 }
 0x15c   :  { %1021 = vmatpush3.bf16.xpose.msk.msra.mxu1 %vm1178_vm3, %v1019_v40 }
 0x15d   :  { %984 = vmatprep.subr.mxu1 %v1053_v4 }
 0x163   :  { %970 = vmatmul.mubr.msk.f32.vlgmr.msra.gmra.mrb[4].mxu1 %vm321_vm2, %v490_v41 }
 0x164   :  { %986 = vmatprep.mubr.msk.f32.mxu1 %vm1052_vm1, %v1053_v4  ;;  %985 = vmatpush3.msra.mxu1 %v488_v3 }
 0x1bf   :  { %v397_v42 = vpop.f32.mrb[2].mxu1 }
 0x1c0   :  { %v401_v43 = vmul.f32 0.35355338, %v397_v42  ;;  %v957_v44 = vpop.f32.mrb[3].mxu1 }
 0x1c2   :  { %v403_v45 = vsel %vm402_vm4, %v401_v43, -inf }
 0x1c3   :  { %404 = vmax.xlane.f32.xlu1 %v403_v45  ;;  %v884_v45 = vld [vmem:[%s1277_s12] ss:$0 sm:$0xff] }
 0x236   :  { %v567_v46 = vpop.f32.mrb[4].mxu1 }
 0x237   :  { %v571_v47 = vmul.f32 0.35355338, %v567_v46  ;;  %v971_v48 = vpop.f32.mrb[5].mxu1 }
 0x239   :  { %v572_v49 = vsel %vm402_vm4, %v571_v47, -inf }
 0x23a   :  { %573 = vmax.xlane.f32.xlu1 %v572_v49 }
 0x250   :  { %v405_v50 = vpop.xlane.xlu1 %404 }
 0x251   :  { %v406_v51 = vsub.f32 %v401_v43, %v405_v50  ;;  %v883_v43 = vld [vmem:[%s1276_s11] ss:$0 sm:$0xff] }
 0x253   :  { %v407_v52 = vmul.f32 1.442695, %v406_v51 }
 0x255   :  { %1039 = vpow2.f32 %v407_v52 }
 0x25f   :  { %v1040_v53 = vpop.eup %1039 }
 0x260   :  { %v409_v54 = vsel %vm402_vm4, %v1040_v53, 0.0 }
 0x261   :  { %410 = vadd.xlane.f32.xlu0 %v409_v54 }
 0x2c7   :  { %v574_v62 = vpop.xlane.xlu1 %573 }
 0x2c8   :  { %v575_v63 = vsub.f32 %v571_v47, %v574_v62 }
 0x2ca   :  { %v576_v0 = vmul.f32 1.442695, %v575_v63 }
 0x2cc   :  { %1041 = vpow2.f32 %v576_v0 }
 0x2d6   :  { %v1042_v1 = vpop.eup %1041 }
 0x2d7   :  { %v578_v2 = vsel %vm402_vm4, %v1042_v1, 0.0 }
 0x2d8   :  { %579 = vadd.xlane.f32.xlu1 %v578_v2 }
 0x2e9   :  { %1035 = vrot.lane.b32.xlu1 %v1034_v60, %s1054_s6 }
 0x2ee   :  { %v411_v5 = vpop.xlane.xlu0 %410 }
 0x2ef   :  { %1043 = vrcp.f32 %v411_v5 }
 0x2f9   :  { %v1044_v6 = vpop.eup %1043 }
 0x2fa   :  { %v413_v7 = vmul.f32 %v1044_v6, %v1040_v53 }
 0x2fc   :  { %963 = vmatmul.mubr.msk.f32.vlgmr.msra.gmra.mrb[4].mxu0 %vm414_vm5, %v413_v7 }
 0x2fd   :  { %976 = vmatprep.mubr.msk.f32.mxu0 %vm1052_vm1, %v1053_v4 }
 0x365   :  { %v580_v8 = vpop.xlane.xlu1 %579 }
 0x366   :  { %1045 = vrcp.f32 %v580_v8 }
 0x369   :  { %v1036_v9 = vpop.permute.xlu1 %1035 }
 0x36a   :  { %v1038_v10 = vunpack.i.h.bf16 %v1036_v9  ;;  %v1037_v11 = vunpack.i.l.bf16 %v1036_v9 }
 0x36c   :  { %v1023_v12 = vpack.c.bf16 %v1038_v10, %v1037_v11 }
 0x36e   :  { %1024 = vmatpush3.bf16.msra.mxu0 %v1023_v12 }
 0x36f   :  { %979 = vmatprep.subr.mxu0 %v1053_v4 }
 0x370   :  { %v1046_v13 = vpop.eup %1045 }
 0x371   :  { %v582_v14 = vmul.f32 %v1046_v13, %v1042_v1 }
 0x373   :  { %977 = vmatmul.mubr.msk.f32.vlgmr.msra.gmra.mrb[6].mxu0 %vm414_vm5, %v582_v14 }
 0x374   :  { %980 = vmatpush3.msra.mxu0 %v664_v15  ;;  %981 = vmatprep.mubr.msk.f32.mxu0 %vm1052_vm1, %v1053_v4  ;;  %v819_v4 = vld [vmem:[%s1275_s13] sm:$0x7f] }
 0x3cf   :  { %v484_v16 = vpop.f32.mrb[4].mxu0 }
 0x3d0   :  { %v964_v17 = vpop.f32.mrb[5].mxu0  ;;  %987 = vmatmul.mubr.msk.f32.vlgmr.msra.gmra.mrb[6].mxu1 %vm321_vm2, %v484_v16 }
 0x446   :  { %v660_v18 = vpop.f32.mrb[6].mxu0 }
 0x447   :  { %v978_v19 = vpop.f32.mrb[7].mxu0  ;;  %982 = vmatmul.mubr.msk.f32.vlgmr.msra.gmra.mrb[8].mxu0 %vm321_vm2, %v660_v18 }
 0x4a3   :  { %v807_v20 = vpop.f32.mrb[6].mxu1 }
 0x4a4   :  { %v988_v21 = vpop.f32.mrb[7].mxu1 }
 0x51a   :  { %v734_v22 = vpop.f32.mrb[8].mxu0 }
 0x51b   :  { %v808_v24 = vadd.f32 %v807_v20, %v734_v22  ;;  %v983_v25 = vpop.f32.mrb[9].mxu0 }
 0x51d   :  { %v818_v26 = vadd.f32 %v882_v23, %v808_v24 }
 0x51f   :  { %v820_v27 = vadd.f32 %v819_v4, %v818_v26 }
 0x521   :  { %v822_v28 = vsel %vm821_vm6, %v820_v27, 0.0 }
 0x522   :  { %823 = vadd.xlane.f32.xlu1 %v822_v28 }
 0x5af   :  { %v824_v29 = vpop.xlane.xlu1 %823 }
 0x5b0   :  { %v826_v30 = vmul.f32 0.03125, %v824_v29 }
 0x5b2   :  { %v827_v31 = vsub.f32 %v820_v27, %v826_v30 }
 0x5b4   :  { %v828_v32 = vmul.f32 %v827_v31, %v827_v31 }
 0x5b6   :  { %v829_v33 = vsel %vm821_vm6, %v828_v32, 0.0 }
 0x5b7   :  { %830 = vadd.xlane.f32.xlu0 %v829_v33 }
 0x644   :  { %v831_v34 = vpop.xlane.xlu0 %830 }
 0x645   :  { %v832_v35 = vmul.f32 0.03125, %v831_v34 }
 0x647   :  { %v833_v36 = vadd.f32 1e-05, %v832_v35 }
 0x649   :  { %1047 = vrsqrt.f32 %v833_v36  ;;  %vm836_vm7 = vcmp.eq.f32.partialorder %v833_v36, inf  ;;  %v839_v39 = vand.u32 2147483648, %v833_v36  ;;  %vm838_vm8 = vcmp.eq.f32.partialorder %v833_v36, 0.0 }
 0x653   :  { %v1048_v37 = vpop.eup %1047 }
 0x654   :  { %v835_v38 = vmul.f32 %v1048_v37, %v833_v36 }
 0x656   :  { %v837_v40 = vsel %vm836_vm7, %v833_v36, %v835_v38 }
 0x657   :  { %v840_v41 = vsel %vm838_vm8, %v839_v39, %v837_v40 }
 0x658   :  { %1049 = vrcp.f32 %v840_v41 }
 0x662   :  { %v1050_v42 = vpop.eup %1049 }
 0x663   :  { %v842_v44 = vmul.f32 %v1050_v42, %v827_v31 }
 0x665   :  { %v850_v46 = vmul.f32 %v883_v43, %v842_v44 }
 0x667   :  { %v858_v47 = vadd.f32 %v884_v45, %v850_v46 }
 0x669   :  { %859 = vst.msk [vmem:[%s1278_s14] sm:$0x7f] %vm821_vm6, %v858_v47 }

// kernel: medsam_forward.50
= control target key start
LH: loop header
LB: loop body
LE: loop exit
PB: predicated region body
PF: predicated region fallthrough
CT: control target
= control target key end

     0   :  { %vm27_vm0 = vcmask 261120   ;;  %s194_s1 = inlined_call_operand.vmem [shape: f32[32,32], index: 1, kind: input, shape index: {}]   ;;  %s195_s0 = inlined_call_operand.vmem [shape: f32[16,32], index: 0, kind: input, shape index: {}]   ;;  %s196_s2 = inlined_call_operand.vmem [shape: f32[1,32], index: 2, kind: input, shape index: {}]   ;;  %s197_s3 = inlined_call_operand.vmem [shape: f32[16,32], index: 3, kind: output, shape index: {}]  }
   0x1   :  { %v16_v0 = vld [vmem:[%s194_s1] sm:$0xff]  ;;  %v17_v1 = vld [vmem:[%s194_s1 + $0x8] sm:$0xff]  ;;  %v18_v2 = vld [vmem:[%s194_s1 + $0x10] sm:$0xff] }
   0x2   :  { %v135_v3 = vpack.c.bf16 %v17_v1, %v16_v0  ;;  %v19_v4 = vld [vmem:[%s194_s1 + $0x18] sm:$0xff]  ;;  %v14_v5 = vld [vmem:[%s195_s0] sm:$0xff]  ;;  %v15_v7 = vld [vmem:[%s195_s0 + $0x8] sm:$0xff] }
   0x3   :  { %v139_v6 = vpack.c.bf16 %v19_v4, %v18_v2  ;;  %132 = vmatprep.mubr.msk.f32.mxu0 %vm27_vm0, %v14_v5  ;;  %v115_v8 = vld [vmem:[%s196_s2] ss:$0 sm:$0xff] }
   0x4   :  { %136 = vmatprep.subr.bf16.mxu0 %v135_v3 }
   0x5   :  { %138 = vmatpush3.bf16.msra.mxu0 %v135_v3 }
   0x6   :  { %140 = vmatprep.subr.bf16.mxu0 %v139_v6 }
   0x9   :  { %142 = vmatpush3.bf16.msra.mxu0 %v139_v6 }
   0xc   :  { %133 = vmatmul.mubr.msk.f32.vlgmr.msra.gmra.mrb[0].mxu0 %vm27_vm0, %v15_v7 }
  0xdf   :  { %v134_v9 = vpop.f32.mrb[0].mxu0 }
  0xe0   :  { %v106_v10 = vadd.f32 %v134_v9, %v115_v8  ;;  %v100_v11 = vpop.f32.mrb[1].mxu0 }
  0xe1   :  { %v101_v12 = vadd.f32 %v115_v8, %v100_v11 }
  0xe2   :  { %110 = vst.msk [vmem:[%s197_s3 + $0x8] sm:$0xff] %vm27_vm0, %v106_v10 }
  0xe3   :  { %109 = vst.msk [vmem:[%s197_s3] sm:$0xff] %vm27_vm0, %v101_v12 }

// kernel: medsam_forward.45
= control target key start
LH: loop header
LB: loop body
LE: loop exit
PB: predicated region body
PF: predicated region fallthrough
CT: control target
= control target key end

     0   :  { %v996_v0 = vmov 0.0|0.0   ;;  %vm997_vm0 = vmmov 0   ;;  %v998_v8 = vmov 0.0   ;;  %vm61_vm1 = vcmask 261120   ;;  %s1209_s5 = inlined_call_operand.vmem [shape: f32[32,32], index: 5, kind: input, shape index: {}]   ;;  %s1210_s3 = inlined_call_operand.vmem [shape: f32[32,32], index: 3, kind: input, shape index: {}]   ;;  %s1211_s1 = inlined_call_operand.vmem [shape: f32[1,7,32], index: 1, kind: input, shape index: {}, may-alias: {0,1}]   ;;  %s1212_s0 = inlined_call_operand.vmem [shape: f32[1,7,32], index: 0, kind: input, shape index: {}, may-alias: {0,1}]   ;;  %s1213_s7 = inlined_call_operand.vmem [shape: f32[32,32], index: 7, kind: input, shape index: {}]   ;;  %s1214_s2 = inlined_call_operand.vmem [shape: f32[1,7,32], index: 2, kind: input, shape index: {}, may-alias: {2,13}]   ;;  %s1215_s6 = inlined_call_operand.vmem [shape: f32[1,32], index: 6, kind: input, shape index: {}]   ;;  %s1216_s4 = inlined_call_operand.vmem [shape: f32[1,32], index: 4, kind: input, shape index: {}]   ;;  %s1217_s8 = inlined_call_operand.vmem [shape: f32[1,32], index: 8, kind: input, shape index: {}]   ;;  %s1218_s9 = inlined_call_operand.vmem [shape: f32[32,32], index: 9, kind: input, shape index: {}]   ;;  %s1219_s10 = inlined_call_operand.vmem [shape: f32[1,32], index: 10, kind: input, shape index: {}]   ;;  %s1220_s13 = inlined_call_operand.vmem [shape: f32[1,7,32], index: 13, kind: input, shape index: {}, may-alias: {2,13}]   ;;  %s1221_s11 = inlined_call_operand.vmem [shape: f32[1,32], index: 11, kind: input, shape index: {}]   ;;  %s1222_s12 = inlined_call_operand.vmem [shape: f32[1,32], index: 12, kind: input, shape index: {}]   ;;  %s1223_s14 = inlined_call_operand.vmem [shape: f32[1,7,32], index: 14, kind: output, shape index: {}]  }
   0x1   :  { %962 = vmatprep.subr.bf16.mxu1 %v996_v0  ;;  %v135_v1 = vld [vmem:[%s1209_s5] sm:$0xff]  ;;  %v136_v2 = vld [vmem:[%s1209_s5 + $0x8] sm:$0xff]  ;;  %956 = vmatprep.subr.bf16.mxu0 %v996_v0  ;;  %v137_v6 = vld [vmem:[%s1209_s5 + $0x10] sm:$0xff]  ;;  %vm303_vm2 = vcmask 130048   ;;  %vm397_vm3 = vcmask 1046528   ;;  %vm381_vm4 = vcmask 55296  }
   0x2   :  { %v50_v3 = vld [vmem:[%s1210_s3] sm:$0xff]  ;;  %v963_v4 = vpack.c.bf16 %v136_v2, %v135_v1  ;;  %v51_v5 = vld [vmem:[%s1210_s3 + $0x8] sm:$0xff]  ;;  %v138_v7 = vld [vmem:[%s1209_s5 + $0x18] sm:$0xff]  ;;  %908 = vmatprep.mubr.msk.f32.mxu1 %vm997_vm0, %v998_v8  ;;  %897 = vmatprep.mubr.msk.f32.mxu0 %vm997_vm0, %v998_v8  ;;  %vm393_vm5 = vcmask 56320   ;;  %vm798_vm6 = vcmask 260096  }
   0x3   :  { %v957_v9 = vpack.c.bf16 %v51_v5, %v50_v3  ;;  %v52_v10 = vld [vmem:[%s1210_s3 + $0x10] sm:$0xff]  ;;  %v53_v11 = vld [vmem:[%s1210_s3 + $0x18] sm:$0xff]  ;;  %v966_v12 = vpack.c.bf16 %v138_v7, %v137_v6  ;;  %v48_v14 = vld [vmem:[%s1211_s1] sm:$0x7f] }
   0x4   :  { %964 = vmatpush3.bf16.msra.mxu1 %v963_v4  ;;  %v960_v13 = vpack.c.bf16 %v53_v11, %v52_v10  ;;  %v47_v15 = vld [vmem:[%s1212_s0] sm:$0x7f]  ;;  %v220_v17 = vld [vmem:[%s1213_s7 + $0x8] sm:$0xff]  ;;  %v221_v18 = vld [vmem:[%s1213_s7 + $0x10] sm:$0xff] }
   0x5   :  { %958 = vmatpush3.bf16.msra.mxu0 %v957_v9  ;;  %965 = vmatprep.subr.bf16.mxu1 %v996_v0  ;;  %v219_v16 = vld [vmem:[%s1213_s7] sm:$0xff]  ;;  %v222_v20 = vld [vmem:[%s1213_s7 + $0x18] sm:$0xff]  ;;  %v640_v58 = vld [vmem:[%s1218_s9 + $0x10] sm:$0xff] }
   0x6   :  { %959 = vmatprep.subr.bf16.mxu0 %v996_v0  ;;  %v969_v19 = vpack.c.bf16 %v220_v17, %v219_v16  ;;  %v972_v21 = vpack.c.bf16 %v222_v20, %v221_v18  ;;  %v49_v22 = vld [vmem:[%s1214_s2] sm:$0x7f]  ;;  %s999_s2 = smov 112   ;;  %v641_v59 = vld [vmem:[%s1218_s9 + $0x18] sm:$0xff]  ;;  %v472_v1 = vld [vmem:[%s1218_s9 + $0x8] sm:$0xff] }
   0x7   :  { %v843_v23 = vld [vmem:[%s1215_s6] ss:$0 sm:$0xff]  ;;  %v975_v60 = vpack.c.bf16 %v641_v59, %v640_v58 }
   0x8   :  { %967 = vmatpush3.bf16.msra.mxu1 %v966_v12  ;;  %v841_v24 = vld [vmem:[%s1216_s4] ss:$0 sm:$0xff] }
   0x9   :  { %961 = vmatpush3.bf16.msra.mxu0 %v960_v13  ;;  %922 = vmatprep.subr.mxu1 %v998_v8  ;;  %v845_v33 = vld [vmem:[%s1217_s8] ss:$0 sm:$0xff] }
   0xa   :  { %968 = vmatprep.subr.bf16.mxu0 %v996_v0  ;;  %v471_v63 = vld [vmem:[%s1218_s9] sm:$0xff] }
   0xb   :  { %909 = vmatmul.mubr.msk.f32.vlgmr.msra.gmra.mrb[0].mxu1 %vm61_vm1, %v48_v14  ;;  %v978_v3 = vpack.c.bf16 %v472_v1, %v471_v63  ;;  %v857_v12 = vld [vmem:[%s1219_s10] ss:$0 sm:$0xff] }
   0xc   :  { %898 = vmatmul.mubr.msk.f32.vlgmr.msra.gmra.mrb[0].mxu0 %vm61_vm1, %v47_v15  ;;  %924 = vmatprep.mubr.msk.f32.mxu1 %vm997_vm0, %v998_v8 }
   0xd   :  { %919 = vmatprep.mubr.msk.f32.mxu0 %vm997_vm0, %v998_v8  ;;  %970 = vmatpush3.bf16.msra.mxu0 %v969_v19 }
   0xe   :  { %971 = vmatprep.subr.bf16.mxu0 %v996_v0 }
  0x11   :  { %973 = vmatpush3.bf16.msra.mxu0 %v972_v21 }
  0x12   :  { %932 = vmatprep.subr.mxu0 %v998_v8 }
  0x14   :  { %920 = vmatmul.mubr.msk.f32.vlgmr.msra.gmra.mrb[2].mxu0 %vm61_vm1, %v49_v22 }
  0x15   :  { %934 = vmatprep.mubr.msk.f32.mxu0 %vm997_vm0, %v998_v8 }
  0xde   :  { %v215_v25 = vpop.f32.mrb[0].mxu1 }
  0xdf   :  { %v216_v26 = vadd.f32 %v843_v23, %v215_v25  ;;  %v910_v27 = vpop.f32.mrb[1].mxu1  ;;  %v131_v28 = vpop.f32.mrb[0].mxu0 }
  0xe0   :  { %v132_v29 = vadd.f32 %v841_v24, %v131_v28  ;;  %v899_v30 = vpop.f32.mrb[1].mxu0 }
  0xe1   :  { %475 = vrot.lane.b32.xlu0 %v216_v26, %s999_s2  ;;  %923 = vmatpush3.xpose.msk.msra.mxu1 %vm303_vm2, %v216_v26 }
  0xe2   :  { %927 = vmatprep.subr.mxu1 %v998_v8 }
  0xe4   :  { %925 = vmatmul.mubr.msk.f32.vlgmr.msra.gmra.mrb[2].mxu1 %vm303_vm2, %v132_v29 }
  0xe5   :  { %473 = vrot.lane.b32.xlu0 %v132_v29, %s999_s2  ;;  %929 = vmatprep.mubr.msk.f32.mxu1 %vm997_vm0, %v998_v8 }
  0xe7   :  { %v299_v34 = vpop.f32.mrb[2].mxu0 }
  0xe8   :  { %v300_v35 = vadd.f32 %v845_v33, %v299_v34  ;;  %v921_v36 = vpop.f32.mrb[3].mxu0  ;;  %v859_v34 = vld [vmem:[%s1222_s12] ss:$0 sm:$0xff] }
  0xea   :  { %928 = vmatpush3.msk.msra.mxu1 %vm397_vm3, %v300_v35 }
  0xeb   :  { %937 = vmatprep.subr.mxu1 %v998_v8 }
 0x153   :  { %v476_v31 = vpop.permute.xlu0 %475 }
 0x154   :  { %933 = vmatpush3.xpose.msk.msra.mxu0 %vm303_vm2, %v476_v31 }
 0x155   :  { %974 = vmatprep.subr.bf16.mxu0 %v996_v0 }
 0x157   :  { %v474_v32 = vpop.permute.xlu0 %473 }
 0x158   :  { %935 = vmatmul.mubr.msk.f32.vlgmr.msra.gmra.mrb[4].mxu0 %vm303_vm2, %v474_v32  ;;  %v858_v32 = vld [vmem:[%s1221_s11] ss:$0 sm:$0xff] }
 0x159   :  { %946 = vmatprep.mubr.msk.f32.mxu0 %vm997_vm0, %v998_v8  ;;  %976 = vmatpush3.bf16.msra.mxu0 %v975_v60 }
 0x1b7   :  { %v376_v37 = vpop.f32.mrb[2].mxu1 }
 0x1b8   :  { %v380_v38 = vmul.f32 0.25, %v376_v37  ;;  %v926_v39 = vpop.f32.mrb[3].mxu1 }
 0x1ba   :  { %v382_v40 = vsel %vm381_vm4, %v380_v38, -inf }
 0x1bb   :  { %383 = vmax.xlane.f32.xlu1 %v382_v40 }
 0x22b   :  { %v547_v41 = vpop.f32.mrb[4].mxu0 }
 0x22c   :  { %v551_v42 = vmul.f32 0.25, %v547_v41  ;;  %v936_v43 = vpop.f32.mrb[5].mxu0 }
 0x22e   :  { %v552_v44 = vsel %vm381_vm4, %v551_v42, -inf }
 0x22f   :  { %553 = vmax.xlane.f32.xlu1 %v552_v44 }
 0x248   :  { %v384_v45 = vpop.xlane.xlu1 %383 }
 0x249   :  { %v385_v46 = vsub.f32 %v380_v38, %v384_v45 }
 0x24b   :  { %v386_v47 = vmul.f32 1.442695, %v385_v46 }
 0x24d   :  { %984 = vpow2.f32 %v386_v47 }
 0x257   :  { %v985_v48 = vpop.eup %984 }
 0x258   :  { %v388_v49 = vsel %vm381_vm4, %v985_v48, 0.0 }
 0x259   :  { %389 = vadd.xlane.f32.xlu0 %v388_v49 }
 0x2bc   :  { %v554_v50 = vpop.xlane.xlu1 %553 }
 0x2bd   :  { %v555_v51 = vsub.f32 %v551_v42, %v554_v50 }
 0x2bf   :  { %v556_v52 = vmul.f32 1.442695, %v555_v51 }
 0x2c1   :  { %986 = vpow2.f32 %v556_v52 }
 0x2cb   :  { %v987_v53 = vpop.eup %986 }
 0x2cc   :  { %v558_v54 = vsel %vm381_vm4, %v987_v53, 0.0 }
 0x2cd   :  { %559 = vadd.xlane.f32.xlu1 %v558_v54 }
 0x2de   :  { %563 = vrot.lane.b32.xlu1 %v300_v35, %s999_s2 }
 0x2e6   :  { %v390_v55 = vpop.xlane.xlu0 %389 }
 0x2e7   :  { %988 = vrcp.f32 %v390_v55 }
 0x2f1   :  { %v989_v56 = vpop.eup %988 }
 0x2f2   :  { %v392_v57 = vmul.f32 %v989_v56, %v985_v48 }
 0x2f4   :  { %930 = vmatmul.mubr.msk.f32.vlgmr.msra.gmra.mrb[4].mxu1 %vm393_vm5, %v392_v57 }
 0x2f5   :  { %939 = vmatprep.mubr.msk.f32.mxu1 %vm997_vm0, %v998_v8 }
 0x35a   :  { %v560_v61 = vpop.xlane.xlu1 %559 }
 0x35b   :  { %990 = vrcp.f32 %v560_v61 }
 0x35e   :  { %v564_v62 = vpop.permute.xlu1 %563 }
 0x35f   :  { %938 = vmatpush3.msk.msra.mxu1 %vm397_vm3, %v564_v62 }
 0x360   :  { %977 = vmatprep.subr.bf16.mxu1 %v996_v0 }
 0x365   :  { %v991_v2 = vpop.eup %990 }
 0x366   :  { %v562_v4 = vmul.f32 %v991_v2, %v987_v53 }
 0x368   :  { %940 = vmatmul.mubr.msk.f32.vlgmr.msra.gmra.mrb[6].mxu1 %vm393_vm5, %v562_v4 }
 0x369   :  { %979 = vmatpush3.bf16.msra.mxu1 %v978_v3  ;;  %953 = vmatprep.mubr.msk.f32.mxu1 %vm997_vm0, %v998_v8  ;;  %v796_v8 = vld [vmem:[%s1220_s13] sm:$0x7f] }
 0x3c7   :  { %v467_v5 = vpop.f32.mrb[4].mxu1 }
 0x3c8   :  { %v931_v6 = vpop.f32.mrb[5].mxu1  ;;  %954 = vmatmul.mubr.msk.f32.vlgmr.msra.gmra.mrb[8].mxu1 %vm303_vm2, %v467_v5 }
 0x43b   :  { %v636_v0 = vpop.f32.mrb[6].mxu1 }
 0x43c   :  { %v941_v7 = vpop.f32.mrb[7].mxu1  ;;  %947 = vmatmul.mubr.msk.f32.vlgmr.msra.gmra.mrb[6].mxu0 %vm303_vm2, %v636_v0 }
 0x49b   :  { %v784_v9 = vpop.f32.mrb[8].mxu1 }
 0x49c   :  { %v955_v10 = vpop.f32.mrb[9].mxu1 }
 0x50f   :  { %v711_v11 = vpop.f32.mrb[6].mxu0 }
 0x510   :  { %v785_v13 = vadd.f32 %v784_v9, %v711_v11  ;;  %v948_v14 = vpop.f32.mrb[7].mxu0 }
 0x512   :  { %v795_v15 = vadd.f32 %v857_v12, %v785_v13 }
 0x514   :  { %v797_v16 = vadd.f32 %v796_v8, %v795_v15 }
 0x516   :  { %v799_v17 = vsel %vm798_vm6, %v797_v16, 0.0 }
 0x517   :  { %800 = vadd.xlane.f32.xlu1 %v799_v17 }
 0x5a4   :  { %v801_v18 = vpop.xlane.xlu1 %800 }
 0x5a5   :  { %v803_v19 = vmul.f32 0.03125, %v801_v18 }
 0x5a7   :  { %v804_v20 = vsub.f32 %v797_v16, %v803_v19 }
 0x5a9   :  { %v805_v21 = vmul.f32 %v804_v20, %v804_v20 }
 0x5ab   :  { %v806_v22 = vsel %vm798_vm6, %v805_v21, 0.0 }
 0x5ac   :  { %807 = vadd.xlane.f32.xlu0 %v806_v22 }
 0x639   :  { %v808_v23 = vpop.xlane.xlu0 %807 }
 0x63a   :  { %v809_v24 = vmul.f32 0.03125, %v808_v23 }
 0x63c   :  { %v810_v25 = vadd.f32 1e-05, %v809_v24 }
 0x63e   :  { %992 = vrsqrt.f32 %v810_v25  ;;  %vm813_vm7 = vcmp.eq.f32.partialorder %v810_v25, inf  ;;  %v816_v28 = vand.u32 2147483648, %v810_v25  ;;  %vm815_vm8 = vcmp.eq.f32.partialorder %v810_v25, 0.0 }
 0x648   :  { %v993_v26 = vpop.eup %992 }
 0x649   :  { %v812_v27 = vmul.f32 %v993_v26, %v810_v25 }
 0x64b   :  { %v814_v29 = vsel %vm813_vm7, %v810_v25, %v812_v27 }
 0x64c   :  { %v817_v30 = vsel %vm815_vm8, %v816_v28, %v814_v29 }
 0x64d   :  { %994 = vrcp.f32 %v817_v30 }
 0x657   :  { %v995_v31 = vpop.eup %994 }
 0x658   :  { %v819_v33 = vmul.f32 %v995_v31, %v804_v20 }
 0x65a   :  { %v827_v35 = vmul.f32 %v858_v32, %v819_v33 }
 0x65c   :  { %v835_v36 = vadd.f32 %v859_v34, %v827_v35 }
 0x65e   :  { %836 = vst.msk [vmem:[%s1223_s14] sm:$0x7f] %vm798_vm6, %v835_v36 }

// kernel: medsam_forward.51
= control target key start
LH: loop header
LB: loop body
LE: loop exit
PB: predicated region body
PF: predicated region fallthrough
CT: control target
= control target key end

     0   :  { %vm22_vm0 = vcmask 64512   ;;  %s422_s0 = inlined_call_operand.vmem [shape: f32[64,8], index: 0, kind: input, shape index: {}]   ;;  %s423_s1 = inlined_call_operand.vmem [shape: f32[1,8], index: 1, kind: input, shape index: {}]   ;;  %s424_s2 = inlined_call_operand.vmem [shape: f32[1,8], index: 2, kind: input, shape index: {}]   ;;  %s425_s3 = inlined_call_operand.vmem [shape: f32[64,8], index: 3, kind: output, shape index: {}]  }
   0x1   :  { %v14_v0 = vld [vmem:[%s422_s0] sm:$0xff]  ;;  %v16_v1 = vld [vmem:[%s422_s0 + $0x10] sm:$0xff]  ;;  %v15_v2 = vld [vmem:[%s422_s0 + $0x8] sm:$0xff] }
   0x2   :  { %v23_v3 = vsel %vm22_vm0, %v14_v0, 0.0  ;;  %v29_v4 = vsel %vm22_vm0, %v16_v1, 0.0  ;;  %v17_v5 = vld [vmem:[%s422_s0 + $0x18] sm:$0xff]  ;;  %v26_v6 = vsel %vm22_vm0, %v15_v2, 0.0  ;;  %v18_v8 = vld [vmem:[%s422_s0 + $0x20] sm:$0xff]  ;;  %v19_v9 = vld [vmem:[%s422_s0 + $0x28] sm:$0xff] }
   0x3   :  { %24 = vadd.xlane.f32.xlu0 %v23_v3  ;;  %30 = vadd.xlane.f32.xlu1 %v29_v4  ;;  %v32_v7 = vsel %vm22_vm0, %v17_v5, 0.0  ;;  %v35_v10 = vsel %vm22_vm0, %v18_v8, 0.0  ;;  %v38_v11 = vsel %vm22_vm0, %v19_v9, 0.0  ;;  %v20_v12 = vld [vmem:[%s422_s0 + $0x30] sm:$0xff]  ;;  %v21_v13 = vld [vmem:[%s422_s0 + $0x38] sm:$0xff] }
   0x4   :  { %v41_v14 = vsel %vm22_vm0, %v20_v12, 0.0  ;;  %v44_v15 = vsel %vm22_vm0, %v21_v13, 0.0 }
   0x7   :  { %27 = vadd.xlane.f32.xlu0 %v26_v6  ;;  %33 = vadd.xlane.f32.xlu1 %v32_v7 }
   0xb   :  { %36 = vadd.xlane.f32.xlu0 %v35_v10  ;;  %39 = vadd.xlane.f32.xlu1 %v38_v11 }
   0xf   :  { %42 = vadd.xlane.f32.xlu0 %v41_v14  ;;  %45 = vadd.xlane.f32.xlu1 %v44_v15 }
  0x90   :  { %v25_v16 = vpop.xlane.xlu0 %24  ;;  %v31_v17 = vpop.xlane.xlu1 %30 }
  0x91   :  { %v48_v18 = vmul.f32 0.125, %v25_v16  ;;  %v50_v19 = vmul.f32 0.125, %v31_v17 }
  0x93   :  { %v312_v20 = vsub.f32 %v14_v0, %v48_v18  ;;  %v314_v21 = vsub.f32 %v16_v1, %v50_v19 }
  0x94   :  { %v28_v22 = vpop.xlane.xlu0 %27  ;;  %v34_v23 = vpop.xlane.xlu1 %33 }
  0x95   :  { %v49_v24 = vmul.f32 0.125, %v28_v22  ;;  %v51_v25 = vmul.f32 0.125, %v34_v23  ;;  %v64_v26 = vmul.f32 %v312_v20, %v312_v20  ;;  %v66_v27 = vmul.f32 %v314_v21, %v314_v21 }
  0x97   :  { %v320_v28 = vsub.f32 %v15_v2, %v49_v24  ;;  %v322_v29 = vsub.f32 %v17_v5, %v51_v25  ;;  %v72_v30 = vsel %vm22_vm0, %v64_v26, 0.0  ;;  %v78_v33 = vsel %vm22_vm0, %v66_v27, 0.0 }
  0x98   :  { %73 = vadd.xlane.f32.xlu0 %v72_v30  ;;  %v37_v31 = vpop.xlane.xlu0 %36  ;;  %v40_v32 = vpop.xlane.xlu1 %39 }
  0x99   :  { %v52_v34 = vmul.f32 0.125, %v37_v31  ;;  %v53_v35 = vmul.f32 0.125, %v40_v32  ;;  %v65_v36 = vmul.f32 %v320_v28, %v320_v28  ;;  %v67_v37 = vmul.f32 %v322_v29, %v322_v29 }
  0x9b   :  { %v330_v38 = vsub.f32 %v18_v8, %v52_v34  ;;  %v332_v39 = vsub.f32 %v19_v9, %v53_v35  ;;  %v75_v40 = vsel %vm22_vm0, %v65_v36, 0.0  ;;  %v81_v43 = vsel %vm22_vm0, %v67_v37, 0.0 }
  0x9c   :  { %79 = vadd.xlane.f32.xlu0 %v78_v33  ;;  %76 = vadd.xlane.f32.xlu1 %v75_v40  ;;  %v43_v41 = vpop.xlane.xlu0 %42  ;;  %v46_v42 = vpop.xlane.xlu1 %45 }
  0x9d   :  { %v54_v44 = vmul.f32 0.125, %v43_v41  ;;  %v55_v45 = vmul.f32 0.125, %v46_v42  ;;  %v68_v46 = vmul.f32 %v330_v38, %v330_v38  ;;  %v69_v47 = vmul.f32 %v332_v39, %v332_v39 }
  0x9f   :  { %v340_v48 = vsub.f32 %v20_v12, %v54_v44  ;;  %v342_v49 = vsub.f32 %v21_v13, %v55_v45  ;;  %v84_v50 = vsel %vm22_vm0, %v68_v46, 0.0  ;;  %v87_v51 = vsel %vm22_vm0, %v69_v47, 0.0 }
  0xa0   :  { %82 = vadd.xlane.f32.xlu1 %v81_v43  ;;  %85 = vadd.xlane.f32.xlu0 %v84_v50 }
  0xa1   :  { %v70_v52 = vmul.f32 %v340_v48, %v340_v48  ;;  %v71_v53 = vmul.f32 %v342_v49, %v342_v49 }
  0xa3   :  { %v90_v54 = vsel %vm22_vm0, %v70_v52, 0.0  ;;  %v93_v55 = vsel %vm22_vm0, %v71_v53, 0.0  ;;  %v226_v53 = vld [vmem:[%s423_s1] ss:$0 sm:$0xff] }
  0xa4   :  { %88 = vadd.xlane.f32.xlu1 %v87_v51  ;;  %91 = vadd.xlane.f32.xlu0 %v90_v54 }
  0xa8   :  { %94 = vadd.xlane.f32.xlu1 %v93_v55 }
 0x125   :  { %v74_v56 = vpop.xlane.xlu0 %73 }
 0x126   :  { %v96_v57 = vmul.f32 0.125, %v74_v56 }
 0x128   :  { %v104_v58 = vadd.f32 1e-06, %v96_v57 }
 0x129   :  { %v77_v59 = vpop.xlane.xlu1 %76  ;;  %v80_v60 = vpop.xlane.xlu0 %79 }
 0x12a   :  { %228 = vrsqrt.f32 %v104_v58  ;;  %v97_v61 = vmul.f32 0.125, %v77_v59  ;;  %v98_v62 = vmul.f32 0.125, %v80_v60  ;;  %vm114_vm1 = vcmp.eq.f32.partialorder %v104_v58, inf  ;;  %v227_v60 = vld [vmem:[%s424_s2] ss:$0 sm:$0xff] }
 0x12b   :  { %v117_v16 = vand.u32 2147483648, %v104_v58  ;;  %vm116_vm2 = vcmp.eq.f32.partialorder %v104_v58, 0.0 }
 0x12c   :  { %v105_v63 = vadd.f32 1e-06, %v97_v61  ;;  %v106_v0 = vadd.f32 1e-06, %v98_v62 }
 0x12d   :  { %v83_v1 = vpop.xlane.xlu1 %82  ;;  %v86_v2 = vpop.xlane.xlu0 %85 }
 0x12e   :  { %v99_v3 = vmul.f32 0.125, %v83_v1  ;;  %v100_v4 = vmul.f32 0.125, %v86_v2  ;;  %230 = vrsqrt.f32 %v105_v63  ;;  %vm121_vm3 = vcmp.eq.f32.partialorder %v105_v63, inf }
 0x12f   :  { %232 = vrsqrt.f32 %v106_v0  ;;  %v124_v26 = vand.u32 2147483648, %v105_v63  ;;  %vm123_vm4 = vcmp.eq.f32.partialorder %v105_v63, 0.0  ;;  %vm128_vm5 = vcmp.eq.f32.partialorder %v106_v0, inf }
 0x130   :  { %v107_v5 = vadd.f32 1e-06, %v99_v3  ;;  %v108_v6 = vadd.f32 1e-06, %v100_v4  ;;  %v131_v31 = vand.u32 2147483648, %v106_v0  ;;  %vm130_vm6 = vcmp.eq.f32.partialorder %v106_v0, 0.0 }
 0x131   :  { %v89_v7 = vpop.xlane.xlu1 %88  ;;  %v92_v8 = vpop.xlane.xlu0 %91 }
 0x132   :  { %v101_v9 = vmul.f32 0.125, %v89_v7  ;;  %v102_v10 = vmul.f32 0.125, %v92_v8  ;;  %234 = vrsqrt.f32 %v107_v5  ;;  %vm135_vm7 = vcmp.eq.f32.partialorder %v107_v5, inf }
 0x133   :  { %236 = vrsqrt.f32 %v108_v6  ;;  %v138_v40 = vand.u32 2147483648, %v107_v5  ;;  %vm137_vm8 = vcmp.eq.f32.partialorder %v107_v5, 0.0  ;;  %vm142_vm9 = vcmp.eq.f32.partialorder %v108_v6, inf }
 0x134   :  { %v229_v11 = vpop.eup %228  ;;  %v352_v13 = vadd.f32 1e-06, %v101_v9  ;;  %v354_v14 = vadd.f32 1e-06, %v102_v10  ;;  %v145_v43 = vand.u32 2147483648, %v108_v6  ;;  %vm144_vm10 = vcmp.eq.f32.partialorder %v108_v6, 0.0 }
 0x135   :  { %v113_v12 = vmul.f32 %v229_v11, %v104_v58  ;;  %v95_v15 = vpop.xlane.xlu1 %94 }
 0x136   :  { %v103_v17 = vmul.f32 0.125, %v95_v15  ;;  %238 = vrsqrt.f32 %v352_v13  ;;  %vm149_vm11 = vcmp.eq.f32.partialorder %v352_v13, inf  ;;  %vm151_vm12 = vcmp.eq.f32.partialorder %v352_v13, 0.0 }
 0x137   :  { %v115_v18 = vsel %vm114_vm1, %v104_v58, %v113_v12  ;;  %240 = vrsqrt.f32 %v354_v14  ;;  %v152_v54 = vand.u32 2147483648, %v352_v13  ;;  %vm156_vm13 = vcmp.eq.f32.partialorder %v354_v14, inf }
 0x138   :  { %v118_v19 = vsel %vm116_vm2, %v117_v16, %v115_v18  ;;  %v231_v22 = vpop.eup %230  ;;  %v358_v23 = vadd.f32 1e-06, %v103_v17  ;;  %v159_v58 = vand.u32 2147483648, %v354_v14  ;;  %vm158_vm14 = vcmp.eq.f32.partialorder %v354_v14, 0.0 }
 0x139   :  { %242 = vrcp.f32 %v118_v19  ;;  %v233_v24 = vpop.eup %232  ;;  %v120_v25 = vmul.f32 %v231_v22, %v105_v63 }
 0x13a   :  { %v127_v27 = vmul.f32 %v233_v24, %v106_v0  ;;  %244 = vrsqrt.f32 %v358_v23  ;;  %vm163_vm15 = vcmp.eq.f32.partialorder %v358_v23, inf  ;;  %v166_v1 = vand.u32 2147483648, %v358_v23 }
 0x13b   :  { %v122_v30 = vsel %vm121_vm3, %v105_v63, %v120_v25  ;;  %vm165_vm1 = vcmp.eq.f32.partialorder %v358_v23, 0.0 }
 0x13c   :  { %v235_v32 = vpop.eup %234  ;;  %v125_v33 = vsel %vm123_vm4, %v124_v26, %v122_v30  ;;  %v129_v34 = vsel %vm128_vm5, %v106_v0, %v127_v27 }
 0x13d   :  { %v237_v35 = vpop.eup %236  ;;  %246 = vrcp.f32 %v125_v33  ;;  %v132_v36 = vsel %vm130_vm6, %v131_v31, %v129_v34  ;;  %v134_v37 = vmul.f32 %v235_v32, %v107_v5 }
 0x13e   :  { %248 = vrcp.f32 %v132_v36  ;;  %v141_v41 = vmul.f32 %v237_v35, %v108_v6 }
 0x13f   :  { %v136_v42 = vsel %vm135_vm7, %v107_v5, %v134_v37 }
 0x140   :  { %v239_v44 = vpop.eup %238  ;;  %v139_v45 = vsel %vm137_vm8, %v138_v40, %v136_v42  ;;  %v143_v46 = vsel %vm142_vm9, %v108_v6, %v141_v41 }
 0x141   :  { %v241_v47 = vpop.eup %240  ;;  %250 = vrcp.f32 %v139_v45  ;;  %v146_v50 = vsel %vm144_vm10, %v145_v43, %v143_v46  ;;  %v148_v51 = vmul.f32 %v239_v44, %v352_v13 }
 0x142   :  { %252 = vrcp.f32 %v146_v50  ;;  %v155_v55 = vmul.f32 %v241_v47, %v354_v14 }
 0x143   :  { %v243_v52 = vpop.eup %242  ;;  %v150_v57 = vsel %vm149_vm11, %v352_v13, %v148_v51 }
 0x144   :  { %v169_v56 = vmul.f32 %v243_v52, %v312_v20  ;;  %v245_v59 = vpop.eup %244  ;;  %v153_v61 = vsel %vm151_vm12, %v152_v54, %v150_v57  ;;  %v157_v62 = vsel %vm156_vm13, %v354_v14, %v155_v55 }
 0x145   :  { %254 = vrcp.f32 %v153_v61  ;;  %v160_v0 = vsel %vm158_vm14, %v159_v58, %v157_v62  ;;  %v162_v20 = vmul.f32 %v245_v59, %v358_v23 }
 0x146   :  { %v191_v63 = vmul.f32 %v226_v53, %v169_v56  ;;  %256 = vrcp.f32 %v160_v0 }
 0x147   :  { %v247_v2 = vpop.eup %246  ;;  %v164_v4 = vsel %vm163_vm15, %v358_v23, %v162_v20 }
 0x148   :  { %v206_v3 = vadd.f32 %v227_v60, %v191_v63  ;;  %v249_v5 = vpop.eup %248  ;;  %v171_v6 = vmul.f32 %v247_v2, %v320_v28  ;;  %v167_v7 = vsel %vm165_vm1, %v166_v1, %v164_v4 }
 0x149   :  { %v173_v8 = vmul.f32 %v249_v5, %v314_v21  ;;  %258 = vrcp.f32 %v167_v7 }
 0x14a   :  { %214 = vst.msk [vmem:[%s425_s3] sm:$0xff] %vm22_vm0, %v206_v3  ;;  %v192_v9 = vmul.f32 %v226_v53, %v171_v6 }
 0x14b   :  { %v251_v10 = vpop.eup %250  ;;  %v193_v11 = vmul.f32 %v226_v53, %v173_v8 }
 0x14c   :  { %v253_v12 = vpop.eup %252  ;;  %v207_v13 = vadd.f32 %v227_v60, %v192_v9  ;;  %v175_v14 = vmul.f32 %v251_v10, %v322_v29 }
 0x14d   :  { %v208_v15 = vadd.f32 %v227_v60, %v193_v11  ;;  %v177_v16 = vmul.f32 %v253_v12, %v330_v38 }
 0x14e   :  { %215 = vst.msk [vmem:[%s425_s3 + $0x8] sm:$0xff] %vm22_vm0, %v207_v13  ;;  %v194_v28 = vmul.f32 %v226_v53, %v175_v14 }
 0x14f   :  { %v255_v17 = vpop.eup %254  ;;  %216 = vst.msk [vmem:[%s425_s3 + $0x10] sm:$0xff] %vm22_vm0, %v208_v15  ;;  %v195_v21 = vmul.f32 %v226_v53, %v177_v16 }
 0x150   :  { %v257_v18 = vpop.eup %256  ;;  %v209_v19 = vadd.f32 %v227_v60, %v194_v28  ;;  %v179_v29 = vmul.f32 %v255_v17, %v332_v39 }
 0x151   :  { %v210_v22 = vadd.f32 %v227_v60, %v195_v21  ;;  %v181_v38 = vmul.f32 %v257_v18, %v340_v48 }
 0x152   :  { %217 = vst.msk [vmem:[%s425_s3 + $0x18] sm:$0xff] %vm22_vm0, %v209_v19  ;;  %v196_v23 = vmul.f32 %v226_v53, %v179_v29 }
 0x153   :  { %v259_v24 = vpop.eup %258  ;;  %218 = vst.msk [vmem:[%s425_s3 + $0x20] sm:$0xff] %vm22_vm0, %v210_v22  ;;  %v197_v25 = vmul.f32 %v226_v53, %v181_v38 }
 0x154   :  { %v211_v26 = vadd.f32 %v227_v60, %v196_v23  ;;  %v183_v27 = vmul.f32 %v259_v24, %v342_v49 }
 0x155   :  { %v212_v39 = vadd.f32 %v227_v60, %v197_v25 }
 0x156   :  { %219 = vst.msk [vmem:[%s425_s3 + $0x28] sm:$0xff] %vm22_vm0, %v211_v26  ;;  %v198_v48 = vmul.f32 %v226_v53, %v183_v27 }
 0x157   :  { %220 = vst.msk [vmem:[%s425_s3 + $0x30] sm:$0xff] %vm22_vm0, %v212_v39 }
 0x158   :  { %v213_v30 = vadd.f32 %v227_v60, %v198_v48 }
 0x15a   :  { %221 = vst.msk [vmem:[%s425_s3 + $0x38] sm:$0xff] %vm22_vm0, %v213_v30 }

// kernel: medsam_forward.52
= control target key start
LH: loop header
LB: loop body
LE: loop exit
PB: predicated region body
PF: predicated region fallthrough
CT: control target
= control target key end

     0   :  { %vm30_vm0 = vcmask 64512   ;;  %vm160_vm1 = vcmask 130048   ;;  %s297_s1 = inlined_call_operand.vmem [shape: f32[8,16], index: 1, kind: input, shape index: {}]   ;;  %s298_s0 = inlined_call_operand.vmem [shape: f32[64,8], index: 0, kind: input, shape index: {}]   ;;  %s299_s2 = inlined_call_operand.vmem [shape: f32[1,16], index: 2, kind: input, shape index: {}]   ;;  %s300_s3 = inlined_call_operand.vmem [shape: f32[64,16], index: 3, kind: output, shape index: {}]  }
   0x1   :  { %v22_v0 = vld [vmem:[%s297_s1] sm:$0xff]  ;;  %v15_v3 = vld [vmem:[%s298_s0 + $0x8] sm:$0xff]  ;;  %v16_v5 = vld [vmem:[%s298_s0 + $0x10] sm:$0xff] }
   0x2   :  { %v14_v1 = vld [vmem:[%s298_s0] sm:$0xff]  ;;  %191 = vmatprep.subr.mxu0 %v22_v0  ;;  %205 = vmatprep.subr.mxu1 %v22_v0  ;;  %v19_v4 = vld [vmem:[%s298_s0 + $0x28] sm:$0xff]  ;;  %v20_v6 = vld [vmem:[%s298_s0 + $0x30] sm:$0xff] }
   0x3   :  { %v18_v2 = vld [vmem:[%s298_s0 + $0x20] sm:$0xff]  ;;  %192 = vmatpush3.msra.mxu0 %v22_v0  ;;  %206 = vmatpush3.msra.mxu1 %v22_v0  ;;  %v17_v7 = vld [vmem:[%s298_s0 + $0x18] sm:$0xff] }
   0x4   :  { %193 = vmatprep.mubr.msk.f32.mxu0 %vm30_vm0, %v14_v1  ;;  %199 = vmatprep.mubr.msk.f32.mxu1 %vm30_vm0, %v18_v2  ;;  %v21_v8 = vld [vmem:[%s298_s0 + $0x38] sm:$0xff]  ;;  %v173_v9 = vld [vmem:[%s299_s2] ss:$0 sm:$0xff] }
   0x5   :  { %194 = vmatmul.mubr.msk.f32.vlgmr.msra.gmra.mrb[0].mxu0 %vm30_vm0, %v15_v3  ;;  %200 = vmatmul.mubr.msk.f32.vlgmr.msra.gmra.mrb[0].mxu1 %vm30_vm0, %v19_v4 }
   0x6   :  { %196 = vmatprep.mubr.msk.f32.mxu0 %vm30_vm0, %v16_v5  ;;  %202 = vmatprep.mubr.msk.f32.mxu1 %vm30_vm0, %v20_v6 }
   0x9   :  { %197 = vmatmul.mubr.msk.f32.gmra.mrb[2].mxu0 %vm30_vm0, %v17_v7  ;;  %203 = vmatmul.mubr.msk.f32.gmra.mrb[2].mxu1 %vm30_vm0, %v21_v8 }
  0xd8   :  { %v195_v10 = vpop.f32.mrb[0].mxu0  ;;  %v201_v11 = vpop.f32.mrb[0].mxu1 }
  0xd9   :  { %v127_v12 = vadd.f32 %v195_v10, %v173_v9  ;;  %v147_v13 = vadd.f32 %v201_v11, %v173_v9  ;;  %v121_v14 = vpop.f32.mrb[1].mxu0  ;;  %v141_v15 = vpop.f32.mrb[1].mxu1 }
  0xda   :  { %v122_v16 = vadd.f32 %v173_v9, %v121_v14  ;;  %v142_v17 = vadd.f32 %v173_v9, %v141_v15 }
  0xdb   :  { %162 = vst.msk [vmem:[%s300_s3 + $0x8] sm:$0xff] %vm160_vm1, %v127_v12  ;;  %166 = vst.msk [vmem:[%s300_s3 + $0x28] sm:$0xff] %vm160_vm1, %v147_v13 }
  0xdc   :  { %161 = vst.msk [vmem:[%s300_s3] sm:$0xff] %vm160_vm1, %v122_v16  ;;  %165 = vst.msk [vmem:[%s300_s3 + $0x20] sm:$0xff] %vm160_vm1, %v142_v17  ;;  %v198_v18 = vpop.f32.mrb[2].mxu0  ;;  %v204_v19 = vpop.f32.mrb[2].mxu1 }
  0xdd   :  { %v137_v20 = vadd.f32 %v198_v18, %v173_v9  ;;  %v157_v21 = vadd.f32 %v204_v19, %v173_v9  ;;  %v131_v22 = vpop.f32.mrb[3].mxu0  ;;  %v151_v23 = vpop.f32.mrb[3].mxu1 }
  0xde   :  { %v132_v24 = vadd.f32 %v173_v9, %v131_v22  ;;  %v152_v25 = vadd.f32 %v173_v9, %v151_v23 }
  0xdf   :  { %164 = vst.msk [vmem:[%s300_s3 + $0x18] sm:$0xff] %vm160_vm1, %v137_v20  ;;  %168 = vst.msk [vmem:[%s300_s3 + $0x38] sm:$0xff] %vm160_vm1, %v157_v21 }
  0xe0   :  { %163 = vst.msk [vmem:[%s300_s3 + $0x10] sm:$0xff] %vm160_vm1, %v132_v24  ;;  %167 = vst.msk [vmem:[%s300_s3 + $0x30] sm:$0xff] %vm160_vm1, %v152_v25 }

// kernel: medsam_forward.54
= control target key start
LH: loop header
LB: loop body
LE: loop exit
PB: predicated region body
PF: predicated region fallthrough
CT: control target
= control target key end

     0   :  { %vm19_vm0 = vcmask 1043456   ;;  %v109_v1 = vmov 0.0   ;;  %vm15_vm1 = vcmask 31744   ;;  %s134_s1 = inlined_call_operand.vmem [shape: f32[1,4,256], index: 1, kind: input, shape index: {}]   ;;  %s135_s0 = inlined_call_operand.vmem [shape: f32[1,4,4], index: 0, kind: input, shape index: {}]   ;;  %s136_s2 = inlined_call_operand.vmem [shape: f32[1,4,256], index: 2, kind: output, shape index: {}]  }
   0x1   :  { %v12_v0 = vld [vmem:[%s134_s1] sm:$0xff]  ;;  %88 = vmatprep.mubr.f32.mxu0 %v109_v1 }
   0x2   :  { %v14_v2 = vcombine.high %v12_v0, %v12_v0  ;;  %v11_v3 = vld [vmem:[%s135_s0] sm:$0xf] }
   0x4   :  { %104 = vmatprep.subr.msk.mxu0 %vm19_vm0, %v14_v2 }
   0x5   :  { %105 = vmatpush1.msk.msra.mxu0 %vm19_vm0, %v12_v0 }
   0x6   :  { %106 = vmatmul.mubr.msk.f32.vlgmr.msra.gmra.mrb[0].mxu0 %vm15_vm1, %v11_v3 }
  0xd9   :  { %v90_v4 = vpop.f32.mrb[0].mxu0 }
  0xda   :  { %v92_v5 = vpop.f32.mrb[1].mxu0 }
  0xdb   :  { %v97_v6 = vcombine.low %v90_v4, %v92_v5 }
  0xdd   :  { %99 = vst [vmem:[%s136_s2] sm:$0xff] %v97_v6 }

// kernel: medsam_forward.53
= control target key start
LH: loop header
LB: loop body
LE: loop exit
PB: predicated region body
PF: predicated region fallthrough
CT: control target
= control target key end

     0   :  { %s865_s24 = smov 0   ;;  %s914_s0 = inlined_call_operand.vmem [shape: f32[4,1,32], index: 0, kind: input, shape index: {}]   ;;  %s915_s1 = inlined_call_operand.vmem [shape: f32[4,32,32], index: 1, kind: input, shape index: {}]   ;;  %s916_s2 = inlined_call_operand.vmem [shape: f32[4,1,32], index: 2, kind: input, shape index: {}]   ;;  %s917_s3 = inlined_call_operand.vmem [shape: f32[4,32,32], index: 3, kind: input, shape index: {}]   ;;  %s918_s4 = inlined_call_operand.vmem [shape: f32[4,1,32], index: 4, kind: input, shape index: {}]   ;;  %s919_s5 = inlined_call_operand.vmem [shape: f32[4,32,4], index: 5, kind: input, shape index: {}]   ;;  %s920_s6 = inlined_call_operand.vmem [shape: f32[4,1,4], index: 6, kind: input, shape index: {}]   ;;  %s921_s7 = inlined_call_operand.vmem [shape: f32[4,1,4], index: 7, kind: output, shape index: {}]  }
   0x1 LB: > { %s718_s25 = sadd.s32 4294967295, %s820_s24   ;;  %p722_p0 = scmp.ge.s32.totalorder %s820_s24, 1  ;;  %s820_s24 = sphi %s865_s24, %s17_s24  }
   0x2   : > { %p289_p1 = scmp.lt.s32.totalorder %s820_s24, 5 }
   0x4   : > { %p290_p2 = pnand %p722_p0, %p289_p1 }
   0x5   : > { %p341_p3 = scmp.lt.s32.totalorder (!%p290_p2), %s718_s25, 3  ;;  %v822_v0 = vmov (!%p290_p2), 0.0|0.0   ;;  %vm823_vm0 = vmmov (!%p290_p2), 0   ;;  %v824_v1 = vmov (!%p290_p2), 0.0   ;;  %vm377_vm1 = vcmask (!%p290_p2), 261120  }
   0x6   : > { %293 = sbr.rel (%p290_p2) target bundleno = 673 (0x2a1), region = 48  ;;  %785 = vmatprep.subr.bf16.mxu0 (!%p290_p2), %v822_v0  ;;  %760 = vmatprep.mubr.msk.f32.mxu0 (!%p290_p2), %vm823_vm0, %v824_v1  ;;  %vm609_vm2 = vcmask (!%p290_p2), 24576  }
   0x7   : > { %791 = vmatprep.subr.bf16.mxu1 (!%p290_p2), %v822_v0  ;;  %771 = vmatprep.mubr.msk.f32.mxu1 (!%p290_p2), %vm823_vm0, %v824_v1 }
   0xd   : > { %s923_s25 = smov (!%p341_p3, %s718_s25), 3 }
   0xe   : > { %s734_s26 = sshll.u32 %s923_s25, 5  ;;  %s343_s12 = scalar_lea.vmem %s914_s0, %s923_s25 }
   0xf   : > { %s348_s29 = scalar_lea.vmem %s915_s1, %s734_s26  ;;  %s356_s9 = scalar_lea.vmem %s917_s3, %s734_s26  ;;  %v371_v11 = vld [vmem:[%s343_s12] sm:$0x1] }
  0x10   : > { %v372_v2 = vld [vmem:[%s348_s29] sm:$0xff]  ;;  %v373_v3 = vld [vmem:[%s348_s29 + $0x8] sm:$0xff]  ;;  %v374_v4 = vld [vmem:[%s348_s29 + $0x10] sm:$0xff]  ;;  %s364_s15 = scalar_lea.vmem %s919_s5, %s734_s26  ;;  %s351_s18 = scalar_lea.vmem %s916_s2, %s923_s25 }
  0x11   : > { %v786_v5 = vpack.c.bf16 %v373_v3, %v372_v2  ;;  %v375_v6 = vld [vmem:[%s348_s29 + $0x18] sm:$0xff]  ;;  %v452_v7 = vld [vmem:[%s356_s9] sm:$0xff]  ;;  %v453_v8 = vld [vmem:[%s356_s9 + $0x8] sm:$0xff]  ;;  %s359_s21 = scalar_lea.vmem %s918_s4, %s923_s25  ;;  %s367_s26 = scalar_lea.vmem %s920_s6, %s923_s25 }
  0x12   : > { %v792_v9 = vpack.c.bf16 %v453_v8, %v452_v7  ;;  %v789_v10 = vpack.c.bf16 %v375_v6, %v374_v4  ;;  %v454_v12 = vld [vmem:[%s356_s9 + $0x10] sm:$0xff]  ;;  %v455_v13 = vld [vmem:[%s356_s9 + $0x18] sm:$0xff]  ;;  %v531_v15 = vld [vmem:[%s364_s15] sm:$0xff]  ;;  %s370_s29 = scalar_lea.vmem %s921_s7, %s923_s25 }
  0x13   : > { %787 = vmatpush3.bf16.msra.mxu0 %v786_v5  ;;  %v795_v14 = vpack.c.bf16 %v455_v13, %v454_v12  ;;  %v532_v16 = vld [vmem:[%s364_s15 + $0x8] sm:$0xff]  ;;  %v376_v18 = vld [vmem:[%s351_s18] sm:$0x1]  ;;  %v533_v23 = vld [vmem:[%s364_s15 + $0x10] sm:$0xff] }
  0x14   : > { %788 = vmatprep.subr.bf16.mxu0 %v822_v0  ;;  %793 = vmatpush3.bf16.msra.mxu1 %v792_v9  ;;  %v798_v17 = vpack.c.bf16 %v532_v16, %v531_v15  ;;  %v534_v24 = vld [vmem:[%s364_s15 + $0x18] sm:$0xff]  ;;  %v456_v26 = vld [vmem:[%s359_s21] sm:$0x1] }
  0x15   : > { %794 = vmatprep.subr.bf16.mxu1 %v822_v0  ;;  %v801_v25 = vpack.c.bf16 %v534_v24, %v533_v23  ;;  %v535_v31 = vld [vmem:[%s367_s26] sm:$0x1] }
  0x17   : > { %790 = vmatpush3.bf16.msra.mxu0 %v789_v10 }
  0x18   : > { %797 = vmatprep.subr.bf16.mxu0 %v822_v0  ;;  %796 = vmatpush3.bf16.msra.mxu1 %v795_v14 }
  0x1a   : > { %761 = vmatmul.mubr.msk.f32.vlgmr.msra.gmra.mrb[0].mxu0 %vm377_vm1, %v371_v11 }
  0x1b   : > { %782 = vmatprep.mubr.msk.f32.mxu0 %vm823_vm0, %v824_v1  ;;  %799 = vmatpush3.bf16.msra.mxu0 %v798_v17 }
  0x1c   : > { %800 = vmatprep.subr.bf16.mxu0 %v822_v0 }
  0x1f   : > { %802 = vmatpush3.bf16.msra.mxu0 %v801_v25 }
  0xed   : > { %v447_v19 = vpop.f32.mrb[0].mxu0 }
  0xee   : > { %v448_v20 = vadd.f32 %v447_v19, %v376_v18  ;;  %v762_v21 = vpop.f32.mrb[1].mxu0 }
  0xf0   : > { %v451_v22 = vmax.f32 %v448_v20, 0.0 }
  0xf2   : > { %772 = vmatmul.mubr.msk.f32.vlgmr.msra.gmra.mrb[0].mxu1 %vm377_vm1, %v451_v22 }
 0x1c5   : > { %v526_v27 = vpop.f32.mrb[0].mxu1 }
 0x1c6   : > { %v527_v28 = vadd.f32 %v526_v27, %v456_v26  ;;  %v773_v29 = vpop.f32.mrb[1].mxu1 }
 0x1c8   : > { %v530_v30 = vmax.f32 %v527_v28, 0.0 }
 0x1ca   : > { %783 = vmatmul.mubr.msk.f32.vlgmr.msra.gmra.mrb[2].mxu0 %vm377_vm1, %v530_v30 }
 0x29d   : > { %v605_v32 = vpop.f32.mrb[2].mxu0 }
 0x29e   : > { %v606_v33 = vadd.f32 %v605_v32, %v535_v31  ;;  %v784_v34 = vpop.f32.mrb[3].mxu0 }
 0x2a0   : > { %610 = vst.msk [vmem:[%s370_s29] sm:$0x1] %vm609_vm2, %v606_v33 }
 0x2a1 PF: > { %s17_s24 = sadd.s32 1, %s820_s24  }
 0x2a2   : > { %p14_p4 = scmp.ge.s32.totalorder %s17_s24, 6  }
 0x2a4   :  { %16 = sbr.rel (!%p14_p4) target bundleno = 1 (0x1), region = 96 }

// kernel: medsam_forward.55
= control target key start
LH: loop header
LB: loop body
LE: loop exit
PB: predicated region body
PF: predicated region fallthrough
CT: control target
= control target key end

     0   :  { %v296_v0 = vmov 0   ;;  %v23_v3 = vlaneseq  ;;  %s513_s1 = inlined_call_operand.vmem [shape: f32[5,1], index: 1, kind: input, shape index: {}]   ;;  %s514_s2 = inlined_call_operand.vmem [shape: f32[5,1], index: 2, kind: input, shape index: {}]   ;;  %s515_s0 = inlined_call_operand.vmem [shape: f32[1,4096], index: 0, kind: input, shape index: {}]   ;;  %s516_s3 = inlined_call_operand.vmem [shape: f32[5,4096], index: 3, kind: output, shape index: {}]  }
   0x1   :  { %295 = vset.pattern.permute.xlu0 %v296_v0  ;;  %v18_v1 = vld [vmem:[%s513_s1] sm:$0x1f]  ;;  %v15_v14 = vld [vmem:[%s515_s0 + $0x8] sm:$0xff]  ;;  %v16_v19 = vld [vmem:[%s515_s0 + $0x10] sm:$0xff] }
   0x2   :  { %185 = vperm.xlu0 %295, %v18_v1   ;;  %v220_v2 = vld [vmem:[%s514_s2] sm:$0x1f]  ;;  %v24_v4 = vshrl.u32 %v23_v3, 7  ;;  %v17_v28 = vld [vmem:[%s515_s0 + $0x18] sm:$0xff] }
   0x3   :  { %v14_v13 = vld [vmem:[%s515_s0] sm:$0xff] }
   0x4   :  { %v323_v5 = vsub.s32 0, %v24_v4  ;;  %v325_v6 = vsub.s32 1, %v24_v4  ;;  %v327_v7 = vsub.s32 2, %v24_v4  ;;  %v329_v8 = vsub.s32 3, %v24_v4 }
   0x5   :  { %v331_v9 = vsub.s32 4, %v24_v4  ;;  %v333_v10 = vsub.s32 5, %v24_v4  ;;  %v335_v11 = vsub.s32 6, %v24_v4  ;;  %v337_v12 = vsub.s32 7, %v24_v4 }
   0x6   :  { %223 = vperm.xlu0 %295, %v220_v2   ;;  %v26_v15 = vrot.slane %v14_v13, %v323_v5  ;;  %v30_v16 = vrot.slane %v14_v13, %v325_v6  ;;  %v34_v17 = vrot.slane %v14_v13, %v327_v7  ;;  %v38_v18 = vrot.slane %v14_v13, %v329_v8 }
   0x7   :  { %v42_v20 = vrot.slane %v14_v13, %v331_v9  ;;  %v46_v21 = vrot.slane %v14_v13, %v333_v10  ;;  %v50_v22 = vrot.slane %v14_v13, %v335_v11  ;;  %v54_v23 = vrot.slane %v14_v13, %v337_v12 }
   0x8   :  { %v58_v24 = vrot.slane %v15_v14, %v323_v5  ;;  %v62_v25 = vrot.slane %v15_v14, %v325_v6  ;;  %v66_v26 = vrot.slane %v15_v14, %v327_v7  ;;  %v70_v27 = vrot.slane %v15_v14, %v329_v8 }
   0x9   :  { %v74_v29 = vrot.slane %v15_v14, %v331_v9  ;;  %v78_v30 = vrot.slane %v15_v14, %v333_v10  ;;  %v82_v31 = vrot.slane %v15_v14, %v335_v11  ;;  %v86_v32 = vrot.slane %v15_v14, %v337_v12 }
   0xa   :  { %v90_v33 = vrot.slane %v16_v19, %v323_v5  ;;  %v94_v34 = vrot.slane %v16_v19, %v325_v6  ;;  %v98_v35 = vrot.slane %v16_v19, %v327_v7  ;;  %v102_v36 = vrot.slane %v16_v19, %v329_v8 }
   0xb   :  { %v106_v37 = vrot.slane %v16_v19, %v331_v9  ;;  %v110_v38 = vrot.slane %v16_v19, %v333_v10  ;;  %v114_v39 = vrot.slane %v16_v19, %v335_v11  ;;  %v118_v40 = vrot.slane %v16_v19, %v337_v12 }
   0xc   :  { %v122_v41 = vrot.slane %v17_v28, %v323_v5  ;;  %v126_v42 = vrot.slane %v17_v28, %v325_v6  ;;  %v130_v43 = vrot.slane %v17_v28, %v327_v7  ;;  %v134_v44 = vrot.slane %v17_v28, %v329_v8 }
   0xd   :  { %v138_v46 = vrot.slane %v17_v28, %v331_v9  ;;  %v142_v47 = vrot.slane %v17_v28, %v333_v10  ;;  %v146_v48 = vrot.slane %v17_v28, %v335_v11  ;;  %v150_v49 = vrot.slane %v17_v28, %v337_v12 }
  0x81   :  { %v186_v45 = vpop.permute.xlu0 %185 }
  0x82   :  { %v188_v50 = vmul.f32 %v186_v45, %v26_v15  ;;  %v189_v51 = vmul.f32 %v186_v45, %v30_v16  ;;  %v190_v52 = vmul.f32 %v186_v45, %v34_v17  ;;  %v191_v53 = vmul.f32 %v186_v45, %v38_v18 }
  0x83   :  { %v192_v54 = vmul.f32 %v186_v45, %v42_v20  ;;  %v193_v55 = vmul.f32 %v186_v45, %v46_v21  ;;  %v194_v56 = vmul.f32 %v186_v45, %v50_v22  ;;  %v195_v57 = vmul.f32 %v186_v45, %v54_v23 }
  0x84   :  { %v196_v58 = vmul.f32 %v186_v45, %v58_v24  ;;  %v197_v59 = vmul.f32 %v186_v45, %v62_v25  ;;  %v198_v60 = vmul.f32 %v186_v45, %v66_v26  ;;  %v199_v61 = vmul.f32 %v186_v45, %v70_v27 }
  0x85   :  { %v200_v62 = vmul.f32 %v186_v45, %v74_v29  ;;  %v201_v63 = vmul.f32 %v186_v45, %v78_v30  ;;  %v202_v0 = vmul.f32 %v186_v45, %v82_v31  ;;  %v203_v1 = vmul.f32 %v186_v45, %v86_v32  ;;  %v383_v6 = vpop.permute.xlu0 %223 }
  0x86   :  { %v204_v2 = vmul.f32 %v186_v45, %v90_v33  ;;  %v205_v3 = vmul.f32 %v186_v45, %v94_v34  ;;  %v206_v4 = vmul.f32 %v186_v45, %v98_v35  ;;  %v207_v5 = vmul.f32 %v186_v45, %v102_v36 }
  0x87   :  { %v208_v7 = vmul.f32 %v186_v45, %v106_v37  ;;  %v209_v8 = vmul.f32 %v186_v45, %v110_v38  ;;  %v210_v9 = vmul.f32 %v186_v45, %v114_v39  ;;  %v211_v10 = vmul.f32 %v186_v45, %v118_v40 }
  0x88   :  { %v212_v11 = vmul.f32 %v186_v45, %v122_v41  ;;  %v213_v12 = vmul.f32 %v186_v45, %v126_v42  ;;  %v214_v13 = vmul.f32 %v186_v45, %v130_v43  ;;  %v215_v14 = vmul.f32 %v186_v45, %v134_v44 }
  0x89   :  { %v216_v15 = vmul.f32 %v186_v45, %v138_v46  ;;  %v217_v16 = vmul.f32 %v186_v45, %v142_v47  ;;  %v218_v17 = vmul.f32 %v186_v45, %v146_v48  ;;  %v219_v18 = vmul.f32 %v186_v45, %v150_v49 }
  0x8a   :  { %v226_v19 = vadd.f32 %v383_v6, %v188_v50  ;;  %v227_v20 = vadd.f32 %v383_v6, %v189_v51  ;;  %v228_v21 = vadd.f32 %v383_v6, %v190_v52  ;;  %v229_v22 = vadd.f32 %v383_v6, %v191_v53 }
  0x8b   :  { %v230_v23 = vadd.f32 %v383_v6, %v192_v54  ;;  %v231_v24 = vadd.f32 %v383_v6, %v193_v55  ;;  %v232_v25 = vadd.f32 %v383_v6, %v194_v56  ;;  %v233_v26 = vadd.f32 %v383_v6, %v195_v57 }
  0x8c   :  { %v234_v27 = vadd.f32 %v383_v6, %v196_v58  ;;  %v235_v28 = vadd.f32 %v383_v6, %v197_v59  ;;  %v236_v29 = vadd.f32 %v383_v6, %v198_v60  ;;  %v237_v30 = vadd.f32 %v383_v6, %v199_v61  ;;  %258 = vst [vmem:[%s516_s3] sm:$0x1f] %v226_v19 }
  0x8d   :  { %259 = vst [vmem:[%s516_s3 + $0x8] sm:$0x1f] %v227_v20  ;;  %260 = vst [vmem:[%s516_s3 + $0x10] sm:$0x1f] %v228_v21  ;;  %v238_v31 = vadd.f32 %v383_v6, %v200_v62  ;;  %v239_v32 = vadd.f32 %v383_v6, %v201_v63  ;;  %v240_v33 = vadd.f32 %v383_v6, %v202_v0 }
  0x8e   :  { %261 = vst [vmem:[%s516_s3 + $0x18] sm:$0x1f] %v229_v22  ;;  %v241_v34 = vadd.f32 %v383_v6, %v203_v1  ;;  %262 = vst [vmem:[%s516_s3 + $0x20] sm:$0x1f] %v230_v23  ;;  %v242_v35 = vadd.f32 %v383_v6, %v204_v2  ;;  %v243_v36 = vadd.f32 %v383_v6, %v205_v3 }
  0x8f   :  { %263 = vst [vmem:[%s516_s3 + $0x28] sm:$0x1f] %v231_v24  ;;  %264 = vst [vmem:[%s516_s3 + $0x30] sm:$0x1f] %v232_v25  ;;  %v244_v37 = vadd.f32 %v383_v6, %v206_v4  ;;  %v245_v38 = vadd.f32 %v383_v6, %v207_v5  ;;  %v246_v39 = vadd.f32 %v383_v6, %v208_v7 }
  0x90   :  { %265 = vst [vmem:[%s516_s3 + $0x38] sm:$0x1f] %v233_v26  ;;  %266 = vst [vmem:[%s516_s3 + $0x40] sm:$0x1f] %v234_v27  ;;  %v247_v40 = vadd.f32 %v383_v6, %v209_v8  ;;  %v248_v41 = vadd.f32 %v383_v6, %v210_v9  ;;  %v249_v42 = vadd.f32 %v383_v6, %v211_v10 }
  0x91   :  { %267 = vst [vmem:[%s516_s3 + $0x48] sm:$0x1f] %v235_v28  ;;  %268 = vst [vmem:[%s516_s3 + $0x50] sm:$0x1f] %v236_v29  ;;  %v250_v43 = vadd.f32 %v383_v6, %v212_v11  ;;  %v251_v44 = vadd.f32 %v383_v6, %v213_v12  ;;  %v252_v45 = vadd.f32 %v383_v6, %v214_v13 }
  0x92   :  { %269 = vst [vmem:[%s516_s3 + $0x58] sm:$0x1f] %v237_v30  ;;  %270 = vst [vmem:[%s516_s3 + $0x60] sm:$0x1f] %v238_v31  ;;  %v253_v46 = vadd.f32 %v383_v6, %v215_v14  ;;  %v254_v47 = vadd.f32 %v383_v6, %v216_v15  ;;  %v255_v48 = vadd.f32 %v383_v6, %v217_v16 }
  0x93   :  { %271 = vst [vmem:[%s516_s3 + $0x68] sm:$0x1f] %v239_v32  ;;  %272 = vst [vmem:[%s516_s3 + $0x70] sm:$0x1f] %v240_v33  ;;  %v256_v49 = vadd.f32 %v383_v6, %v218_v17  ;;  %v257_v50 = vadd.f32 %v383_v6, %v219_v18 }
  0x94   :  { %273 = vst [vmem:[%s516_s3 + $0x78] sm:$0x1f] %v241_v34  ;;  %274 = vst [vmem:[%s516_s3 + $0x80] sm:$0x1f] %v242_v35 }
  0x95   :  { %275 = vst [vmem:[%s516_s3 + $0x88] sm:$0x1f] %v243_v36  ;;  %276 = vst [vmem:[%s516_s3 + $0x90] sm:$0x1f] %v244_v37 }
  0x96   :  { %277 = vst [vmem:[%s516_s3 + $0x98] sm:$0x1f] %v245_v38  ;;  %278 = vst [vmem:[%s516_s3 + $0xa0] sm:$0x1f] %v246_v39 }
  0x97   :  { %279 = vst [vmem:[%s516_s3 + $0xa8] sm:$0x1f] %v247_v40  ;;  %280 = vst [vmem:[%s516_s3 + $0xb0] sm:$0x1f] %v248_v41 }
  0x98   :  { %281 = vst [vmem:[%s516_s3 + $0xb8] sm:$0x1f] %v249_v42  ;;  %282 = vst [vmem:[%s516_s3 + $0xc0] sm:$0x1f] %v250_v43 }
  0x99   :  { %283 = vst [vmem:[%s516_s3 + $0xc8] sm:$0x1f] %v251_v44  ;;  %284 = vst [vmem:[%s516_s3 + $0xd0] sm:$0x1f] %v252_v45 }
  0x9a   :  { %285 = vst [vmem:[%s516_s3 + $0xd8] sm:$0x1f] %v253_v46  ;;  %286 = vst [vmem:[%s516_s3 + $0xe0] sm:$0x1f] %v254_v47 }
  0x9b   :  { %287 = vst [vmem:[%s516_s3 + $0xe8] sm:$0x1f] %v255_v48  ;;  %288 = vst [vmem:[%s516_s3 + $0xf0] sm:$0x1f] %v256_v49 }
  0x9c   :  { %289 = vst [vmem:[%s516_s3 + $0xf8] sm:$0x1f] %v257_v50 }

</bundles_post_ra>
